<compile_context>
chip_gen: v7x
topology: tpu7x:2x2x1
jax: 0.10.0
libtpu: 0.0.40
codegen_flags: <defaults>
</compile_context>

<pallas_src>
import functools
import math

import jax
import jax.numpy as jnp
from jax.experimental import pallas as pl
from jax.experimental.pallas import tpu as pltpu

LRELU_SLOPE = 0.01   # nn.LeakyReLU default
BN_EPS = 1e-5        # nn.BatchNorm2d default


# ------------------------------ small helpers --------------------------------

def _m_tile(m, target=512):
    """Pick an M tile: full M when small, else the largest divisor <= target
    that keeps sublane alignment for bf16 inputs (multiple of 16)."""
    if m <= target:
        return m
    for t in range(target, 0, -16):
        if m % t == 0:
            return t
    return m


def _vmem_limit(*blocks):
    """Rough VMEM budget: double-buffered blocks + headroom, clamped so the
    plan also fits v7x (64 MiB physical / 32 MiB scoped default)."""
    total = 0
    for shape, dtype in blocks:
        total += math.prod(shape) * jnp.dtype(dtype).itemsize
    return int(min(max(2 * total + (2 << 20), 8 << 20), 32 << 20))


def _vmem():
    return pl.BlockSpec(memory_space=pltpu.MemorySpace.VMEM)


# ------------------------------ Pallas kernels --------------------------------

def _matmul_bias_kernel(p_ref, w_ref, b_ref, o_ref):
    # bf16 x bf16 -> f32 accumulate on the MXU, f32 bias epilogue.
    o_ref[...] = jnp.dot(p_ref[...], w_ref[...],
                         preferred_element_type=jnp.float32) + b_ref[...]


def _matmul_bias_tanh_kernel(p_ref, w_ref, b_ref, o_ref):
    y = jnp.dot(p_ref[...], w_ref[...],
                preferred_element_type=jnp.float32) + b_ref[...]
    o_ref[...] = jnp.tanh(y)


def _tconv_matmul_kernel(a_ref, b_ref, c_ref, d_ref, w_ref, bias_ref, o_ref):
    # Sub-pixel decomposition of ConvTranspose2d(k=3, s=2, p=1, op=1):
    # out[2q+dy, 2r+dx] for the four parities (ee, eo, oe, oo) built from the
    # shifted input views A=x[q,r], B=x[q,r+1], C=x[q+1,r], D=x[q+1,r+1].
    # w_ref: [9, IC, OC], index 3*ky+kx holds the ConvT tap w[:, :, ky, kx].
    w = w_ref[...]
    bias = bias_ref[...]
    a = a_ref[...]
    b = b_ref[...]
    c = c_ref[...]
    d = d_ref[...]

    def mm(x, ky, kx):
        return jnp.dot(x, w[3 * ky + kx], preferred_element_type=jnp.float32)

    o_ref[0, :, :] = mm(a, 1, 1) + bias                                  # even/even
    o_ref[1, :, :] = mm(a, 1, 2) + mm(b, 1, 0) + bias                    # even/odd
    o_ref[2, :, :] = mm(a, 2, 1) + mm(c, 0, 1) + bias                    # odd/even
    o_ref[3, :, :] = (mm(a, 2, 2) + mm(b, 2, 0) + mm(c, 0, 2)
                      + mm(d, 0, 0) + bias)                              # odd/odd


def _bn_stats_kernel(y_ref, stats_ref, *, m_total):
    # Cross-tile sum / sum-of-squares -> per-channel mean / biased var.
    # Output block is resident across the (arbitrary) M axis => accumulator.
    i = pl.program_id(0)

    @pl.when(i == 0)
    def _():
        stats_ref[...] = jnp.zeros_like(stats_ref)

    y = y_ref[...]
    part = jnp.concatenate([jnp.sum(y, axis=0, keepdims=True),
                            jnp.sum(y * y, axis=0, keepdims=True)], axis=0)
    stats_ref[...] += part

    @pl.when(i == pl.num_programs(0) - 1)
    def _():
        acc = stats_ref[...]
        mean = acc[0:1, :] / m_total
        var = acc[1:2, :] / m_total - mean * mean
        stats_ref[...] = jnp.concatenate([mean, var], axis=0)


def _bn_lrelu_kernel(y_ref, stats_ref, g_ref, beta_ref, o_ref):
    y = y_ref[...]
    stats = stats_ref[...]
    mean = stats[0:1, :]
    var = stats[1:2, :]
    yn = (y - mean) * jax.lax.rsqrt(var + BN_EPS)
    yn = yn * g_ref[...] + beta_ref[...]
    o_ref[...] = jnp.where(yn >= 0.0, yn, LRELU_SLOPE * yn)


def _latent_kernel(feat_ref, wmu_ref, bmu_ref, wvar_ref, bvar_ref, eps_ref,
                   wdec_ref, bdec_ref, mu_ref, logvar_ref, d_ref):
    # fc_mu + fc_var + reparameterize + decoder_input fused into one kernel.
    feat = feat_ref[...]
    mu = jnp.dot(feat, wmu_ref[...],
                 preferred_element_type=jnp.float32) + bmu_ref[...]
    logvar = jnp.dot(feat, wvar_ref[...],
                     preferred_element_type=jnp.float32) + bvar_ref[...]
    z = eps_ref[...] * jnp.exp(0.5 * logvar) + mu
    d = jnp.dot(z.astype(wdec_ref.dtype), wdec_ref[...],
                preferred_element_type=jnp.float32) + bdec_ref[...]
    mu_ref[...] = mu
    logvar_ref[...] = logvar
    d_ref[...] = d


# --------------------------- gridded pallas_call wrappers ---------------------

def _gemm_bias(patches, w2d, bias, *, tanh=False):
    m, k = patches.shape
    oc = w2d.shape[1]
    tm = _m_tile(m)
    kernel = _matmul_bias_tanh_kernel if tanh else _matmul_bias_kernel
    return pl.pallas_call(
        kernel,
        out_shape=jax.ShapeDtypeStruct((m, oc), jnp.float32),
        grid=(m // tm,),
        in_specs=[pl.BlockSpec((tm, k), lambda i: (i, 0)),
                  pl.BlockSpec((k, oc), lambda i: (0, 0)),
                  pl.BlockSpec((1, oc), lambda i: (0, 0))],
        out_specs=pl.BlockSpec((tm, oc), lambda i: (i, 0)),
        compiler_params=pltpu.CompilerParams(
            dimension_semantics=("parallel",),
            vmem_limit_bytes=_vmem_limit(((tm, k), patches.dtype),
                                         ((k, oc), w2d.dtype),
                                         ((1, oc), bias.dtype),
                                         ((tm, oc), jnp.float32))),
    )(patches, w2d, bias)


def _tconv_gemm(pa, pb, pc, pd, w9, bias):
    m, ic = pa.shape
    oc = w9.shape[-1]
    tm = _m_tile(m)
    in_specs = [pl.BlockSpec((tm, ic), lambda i: (i, 0)) for _ in range(4)]
    in_specs += [pl.BlockSpec((9, ic, oc), lambda i: (0, 0, 0)),
                 pl.BlockSpec((1, oc), lambda i: (0, 0))]
    return pl.pallas_call(
        _tconv_matmul_kernel,
        out_shape=jax.ShapeDtypeStruct((4, m, oc), jnp.float32),
        grid=(m // tm,),
        in_specs=in_specs,
        out_specs=pl.BlockSpec((4, tm, oc), lambda i: (0, i, 0)),
        compiler_params=pltpu.CompilerParams(
            dimension_semantics=("parallel",),
            vmem_limit_bytes=_vmem_limit(((tm, ic), pa.dtype),
                                         ((tm, ic), pb.dtype),
                                         ((tm, ic), pc.dtype),
                                         ((tm, ic), pd.dtype),
                                         ((9, ic, oc), w9.dtype),
                                         ((1, oc), bias.dtype),
                                         ((4, tm, oc), jnp.float32))),
    )(pa, pb, pc, pd, w9, bias)


def _bn_stats(y):
    m, oc = y.shape
    tm = _m_tile(m)
    kernel = functools.partial(_bn_stats_kernel, m_total=float(m))
    return pl.pallas_call(
        kernel,
        out_shape=jax.ShapeDtypeStruct((2, oc), jnp.float32),
        grid=(m // tm,),
        in_specs=[pl.BlockSpec((tm, oc), lambda i: (i, 0))],
        out_specs=pl.BlockSpec((2, oc), lambda i: (0, 0)),
        compiler_params=pltpu.CompilerParams(
            dimension_semantics=("arbitrary",),   # resident accumulator output
            vmem_limit_bytes=_vmem_limit(((tm, oc), jnp.float32),
                                         ((2, oc), jnp.float32))),
    )(y)


def _bn_lrelu(y, stats, gamma, beta):
    m, oc = y.shape
    tm = _m_tile(m)
    return pl.pallas_call(
        _bn_lrelu_kernel,
        out_shape=jax.ShapeDtypeStruct((m, oc), jnp.float32),
        grid=(m // tm,),
        in_specs=[pl.BlockSpec((tm, oc), lambda i: (i, 0)),
                  pl.BlockSpec((2, oc), lambda i: (0, 0)),
                  pl.BlockSpec((1, oc), lambda i: (0, 0)),
                  pl.BlockSpec((1, oc), lambda i: (0, 0))],
        out_specs=pl.BlockSpec((tm, oc), lambda i: (i, 0)),
        compiler_params=pltpu.CompilerParams(
            dimension_semantics=("parallel",),
            vmem_limit_bytes=_vmem_limit(((tm, oc), jnp.float32),
                                         ((2, oc), jnp.float32),
                                         ((1, oc), jnp.float32),
                                         ((1, oc), jnp.float32),
                                         ((tm, oc), jnp.float32))),
    )(y, stats, gamma, beta)


def latent_block(feat, eps, p):
    n, f = feat.shape
    l = eps.shape[1]
    return pl.pallas_call(
        _latent_kernel,
        out_shape=(jax.ShapeDtypeStruct((n, l), jnp.float32),
                   jax.ShapeDtypeStruct((n, l), jnp.float32),
                   jax.ShapeDtypeStruct((n, f), jnp.float32)),
        in_specs=[_vmem() for _ in range(8)],
        out_specs=(_vmem(), _vmem(), _vmem()),
    )(feat, p["w_mu"], p["b_mu"], p["w_var"], p["b_var"], eps,
      p["w_dec"], p["b_dec"])


# -------------------------------- JAX glue ------------------------------------

def _extract_patches(x_nhwc, kh, kw, stride, pad):
    """im2col for a regular conv: [N,H,W,C] -> bf16 [N*OH*OW, KH*KW*C]."""
    n, h, w, c = x_nhwc.shape
    xp = jnp.pad(x_nhwc, ((0, 0), (pad, pad), (pad, pad), (0, 0)))
    oh = (h + 2 * pad - kh) // stride + 1
    ow = (w + 2 * pad - kw) // stride + 1
    cols = []
    for ki in range(kh):
        for kj in range(kw):
            cols.append(xp[:, ki:ki + stride * oh:stride,
                           kj:kj + stride * ow:stride, :])
    patches = jnp.stack(cols, axis=3)            # [N, OH, OW, KH*KW, C]
    patches = patches.reshape(n * oh * ow, kh * kw * c)
    return patches.astype(jnp.bfloat16), (n, oh, ow)


def conv_bn_lrelu(x_nhwc, layer):
    """nn.Conv2d(k=3, s=2, p=1) + BatchNorm2d(train stats) + LeakyReLU."""
    oc = layer["w2d"].shape[1]
    patches, (n, oh, ow) = _extract_patches(x_nhwc, 3, 3, stride=2, pad=1)
    y = _gemm_bias(patches, layer["w2d"], layer["b"])          # [M, OC] f32
    stats = _bn_stats(y)                                        # [2, OC]
    out = _bn_lrelu(y, stats, layer["g"], layer["beta"])        # [M, OC]
    return out.reshape(n, oh, ow, oc)


def tconv_bn_lrelu(x_nhwc, layer):
    """nn.ConvTranspose2d(k=3, s=2, p=1, op=1) + BatchNorm2d + LeakyReLU via a
    sub-pixel (4-parity) decomposition — no zero-dilated im2col."""
    n, h, w, ic = x_nhwc.shape
    oc = layer["w9"].shape[-1]
    xp = jnp.pad(x_nhwc, ((0, 0), (0, 1), (0, 1), (0, 0))).astype(jnp.bfloat16)
    m = n * h * w
    pa = xp[:, :h, :w, :].reshape(m, ic)     # x[q,   r  ]
    pb = xp[:, :h, 1:, :].reshape(m, ic)     # x[q,   r+1]
    pc = xp[:, 1:, :w, :].reshape(m, ic)     # x[q+1, r  ]
    pd = xp[:, 1:, 1:, :].reshape(m, ic)     # x[q+1, r+1]
    y4 = _tconv_gemm(pa, pb, pc, pd, layer["w9"], layer["b"])   # [4, M, OC]
    yf = y4.reshape(4 * m, oc)
    stats = _bn_stats(yf)                    # stats over the full 2Hx2W output
    out = _bn_lrelu(yf, stats, layer["g"], layer["beta"])
    # interleave the four parities into the [N, 2H, 2W, OC] output
    out = out.reshape(2, 2, n, h, w, oc)
    out = jnp.transpose(out, (2, 3, 0, 4, 1, 5)).reshape(n, 2 * h, 2 * w, oc)
    return out


def conv_tanh(x_nhwc, w2d_pad, b_pad):
    """final nn.Conv2d(k=3, s=1, p=1, out_channels=1) + Tanh with a lane-dense
    (OC padded to 128) output; the single real channel is sliced out here."""
    patches, (n, oh, ow) = _extract_patches(x_nhwc, 3, 3, stride=1, pad=1)
    y = _gemm_bias(patches, w2d_pad, b_pad, tanh=True)          # [M, 128]
    return y[:, :1].reshape(n, oh, ow, 1)


# ----------------------------- parameter setup --------------------------------

def init_params(key, in_channels, img_size, latent_dim, hidden_dims):
    def nrm(k, shape, scale=0.1):
        return scale * jax.random.normal(k, shape, dtype=jnp.float32)

    keys = iter(jax.random.split(key, 128))
    params = {"encoder": [], "decoder": []}

    ic = in_channels
    for hdim in hidden_dims:
        params["encoder"].append({
            # conv weight stored matmul-ready: [kh*kw*ic, oc], bf16
            "w2d": nrm(next(keys), (9 * ic, hdim)).astype(jnp.bfloat16),
            "b": nrm(next(keys), (1, hdim)),
            "g": jnp.ones((1, hdim), jnp.float32),
            "beta": jnp.zeros((1, hdim), jnp.float32),
        })
        ic = hdim

    s = img_size // (2 ** len(hidden_dims))
    conv_out_size = hidden_dims[-1] * s * s

    # fc_mu / fc_var / decoder_input weights, stored pre-transposed ([in, out])
    # in HWC flatten order (the permutation is absorbed into the random init).
    params["latent"] = {
        "w_mu": nrm(next(keys), (conv_out_size, latent_dim)).astype(jnp.bfloat16),
        "b_mu": nrm(next(keys), (1, latent_dim)),
        "w_var": nrm(next(keys), (conv_out_size, latent_dim)).astype(jnp.bfloat16),
        "b_var": nrm(next(keys), (1, latent_dim)),
        "w_dec": nrm(next(keys), (latent_dim, conv_out_size)).astype(jnp.bfloat16),
        "b_dec": nrm(next(keys), (1, conv_out_size)),
    }

    rev = list(reversed(hidden_dims))

    def tconv_params(ic_, oc_):
        return {
            # ConvT weight stored as its 9 taps: [9, ic, oc] bf16,
            # index 3*ky+kx holds w[:, :, ky, kx].
            "w9": nrm(next(keys), (9, ic_, oc_)).astype(jnp.bfloat16),
            "b": nrm(next(keys), (1, oc_)),
            "g": jnp.ones((1, oc_), jnp.float32),
            "beta": jnp.zeros((1, oc_), jnp.float32),
        }

    for i in range(len(rev) - 1):
        params["decoder"].append(tconv_params(rev[i], rev[i + 1]))

    hlast = rev[-1]
    w_fin = nrm(next(keys), (9 * hlast, 1))
    b_fin = nrm(next(keys), (1, 1))
    params["final"] = {
        "tconv": tconv_params(hlast, hlast),
        # lane-dense final conv: OC padded 1 -> 128, sliced in the wrapper
        "conv_w": jnp.pad(w_fin, ((0, 0), (0, 127))).astype(jnp.bfloat16),
        "conv_b": jnp.pad(b_fin, ((0, 0), (0, 127))),
    }
    # static (channels, spatial) of the encoder output — kept OUT of the pytree
    return params, (hidden_dims[-1], s)


# ------------------------------ forward pass -----------------------------------

def vae_forward(params, x_nchw, eps, *, conv_shape):
    # returns [recon, input, mu, log_var] like the PyTorch module
    c_last, s = conv_shape
    x = jnp.transpose(x_nchw, (0, 2, 3, 1))        # NCHW -> NHWC (C=1: cheap)
    h = x
    for layer in params["encoder"]:
        h = conv_bn_lrelu(h, layer)

    n = h.shape[0]
    # activations stay NHWC; the (H, W, C) flatten order is absorbed into the
    # randomly initialized fc weights (same forward semantics, no transpose).
    feat = h.reshape(n, -1).astype(jnp.bfloat16)

    mu, log_var, d = latent_block(feat, eps, params["latent"])

    d = d.reshape(n, s, s, c_last)                 # decoder_input, HWC layout
    for layer in params["decoder"]:
        d = tconv_bn_lrelu(d, layer)

    fl = params["final"]
    d = tconv_bn_lrelu(d, fl["tconv"])
    d = conv_tanh(d, fl["conv_w"], fl["conv_b"])
    recon = jnp.transpose(d, (0, 3, 1, 2))         # NHWC -> NCHW (C=1)
    return recon, x_nchw, mu, log_var


# ---------------------------------- main ----------------------------------------

if __name__ == "__main__":
    # The reference probes its encoder with a 1-channel image, so in_channels=1.
    IN_CHANNELS = 1
    IMG_SIZE = 16
    LATENT_DIM = 8
    HIDDEN_DIMS = [8, 16, 32]
    BATCH = 2

    root = jax.random.PRNGKey(0)
    k_params, k_x, k_eps = jax.random.split(root, 3)

    params, conv_shape = init_params(k_params, IN_CHANNELS, IMG_SIZE,
                                     LATENT_DIM, HIDDEN_DIMS)
    x = jax.random.normal(k_x, (BATCH, IN_CHANNELS, IMG_SIZE, IMG_SIZE),
                          dtype=jnp.float32)
    # TODO(synk): torch.randn_like(std) is drawn host-side with jax.random
    # (could move in-kernel via pltpu.prng_random_bits + Box-Muller); the
    # eps*std + mu affine itself runs inside the fused latent Pallas kernel.
    eps = jax.random.normal(k_eps, (BATCH, LATENT_DIM), dtype=jnp.float32)

    forward = jax.jit(functools.partial(vae_forward, conv_shape=conv_shape))
    recon, inp, mu, log_var = forward(params, x, eps)
    jax.block_until_ready((recon, inp, mu, log_var))

    assert recon.shape == (BATCH, 1, IMG_SIZE, IMG_SIZE)
    assert inp.shape == x.shape
    assert mu.shape == (BATCH, LATENT_DIM)
    assert log_var.shape == (BATCH, LATENT_DIM)
    print("KERNEL_OK")
</pallas_src>

<mosaic_0001>
module attributes {stable_mosaic.version = 11 : i64} {
  func.func @_bn_stats_kernel(%arg0: i32, %arg1: memref<128x8xf32, #tpu.memory_space<vmem>>, %arg2: memref<2x8xf32, #tpu.memory_space<vmem>>) attributes {dimension_semantics = [#tpu.dimension_semantics<arbitrary>], iteration_bounds = array<i64: 1>, scalar_prefetch = 0 : i64, scratch_operands = 0 : i64, tpu.core_type = #tpu.core_type<tc>, window_params = [{transform_indices = @transform_0, window_bounds = array<i64: 128, 8>}, {pipeline_mode = #tpu.pipeline_mode<synchronous>, transform_indices = @transform_1, window_bounds = array<i64: 2, 8>}]} {
    %c0_i32 = arith.constant 0 : i32
    %0 = arith.cmpi eq, %arg0, %c0_i32 : i32
    %1 = arith.extui %0 : i1 to i32
    %c0_i32_0 = arith.constant 0 : i32
    %2 = arith.cmpi ne, %1, %c0_i32_0 : i32
    scf.if %2 {
      %cst_9 = arith.constant 0.000000e+00 : f32
      %16 = vector.broadcast %cst_9 : f32 to vector<2x8xf32>
      %c0_10 = arith.constant 0 : index
      %c0_11 = arith.constant 0 : index
      %17 = vector.load %arg2[%c0_10, %c0_11] : memref<2x8xf32, #tpu.memory_space<vmem>>, vector<2x8xf32>
      tpu.vector_store %arg2[%c0_10, %c0_11], %16 {strides = array<i32>} : memref<2x8xf32, #tpu.memory_space<vmem>>, vector<2x8xf32>,
    } else {
    }
    %c0 = arith.constant 0 : index
    %c0_1 = arith.constant 0 : index
    %3 = vector.load %arg1[%c0, %c0_1] : memref<128x8xf32, #tpu.memory_space<vmem>>, vector<128x8xf32>
    %cst = arith.constant dense<0.000000e+00> : vector<8xf32>
    %4 = vector.multi_reduction <add>, %3, %cst [0] : vector<128x8xf32> to vector<8xf32>
    %5 = vector.shape_cast %4 : vector<8xf32> to vector<1x8xf32>
    %6 = arith.mulf %3, %3 : vector<128x8xf32>
    %cst_2 = arith.constant dense<0.000000e+00> : vector<8xf32>
    %7 = vector.multi_reduction <add>, %6, %cst_2 [0] : vector<128x8xf32> to vector<8xf32>
    %8 = vector.shape_cast %7 : vector<8xf32> to vector<1x8xf32>
    %9 = tpu.concatenate %5, %8 in 0 : vector<1x8xf32>, vector<1x8xf32> -> vector<2x8xf32>
    %c0_3 = arith.constant 0 : index
    %c0_4 = arith.constant 0 : index
    %10 = vector.load %arg2[%c0_3, %c0_4] : memref<2x8xf32, #tpu.memory_space<vmem>>, vector<2x8xf32>
    %11 = arith.addf %10, %9 : vector<2x8xf32>
    %c0_5 = arith.constant 0 : index
    %c0_6 = arith.constant 0 : index
    %12 = vector.load %arg2[%c0_5, %c0_6] : memref<2x8xf32, #tpu.memory_space<vmem>>, vector<2x8xf32>
    tpu.vector_store %arg2[%c0_5, %c0_6], %11 {strides = array<i32>} : memref<2x8xf32, #tpu.memory_space<vmem>>, vector<2x8xf32>,
    %c0_i32_7 = arith.constant 0 : i32
    %13 = arith.cmpi eq, %arg0, %c0_i32_7 : i32
    %14 = arith.extui %13 : i1 to i32
    %c0_i32_8 = arith.constant 0 : i32
    %15 = arith.cmpi ne, %14, %c0_i32_8 : i32
    scf.if %15 {
      %c0_9 = arith.constant 0 : index
      %c0_10 = arith.constant 0 : index
      %16 = vector.load %arg2[%c0_9, %c0_10] : memref<2x8xf32, #tpu.memory_space<vmem>>, vector<2x8xf32>
      %17 = vector.extract_strided_slice %16 {offsets = [0, 0], sizes = [1, 8], strides = [1, 1]} : vector<2x8xf32> to vector<1x8xf32>
      %cst_11 = arith.constant 1.280000e+02 : f32
      %18 = vector.broadcast %cst_11 : f32 to vector<1x8xf32>
      %19 = arith.divf %17, %18 : vector<1x8xf32>
      %20 = vector.extract_strided_slice %16 {offsets = [1, 0], sizes = [1, 8], strides = [1, 1]} : vector<2x8xf32> to vector<1x8xf32>
      %cst_12 = arith.constant 1.280000e+02 : f32
      %21 = vector.broadcast %cst_12 : f32 to vector<1x8xf32>
      %22 = arith.divf %20, %21 : vector<1x8xf32>
      %23 = arith.mulf %19, %19 : vector<1x8xf32>
      %24 = arith.subf %22, %23 : vector<1x8xf32>
      %25 = tpu.concatenate %19, %24 in 0 : vector<1x8xf32>, vector<1x8xf32> -> vector<2x8xf32>
      %c0_13 = arith.constant 0 : index
      %c0_14 = arith.constant 0 : index
      %26 = vector.load %arg2[%c0_13, %c0_14] : memref<2x8xf32, #tpu.memory_space<vmem>>, vector<2x8xf32>
      tpu.vector_store %arg2[%c0_13, %c0_14], %25 {strides = array<i32>} : memref<2x8xf32, #tpu.memory_space<vmem>>, vector<2x8xf32>,
    } else {
    }
    return
  }
  func.func @transform_0(%arg0: i32) -> (i32, i32) {
    %c0_i32 = arith.constant 0 : i32
    %c0_i32_0 = arith.constant 0 : i32
    return %arg0, %c0_i32 : i32, i32
  }
  func.func @transform_1(%arg0: i32) -> (i32, i32) {
    %c0_i32 = arith.constant 0 : i32
    %c0_i32_0 = arith.constant 0 : i32
    %c0_i32_1 = arith.constant 0 : i32
    return %c0_i32, %c0_i32_0 : i32, i32
  }
}

module attributes {stable_mosaic.version = 11 : i64} {
  func.func @_matmul_bias_kernel(%arg0: i32, %arg1: memref<128x9xbf16, #tpu.memory_space<vmem>>, %arg2: memref<9x8xbf16, #tpu.memory_space<vmem>>, %arg3: memref<1x8xf32, #tpu.memory_space<vmem>>, %arg4: memref<128x8xf32, #tpu.memory_space<vmem>>) attributes {dimension_semantics = [#tpu.dimension_semantics<parallel>], iteration_bounds = array<i64: 1>, scalar_prefetch = 0 : i64, scratch_operands = 0 : i64, tpu.core_type = #tpu.core_type<tc>, window_params = [{transform_indices = @transform_0, window_bounds = array<i64: 128, 9>}, {pipeline_mode = #tpu.pipeline_mode<synchronous>, transform_indices = @transform_1, window_bounds = array<i64: 9, 8>}, {pipeline_mode = #tpu.pipeline_mode<synchronous>, transform_indices = @transform_2, window_bounds = array<i64: 1, 8>}, {transform_indices = @transform_3, window_bounds = array<i64: 128, 8>}]} {
    %c0 = arith.constant 0 : index
    %c0_0 = arith.constant 0 : index
    %0 = vector.load %arg1[%c0, %c0_0] : memref<128x9xbf16, #tpu.memory_space<vmem>>, vector<128x9xbf16>
    %c0_1 = arith.constant 0 : index
    %c0_2 = arith.constant 0 : index
    %1 = vector.load %arg2[%c0_1, %c0_2] : memref<9x8xbf16, #tpu.memory_space<vmem>>, vector<9x8xbf16>
    %cst = arith.constant dense<0.000000e+00> : vector<128x8xf32>
    %2 = tpu.matmul %0, %1, %cst {dimension_numbers = #tpu.dot_dimension_numbers<[1], [0], [0], [1], [0, 0, 1, 1], [], []>} : vector<128x9xbf16>, vector<9x8xbf16>, vector<128x8xf32> -> vector<128x8xf32>
    %c0_3 = arith.constant 0 : index
    %c0_4 = arith.constant 0 : index
    %3 = vector.load %arg3[%c0_3, %c0_4] : memref<1x8xf32, #tpu.memory_space<vmem>>, vector<1x8xf32>
    %4 = vector.broadcast %3 : vector<1x8xf32> to vector<128x8xf32>
    %5 = arith.addf %2, %4 : vector<128x8xf32>
    %c0_5 = arith.constant 0 : index
    %c0_6 = arith.constant 0 : index
    %6 = vector.load %arg4[%c0_5, %c0_6] : memref<128x8xf32, #tpu.memory_space<vmem>>, vector<128x8xf32>
    tpu.vector_store %arg4[%c0_5, %c0_6], %5 {strides = array<i32>} : memref<128x8xf32, #tpu.memory_space<vmem>>, vector<128x8xf32>,
    return
  }
  func.func @transform_0(%arg0: i32) -> (i32, i32) {
    %c0_i32 = arith.constant 0 : i32
    %c0_i32_0 = arith.constant 0 : i32
    return %arg0, %c0_i32 : i32, i32
  }
  func.func @transform_1(%arg0: i32) -> (i32, i32) {
    %c0_i32 = arith.constant 0 : i32
    %c0_i32_0 = arith.constant 0 : i32
    %c0_i32_1 = arith.constant 0 : i32
    return %c0_i32, %c0_i32_0 : i32, i32
  }
  func.func @transform_2(%arg0: i32) -> (i32, i32) {
    %c0_i32 = arith.constant 0 : i32
    %c0_i32_0 = arith.constant 0 : i32
    %c0_i32_1 = arith.constant 0 : i32
    return %c0_i32, %c0_i32_0 : i32, i32
  }
  func.func @transform_3(%arg0: i32) -> (i32, i32) {
    %c0_i32 = arith.constant 0 : i32
    %c0_i32_0 = arith.constant 0 : i32
    return %arg0, %c0_i32 : i32, i32
  }
}

module attributes {stable_mosaic.version = 11 : i64} {
  func.func @_bn_lrelu_kernel(%arg0: i32, %arg1: memref<128x8xf32, #tpu.memory_space<vmem>>, %arg2: memref<2x8xf32, #tpu.memory_space<vmem>>, %arg3: memref<1x8xf32, #tpu.memory_space<vmem>>, %arg4: memref<1x8xf32, #tpu.memory_space<vmem>>, %arg5: memref<128x8xf32, #tpu.memory_space<vmem>>) attributes {dimension_semantics = [#tpu.dimension_semantics<parallel>], iteration_bounds = array<i64: 1>, scalar_prefetch = 0 : i64, scratch_operands = 0 : i64, tpu.core_type = #tpu.core_type<tc>, window_params = [{transform_indices = @transform_0, window_bounds = array<i64: 128, 8>}, {pipeline_mode = #tpu.pipeline_mode<synchronous>, transform_indices = @transform_1, window_bounds = array<i64: 2, 8>}, {pipeline_mode = #tpu.pipeline_mode<synchronous>, transform_indices = @transform_2, window_bounds = array<i64: 1, 8>}, {pipeline_mode = #tpu.pipeline_mode<synchronous>, transform_indices = @transform_3, window_bounds = array<i64: 1, 8>}, {transform_indices = @transform_4, window_bounds = array<i64: 128, 8>}]} {
    %c0 = arith.constant 0 : index
    %c0_0 = arith.constant 0 : index
    %0 = vector.load %arg1[%c0, %c0_0] : memref<128x8xf32, #tpu.memory_space<vmem>>, vector<128x8xf32>
    %c0_1 = arith.constant 0 : index
    %c0_2 = arith.constant 0 : index
    %1 = vector.load %arg2[%c0_1, %c0_2] : memref<2x8xf32, #tpu.memory_space<vmem>>, vector<2x8xf32>
    %2 = vector.extract_strided_slice %1 {offsets = [0, 0], sizes = [1, 8], strides = [1, 1]} : vector<2x8xf32> to vector<1x8xf32>
    %3 = vector.extract_strided_slice %1 {offsets = [1, 0], sizes = [1, 8], strides = [1, 1]} : vector<2x8xf32> to vector<1x8xf32>
    %4 = vector.broadcast %2 : vector<1x8xf32> to vector<128x8xf32>
    %5 = arith.subf %0, %4 : vector<128x8xf32>
    %cst = arith.constant 9.99999974E-6 : f32
    %6 = vector.broadcast %cst : f32 to vector<1x8xf32>
    %7 = arith.addf %3, %6 : vector<1x8xf32>
    %8 = math.rsqrt %7 : vector<1x8xf32>
    %9 = vector.broadcast %8 : vector<1x8xf32> to vector<128x8xf32>
    %10 = arith.mulf %5, %9 : vector<128x8xf32>
    %c0_3 = arith.constant 0 : index
    %c0_4 = arith.constant 0 : index
    %11 = vector.load %arg3[%c0_3, %c0_4] : memref<1x8xf32, #tpu.memory_space<vmem>>, vector<1x8xf32>
    %12 = vector.broadcast %11 : vector<1x8xf32> to vector<128x8xf32>
    %13 = arith.mulf %10, %12 : vector<128x8xf32>
    %c0_5 = arith.constant 0 : index
    %c0_6 = arith.constant 0 : index
    %14 = vector.load %arg4[%c0_5, %c0_6] : memref<1x8xf32, #tpu.memory_space<vmem>>, vector<1x8xf32>
    %15 = vector.broadcast %14 : vector<1x8xf32> to vector<128x8xf32>
    %16 = arith.addf %13, %15 : vector<128x8xf32>
    %cst_7 = arith.constant 0.000000e+00 : f32
    %17 = vector.broadcast %cst_7 : f32 to vector<128x8xf32>
    %18 = arith.cmpf oge, %16, %17 : vector<128x8xf32>
    %cst_8 = arith.constant 0.00999999977 : f32
    %19 = vector.broadcast %cst_8 : f32 to vector<128x8xf32>
    %20 = arith.mulf %19, %16 : vector<128x8xf32>
    %21 = arith.select %18, %16, %20 : vector<128x8xi1>, vector<128x8xf32>
    %c0_9 = arith.constant 0 : index
    %c0_10 = arith.constant 0 : index
    %22 = vector.load %arg5[%c0_9, %c0_10] : memref<128x8xf32, #tpu.memory_space<vmem>>, vector<128x8xf32>
    tpu.vector_store %arg5[%c0_9, %c0_10], %21 {strides = array<i32>} : memref<128x8xf32, #tpu.memory_space<vmem>>, vector<128x8xf32>,
    return
  }
  func.func @transform_0(%arg0: i32) -> (i32, i32) {
    %c0_i32 = arith.constant 0 : i32
    %c0_i32_0 = arith.constant 0 : i32
    return %arg0, %c0_i32 : i32, i32
  }
  func.func @transform_1(%arg0: i32) -> (i32, i32) {
    %c0_i32 = arith.constant 0 : i32
    %c0_i32_0 = arith.constant 0 : i32
    %c0_i32_1 = arith.constant 0 : i32
    return %c0_i32, %c0_i32_0 : i32, i32
  }
  func.func @transform_2(%arg0: i32) -> (i32, i32) {
    %c0_i32 = arith.constant 0 : i32
    %c0_i32_0 = arith.constant 0 : i32
    %c0_i32_1 = arith.constant 0 : i32
    return %c0_i32, %c0_i32_0 : i32, i32
  }
  func.func @transform_3(%arg0: i32) -> (i32, i32) {
    %c0_i32 = arith.constant 0 : i32
    %c0_i32_0 = arith.constant 0 : i32
    %c0_i32_1 = arith.constant 0 : i32
    return %c0_i32, %c0_i32_0 : i32, i32
  }
  func.func @transform_4(%arg0: i32) -> (i32, i32) {
    %c0_i32 = arith.constant 0 : i32
    %c0_i32_0 = arith.constant 0 : i32
    return %arg0, %c0_i32 : i32, i32
  }
}

module attributes {stable_mosaic.version = 11 : i64} {
  func.func @_bn_stats_kernel(%arg0: i32, %arg1: memref<32x16xf32, #tpu.memory_space<vmem>>, %arg2: memref<2x16xf32, #tpu.memory_space<vmem>>) attributes {dimension_semantics = [#tpu.dimension_semantics<arbitrary>], iteration_bounds = array<i64: 1>, scalar_prefetch = 0 : i64, scratch_operands = 0 : i64, tpu.core_type = #tpu.core_type<tc>, window_params = [{transform_indices = @transform_0, window_bounds = array<i64: 32, 16>}, {pipeline_mode = #tpu.pipeline_mode<synchronous>, transform_indices = @transform_1, window_bounds = array<i64: 2, 16>}]} {
    %c0_i32 = arith.constant 0 : i32
    %0 = arith.cmpi eq, %arg0, %c0_i32 : i32
    %1 = arith.extui %0 : i1 to i32
    %c0_i32_0 = arith.constant 0 : i32
    %2 = arith.cmpi ne, %1, %c0_i32_0 : i32
    scf.if %2 {
      %cst_9 = arith.constant 0.000000e+00 : f32
      %16 = vector.broadcast %cst_9 : f32 to vector<2x16xf32>
      %c0_10 = arith.constant 0 : index
      %c0_11 = arith.constant 0 : index
      %17 = vector.load %arg2[%c0_10, %c0_11] : memref<2x16xf32, #tpu.memory_space<vmem>>, vector<2x16xf32>
      tpu.vector_store %arg2[%c0_10, %c0_11], %16 {strides = array<i32>} : memref<2x16xf32, #tpu.memory_space<vmem>>, vector<2x16xf32>,
    } else {
    }
    %c0 = arith.constant 0 : index
    %c0_1 = arith.constant 0 : index
    %3 = vector.load %arg1[%c0, %c0_1] : memref<32x16xf32, #tpu.memory_space<vmem>>, vector<32x16xf32>
    %cst = arith.constant dense<0.000000e+00> : vector<16xf32>
    %4 = vector.multi_reduction <add>, %3, %cst [0] : vector<32x16xf32> to vector<16xf32>
    %5 = vector.shape_cast %4 : vector<16xf32> to vector<1x16xf32>
    %6 = arith.mulf %3, %3 : vector<32x16xf32>
    %cst_2 = arith.constant dense<0.000000e+00> : vector<16xf32>
    %7 = vector.multi_reduction <add>, %6, %cst_2 [0] : vector<32x16xf32> to vector<16xf32>
    %8 = vector.shape_cast %7 : vector<16xf32> to vector<1x16xf32>
    %9 = tpu.concatenate %5, %8 in 0 : vector<1x16xf32>, vector<1x16xf32> -> vector<2x16xf32>
    %c0_3 = arith.constant 0 : index
    %c0_4 = arith.constant 0 : index
    %10 = vector.load %arg2[%c0_3, %c0_4] : memref<2x16xf32, #tpu.memory_space<vmem>>, vector<2x16xf32>
    %11 = arith.addf %10, %9 : vector<2x16xf32>
    %c0_5 = arith.constant 0 : index
    %c0_6 = arith.constant 0 : index
    %12 = vector.load %arg2[%c0_5, %c0_6] : memref<2x16xf32, #tpu.memory_space<vmem>>, vector<2x16xf32>
    tpu.vector_store %arg2[%c0_5, %c0_6], %11 {strides = array<i32>} : memref<2x16xf32, #tpu.memory_space<vmem>>, vector<2x16xf32>,
    %c0_i32_7 = arith.constant 0 : i32
    %13 = arith.cmpi eq, %arg0, %c0_i32_7 : i32
    %14 = arith.extui %13 : i1 to i32
    %c0_i32_8 = arith.constant 0 : i32
    %15 = arith.cmpi ne, %14, %c0_i32_8 : i32
    scf.if %15 {
      %c0_9 = arith.constant 0 : index
      %c0_10 = arith.constant 0 : index
      %16 = vector.load %arg2[%c0_9, %c0_10] : memref<2x16xf32, #tpu.memory_space<vmem>>, vector<2x16xf32>
      %17 = vector.extract_strided_slice %16 {offsets = [0, 0], sizes = [1, 16], strides = [1, 1]} : vector<2x16xf32> to vector<1x16xf32>
      %cst_11 = arith.constant 3.200000e+01 : f32
      %18 = vector.broadcast %cst_11 : f32 to vector<1x16xf32>
      %19 = arith.divf %17, %18 : vector<1x16xf32>
      %20 = vector.extract_strided_slice %16 {offsets = [1, 0], sizes = [1, 16], strides = [1, 1]} : vector<2x16xf32> to vector<1x16xf32>
      %cst_12 = arith.constant 3.200000e+01 : f32
      %21 = vector.broadcast %cst_12 : f32 to vector<1x16xf32>
      %22 = arith.divf %20, %21 : vector<1x16xf32>
      %23 = arith.mulf %19, %19 : vector<1x16xf32>
      %24 = arith.subf %22, %23 : vector<1x16xf32>
      %25 = tpu.concatenate %19, %24 in 0 : vector<1x16xf32>, vector<1x16xf32> -> vector<2x16xf32>
      %c0_13 = arith.constant 0 : index
      %c0_14 = arith.constant 0 : index
      %26 = vector.load %arg2[%c0_13, %c0_14] : memref<2x16xf32, #tpu.memory_space<vmem>>, vector<2x16xf32>
      tpu.vector_store %arg2[%c0_13, %c0_14], %25 {strides = array<i32>} : memref<2x16xf32, #tpu.memory_space<vmem>>, vector<2x16xf32>,
    } else {
    }
    return
  }
  func.func @transform_0(%arg0: i32) -> (i32, i32) {
    %c0_i32 = arith.constant 0 : i32
    %c0_i32_0 = arith.constant 0 : i32
    return %arg0, %c0_i32 : i32, i32
  }
  func.func @transform_1(%arg0: i32) -> (i32, i32) {
    %c0_i32 = arith.constant 0 : i32
    %c0_i32_0 = arith.constant 0 : i32
    %c0_i32_1 = arith.constant 0 : i32
    return %c0_i32, %c0_i32_0 : i32, i32
  }
}

module attributes {stable_mosaic.version = 11 : i64} {
  func.func @_matmul_bias_kernel(%arg0: i32, %arg1: memref<32x72xbf16, #tpu.memory_space<vmem>>, %arg2: memref<72x16xbf16, #tpu.memory_space<vmem>>, %arg3: memref<1x16xf32, #tpu.memory_space<vmem>>, %arg4: memref<32x16xf32, #tpu.memory_space<vmem>>) attributes {dimension_semantics = [#tpu.dimension_semantics<parallel>], iteration_bounds = array<i64: 1>, scalar_prefetch = 0 : i64, scratch_operands = 0 : i64, tpu.core_type = #tpu.core_type<tc>, window_params = [{transform_indices = @transform_0, window_bounds = array<i64: 32, 72>}, {pipeline_mode = #tpu.pipeline_mode<synchronous>, transform_indices = @transform_1, window_bounds = array<i64: 72, 16>}, {pipeline_mode = #tpu.pipeline_mode<synchronous>, transform_indices = @transform_2, window_bounds = array<i64: 1, 16>}, {transform_indices = @transform_3, window_bounds = array<i64: 32, 16>}]} {
    %c0 = arith.constant 0 : index
    %c0_0 = arith.constant 0 : index
    %0 = vector.load %arg1[%c0, %c0_0] : memref<32x72xbf16, #tpu.memory_space<vmem>>, vector<32x72xbf16>
    %c0_1 = arith.constant 0 : index
    %c0_2 = arith.constant 0 : index
    %1 = vector.load %arg2[%c0_1, %c0_2] : memref<72x16xbf16, #tpu.memory_space<vmem>>, vector<72x16xbf16>
    %cst = arith.constant dense<0.000000e+00> : vector<32x16xf32>
    %2 = tpu.matmul %0, %1, %cst {dimension_numbers = #tpu.dot_dimension_numbers<[1], [0], [0], [1], [0, 0, 1, 1], [], []>} : vector<32x72xbf16>, vector<72x16xbf16>, vector<32x16xf32> -> vector<32x16xf32>
    %c0_3 = arith.constant 0 : index
    %c0_4 = arith.constant 0 : index
    %3 = vector.load %arg3[%c0_3, %c0_4] : memref<1x16xf32, #tpu.memory_space<vmem>>, vector<1x16xf32>
    %4 = vector.broadcast %3 : vector<1x16xf32> to vector<32x16xf32>
    %5 = arith.addf %2, %4 : vector<32x16xf32>
    %c0_5 = arith.constant 0 : index
    %c0_6 = arith.constant 0 : index
    %6 = vector.load %arg4[%c0_5, %c0_6] : memref<32x16xf32, #tpu.memory_space<vmem>>, vector<32x16xf32>
    tpu.vector_store %arg4[%c0_5, %c0_6], %5 {strides = array<i32>} : memref<32x16xf32, #tpu.memory_space<vmem>>, vector<32x16xf32>,
    return
  }
  func.func @transform_0(%arg0: i32) -> (i32, i32) {
    %c0_i32 = arith.constant 0 : i32
    %c0_i32_0 = arith.constant 0 : i32
    return %arg0, %c0_i32 : i32, i32
  }
  func.func @transform_1(%arg0: i32) -> (i32, i32) {
    %c0_i32 = arith.constant 0 : i32
    %c0_i32_0 = arith.constant 0 : i32
    %c0_i32_1 = arith.constant 0 : i32
    return %c0_i32, %c0_i32_0 : i32, i32
  }
  func.func @transform_2(%arg0: i32) -> (i32, i32) {
    %c0_i32 = arith.constant 0 : i32
    %c0_i32_0 = arith.constant 0 : i32
    %c0_i32_1 = arith.constant 0 : i32
    return %c0_i32, %c0_i32_0 : i32, i32
  }
  func.func @transform_3(%arg0: i32) -> (i32, i32) {
    %c0_i32 = arith.constant 0 : i32
    %c0_i32_0 = arith.constant 0 : i32
    return %arg0, %c0_i32 : i32, i32
  }
}

module attributes {stable_mosaic.version = 11 : i64} {
  func.func @_bn_lrelu_kernel(%arg0: i32, %arg1: memref<32x16xf32, #tpu.memory_space<vmem>>, %arg2: memref<2x16xf32, #tpu.memory_space<vmem>>, %arg3: memref<1x16xf32, #tpu.memory_space<vmem>>, %arg4: memref<1x16xf32, #tpu.memory_space<vmem>>, %arg5: memref<32x16xf32, #tpu.memory_space<vmem>>) attributes {dimension_semantics = [#tpu.dimension_semantics<parallel>], iteration_bounds = array<i64: 1>, scalar_prefetch = 0 : i64, scratch_operands = 0 : i64, tpu.core_type = #tpu.core_type<tc>, window_params = [{transform_indices = @transform_0, window_bounds = array<i64: 32, 16>}, {pipeline_mode = #tpu.pipeline_mode<synchronous>, transform_indices = @transform_1, window_bounds = array<i64: 2, 16>}, {pipeline_mode = #tpu.pipeline_mode<synchronous>, transform_indices = @transform_2, window_bounds = array<i64: 1, 16>}, {pipeline_mode = #tpu.pipeline_mode<synchronous>, transform_indices = @transform_3, window_bounds = array<i64: 1, 16>}, {transform_indices = @transform_4, window_bounds = array<i64: 32, 16>}]} {
    %c0 = arith.constant 0 : index
    %c0_0 = arith.constant 0 : index
    %0 = vector.load %arg1[%c0, %c0_0] : memref<32x16xf32, #tpu.memory_space<vmem>>, vector<32x16xf32>
    %c0_1 = arith.constant 0 : index
    %c0_2 = arith.constant 0 : index
    %1 = vector.load %arg2[%c0_1, %c0_2] : memref<2x16xf32, #tpu.memory_space<vmem>>, vector<2x16xf32>
    %2 = vector.extract_strided_slice %1 {offsets = [0, 0], sizes = [1, 16], strides = [1, 1]} : vector<2x16xf32> to vector<1x16xf32>
    %3 = vector.extract_strided_slice %1 {offsets = [1, 0], sizes = [1, 16], strides = [1, 1]} : vector<2x16xf32> to vector<1x16xf32>
    %4 = vector.broadcast %2 : vector<1x16xf32> to vector<32x16xf32>
    %5 = arith.subf %0, %4 : vector<32x16xf32>
    %cst = arith.constant 9.99999974E-6 : f32
    %6 = vector.broadcast %cst : f32 to vector<1x16xf32>
    %7 = arith.addf %3, %6 : vector<1x16xf32>
    %8 = math.rsqrt %7 : vector<1x16xf32>
    %9 = vector.broadcast %8 : vector<1x16xf32> to vector<32x16xf32>
    %10 = arith.mulf %5, %9 : vector<32x16xf32>
    %c0_3 = arith.constant 0 : index
    %c0_4 = arith.constant 0 : index
    %11 = vector.load %arg3[%c0_3, %c0_4] : memref<1x16xf32, #tpu.memory_space<vmem>>, vector<1x16xf32>
    %12 = vector.broadcast %11 : vector<1x16xf32> to vector<32x16xf32>
    %13 = arith.mulf %10, %12 : vector<32x16xf32>
    %c0_5 = arith.constant 0 : index
    %c0_6 = arith.constant 0 : index
    %14 = vector.load %arg4[%c0_5, %c0_6] : memref<1x16xf32, #tpu.memory_space<vmem>>, vector<1x16xf32>
    %15 = vector.broadcast %14 : vector<1x16xf32> to vector<32x16xf32>
    %16 = arith.addf %13, %15 : vector<32x16xf32>
    %cst_7 = arith.constant 0.000000e+00 : f32
    %17 = vector.broadcast %cst_7 : f32 to vector<32x16xf32>
    %18 = arith.cmpf oge, %16, %17 : vector<32x16xf32>
    %cst_8 = arith.constant 0.00999999977 : f32
    %19 = vector.broadcast %cst_8 : f32 to vector<32x16xf32>
    %20 = arith.mulf %19, %16 : vector<32x16xf32>
    %21 = arith.select %18, %16, %20 : vector<32x16xi1>, vector<32x16xf32>
    %c0_9 = arith.constant 0 : index
    %c0_10 = arith.constant 0 : index
    %22 = vector.load %arg5[%c0_9, %c0_10] : memref<32x16xf32, #tpu.memory_space<vmem>>, vector<32x16xf32>
    tpu.vector_store %arg5[%c0_9, %c0_10], %21 {strides = array<i32>} : memref<32x16xf32, #tpu.memory_space<vmem>>, vector<32x16xf32>,
    return
  }
  func.func @transform_0(%arg0: i32) -> (i32, i32) {
    %c0_i32 = arith.constant 0 : i32
    %c0_i32_0 = arith.constant 0 : i32
    return %arg0, %c0_i32 : i32, i32
  }
  func.func @transform_1(%arg0: i32) -> (i32, i32) {
    %c0_i32 = arith.constant 0 : i32
    %c0_i32_0 = arith.constant 0 : i32
    %c0_i32_1 = arith.constant 0 : i32
    return %c0_i32, %c0_i32_0 : i32, i32
  }
  func.func @transform_2(%arg0: i32) -> (i32, i32) {
    %c0_i32 = arith.constant 0 : i32
    %c0_i32_0 = arith.constant 0 : i32
    %c0_i32_1 = arith.constant 0 : i32
    return %c0_i32, %c0_i32_0 : i32, i32
  }
  func.func @transform_3(%arg0: i32) -> (i32, i32) {
    %c0_i32 = arith.constant 0 : i32
    %c0_i32_0 = arith.constant 0 : i32
    %c0_i32_1 = arith.constant 0 : i32
    return %c0_i32, %c0_i32_0 : i32, i32
  }
  func.func @transform_4(%arg0: i32) -> (i32, i32) {
    %c0_i32 = arith.constant 0 : i32
    %c0_i32_0 = arith.constant 0 : i32
    return %arg0, %c0_i32 : i32, i32
  }
}

module attributes {stable_mosaic.version = 11 : i64} {
  func.func @_bn_lrelu_kernel(%arg0: i32, %arg1: memref<8x32xf32, #tpu.memory_space<vmem>>, %arg2: memref<2x32xf32, #tpu.memory_space<vmem>>, %arg3: memref<1x32xf32, #tpu.memory_space<vmem>>, %arg4: memref<1x32xf32, #tpu.memory_space<vmem>>, %arg5: memref<8x32xf32, #tpu.memory_space<vmem>>) attributes {dimension_semantics = [#tpu.dimension_semantics<parallel>], iteration_bounds = array<i64: 1>, scalar_prefetch = 0 : i64, scratch_operands = 0 : i64, tpu.core_type = #tpu.core_type<tc>, window_params = [{transform_indices = @transform_0, window_bounds = array<i64: 8, 32>}, {pipeline_mode = #tpu.pipeline_mode<synchronous>, transform_indices = @transform_1, window_bounds = array<i64: 2, 32>}, {pipeline_mode = #tpu.pipeline_mode<synchronous>, transform_indices = @transform_2, window_bounds = array<i64: 1, 32>}, {pipeline_mode = #tpu.pipeline_mode<synchronous>, transform_indices = @transform_3, window_bounds = array<i64: 1, 32>}, {transform_indices = @transform_4, window_bounds = array<i64: 8, 32>}]} {
    %c0 = arith.constant 0 : index
    %c0_0 = arith.constant 0 : index
    %0 = vector.load %arg1[%c0, %c0_0] : memref<8x32xf32, #tpu.memory_space<vmem>>, vector<8x32xf32>
    %c0_1 = arith.constant 0 : index
    %c0_2 = arith.constant 0 : index
    %1 = vector.load %arg2[%c0_1, %c0_2] : memref<2x32xf32, #tpu.memory_space<vmem>>, vector<2x32xf32>
    %2 = vector.extract_strided_slice %1 {offsets = [0, 0], sizes = [1, 32], strides = [1, 1]} : vector<2x32xf32> to vector<1x32xf32>
    %3 = vector.extract_strided_slice %1 {offsets = [1, 0], sizes = [1, 32], strides = [1, 1]} : vector<2x32xf32> to vector<1x32xf32>
    %4 = vector.broadcast %2 : vector<1x32xf32> to vector<8x32xf32>
    %5 = arith.subf %0, %4 : vector<8x32xf32>
    %cst = arith.constant 9.99999974E-6 : f32
    %6 = vector.broadcast %cst : f32 to vector<1x32xf32>
    %7 = arith.addf %3, %6 : vector<1x32xf32>
    %8 = math.rsqrt %7 : vector<1x32xf32>
    %9 = vector.broadcast %8 : vector<1x32xf32> to vector<8x32xf32>
    %10 = arith.mulf %5, %9 : vector<8x32xf32>
    %c0_3 = arith.constant 0 : index
    %c0_4 = arith.constant 0 : index
    %11 = vector.load %arg3[%c0_3, %c0_4] : memref<1x32xf32, #tpu.memory_space<vmem>>, vector<1x32xf32>
    %12 = vector.broadcast %11 : vector<1x32xf32> to vector<8x32xf32>
    %13 = arith.mulf %10, %12 : vector<8x32xf32>
    %c0_5 = arith.constant 0 : index
    %c0_6 = arith.constant 0 : index
    %14 = vector.load %arg4[%c0_5, %c0_6] : memref<1x32xf32, #tpu.memory_space<vmem>>, vector<1x32xf32>
    %15 = vector.broadcast %14 : vector<1x32xf32> to vector<8x32xf32>
    %16 = arith.addf %13, %15 : vector<8x32xf32>
    %cst_7 = arith.constant 0.000000e+00 : f32
    %17 = vector.broadcast %cst_7 : f32 to vector<8x32xf32>
    %18 = arith.cmpf oge, %16, %17 : vector<8x32xf32>
    %cst_8 = arith.constant 0.00999999977 : f32
    %19 = vector.broadcast %cst_8 : f32 to vector<8x32xf32>
    %20 = arith.mulf %19, %16 : vector<8x32xf32>
    %21 = arith.select %18, %16, %20 : vector<8x32xi1>, vector<8x32xf32>
    %c0_9 = arith.constant 0 : index
    %c0_10 = arith.constant 0 : index
    %22 = vector.load %arg5[%c0_9, %c0_10] : memref<8x32xf32, #tpu.memory_space<vmem>>, vector<8x32xf32>
    tpu.vector_store %arg5[%c0_9, %c0_10], %21 {strides = array<i32>} : memref<8x32xf32, #tpu.memory_space<vmem>>, vector<8x32xf32>,
    return
  }
  func.func @transform_0(%arg0: i32) -> (i32, i32) {
    %c0_i32 = arith.constant 0 : i32
    %c0_i32_0 = arith.constant 0 : i32
    return %arg0, %c0_i32 : i32, i32
  }
  func.func @transform_1(%arg0: i32) -> (i32, i32) {
    %c0_i32 = arith.constant 0 : i32
    %c0_i32_0 = arith.constant 0 : i32
    %c0_i32_1 = arith.constant 0 : i32
    return %c0_i32, %c0_i32_0 : i32, i32
  }
  func.func @transform_2(%arg0: i32) -> (i32, i32) {
    %c0_i32 = arith.constant 0 : i32
    %c0_i32_0 = arith.constant 0 : i32
    %c0_i32_1 = arith.constant 0 : i32
    return %c0_i32, %c0_i32_0 : i32, i32
  }
  func.func @transform_3(%arg0: i32) -> (i32, i32) {
    %c0_i32 = arith.constant 0 : i32
    %c0_i32_0 = arith.constant 0 : i32
    %c0_i32_1 = arith.constant 0 : i32
    return %c0_i32, %c0_i32_0 : i32, i32
  }
  func.func @transform_4(%arg0: i32) -> (i32, i32) {
    %c0_i32 = arith.constant 0 : i32
    %c0_i32_0 = arith.constant 0 : i32
    return %arg0, %c0_i32 : i32, i32
  }
}

module attributes {stable_mosaic.version = 11 : i64} {
  func.func @_bn_stats_kernel(%arg0: i32, %arg1: memref<8x32xf32, #tpu.memory_space<vmem>>, %arg2: memref<2x32xf32, #tpu.memory_space<vmem>>) attributes {dimension_semantics = [#tpu.dimension_semantics<arbitrary>], iteration_bounds = array<i64: 1>, scalar_prefetch = 0 : i64, scratch_operands = 0 : i64, tpu.core_type = #tpu.core_type<tc>, window_params = [{transform_indices = @transform_0, window_bounds = array<i64: 8, 32>}, {pipeline_mode = #tpu.pipeline_mode<synchronous>, transform_indices = @transform_1, window_bounds = array<i64: 2, 32>}]} {
    %c0_i32 = arith.constant 0 : i32
    %0 = arith.cmpi eq, %arg0, %c0_i32 : i32
    %1 = arith.extui %0 : i1 to i32
    %c0_i32_0 = arith.constant 0 : i32
    %2 = arith.cmpi ne, %1, %c0_i32_0 : i32
    scf.if %2 {
      %cst_9 = arith.constant 0.000000e+00 : f32
      %16 = vector.broadcast %cst_9 : f32 to vector<2x32xf32>
      %c0_10 = arith.constant 0 : index
      %c0_11 = arith.constant 0 : index
      %17 = vector.load %arg2[%c0_10, %c0_11] : memref<2x32xf32, #tpu.memory_space<vmem>>, vector<2x32xf32>
      tpu.vector_store %arg2[%c0_10, %c0_11], %16 {strides = array<i32>} : memref<2x32xf32, #tpu.memory_space<vmem>>, vector<2x32xf32>,
    } else {
    }
    %c0 = arith.constant 0 : index
    %c0_1 = arith.constant 0 : index
    %3 = vector.load %arg1[%c0, %c0_1] : memref<8x32xf32, #tpu.memory_space<vmem>>, vector<8x32xf32>
    %cst = arith.constant dense<0.000000e+00> : vector<32xf32>
    %4 = vector.multi_reduction <add>, %3, %cst [0] : vector<8x32xf32> to vector<32xf32>
    %5 = vector.shape_cast %4 : vector<32xf32> to vector<1x32xf32>
    %6 = arith.mulf %3, %3 : vector<8x32xf32>
    %cst_2 = arith.constant dense<0.000000e+00> : vector<32xf32>
    %7 = vector.multi_reduction <add>, %6, %cst_2 [0] : vector<8x32xf32> to vector<32xf32>
    %8 = vector.shape_cast %7 : vector<32xf32> to vector<1x32xf32>
    %9 = tpu.concatenate %5, %8 in 0 : vector<1x32xf32>, vector<1x32xf32> -> vector<2x32xf32>
    %c0_3 = arith.constant 0 : index
    %c0_4 = arith.constant 0 : index
    %10 = vector.load %arg2[%c0_3, %c0_4] : memref<2x32xf32, #tpu.memory_space<vmem>>, vector<2x32xf32>
    %11 = arith.addf %10, %9 : vector<2x32xf32>
    %c0_5 = arith.constant 0 : index
    %c0_6 = arith.constant 0 : index
    %12 = vector.load %arg2[%c0_5, %c0_6] : memref<2x32xf32, #tpu.memory_space<vmem>>, vector<2x32xf32>
    tpu.vector_store %arg2[%c0_5, %c0_6], %11 {strides = array<i32>} : memref<2x32xf32, #tpu.memory_space<vmem>>, vector<2x32xf32>,
    %c0_i32_7 = arith.constant 0 : i32
    %13 = arith.cmpi eq, %arg0, %c0_i32_7 : i32
    %14 = arith.extui %13 : i1 to i32
    %c0_i32_8 = arith.constant 0 : i32
    %15 = arith.cmpi ne, %14, %c0_i32_8 : i32
    scf.if %15 {
      %c0_9 = arith.constant 0 : index
      %c0_10 = arith.constant 0 : index
      %16 = vector.load %arg2[%c0_9, %c0_10] : memref<2x32xf32, #tpu.memory_space<vmem>>, vector<2x32xf32>
      %17 = vector.extract_strided_slice %16 {offsets = [0, 0], sizes = [1, 32], strides = [1, 1]} : vector<2x32xf32> to vector<1x32xf32>
      %cst_11 = arith.constant 8.000000e+00 : f32
      %18 = vector.broadcast %cst_11 : f32 to vector<1x32xf32>
      %19 = arith.divf %17, %18 : vector<1x32xf32>
      %20 = vector.extract_strided_slice %16 {offsets = [1, 0], sizes = [1, 32], strides = [1, 1]} : vector<2x32xf32> to vector<1x32xf32>
      %cst_12 = arith.constant 8.000000e+00 : f32
      %21 = vector.broadcast %cst_12 : f32 to vector<1x32xf32>
      %22 = arith.divf %20, %21 : vector<1x32xf32>
      %23 = arith.mulf %19, %19 : vector<1x32xf32>
      %24 = arith.subf %22, %23 : vector<1x32xf32>
      %25 = tpu.concatenate %19, %24 in 0 : vector<1x32xf32>, vector<1x32xf32> -> vector<2x32xf32>
      %c0_13 = arith.constant 0 : index
      %c0_14 = arith.constant 0 : index
      %26 = vector.load %arg2[%c0_13, %c0_14] : memref<2x32xf32, #tpu.memory_space<vmem>>, vector<2x32xf32>
      tpu.vector_store %arg2[%c0_13, %c0_14], %25 {strides = array<i32>} : memref<2x32xf32, #tpu.memory_space<vmem>>, vector<2x32xf32>,
    } else {
    }
    return
  }
  func.func @transform_0(%arg0: i32) -> (i32, i32) {
    %c0_i32 = arith.constant 0 : i32
    %c0_i32_0 = arith.constant 0 : i32
    return %arg0, %c0_i32 : i32, i32
  }
  func.func @transform_1(%arg0: i32) -> (i32, i32) {
    %c0_i32 = arith.constant 0 : i32
    %c0_i32_0 = arith.constant 0 : i32
    %c0_i32_1 = arith.constant 0 : i32
    return %c0_i32, %c0_i32_0 : i32, i32
  }
}

module attributes {stable_mosaic.version = 11 : i64} {
  func.func @_matmul_bias_kernel(%arg0: i32, %arg1: memref<8x144xbf16, #tpu.memory_space<vmem>>, %arg2: memref<144x32xbf16, #tpu.memory_space<vmem>>, %arg3: memref<1x32xf32, #tpu.memory_space<vmem>>, %arg4: memref<8x32xf32, #tpu.memory_space<vmem>>) attributes {dimension_semantics = [#tpu.dimension_semantics<parallel>], iteration_bounds = array<i64: 1>, scalar_prefetch = 0 : i64, scratch_operands = 0 : i64, tpu.core_type = #tpu.core_type<tc>, window_params = [{transform_indices = @transform_0, window_bounds = array<i64: 8, 144>}, {pipeline_mode = #tpu.pipeline_mode<synchronous>, transform_indices = @transform_1, window_bounds = array<i64: 144, 32>}, {pipeline_mode = #tpu.pipeline_mode<synchronous>, transform_indices = @transform_2, window_bounds = array<i64: 1, 32>}, {transform_indices = @transform_3, window_bounds = array<i64: 8, 32>}]} {
    %c0 = arith.constant 0 : index
    %c0_0 = arith.constant 0 : index
    %0 = vector.load %arg1[%c0, %c0_0] : memref<8x144xbf16, #tpu.memory_space<vmem>>, vector<8x144xbf16>
    %c0_1 = arith.constant 0 : index
    %c0_2 = arith.constant 0 : index
    %1 = vector.load %arg2[%c0_1, %c0_2] : memref<144x32xbf16, #tpu.memory_space<vmem>>, vector<144x32xbf16>
    %cst = arith.constant dense<0.000000e+00> : vector<8x32xf32>
    %2 = tpu.matmul %0, %1, %cst {dimension_numbers = #tpu.dot_dimension_numbers<[1], [0], [0], [1], [0, 0, 1, 1], [], []>} : vector<8x144xbf16>, vector<144x32xbf16>, vector<8x32xf32> -> vector<8x32xf32>
    %c0_3 = arith.constant 0 : index
    %c0_4 = arith.constant 0 : index
    %3 = vector.load %arg3[%c0_3, %c0_4] : memref<1x32xf32, #tpu.memory_space<vmem>>, vector<1x32xf32>
    %4 = vector.broadcast %3 : vector<1x32xf32> to vector<8x32xf32>
    %5 = arith.addf %2, %4 : vector<8x32xf32>
    %c0_5 = arith.constant 0 : index
    %c0_6 = arith.constant 0 : index
    %6 = vector.load %arg4[%c0_5, %c0_6] : memref<8x32xf32, #tpu.memory_space<vmem>>, vector<8x32xf32>
    tpu.vector_store %arg4[%c0_5, %c0_6], %5 {strides = array<i32>} : memref<8x32xf32, #tpu.memory_space<vmem>>, vector<8x32xf32>,
    return
  }
  func.func @transform_0(%arg0: i32) -> (i32, i32) {
    %c0_i32 = arith.constant 0 : i32
    %c0_i32_0 = arith.constant 0 : i32
    return %arg0, %c0_i32 : i32, i32
  }
  func.func @transform_1(%arg0: i32) -> (i32, i32) {
    %c0_i32 = arith.constant 0 : i32
    %c0_i32_0 = arith.constant 0 : i32
    %c0_i32_1 = arith.constant 0 : i32
    return %c0_i32, %c0_i32_0 : i32, i32
  }
  func.func @transform_2(%arg0: i32) -> (i32, i32) {
    %c0_i32 = arith.constant 0 : i32
    %c0_i32_0 = arith.constant 0 : i32
    %c0_i32_1 = arith.constant 0 : i32
    return %c0_i32, %c0_i32_0 : i32, i32
  }
  func.func @transform_3(%arg0: i32) -> (i32, i32) {
    %c0_i32 = arith.constant 0 : i32
    %c0_i32_0 = arith.constant 0 : i32
    return %arg0, %c0_i32 : i32, i32
  }
}

module attributes {stable_mosaic.version = 11 : i64} {
  func.func @_latent_kernel(%arg0: memref<2x128xbf16, #tpu.memory_space<vmem>>, %arg1: memref<128x8xbf16, #tpu.memory_space<vmem>>, %arg2: memref<1x8xf32, #tpu.memory_space<vmem>>, %arg3: memref<128x8xbf16, #tpu.memory_space<vmem>>, %arg4: memref<1x8xf32, #tpu.memory_space<vmem>>, %arg5: memref<2x8xf32, #tpu.memory_space<vmem>>, %arg6: memref<8x128xbf16, #tpu.memory_space<vmem>>, %arg7: memref<1x128xf32, #tpu.memory_space<vmem>>, %arg8: memref<2x8xf32, #tpu.memory_space<vmem>>, %arg9: memref<2x8xf32, #tpu.memory_space<vmem>>, %arg10: memref<2x128xf32, #tpu.memory_space<vmem>>) attributes {dimension_semantics = [], scalar_prefetch = 0 : i64, scratch_operands = 0 : i64, tpu.core_type = #tpu.core_type<tc>} {
    %c0 = arith.constant 0 : index
    %c0_0 = arith.constant 0 : index
    %0 = vector.load %arg0[%c0, %c0_0] : memref<2x128xbf16, #tpu.memory_space<vmem>>, vector<2x128xbf16>
    %c0_1 = arith.constant 0 : index
    %c0_2 = arith.constant 0 : index
    %1 = vector.load %arg1[%c0_1, %c0_2] : memref<128x8xbf16, #tpu.memory_space<vmem>>, vector<128x8xbf16>
    %cst = arith.constant dense<0.000000e+00> : vector<2x8xf32>
    %2 = tpu.matmul %0, %1, %cst {dimension_numbers = #tpu.dot_dimension_numbers<[1], [0], [0], [1], [0, 0, 1, 1], [], []>} : vector<2x128xbf16>, vector<128x8xbf16>, vector<2x8xf32> -> vector<2x8xf32>
    %c0_3 = arith.constant 0 : index
    %c0_4 = arith.constant 0 : index
    %3 = vector.load %arg2[%c0_3, %c0_4] : memref<1x8xf32, #tpu.memory_space<vmem>>, vector<1x8xf32>
    %4 = vector.broadcast %3 : vector<1x8xf32> to vector<2x8xf32>
    %5 = arith.addf %2, %4 : vector<2x8xf32>
    %c0_5 = arith.constant 0 : index
    %c0_6 = arith.constant 0 : index
    %6 = vector.load %arg3[%c0_5, %c0_6] : memref<128x8xbf16, #tpu.memory_space<vmem>>, vector<128x8xbf16>
    %cst_7 = arith.constant dense<0.000000e+00> : vector<2x8xf32>
    %7 = tpu.matmul %0, %6, %cst_7 {dimension_numbers = #tpu.dot_dimension_numbers<[1], [0], [0], [1], [0, 0, 1, 1], [], []>} : vector<2x128xbf16>, vector<128x8xbf16>, vector<2x8xf32> -> vector<2x8xf32>
    %c0_8 = arith.constant 0 : index
    %c0_9 = arith.constant 0 : index
    %8 = vector.load %arg4[%c0_8, %c0_9] : memref<1x8xf32, #tpu.memory_space<vmem>>, vector<1x8xf32>
    %9 = vector.broadcast %8 : vector<1x8xf32> to vector<2x8xf32>
    %10 = arith.addf %7, %9 : vector<2x8xf32>
    %c0_10 = arith.constant 0 : index
    %c0_11 = arith.constant 0 : index
    %11 = vector.load %arg5[%c0_10, %c0_11] : memref<2x8xf32, #tpu.memory_space<vmem>>, vector<2x8xf32>
    %cst_12 = arith.constant 5.000000e-01 : f32
    %12 = vector.broadcast %cst_12 : f32 to vector<2x8xf32>
    %13 = arith.mulf %12, %10 : vector<2x8xf32>
    %14 = math.exp %13 : vector<2x8xf32>
    %15 = arith.mulf %11, %14 : vector<2x8xf32>
    %16 = arith.addf %15, %5 : vector<2x8xf32>
    %17 = arith.truncf %16 : vector<2x8xf32> to vector<2x8xbf16>
    %c0_13 = arith.constant 0 : index
    %c0_14 = arith.constant 0 : index
    %18 = vector.load %arg6[%c0_13, %c0_14] : memref<8x128xbf16, #tpu.memory_space<vmem>>, vector<8x128xbf16>
    %cst_15 = arith.constant dense<0.000000e+00> : vector<2x128xf32>
    %19 = tpu.matmul %17, %18, %cst_15 {dimension_numbers = #tpu.dot_dimension_numbers<[1], [0], [0], [1], [0, 0, 1, 1], [], []>} : vector<2x8xbf16>, vector<8x128xbf16>, vector<2x128xf32> -> vector<2x128xf32>
    %c0_16 = arith.constant 0 : index
    %c0_17 = arith.constant 0 : index
    %20 = vector.load %arg7[%c0_16, %c0_17] : memref<1x128xf32, #tpu.memory_space<vmem>>, vector<1x128xf32>
    %21 = vector.broadcast %20 : vector<1x128xf32> to vector<2x128xf32>
    %22 = arith.addf %19, %21 : vector<2x128xf32>
    %c0_18 = arith.constant 0 : index
    %c0_19 = arith.constant 0 : index
    %23 = vector.load %arg8[%c0_18, %c0_19] : memref<2x8xf32, #tpu.memory_space<vmem>>, vector<2x8xf32>
    tpu.vector_store %arg8[%c0_18, %c0_19], %5 {strides = array<i32>} : memref<2x8xf32, #tpu.memory_space<vmem>>, vector<2x8xf32>,
    %c0_20 = arith.constant 0 : index
    %c0_21 = arith.constant 0 : index
    %24 = vector.load %arg9[%c0_20, %c0_21] : memref<2x8xf32, #tpu.memory_space<vmem>>, vector<2x8xf32>
    tpu.vector_store %arg9[%c0_20, %c0_21], %10 {strides = array<i32>} : memref<2x8xf32, #tpu.memory_space<vmem>>, vector<2x8xf32>,
    %c0_22 = arith.constant 0 : index
    %c0_23 = arith.constant 0 : index
    %25 = vector.load %arg10[%c0_22, %c0_23] : memref<2x128xf32, #tpu.memory_space<vmem>>, vector<2x128xf32>
    tpu.vector_store %arg10[%c0_22, %c0_23], %22 {strides = array<i32>} : memref<2x128xf32, #tpu.memory_space<vmem>>, vector<2x128xf32>,
    return
  }
}

module attributes {stable_mosaic.version = 11 : i64} {
  func.func @_tconv_matmul_kernel(%arg0: i32, %arg1: memref<8x32xbf16, #tpu.memory_space<vmem>>, %arg2: memref<8x32xbf16, #tpu.memory_space<vmem>>, %arg3: memref<8x32xbf16, #tpu.memory_space<vmem>>, %arg4: memref<8x32xbf16, #tpu.memory_space<vmem>>, %arg5: memref<9x32x16xbf16, #tpu.memory_space<vmem>>, %arg6: memref<1x16xf32, #tpu.memory_space<vmem>>, %arg7: memref<4x8x16xf32, #tpu.memory_space<vmem>>) attributes {dimension_semantics = [#tpu.dimension_semantics<parallel>], iteration_bounds = array<i64: 1>, scalar_prefetch = 0 : i64, scratch_operands = 0 : i64, tpu.core_type = #tpu.core_type<tc>, window_params = [{transform_indices = @transform_0, window_bounds = array<i64: 8, 32>}, {transform_indices = @transform_1, window_bounds = array<i64: 8, 32>}, {transform_indices = @transform_2, window_bounds = array<i64: 8, 32>}, {transform_indices = @transform_3, window_bounds = array<i64: 8, 32>}, {pipeline_mode = #tpu.pipeline_mode<synchronous>, transform_indices = @transform_4, window_bounds = array<i64: 9, 32, 16>}, {pipeline_mode = #tpu.pipeline_mode<synchronous>, transform_indices = @transform_5, window_bounds = array<i64: 1, 16>}, {transform_indices = @transform_6, window_bounds = array<i64: 4, 8, 16>}]} {
    %c0 = arith.constant 0 : index
    %c0_0 = arith.constant 0 : index
    %c0_1 = arith.constant 0 : index
    %0 = vector.load %arg5[%c0, %c0_0, %c0_1] : memref<9x32x16xbf16, #tpu.memory_space<vmem>>, vector<9x32x16xbf16>
    %c0_2 = arith.constant 0 : index
    %c0_3 = arith.constant 0 : index
    %1 = vector.load %arg6[%c0_2, %c0_3] : memref<1x16xf32, #tpu.memory_space<vmem>>, vector<1x16xf32>
    %c0_4 = arith.constant 0 : index
    %c0_5 = arith.constant 0 : index
    %2 = vector.load %arg1[%c0_4, %c0_5] : memref<8x32xbf16, #tpu.memory_space<vmem>>, vector<8x32xbf16>
    %c0_6 = arith.constant 0 : index
    %c0_7 = arith.constant 0 : index
    %3 = vector.load %arg2[%c0_6, %c0_7] : memref<8x32xbf16, #tpu.memory_space<vmem>>, vector<8x32xbf16>
    %c0_8 = arith.constant 0 : index
    %c0_9 = arith.constant 0 : index
    %4 = vector.load %arg3[%c0_8, %c0_9] : memref<8x32xbf16, #tpu.memory_space<vmem>>, vector<8x32xbf16>
    %c0_10 = arith.constant 0 : index
    %c0_11 = arith.constant 0 : index
    %5 = vector.load %arg4[%c0_10, %c0_11] : memref<8x32xbf16, #tpu.memory_space<vmem>>, vector<8x32xbf16>
    %6 = vector.extract_strided_slice %0 {offsets = [4, 0, 0], sizes = [1, 32, 16], strides = [1, 1, 1]} : vector<9x32x16xbf16> to vector<1x32x16xbf16>
    %7 = vector.shape_cast %6 : vector<1x32x16xbf16> to vector<32x16xbf16>
    %cst = arith.constant dense<0.000000e+00> : vector<8x16xf32>
    %8 = tpu.matmul %2, %7, %cst {dimension_numbers = #tpu.dot_dimension_numbers<[1], [0], [0], [1], [0, 0, 1, 1], [], []>} : vector<8x32xbf16>, vector<32x16xbf16>, vector<8x16xf32> -> vector<8x16xf32>
    %9 = vector.broadcast %1 : vector<1x16xf32> to vector<8x16xf32>
    %10 = arith.addf %8, %9 : vector<8x16xf32>
    %c0_12 = arith.constant 0 : index
    %c0_13 = arith.constant 0 : index
    %c0_14 = arith.constant 0 : index
    %11 = vector.load %arg7[%c0_12, %c0_13, %c0_14] : memref<4x8x16xf32, #tpu.memory_space<vmem>>, vector<1x8x16xf32>
    %12 = vector.shape_cast %11 : vector<1x8x16xf32> to vector<8x16xf32>
    %13 = vector.shape_cast %10 : vector<8x16xf32> to vector<1x8x16xf32>
    tpu.vector_store %arg7[%c0_12, %c0_13, %c0_14], %13 {strides = array<i32>} : memref<4x8x16xf32, #tpu.memory_space<vmem>>, vector<1x8x16xf32>,
    %14 = vector.extract_strided_slice %0 {offsets = [5, 0, 0], sizes = [1, 32, 16], strides = [1, 1, 1]} : vector<9x32x16xbf16> to vector<1x32x16xbf16>
    %15 = vector.shape_cast %14 : vector<1x32x16xbf16> to vector<32x16xbf16>
    %cst_15 = arith.constant dense<0.000000e+00> : vector<8x16xf32>
    %16 = tpu.matmul %2, %15, %cst_15 {dimension_numbers = #tpu.dot_dimension_numbers<[1], [0], [0], [1], [0, 0, 1, 1], [], []>} : vector<8x32xbf16>, vector<32x16xbf16>, vector<8x16xf32> -> vector<8x16xf32>
    %17 = vector.extract_strided_slice %0 {offsets = [3, 0, 0], sizes = [1, 32, 16], strides = [1, 1, 1]} : vector<9x32x16xbf16> to vector<1x32x16xbf16>
    %18 = vector.shape_cast %17 : vector<1x32x16xbf16> to vector<32x16xbf16>
    %cst_16 = arith.constant dense<0.000000e+00> : vector<8x16xf32>
    %19 = tpu.matmul %3, %18, %cst_16 {dimension_numbers = #tpu.dot_dimension_numbers<[1], [0], [0], [1], [0, 0, 1, 1], [], []>} : vector<8x32xbf16>, vector<32x16xbf16>, vector<8x16xf32> -> vector<8x16xf32>
    %20 = arith.addf %16, %19 : vector<8x16xf32>
    %21 = vector.broadcast %1 : vector<1x16xf32> to vector<8x16xf32>
    %22 = arith.addf %20, %21 : vector<8x16xf32>
    %c1 = arith.constant 1 : index
    %c0_17 = arith.constant 0 : index
    %c0_18 = arith.constant 0 : index
    %23 = vector.load %arg7[%c1, %c0_17, %c0_18] : memref<4x8x16xf32, #tpu.memory_space<vmem>>, vector<1x8x16xf32>
    %24 = vector.shape_cast %23 : vector<1x8x16xf32> to vector<8x16xf32>
    %25 = vector.shape_cast %22 : vector<8x16xf32> to vector<1x8x16xf32>
    tpu.vector_store %arg7[%c1, %c0_17, %c0_18], %25 {strides = array<i32>} : memref<4x8x16xf32, #tpu.memory_space<vmem>>, vector<1x8x16xf32>,
    %26 = vector.extract_strided_slice %0 {offsets = [7, 0, 0], sizes = [1, 32, 16], strides = [1, 1, 1]} : vector<9x32x16xbf16> to vector<1x32x16xbf16>
    %27 = vector.shape_cast %26 : vector<1x32x16xbf16> to vector<32x16xbf16>
    %cst_19 = arith.constant dense<0.000000e+00> : vector<8x16xf32>
    %28 = tpu.matmul %2, %27, %cst_19 {dimension_numbers = #tpu.dot_dimension_numbers<[1], [0], [0], [1], [0, 0, 1, 1], [], []>} : vector<8x32xbf16>, vector<32x16xbf16>, vector<8x16xf32> -> vector<8x16xf32>
    %29 = vector.extract_strided_slice %0 {offsets = [1, 0, 0], sizes = [1, 32, 16], strides = [1, 1, 1]} : vector<9x32x16xbf16> to vector<1x32x16xbf16>
    %30 = vector.shape_cast %29 : vector<1x32x16xbf16> to vector<32x16xbf16>
    %cst_20 = arith.constant dense<0.000000e+00> : vector<8x16xf32>
    %31 = tpu.matmul %4, %30, %cst_20 {dimension_numbers = #tpu.dot_dimension_numbers<[1], [0], [0], [1], [0, 0, 1, 1], [], []>} : vector<8x32xbf16>, vector<32x16xbf16>, vector<8x16xf32> -> vector<8x16xf32>
    %32 = arith.addf %28, %31 : vector<8x16xf32>
    %33 = vector.broadcast %1 : vector<1x16xf32> to vector<8x16xf32>
    %34 = arith.addf %32, %33 : vector<8x16xf32>
    %c2 = arith.constant 2 : index
    %c0_21 = arith.constant 0 : index
    %c0_22 = arith.constant 0 : index
    %35 = vector.load %arg7[%c2, %c0_21, %c0_22] : memref<4x8x16xf32, #tpu.memory_space<vmem>>, vector<1x8x16xf32>
    %36 = vector.shape_cast %35 : vector<1x8x16xf32> to vector<8x16xf32>
    %37 = vector.shape_cast %34 : vector<8x16xf32> to vector<1x8x16xf32>
    tpu.vector_store %arg7[%c2, %c0_21, %c0_22], %37 {strides = array<i32>} : memref<4x8x16xf32, #tpu.memory_space<vmem>>, vector<1x8x16xf32>,
    %38 = vector.extract_strided_slice %0 {offsets = [8, 0, 0], sizes = [1, 32, 16], strides = [1, 1, 1]} : vector<9x32x16xbf16> to vector<1x32x16xbf16>
    %39 = vector.shape_cast %38 : vector<1x32x16xbf16> to vector<32x16xbf16>
    %cst_23 = arith.constant dense<0.000000e+00> : vector<8x16xf32>
    %40 = tpu.matmul %2, %39, %cst_23 {dimension_numbers = #tpu.dot_dimension_numbers<[1], [0], [0], [1], [0, 0, 1, 1], [], []>} : vector<8x32xbf16>, vector<32x16xbf16>, vector<8x16xf32> -> vector<8x16xf32>
    %41 = vector.extract_strided_slice %0 {offsets = [6, 0, 0], sizes = [1, 32, 16], strides = [1, 1, 1]} : vector<9x32x16xbf16> to vector<1x32x16xbf16>
    %42 = vector.shape_cast %41 : vector<1x32x16xbf16> to vector<32x16xbf16>
    %cst_24 = arith.constant dense<0.000000e+00> : vector<8x16xf32>
    %43 = tpu.matmul %3, %42, %cst_24 {dimension_numbers = #tpu.dot_dimension_numbers<[1], [0], [0], [1], [0, 0, 1, 1], [], []>} : vector<8x32xbf16>, vector<32x16xbf16>, vector<8x16xf32> -> vector<8x16xf32>
    %44 = arith.addf %40, %43 : vector<8x16xf32>
    %45 = vector.extract_strided_slice %0 {offsets = [2, 0, 0], sizes = [1, 32, 16], strides = [1, 1, 1]} : vector<9x32x16xbf16> to vector<1x32x16xbf16>
    %46 = vector.shape_cast %45 : vector<1x32x16xbf16> to vector<32x16xbf16>
    %cst_25 = arith.constant dense<0.000000e+00> : vector<8x16xf32>
    %47 = tpu.matmul %4, %46, %cst_25 {dimension_numbers = #tpu.dot_dimension_numbers<[1], [0], [0], [1], [0, 0, 1, 1], [], []>} : vector<8x32xbf16>, vector<32x16xbf16>, vector<8x16xf32> -> vector<8x16xf32>
    %48 = arith.addf %44, %47 : vector<8x16xf32>
    %49 = vector.extract_strided_slice %0 {offsets = [0, 0, 0], sizes = [1, 32, 16], strides = [1, 1, 1]} : vector<9x32x16xbf16> to vector<1x32x16xbf16>
    %50 = vector.shape_cast %49 : vector<1x32x16xbf16> to vector<32x16xbf16>
    %cst_26 = arith.constant dense<0.000000e+00> : vector<8x16xf32>
    %51 = tpu.matmul %5, %50, %cst_26 {dimension_numbers = #tpu.dot_dimension_numbers<[1], [0], [0], [1], [0, 0, 1, 1], [], []>} : vector<8x32xbf16>, vector<32x16xbf16>, vector<8x16xf32> -> vector<8x16xf32>
    %52 = arith.addf %48, %51 : vector<8x16xf32>
    %53 = vector.broadcast %1 : vector<1x16xf32> to vector<8x16xf32>
    %54 = arith.addf %52, %53 : vector<8x16xf32>
    %c3 = arith.constant 3 : index
    %c0_27 = arith.constant 0 : index
    %c0_28 = arith.constant 0 : index
    %55 = vector.load %arg7[%c3, %c0_27, %c0_28] : memref<4x8x16xf32, #tpu.memory_space<vmem>>, vector<1x8x16xf32>
    %56 = vector.shape_cast %55 : vector<1x8x16xf32> to vector<8x16xf32>
    %57 = vector.shape_cast %54 : vector<8x16xf32> to vector<1x8x16xf32>
    tpu.vector_store %arg7[%c3, %c0_27, %c0_28], %57 {strides = array<i32>} : memref<4x8x16xf32, #tpu.memory_space<vmem>>, vector<1x8x16xf32>,
    return
  }
  func.func @transform_0(%arg0: i32) -> (i32, i32) {
    %c0_i32 = arith.constant 0 : i32
    %c0_i32_0 = arith.constant 0 : i32
    return %arg0, %c0_i32 : i32, i32
  }
  func.func @transform_1(%arg0: i32) -> (i32, i32) {
    %c0_i32 = arith.constant 0 : i32
    %c0_i32_0 = arith.constant 0 : i32
    return %arg0, %c0_i32 : i32, i32
  }
  func.func @transform_2(%arg0: i32) -> (i32, i32) {
    %c0_i32 = arith.constant 0 : i32
    %c0_i32_0 = arith.constant 0 : i32
    return %arg0, %c0_i32 : i32, i32
  }
  func.func @transform_3(%arg0: i32) -> (i32, i32) {
    %c0_i32 = arith.constant 0 : i32
    %c0_i32_0 = arith.constant 0 : i32
    return %arg0, %c0_i32 : i32, i32
  }
  func.func @transform_4(%arg0: i32) -> (i32, i32, i32) {
    %c0_i32 = arith.constant 0 : i32
    %c0_i32_0 = arith.constant 0 : i32
    %c0_i32_1 = arith.constant 0 : i32
    %c0_i32_2 = arith.constant 0 : i32
    return %c0_i32, %c0_i32_0, %c0_i32_1 : i32, i32, i32
  }
  func.func @transform_5(%arg0: i32) -> (i32, i32) {
    %c0_i32 = arith.constant 0 : i32
    %c0_i32_0 = arith.constant 0 : i32
    %c0_i32_1 = arith.constant 0 : i32
    return %c0_i32, %c0_i32_0 : i32, i32
  }
  func.func @transform_6(%arg0: i32) -> (i32, i32, i32) {
    %c0_i32 = arith.constant 0 : i32
    %c0_i32_0 = arith.constant 0 : i32
    %c0_i32_1 = arith.constant 0 : i32
    return %c0_i32, %arg0, %c0_i32_0 : i32, i32, i32
  }
}

module attributes {stable_mosaic.version = 11 : i64} {
  func.func @_bn_lrelu_kernel(%arg0: i32, %arg1: memref<128x8xf32, #tpu.memory_space<vmem>>, %arg2: memref<2x8xf32, #tpu.memory_space<vmem>>, %arg3: memref<1x8xf32, #tpu.memory_space<vmem>>, %arg4: memref<1x8xf32, #tpu.memory_space<vmem>>, %arg5: memref<128x8xf32, #tpu.memory_space<vmem>>) attributes {dimension_semantics = [#tpu.dimension_semantics<parallel>], iteration_bounds = array<i64: 1>, scalar_prefetch = 0 : i64, scratch_operands = 0 : i64, tpu.core_type = #tpu.core_type<tc>, window_params = [{transform_indices = @transform_0, window_bounds = array<i64: 128, 8>}, {pipeline_mode = #tpu.pipeline_mode<synchronous>, transform_indices = @transform_1, window_bounds = array<i64: 2, 8>}, {pipeline_mode = #tpu.pipeline_mode<synchronous>, transform_indices = @transform_2, window_bounds = array<i64: 1, 8>}, {pipeline_mode = #tpu.pipeline_mode<synchronous>, transform_indices = @transform_3, window_bounds = array<i64: 1, 8>}, {transform_indices = @transform_4, window_bounds = array<i64: 128, 8>}]} {
    %c0 = arith.constant 0 : index
    %c0_0 = arith.constant 0 : index
    %0 = vector.load %arg1[%c0, %c0_0] : memref<128x8xf32, #tpu.memory_space<vmem>>, vector<128x8xf32>
    %c0_1 = arith.constant 0 : index
    %c0_2 = arith.constant 0 : index
    %1 = vector.load %arg2[%c0_1, %c0_2] : memref<2x8xf32, #tpu.memory_space<vmem>>, vector<2x8xf32>
    %2 = vector.extract_strided_slice %1 {offsets = [0, 0], sizes = [1, 8], strides = [1, 1]} : vector<2x8xf32> to vector<1x8xf32>
    %3 = vector.extract_strided_slice %1 {offsets = [1, 0], sizes = [1, 8], strides = [1, 1]} : vector<2x8xf32> to vector<1x8xf32>
    %4 = vector.broadcast %2 : vector<1x8xf32> to vector<128x8xf32>
    %5 = arith.subf %0, %4 : vector<128x8xf32>
    %cst = arith.constant 9.99999974E-6 : f32
    %6 = vector.broadcast %cst : f32 to vector<1x8xf32>
    %7 = arith.addf %3, %6 : vector<1x8xf32>
    %8 = math.rsqrt %7 : vector<1x8xf32>
    %9 = vector.broadcast %8 : vector<1x8xf32> to vector<128x8xf32>
    %10 = arith.mulf %5, %9 : vector<128x8xf32>
    %c0_3 = arith.constant 0 : index
    %c0_4 = arith.constant 0 : index
    %11 = vector.load %arg3[%c0_3, %c0_4] : memref<1x8xf32, #tpu.memory_space<vmem>>, vector<1x8xf32>
    %12 = vector.broadcast %11 : vector<1x8xf32> to vector<128x8xf32>
    %13 = arith.mulf %10, %12 : vector<128x8xf32>
    %c0_5 = arith.constant 0 : index
    %c0_6 = arith.constant 0 : index
    %14 = vector.load %arg4[%c0_5, %c0_6] : memref<1x8xf32, #tpu.memory_space<vmem>>, vector<1x8xf32>
    %15 = vector.broadcast %14 : vector<1x8xf32> to vector<128x8xf32>
    %16 = arith.addf %13, %15 : vector<128x8xf32>
    %cst_7 = arith.constant 0.000000e+00 : f32
    %17 = vector.broadcast %cst_7 : f32 to vector<128x8xf32>
    %18 = arith.cmpf oge, %16, %17 : vector<128x8xf32>
    %cst_8 = arith.constant 0.00999999977 : f32
    %19 = vector.broadcast %cst_8 : f32 to vector<128x8xf32>
    %20 = arith.mulf %19, %16 : vector<128x8xf32>
    %21 = arith.select %18, %16, %20 : vector<128x8xi1>, vector<128x8xf32>
    %c0_9 = arith.constant 0 : index
    %c0_10 = arith.constant 0 : index
    %22 = vector.load %arg5[%c0_9, %c0_10] : memref<128x8xf32, #tpu.memory_space<vmem>>, vector<128x8xf32>
    tpu.vector_store %arg5[%c0_9, %c0_10], %21 {strides = array<i32>} : memref<128x8xf32, #tpu.memory_space<vmem>>, vector<128x8xf32>,
    return
  }
  func.func @transform_0(%arg0: i32) -> (i32, i32) {
    %c0_i32 = arith.constant 0 : i32
    %c0_i32_0 = arith.constant 0 : i32
    return %arg0, %c0_i32 : i32, i32
  }
  func.func @transform_1(%arg0: i32) -> (i32, i32) {
    %c0_i32 = arith.constant 0 : i32
    %c0_i32_0 = arith.constant 0 : i32
    %c0_i32_1 = arith.constant 0 : i32
    return %c0_i32, %c0_i32_0 : i32, i32
  }
  func.func @transform_2(%arg0: i32) -> (i32, i32) {
    %c0_i32 = arith.constant 0 : i32
    %c0_i32_0 = arith.constant 0 : i32
    %c0_i32_1 = arith.constant 0 : i32
    return %c0_i32, %c0_i32_0 : i32, i32
  }
  func.func @transform_3(%arg0: i32) -> (i32, i32) {
    %c0_i32 = arith.constant 0 : i32
    %c0_i32_0 = arith.constant 0 : i32
    %c0_i32_1 = arith.constant 0 : i32
    return %c0_i32, %c0_i32_0 : i32, i32
  }
  func.func @transform_4(%arg0: i32) -> (i32, i32) {
    %c0_i32 = arith.constant 0 : i32
    %c0_i32_0 = arith.constant 0 : i32
    return %arg0, %c0_i32 : i32, i32
  }
}

module attributes {stable_mosaic.version = 11 : i64} {
  func.func @_tconv_matmul_kernel(%arg0: i32, %arg1: memref<32x16xbf16, #tpu.memory_space<vmem>>, %arg2: memref<32x16xbf16, #tpu.memory_space<vmem>>, %arg3: memref<32x16xbf16, #tpu.memory_space<vmem>>, %arg4: memref<32x16xbf16, #tpu.memory_space<vmem>>, %arg5: memref<9x16x8xbf16, #tpu.memory_space<vmem>>, %arg6: memref<1x8xf32, #tpu.memory_space<vmem>>, %arg7: memref<4x32x8xf32, #tpu.memory_space<vmem>>) attributes {dimension_semantics = [#tpu.dimension_semantics<parallel>], iteration_bounds = array<i64: 1>, scalar_prefetch = 0 : i64, scratch_operands = 0 : i64, tpu.core_type = #tpu.core_type<tc>, window_params = [{transform_indices = @transform_0, window_bounds = array<i64: 32, 16>}, {transform_indices = @transform_1, window_bounds = array<i64: 32, 16>}, {transform_indices = @transform_2, window_bounds = array<i64: 32, 16>}, {transform_indices = @transform_3, window_bounds = array<i64: 32, 16>}, {pipeline_mode = #tpu.pipeline_mode<synchronous>, transform_indices = @transform_4, window_bounds = array<i64: 9, 16, 8>}, {pipeline_mode = #tpu.pipeline_mode<synchronous>, transform_indices = @transform_5, window_bounds = array<i64: 1, 8>}, {transform_indices = @transform_6, window_bounds = array<i64: 4, 32, 8>}]} {
    %c0 = arith.constant 0 : index
    %c0_0 = arith.constant 0 : index
    %c0_1 = arith.constant 0 : index
    %0 = vector.load %arg5[%c0, %c0_0, %c0_1] : memref<9x16x8xbf16, #tpu.memory_space<vmem>>, vector<9x16x8xbf16>
    %c0_2 = arith.constant 0 : index
    %c0_3 = arith.constant 0 : index
    %1 = vector.load %arg6[%c0_2, %c0_3] : memref<1x8xf32, #tpu.memory_space<vmem>>, vector<1x8xf32>
    %c0_4 = arith.constant 0 : index
    %c0_5 = arith.constant 0 : index
    %2 = vector.load %arg1[%c0_4, %c0_5] : memref<32x16xbf16, #tpu.memory_space<vmem>>, vector<32x16xbf16>
    %c0_6 = arith.constant 0 : index
    %c0_7 = arith.constant 0 : index
    %3 = vector.load %arg2[%c0_6, %c0_7] : memref<32x16xbf16, #tpu.memory_space<vmem>>, vector<32x16xbf16>
    %c0_8 = arith.constant 0 : index
    %c0_9 = arith.constant 0 : index
    %4 = vector.load %arg3[%c0_8, %c0_9] : memref<32x16xbf16, #tpu.memory_space<vmem>>, vector<32x16xbf16>
    %c0_10 = arith.constant 0 : index
    %c0_11 = arith.constant 0 : index
    %5 = vector.load %arg4[%c0_10, %c0_11] : memref<32x16xbf16, #tpu.memory_space<vmem>>, vector<32x16xbf16>
    %6 = vector.extract_strided_slice %0 {offsets = [4, 0, 0], sizes = [1, 16, 8], strides = [1, 1, 1]} : vector<9x16x8xbf16> to vector<1x16x8xbf16>
    %7 = vector.shape_cast %6 : vector<1x16x8xbf16> to vector<16x8xbf16>
    %cst = arith.constant dense<0.000000e+00> : vector<32x8xf32>
    %8 = tpu.matmul %2, %7, %cst {dimension_numbers = #tpu.dot_dimension_numbers<[1], [0], [0], [1], [0, 0, 1, 1], [], []>} : vector<32x16xbf16>, vector<16x8xbf16>, vector<32x8xf32> -> vector<32x8xf32>
    %9 = vector.broadcast %1 : vector<1x8xf32> to vector<32x8xf32>
    %10 = arith.addf %8, %9 : vector<32x8xf32>
    %c0_12 = arith.constant 0 : index
    %c0_13 = arith.constant 0 : index
    %c0_14 = arith.constant 0 : index
    %11 = vector.load %arg7[%c0_12, %c0_13, %c0_14] : memref<4x32x8xf32, #tpu.memory_space<vmem>>, vector<1x32x8xf32>
    %12 = vector.shape_cast %11 : vector<1x32x8xf32> to vector<32x8xf32>
    %13 = vector.shape_cast %10 : vector<32x8xf32> to vector<1x32x8xf32>
    tpu.vector_store %arg7[%c0_12, %c0_13, %c0_14], %13 {strides = array<i32>} : memref<4x32x8xf32, #tpu.memory_space<vmem>>, vector<1x32x8xf32>,
    %14 = vector.extract_strided_slice %0 {offsets = [5, 0, 0], sizes = [1, 16, 8], strides = [1, 1, 1]} : vector<9x16x8xbf16> to vector<1x16x8xbf16>
    %15 = vector.shape_cast %14 : vector<1x16x8xbf16> to vector<16x8xbf16>
    %cst_15 = arith.constant dense<0.000000e+00> : vector<32x8xf32>
    %16 = tpu.matmul %2, %15, %cst_15 {dimension_numbers = #tpu.dot_dimension_numbers<[1], [0], [0], [1], [0, 0, 1, 1], [], []>} : vector<32x16xbf16>, vector<16x8xbf16>, vector<32x8xf32> -> vector<32x8xf32>
    %17 = vector.extract_strided_slice %0 {offsets = [3, 0, 0], sizes = [1, 16, 8], strides = [1, 1, 1]} : vector<9x16x8xbf16> to vector<1x16x8xbf16>
    %18 = vector.shape_cast %17 : vector<1x16x8xbf16> to vector<16x8xbf16>
    %cst_16 = arith.constant dense<0.000000e+00> : vector<32x8xf32>
    %19 = tpu.matmul %3, %18, %cst_16 {dimension_numbers = #tpu.dot_dimension_numbers<[1], [0], [0], [1], [0, 0, 1, 1], [], []>} : vector<32x16xbf16>, vector<16x8xbf16>, vector<32x8xf32> -> vector<32x8xf32>
    %20 = arith.addf %16, %19 : vector<32x8xf32>
    %21 = vector.broadcast %1 : vector<1x8xf32> to vector<32x8xf32>
    %22 = arith.addf %20, %21 : vector<32x8xf32>
    %c1 = arith.constant 1 : index
    %c0_17 = arith.constant 0 : index
    %c0_18 = arith.constant 0 : index
    %23 = vector.load %arg7[%c1, %c0_17, %c0_18] : memref<4x32x8xf32, #tpu.memory_space<vmem>>, vector<1x32x8xf32>
    %24 = vector.shape_cast %23 : vector<1x32x8xf32> to vector<32x8xf32>
    %25 = vector.shape_cast %22 : vector<32x8xf32> to vector<1x32x8xf32>
    tpu.vector_store %arg7[%c1, %c0_17, %c0_18], %25 {strides = array<i32>} : memref<4x32x8xf32, #tpu.memory_space<vmem>>, vector<1x32x8xf32>,
    %26 = vector.extract_strided_slice %0 {offsets = [7, 0, 0], sizes = [1, 16, 8], strides = [1, 1, 1]} : vector<9x16x8xbf16> to vector<1x16x8xbf16>
    %27 = vector.shape_cast %26 : vector<1x16x8xbf16> to vector<16x8xbf16>
    %cst_19 = arith.constant dense<0.000000e+00> : vector<32x8xf32>
    %28 = tpu.matmul %2, %27, %cst_19 {dimension_numbers = #tpu.dot_dimension_numbers<[1], [0], [0], [1], [0, 0, 1, 1], [], []>} : vector<32x16xbf16>, vector<16x8xbf16>, vector<32x8xf32> -> vector<32x8xf32>
    %29 = vector.extract_strided_slice %0 {offsets = [1, 0, 0], sizes = [1, 16, 8], strides = [1, 1, 1]} : vector<9x16x8xbf16> to vector<1x16x8xbf16>
    %30 = vector.shape_cast %29 : vector<1x16x8xbf16> to vector<16x8xbf16>
    %cst_20 = arith.constant dense<0.000000e+00> : vector<32x8xf32>
    %31 = tpu.matmul %4, %30, %cst_20 {dimension_numbers = #tpu.dot_dimension_numbers<[1], [0], [0], [1], [0, 0, 1, 1], [], []>} : vector<32x16xbf16>, vector<16x8xbf16>, vector<32x8xf32> -> vector<32x8xf32>
    %32 = arith.addf %28, %31 : vector<32x8xf32>
    %33 = vector.broadcast %1 : vector<1x8xf32> to vector<32x8xf32>
    %34 = arith.addf %32, %33 : vector<32x8xf32>
    %c2 = arith.constant 2 : index
    %c0_21 = arith.constant 0 : index
    %c0_22 = arith.constant 0 : index
    %35 = vector.load %arg7[%c2, %c0_21, %c0_22] : memref<4x32x8xf32, #tpu.memory_space<vmem>>, vector<1x32x8xf32>
    %36 = vector.shape_cast %35 : vector<1x32x8xf32> to vector<32x8xf32>
    %37 = vector.shape_cast %34 : vector<32x8xf32> to vector<1x32x8xf32>
    tpu.vector_store %arg7[%c2, %c0_21, %c0_22], %37 {strides = array<i32>} : memref<4x32x8xf32, #tpu.memory_space<vmem>>, vector<1x32x8xf32>,
    %38 = vector.extract_strided_slice %0 {offsets = [8, 0, 0], sizes = [1, 16, 8], strides = [1, 1, 1]} : vector<9x16x8xbf16> to vector<1x16x8xbf16>
    %39 = vector.shape_cast %38 : vector<1x16x8xbf16> to vector<16x8xbf16>
    %cst_23 = arith.constant dense<0.000000e+00> : vector<32x8xf32>
    %40 = tpu.matmul %2, %39, %cst_23 {dimension_numbers = #tpu.dot_dimension_numbers<[1], [0], [0], [1], [0, 0, 1, 1], [], []>} : vector<32x16xbf16>, vector<16x8xbf16>, vector<32x8xf32> -> vector<32x8xf32>
    %41 = vector.extract_strided_slice %0 {offsets = [6, 0, 0], sizes = [1, 16, 8], strides = [1, 1, 1]} : vector<9x16x8xbf16> to vector<1x16x8xbf16>
    %42 = vector.shape_cast %41 : vector<1x16x8xbf16> to vector<16x8xbf16>
    %cst_24 = arith.constant dense<0.000000e+00> : vector<32x8xf32>
    %43 = tpu.matmul %3, %42, %cst_24 {dimension_numbers = #tpu.dot_dimension_numbers<[1], [0], [0], [1], [0, 0, 1, 1], [], []>} : vector<32x16xbf16>, vector<16x8xbf16>, vector<32x8xf32> -> vector<32x8xf32>
    %44 = arith.addf %40, %43 : vector<32x8xf32>
    %45 = vector.extract_strided_slice %0 {offsets = [2, 0, 0], sizes = [1, 16, 8], strides = [1, 1, 1]} : vector<9x16x8xbf16> to vector<1x16x8xbf16>
    %46 = vector.shape_cast %45 : vector<1x16x8xbf16> to vector<16x8xbf16>
    %cst_25 = arith.constant dense<0.000000e+00> : vector<32x8xf32>
    %47 = tpu.matmul %4, %46, %cst_25 {dimension_numbers = #tpu.dot_dimension_numbers<[1], [0], [0], [1], [0, 0, 1, 1], [], []>} : vector<32x16xbf16>, vector<16x8xbf16>, vector<32x8xf32> -> vector<32x8xf32>
    %48 = arith.addf %44, %47 : vector<32x8xf32>
    %49 = vector.extract_strided_slice %0 {offsets = [0, 0, 0], sizes = [1, 16, 8], strides = [1, 1, 1]} : vector<9x16x8xbf16> to vector<1x16x8xbf16>
    %50 = vector.shape_cast %49 : vector<1x16x8xbf16> to vector<16x8xbf16>
    %cst_26 = arith.constant dense<0.000000e+00> : vector<32x8xf32>
    %51 = tpu.matmul %5, %50, %cst_26 {dimension_numbers = #tpu.dot_dimension_numbers<[1], [0], [0], [1], [0, 0, 1, 1], [], []>} : vector<32x16xbf16>, vector<16x8xbf16>, vector<32x8xf32> -> vector<32x8xf32>
    %52 = arith.addf %48, %51 : vector<32x8xf32>
    %53 = vector.broadcast %1 : vector<1x8xf32> to vector<32x8xf32>
    %54 = arith.addf %52, %53 : vector<32x8xf32>
    %c3 = arith.constant 3 : index
    %c0_27 = arith.constant 0 : index
    %c0_28 = arith.constant 0 : index
    %55 = vector.load %arg7[%c3, %c0_27, %c0_28] : memref<4x32x8xf32, #tpu.memory_space<vmem>>, vector<1x32x8xf32>
    %56 = vector.shape_cast %55 : vector<1x32x8xf32> to vector<32x8xf32>
    %57 = vector.shape_cast %54 : vector<32x8xf32> to vector<1x32x8xf32>
    tpu.vector_store %arg7[%c3, %c0_27, %c0_28], %57 {strides = array<i32>} : memref<4x32x8xf32, #tpu.memory_space<vmem>>, vector<1x32x8xf32>,
    return
  }
  func.func @transform_0(%arg0: i32) -> (i32, i32) {
    %c0_i32 = arith.constant 0 : i32
    %c0_i32_0 = arith.constant 0 : i32
    return %arg0, %c0_i32 : i32, i32
  }
  func.func @transform_1(%arg0: i32) -> (i32, i32) {
    %c0_i32 = arith.constant 0 : i32
    %c0_i32_0 = arith.constant 0 : i32
    return %arg0, %c0_i32 : i32, i32
  }
  func.func @transform_2(%arg0: i32) -> (i32, i32) {
    %c0_i32 = arith.constant 0 : i32
    %c0_i32_0 = arith.constant 0 : i32
    return %arg0, %c0_i32 : i32, i32
  }
  func.func @transform_3(%arg0: i32) -> (i32, i32) {
    %c0_i32 = arith.constant 0 : i32
    %c0_i32_0 = arith.constant 0 : i32
    return %arg0, %c0_i32 : i32, i32
  }
  func.func @transform_4(%arg0: i32) -> (i32, i32, i32) {
    %c0_i32 = arith.constant 0 : i32
    %c0_i32_0 = arith.constant 0 : i32
    %c0_i32_1 = arith.constant 0 : i32
    %c0_i32_2 = arith.constant 0 : i32
    return %c0_i32, %c0_i32_0, %c0_i32_1 : i32, i32, i32
  }
  func.func @transform_5(%arg0: i32) -> (i32, i32) {
    %c0_i32 = arith.constant 0 : i32
    %c0_i32_0 = arith.constant 0 : i32
    %c0_i32_1 = arith.constant 0 : i32
    return %c0_i32, %c0_i32_0 : i32, i32
  }
  func.func @transform_6(%arg0: i32) -> (i32, i32, i32) {
    %c0_i32 = arith.constant 0 : i32
    %c0_i32_0 = arith.constant 0 : i32
    %c0_i32_1 = arith.constant 0 : i32
    return %c0_i32, %arg0, %c0_i32_0 : i32, i32, i32
  }
}

module attributes {stable_mosaic.version = 11 : i64} {
  func.func @_tconv_matmul_kernel(%arg0: i32, %arg1: memref<128x8xbf16, #tpu.memory_space<vmem>>, %arg2: memref<128x8xbf16, #tpu.memory_space<vmem>>, %arg3: memref<128x8xbf16, #tpu.memory_space<vmem>>, %arg4: memref<128x8xbf16, #tpu.memory_space<vmem>>, %arg5: memref<9x8x8xbf16, #tpu.memory_space<vmem>>, %arg6: memref<1x8xf32, #tpu.memory_space<vmem>>, %arg7: memref<4x128x8xf32, #tpu.memory_space<vmem>>) attributes {dimension_semantics = [#tpu.dimension_semantics<parallel>], iteration_bounds = array<i64: 1>, scalar_prefetch = 0 : i64, scratch_operands = 0 : i64, tpu.core_type = #tpu.core_type<tc>, window_params = [{transform_indices = @transform_0, window_bounds = array<i64: 128, 8>}, {transform_indices = @transform_1, window_bounds = array<i64: 128, 8>}, {transform_indices = @transform_2, window_bounds = array<i64: 128, 8>}, {transform_indices = @transform_3, window_bounds = array<i64: 128, 8>}, {pipeline_mode = #tpu.pipeline_mode<synchronous>, transform_indices = @transform_4, window_bounds = array<i64: 9, 8, 8>}, {pipeline_mode = #tpu.pipeline_mode<synchronous>, transform_indices = @transform_5, window_bounds = array<i64: 1, 8>}, {transform_indices = @transform_6, window_bounds = array<i64: 4, 128, 8>}]} {
    %c0 = arith.constant 0 : index
    %c0_0 = arith.constant 0 : index
    %c0_1 = arith.constant 0 : index
    %0 = vector.load %arg5[%c0, %c0_0, %c0_1] : memref<9x8x8xbf16, #tpu.memory_space<vmem>>, vector<9x8x8xbf16>
    %c0_2 = arith.constant 0 : index
    %c0_3 = arith.constant 0 : index
    %1 = vector.load %arg6[%c0_2, %c0_3] : memref<1x8xf32, #tpu.memory_space<vmem>>, vector<1x8xf32>
    %c0_4 = arith.constant 0 : index
    %c0_5 = arith.constant 0 : index
    %2 = vector.load %arg1[%c0_4, %c0_5] : memref<128x8xbf16, #tpu.memory_space<vmem>>, vector<128x8xbf16>
    %c0_6 = arith.constant 0 : index
    %c0_7 = arith.constant 0 : index
    %3 = vector.load %arg2[%c0_6, %c0_7] : memref<128x8xbf16, #tpu.memory_space<vmem>>, vector<128x8xbf16>
    %c0_8 = arith.constant 0 : index
    %c0_9 = arith.constant 0 : index
    %4 = vector.load %arg3[%c0_8, %c0_9] : memref<128x8xbf16, #tpu.memory_space<vmem>>, vector<128x8xbf16>
    %c0_10 = arith.constant 0 : index
    %c0_11 = arith.constant 0 : index
    %5 = vector.load %arg4[%c0_10, %c0_11] : memref<128x8xbf16, #tpu.memory_space<vmem>>, vector<128x8xbf16>
    %6 = vector.extract_strided_slice %0 {offsets = [4, 0, 0], sizes = [1, 8, 8], strides = [1, 1, 1]} : vector<9x8x8xbf16> to vector<1x8x8xbf16>
    %7 = vector.shape_cast %6 : vector<1x8x8xbf16> to vector<8x8xbf16>
    %cst = arith.constant dense<0.000000e+00> : vector<128x8xf32>
    %8 = tpu.matmul %2, %7, %cst {dimension_numbers = #tpu.dot_dimension_numbers<[1], [0], [0], [1], [0, 0, 1, 1], [], []>} : vector<128x8xbf16>, vector<8x8xbf16>, vector<128x8xf32> -> vector<128x8xf32>
    %9 = vector.broadcast %1 : vector<1x8xf32> to vector<128x8xf32>
    %10 = arith.addf %8, %9 : vector<128x8xf32>
    %c0_12 = arith.constant 0 : index
    %c0_13 = arith.constant 0 : index
    %c0_14 = arith.constant 0 : index
    %11 = vector.load %arg7[%c0_12, %c0_13, %c0_14] : memref<4x128x8xf32, #tpu.memory_space<vmem>>, vector<1x128x8xf32>
    %12 = vector.shape_cast %11 : vector<1x128x8xf32> to vector<128x8xf32>
    %13 = vector.shape_cast %10 : vector<128x8xf32> to vector<1x128x8xf32>
    tpu.vector_store %arg7[%c0_12, %c0_13, %c0_14], %13 {strides = array<i32>} : memref<4x128x8xf32, #tpu.memory_space<vmem>>, vector<1x128x8xf32>,
    %14 = vector.extract_strided_slice %0 {offsets = [5, 0, 0], sizes = [1, 8, 8], strides = [1, 1, 1]} : vector<9x8x8xbf16> to vector<1x8x8xbf16>
    %15 = vector.shape_cast %14 : vector<1x8x8xbf16> to vector<8x8xbf16>
    %cst_15 = arith.constant dense<0.000000e+00> : vector<128x8xf32>
    %16 = tpu.matmul %2, %15, %cst_15 {dimension_numbers = #tpu.dot_dimension_numbers<[1], [0], [0], [1], [0, 0, 1, 1], [], []>} : vector<128x8xbf16>, vector<8x8xbf16>, vector<128x8xf32> -> vector<128x8xf32>
    %17 = vector.extract_strided_slice %0 {offsets = [3, 0, 0], sizes = [1, 8, 8], strides = [1, 1, 1]} : vector<9x8x8xbf16> to vector<1x8x8xbf16>
    %18 = vector.shape_cast %17 : vector<1x8x8xbf16> to vector<8x8xbf16>
    %cst_16 = arith.constant dense<0.000000e+00> : vector<128x8xf32>
    %19 = tpu.matmul %3, %18, %cst_16 {dimension_numbers = #tpu.dot_dimension_numbers<[1], [0], [0], [1], [0, 0, 1, 1], [], []>} : vector<128x8xbf16>, vector<8x8xbf16>, vector<128x8xf32> -> vector<128x8xf32>
    %20 = arith.addf %16, %19 : vector<128x8xf32>
    %21 = vector.broadcast %1 : vector<1x8xf32> to vector<128x8xf32>
    %22 = arith.addf %20, %21 : vector<128x8xf32>
    %c1 = arith.constant 1 : index
    %c0_17 = arith.constant 0 : index
    %c0_18 = arith.constant 0 : index
    %23 = vector.load %arg7[%c1, %c0_17, %c0_18] : memref<4x128x8xf32, #tpu.memory_space<vmem>>, vector<1x128x8xf32>
    %24 = vector.shape_cast %23 : vector<1x128x8xf32> to vector<128x8xf32>
    %25 = vector.shape_cast %22 : vector<128x8xf32> to vector<1x128x8xf32>
    tpu.vector_store %arg7[%c1, %c0_17, %c0_18], %25 {strides = array<i32>} : memref<4x128x8xf32, #tpu.memory_space<vmem>>, vector<1x128x8xf32>,
    %26 = vector.extract_strided_slice %0 {offsets = [7, 0, 0], sizes = [1, 8, 8], strides = [1, 1, 1]} : vector<9x8x8xbf16> to vector<1x8x8xbf16>
    %27 = vector.shape_cast %26 : vector<1x8x8xbf16> to vector<8x8xbf16>
    %cst_19 = arith.constant dense<0.000000e+00> : vector<128x8xf32>
    %28 = tpu.matmul %2, %27, %cst_19 {dimension_numbers = #tpu.dot_dimension_numbers<[1], [0], [0], [1], [0, 0, 1, 1], [], []>} : vector<128x8xbf16>, vector<8x8xbf16>, vector<128x8xf32> -> vector<128x8xf32>
    %29 = vector.extract_strided_slice %0 {offsets = [1, 0, 0], sizes = [1, 8, 8], strides = [1, 1, 1]} : vector<9x8x8xbf16> to vector<1x8x8xbf16>
    %30 = vector.shape_cast %29 : vector<1x8x8xbf16> to vector<8x8xbf16>
    %cst_20 = arith.constant dense<0.000000e+00> : vector<128x8xf32>
    %31 = tpu.matmul %4, %30, %cst_20 {dimension_numbers = #tpu.dot_dimension_numbers<[1], [0], [0], [1], [0, 0, 1, 1], [], []>} : vector<128x8xbf16>, vector<8x8xbf16>, vector<128x8xf32> -> vector<128x8xf32>
    %32 = arith.addf %28, %31 : vector<128x8xf32>
    %33 = vector.broadcast %1 : vector<1x8xf32> to vector<128x8xf32>
    %34 = arith.addf %32, %33 : vector<128x8xf32>
    %c2 = arith.constant 2 : index
    %c0_21 = arith.constant 0 : index
    %c0_22 = arith.constant 0 : index
    %35 = vector.load %arg7[%c2, %c0_21, %c0_22] : memref<4x128x8xf32, #tpu.memory_space<vmem>>, vector<1x128x8xf32>
    %36 = vector.shape_cast %35 : vector<1x128x8xf32> to vector<128x8xf32>
    %37 = vector.shape_cast %34 : vector<128x8xf32> to vector<1x128x8xf32>
    tpu.vector_store %arg7[%c2, %c0_21, %c0_22], %37 {strides = array<i32>} : memref<4x128x8xf32, #tpu.memory_space<vmem>>, vector<1x128x8xf32>,
    %38 = vector.extract_strided_slice %0 {offsets = [8, 0, 0], sizes = [1, 8, 8], strides = [1, 1, 1]} : vector<9x8x8xbf16> to vector<1x8x8xbf16>
    %39 = vector.shape_cast %38 : vector<1x8x8xbf16> to vector<8x8xbf16>
    %cst_23 = arith.constant dense<0.000000e+00> : vector<128x8xf32>
    %40 = tpu.matmul %2, %39, %cst_23 {dimension_numbers = #tpu.dot_dimension_numbers<[1], [0], [0], [1], [0, 0, 1, 1], [], []>} : vector<128x8xbf16>, vector<8x8xbf16>, vector<128x8xf32> -> vector<128x8xf32>
    %41 = vector.extract_strided_slice %0 {offsets = [6, 0, 0], sizes = [1, 8, 8], strides = [1, 1, 1]} : vector<9x8x8xbf16> to vector<1x8x8xbf16>
    %42 = vector.shape_cast %41 : vector<1x8x8xbf16> to vector<8x8xbf16>
    %cst_24 = arith.constant dense<0.000000e+00> : vector<128x8xf32>
    %43 = tpu.matmul %3, %42, %cst_24 {dimension_numbers = #tpu.dot_dimension_numbers<[1], [0], [0], [1], [0, 0, 1, 1], [], []>} : vector<128x8xbf16>, vector<8x8xbf16>, vector<128x8xf32> -> vector<128x8xf32>
    %44 = arith.addf %40, %43 : vector<128x8xf32>
    %45 = vector.extract_strided_slice %0 {offsets = [2, 0, 0], sizes = [1, 8, 8], strides = [1, 1, 1]} : vector<9x8x8xbf16> to vector<1x8x8xbf16>
    %46 = vector.shape_cast %45 : vector<1x8x8xbf16> to vector<8x8xbf16>
    %cst_25 = arith.constant dense<0.000000e+00> : vector<128x8xf32>
    %47 = tpu.matmul %4, %46, %cst_25 {dimension_numbers = #tpu.dot_dimension_numbers<[1], [0], [0], [1], [0, 0, 1, 1], [], []>} : vector<128x8xbf16>, vector<8x8xbf16>, vector<128x8xf32> -> vector<128x8xf32>
    %48 = arith.addf %44, %47 : vector<128x8xf32>
    %49 = vector.extract_strided_slice %0 {offsets = [0, 0, 0], sizes = [1, 8, 8], strides = [1, 1, 1]} : vector<9x8x8xbf16> to vector<1x8x8xbf16>
    %50 = vector.shape_cast %49 : vector<1x8x8xbf16> to vector<8x8xbf16>
    %cst_26 = arith.constant dense<0.000000e+00> : vector<128x8xf32>
    %51 = tpu.matmul %5, %50, %cst_26 {dimension_numbers = #tpu.dot_dimension_numbers<[1], [0], [0], [1], [0, 0, 1, 1], [], []>} : vector<128x8xbf16>, vector<8x8xbf16>, vector<128x8xf32> -> vector<128x8xf32>
    %52 = arith.addf %48, %51 : vector<128x8xf32>
    %53 = vector.broadcast %1 : vector<1x8xf32> to vector<128x8xf32>
    %54 = arith.addf %52, %53 : vector<128x8xf32>
    %c3 = arith.constant 3 : index
    %c0_27 = arith.constant 0 : index
    %c0_28 = arith.constant 0 : index
    %55 = vector.load %arg7[%c3, %c0_27, %c0_28] : memref<4x128x8xf32, #tpu.memory_space<vmem>>, vector<1x128x8xf32>
    %56 = vector.shape_cast %55 : vector<1x128x8xf32> to vector<128x8xf32>
    %57 = vector.shape_cast %54 : vector<128x8xf32> to vector<1x128x8xf32>
    tpu.vector_store %arg7[%c3, %c0_27, %c0_28], %57 {strides = array<i32>} : memref<4x128x8xf32, #tpu.memory_space<vmem>>, vector<1x128x8xf32>,
    return
  }
  func.func @transform_0(%arg0: i32) -> (i32, i32) {
    %c0_i32 = arith.constant 0 : i32
    %c0_i32_0 = arith.constant 0 : i32
    return %arg0, %c0_i32 : i32, i32
  }
  func.func @transform_1(%arg0: i32) -> (i32, i32) {
    %c0_i32 = arith.constant 0 : i32
    %c0_i32_0 = arith.constant 0 : i32
    return %arg0, %c0_i32 : i32, i32
  }
  func.func @transform_2(%arg0: i32) -> (i32, i32) {
    %c0_i32 = arith.constant 0 : i32
    %c0_i32_0 = arith.constant 0 : i32
    return %arg0, %c0_i32 : i32, i32
  }
  func.func @transform_3(%arg0: i32) -> (i32, i32) {
    %c0_i32 = arith.constant 0 : i32
    %c0_i32_0 = arith.constant 0 : i32
    return %arg0, %c0_i32 : i32, i32
  }
  func.func @transform_4(%arg0: i32) -> (i32, i32, i32) {
    %c0_i32 = arith.constant 0 : i32
    %c0_i32_0 = arith.constant 0 : i32
    %c0_i32_1 = arith.constant 0 : i32
    %c0_i32_2 = arith.constant 0 : i32
    return %c0_i32, %c0_i32_0, %c0_i32_1 : i32, i32, i32
  }
  func.func @transform_5(%arg0: i32) -> (i32, i32) {
    %c0_i32 = arith.constant 0 : i32
    %c0_i32_0 = arith.constant 0 : i32
    %c0_i32_1 = arith.constant 0 : i32
    return %c0_i32, %c0_i32_0 : i32, i32
  }
  func.func @transform_6(%arg0: i32) -> (i32, i32, i32) {
    %c0_i32 = arith.constant 0 : i32
    %c0_i32_0 = arith.constant 0 : i32
    %c0_i32_1 = arith.constant 0 : i32
    return %c0_i32, %arg0, %c0_i32_0 : i32, i32, i32
  }
}

module attributes {stable_mosaic.version = 11 : i64} {
  func.func @_bn_stats_kernel(%arg0: i32, %arg1: memref<512x8xf32, #tpu.memory_space<vmem>>, %arg2: memref<2x8xf32, #tpu.memory_space<vmem>>) attributes {dimension_semantics = [#tpu.dimension_semantics<arbitrary>], iteration_bounds = array<i64: 1>, scalar_prefetch = 0 : i64, scratch_operands = 0 : i64, tpu.core_type = #tpu.core_type<tc>, window_params = [{transform_indices = @transform_0, window_bounds = array<i64: 512, 8>}, {pipeline_mode = #tpu.pipeline_mode<synchronous>, transform_indices = @transform_1, window_bounds = array<i64: 2, 8>}]} {
    %c0_i32 = arith.constant 0 : i32
    %0 = arith.cmpi eq, %arg0, %c0_i32 : i32
    %1 = arith.extui %0 : i1 to i32
    %c0_i32_0 = arith.constant 0 : i32
    %2 = arith.cmpi ne, %1, %c0_i32_0 : i32
    scf.if %2 {
      %cst_9 = arith.constant 0.000000e+00 : f32
      %16 = vector.broadcast %cst_9 : f32 to vector<2x8xf32>
      %c0_10 = arith.constant 0 : index
      %c0_11 = arith.constant 0 : index
      %17 = vector.load %arg2[%c0_10, %c0_11] : memref<2x8xf32, #tpu.memory_space<vmem>>, vector<2x8xf32>
      tpu.vector_store %arg2[%c0_10, %c0_11], %16 {strides = array<i32>} : memref<2x8xf32, #tpu.memory_space<vmem>>, vector<2x8xf32>,
    } else {
    }
    %c0 = arith.constant 0 : index
    %c0_1 = arith.constant 0 : index
    %3 = vector.load %arg1[%c0, %c0_1] : memref<512x8xf32, #tpu.memory_space<vmem>>, vector<512x8xf32>
    %cst = arith.constant dense<0.000000e+00> : vector<8xf32>
    %4 = vector.multi_reduction <add>, %3, %cst [0] : vector<512x8xf32> to vector<8xf32>
    %5 = vector.shape_cast %4 : vector<8xf32> to vector<1x8xf32>
    %6 = arith.mulf %3, %3 : vector<512x8xf32>
    %cst_2 = arith.constant dense<0.000000e+00> : vector<8xf32>
    %7 = vector.multi_reduction <add>, %6, %cst_2 [0] : vector<512x8xf32> to vector<8xf32>
    %8 = vector.shape_cast %7 : vector<8xf32> to vector<1x8xf32>
    %9 = tpu.concatenate %5, %8 in 0 : vector<1x8xf32>, vector<1x8xf32> -> vector<2x8xf32>
    %c0_3 = arith.constant 0 : index
    %c0_4 = arith.constant 0 : index
    %10 = vector.load %arg2[%c0_3, %c0_4] : memref<2x8xf32, #tpu.memory_space<vmem>>, vector<2x8xf32>
    %11 = arith.addf %10, %9 : vector<2x8xf32>
    %c0_5 = arith.constant 0 : index
    %c0_6 = arith.constant 0 : index
    %12 = vector.load %arg2[%c0_5, %c0_6] : memref<2x8xf32, #tpu.memory_space<vmem>>, vector<2x8xf32>
    tpu.vector_store %arg2[%c0_5, %c0_6], %11 {strides = array<i32>} : memref<2x8xf32, #tpu.memory_space<vmem>>, vector<2x8xf32>,
    %c0_i32_7 = arith.constant 0 : i32
    %13 = arith.cmpi eq, %arg0, %c0_i32_7 : i32
    %14 = arith.extui %13 : i1 to i32
    %c0_i32_8 = arith.constant 0 : i32
    %15 = arith.cmpi ne, %14, %c0_i32_8 : i32
    scf.if %15 {
      %c0_9 = arith.constant 0 : index
      %c0_10 = arith.constant 0 : index
      %16 = vector.load %arg2[%c0_9, %c0_10] : memref<2x8xf32, #tpu.memory_space<vmem>>, vector<2x8xf32>
      %17 = vector.extract_strided_slice %16 {offsets = [0, 0], sizes = [1, 8], strides = [1, 1]} : vector<2x8xf32> to vector<1x8xf32>
      %cst_11 = arith.constant 5.120000e+02 : f32
      %18 = vector.broadcast %cst_11 : f32 to vector<1x8xf32>
      %19 = arith.divf %17, %18 : vector<1x8xf32>
      %20 = vector.extract_strided_slice %16 {offsets = [1, 0], sizes = [1, 8], strides = [1, 1]} : vector<2x8xf32> to vector<1x8xf32>
      %cst_12 = arith.constant 5.120000e+02 : f32
      %21 = vector.broadcast %cst_12 : f32 to vector<1x8xf32>
      %22 = arith.divf %20, %21 : vector<1x8xf32>
      %23 = arith.mulf %19, %19 : vector<1x8xf32>
      %24 = arith.subf %22, %23 : vector<1x8xf32>
      %25 = tpu.concatenate %19, %24 in 0 : vector<1x8xf32>, vector<1x8xf32> -> vector<2x8xf32>
      %c0_13 = arith.constant 0 : index
      %c0_14 = arith.constant 0 : index
      %26 = vector.load %arg2[%c0_13, %c0_14] : memref<2x8xf32, #tpu.memory_space<vmem>>, vector<2x8xf32>
      tpu.vector_store %arg2[%c0_13, %c0_14], %25 {strides = array<i32>} : memref<2x8xf32, #tpu.memory_space<vmem>>, vector<2x8xf32>,
    } else {
    }
    return
  }
  func.func @transform_0(%arg0: i32) -> (i32, i32) {
    %c0_i32 = arith.constant 0 : i32
    %c0_i32_0 = arith.constant 0 : i32
    return %arg0, %c0_i32 : i32, i32
  }
  func.func @transform_1(%arg0: i32) -> (i32, i32) {
    %c0_i32 = arith.constant 0 : i32
    %c0_i32_0 = arith.constant 0 : i32
    %c0_i32_1 = arith.constant 0 : i32
    return %c0_i32, %c0_i32_0 : i32, i32
  }
}

module attributes {stable_mosaic.version = 11 : i64} {
  func.func @_bn_lrelu_kernel(%arg0: i32, %arg1: memref<512x8xf32, #tpu.memory_space<vmem>>, %arg2: memref<2x8xf32, #tpu.memory_space<vmem>>, %arg3: memref<1x8xf32, #tpu.memory_space<vmem>>, %arg4: memref<1x8xf32, #tpu.memory_space<vmem>>, %arg5: memref<512x8xf32, #tpu.memory_space<vmem>>) attributes {dimension_semantics = [#tpu.dimension_semantics<parallel>], iteration_bounds = array<i64: 1>, scalar_prefetch = 0 : i64, scratch_operands = 0 : i64, tpu.core_type = #tpu.core_type<tc>, window_params = [{transform_indices = @transform_0, window_bounds = array<i64: 512, 8>}, {pipeline_mode = #tpu.pipeline_mode<synchronous>, transform_indices = @transform_1, window_bounds = array<i64: 2, 8>}, {pipeline_mode = #tpu.pipeline_mode<synchronous>, transform_indices = @transform_2, window_bounds = array<i64: 1, 8>}, {pipeline_mode = #tpu.pipeline_mode<synchronous>, transform_indices = @transform_3, window_bounds = array<i64: 1, 8>}, {transform_indices = @transform_4, window_bounds = array<i64: 512, 8>}]} {
    %c0 = arith.constant 0 : index
    %c0_0 = arith.constant 0 : index
    %0 = vector.load %arg1[%c0, %c0_0] : memref<512x8xf32, #tpu.memory_space<vmem>>, vector<512x8xf32>
    %c0_1 = arith.constant 0 : index
    %c0_2 = arith.constant 0 : index
    %1 = vector.load %arg2[%c0_1, %c0_2] : memref<2x8xf32, #tpu.memory_space<vmem>>, vector<2x8xf32>
    %2 = vector.extract_strided_slice %1 {offsets = [0, 0], sizes = [1, 8], strides = [1, 1]} : vector<2x8xf32> to vector<1x8xf32>
    %3 = vector.extract_strided_slice %1 {offsets = [1, 0], sizes = [1, 8], strides = [1, 1]} : vector<2x8xf32> to vector<1x8xf32>
    %4 = vector.broadcast %2 : vector<1x8xf32> to vector<512x8xf32>
    %5 = arith.subf %0, %4 : vector<512x8xf32>
    %cst = arith.constant 9.99999974E-6 : f32
    %6 = vector.broadcast %cst : f32 to vector<1x8xf32>
    %7 = arith.addf %3, %6 : vector<1x8xf32>
    %8 = math.rsqrt %7 : vector<1x8xf32>
    %9 = vector.broadcast %8 : vector<1x8xf32> to vector<512x8xf32>
    %10 = arith.mulf %5, %9 : vector<512x8xf32>
    %c0_3 = arith.constant 0 : index
    %c0_4 = arith.constant 0 : index
    %11 = vector.load %arg3[%c0_3, %c0_4] : memref<1x8xf32, #tpu.memory_space<vmem>>, vector<1x8xf32>
    %12 = vector.broadcast %11 : vector<1x8xf32> to vector<512x8xf32>
    %13 = arith.mulf %10, %12 : vector<512x8xf32>
    %c0_5 = arith.constant 0 : index
    %c0_6 = arith.constant 0 : index
    %14 = vector.load %arg4[%c0_5, %c0_6] : memref<1x8xf32, #tpu.memory_space<vmem>>, vector<1x8xf32>
    %15 = vector.broadcast %14 : vector<1x8xf32> to vector<512x8xf32>
    %16 = arith.addf %13, %15 : vector<512x8xf32>
    %cst_7 = arith.constant 0.000000e+00 : f32
    %17 = vector.broadcast %cst_7 : f32 to vector<512x8xf32>
    %18 = arith.cmpf oge, %16, %17 : vector<512x8xf32>
    %cst_8 = arith.constant 0.00999999977 : f32
    %19 = vector.broadcast %cst_8 : f32 to vector<512x8xf32>
    %20 = arith.mulf %19, %16 : vector<512x8xf32>
    %21 = arith.select %18, %16, %20 : vector<512x8xi1>, vector<512x8xf32>
    %c0_9 = arith.constant 0 : index
    %c0_10 = arith.constant 0 : index
    %22 = vector.load %arg5[%c0_9, %c0_10] : memref<512x8xf32, #tpu.memory_space<vmem>>, vector<512x8xf32>
    tpu.vector_store %arg5[%c0_9, %c0_10], %21 {strides = array<i32>} : memref<512x8xf32, #tpu.memory_space<vmem>>, vector<512x8xf32>,
    return
  }
  func.func @transform_0(%arg0: i32) -> (i32, i32) {
    %c0_i32 = arith.constant 0 : i32
    %c0_i32_0 = arith.constant 0 : i32
    return %arg0, %c0_i32 : i32, i32
  }
  func.func @transform_1(%arg0: i32) -> (i32, i32) {
    %c0_i32 = arith.constant 0 : i32
    %c0_i32_0 = arith.constant 0 : i32
    %c0_i32_1 = arith.constant 0 : i32
    return %c0_i32, %c0_i32_0 : i32, i32
  }
  func.func @transform_2(%arg0: i32) -> (i32, i32) {
    %c0_i32 = arith.constant 0 : i32
    %c0_i32_0 = arith.constant 0 : i32
    %c0_i32_1 = arith.constant 0 : i32
    return %c0_i32, %c0_i32_0 : i32, i32
  }
  func.func @transform_3(%arg0: i32) -> (i32, i32) {
    %c0_i32 = arith.constant 0 : i32
    %c0_i32_0 = arith.constant 0 : i32
    %c0_i32_1 = arith.constant 0 : i32
    return %c0_i32, %c0_i32_0 : i32, i32
  }
  func.func @transform_4(%arg0: i32) -> (i32, i32) {
    %c0_i32 = arith.constant 0 : i32
    %c0_i32_0 = arith.constant 0 : i32
    return %arg0, %c0_i32 : i32, i32
  }
}

module attributes {stable_mosaic.version = 11 : i64} {
  func.func @_matmul_bias_tanh_kernel(%arg0: i32, %arg1: memref<512x72xbf16, #tpu.memory_space<vmem>>, %arg2: memref<72x128xbf16, #tpu.memory_space<vmem>>, %arg3: memref<1x128xf32, #tpu.memory_space<vmem>>, %arg4: memref<512x128xf32, #tpu.memory_space<vmem>>) attributes {dimension_semantics = [#tpu.dimension_semantics<parallel>], iteration_bounds = array<i64: 1>, scalar_prefetch = 0 : i64, scratch_operands = 0 : i64, tpu.core_type = #tpu.core_type<tc>, window_params = [{transform_indices = @transform_0, window_bounds = array<i64: 512, 72>}, {pipeline_mode = #tpu.pipeline_mode<synchronous>, transform_indices = @transform_1, window_bounds = array<i64: 72, 128>}, {pipeline_mode = #tpu.pipeline_mode<synchronous>, transform_indices = @transform_2, window_bounds = array<i64: 1, 128>}, {transform_indices = @transform_3, window_bounds = array<i64: 512, 128>}]} {
    %c0 = arith.constant 0 : index
    %c0_0 = arith.constant 0 : index
    %0 = vector.load %arg1[%c0, %c0_0] : memref<512x72xbf16, #tpu.memory_space<vmem>>, vector<512x72xbf16>
    %c0_1 = arith.constant 0 : index
    %c0_2 = arith.constant 0 : index
    %1 = vector.load %arg2[%c0_1, %c0_2] : memref<72x128xbf16, #tpu.memory_space<vmem>>, vector<72x128xbf16>
    %cst = arith.constant dense<0.000000e+00> : vector<512x128xf32>
    %2 = tpu.matmul %0, %1, %cst {dimension_numbers = #tpu.dot_dimension_numbers<[1], [0], [0], [1], [0, 0, 1, 1], [], []>} : vector<512x72xbf16>, vector<72x128xbf16>, vector<512x128xf32> -> vector<512x128xf32>
    %c0_3 = arith.constant 0 : index
    %c0_4 = arith.constant 0 : index
    %3 = vector.load %arg3[%c0_3, %c0_4] : memref<1x128xf32, #tpu.memory_space<vmem>>, vector<1x128xf32>
    %4 = vector.broadcast %3 : vector<1x128xf32> to vector<512x128xf32>
    %5 = arith.addf %2, %4 : vector<512x128xf32>
    %6 = math.tanh %5 : vector<512x128xf32>
    %c0_5 = arith.constant 0 : index
    %c0_6 = arith.constant 0 : index
    %7 = vector.load %arg4[%c0_5, %c0_6] : memref<512x128xf32, #tpu.memory_space<vmem>>, vector<512x128xf32>
    tpu.vector_store %arg4[%c0_5, %c0_6], %6 {strides = array<i32>} : memref<512x128xf32, #tpu.memory_space<vmem>>, vector<512x128xf32>,
    return
  }
  func.func @transform_0(%arg0: i32) -> (i32, i32) {
    %c0_i32 = arith.constant 0 : i32
    %c0_i32_0 = arith.constant 0 : i32
    return %arg0, %c0_i32 : i32, i32
  }
  func.func @transform_1(%arg0: i32) -> (i32, i32) {
    %c0_i32 = arith.constant 0 : i32
    %c0_i32_0 = arith.constant 0 : i32
    %c0_i32_1 = arith.constant 0 : i32
    return %c0_i32, %c0_i32_0 : i32, i32
  }
  func.func @transform_2(%arg0: i32) -> (i32, i32) {
    %c0_i32 = arith.constant 0 : i32
    %c0_i32_0 = arith.constant 0 : i32
    %c0_i32_1 = arith.constant 0 : i32
    return %c0_i32, %c0_i32_0 : i32, i32
  }
  func.func @transform_3(%arg0: i32) -> (i32, i32) {
    %c0_i32 = arith.constant 0 : i32
    %c0_i32_0 = arith.constant 0 : i32
    return %arg0, %c0_i32 : i32, i32
  }
}

</mosaic_0001>

<bundles_post_ra>
// kernel: vae_forward.21
= control target key start
LH: loop header
LB: loop body
LE: loop exit
PB: predicated region body
PF: predicated region fallthrough
CT: control target
= control target key end

     0   :  { %vm12_vm0 = vcmask 58368   ;;  %vm30_vm1 = vcmask 64512   ;;  %v145_v0 = vmov 0.0   ;;  %vm121_vm2 = vcmask 1040384   ;;  %s254_s1 = inlined_call_operand.vmem [shape: f32[2,8], index: 1, kind: output, shape index: {}]   ;;  %s255_s0 = inlined_call_operand.vmem [shape: f32[128,8], index: 0, kind: input, shape index: {}]  }
   0x1   :  { %13 = vst.msk [vmem:[%s254_s1] sm:$0x3] %vm12_vm0, %v145_v0  ;;  %v14_v1 = vld [vmem:[%s255_s0] sm:$0xff]  ;;  %v15_v2 = vld [vmem:[%s255_s0 + $0x8] sm:$0xff]  ;;  %v16_v3 = vld [vmem:[%s255_s0 + $0x10] sm:$0xff] }
   0x2   :  { %v31_v4 = vsel %vm30_vm1, %v14_v1, 0.0  ;;  %v32_v5 = vsel %vm30_vm1, %v15_v2, 0.0  ;;  %v34_v6 = vsel %vm30_vm1, %v16_v3, 0.0  ;;  %v17_v7 = vld [vmem:[%s255_s0 + $0x18] sm:$0xff]  ;;  %v18_v10 = vld [vmem:[%s255_s0 + $0x20] sm:$0xff]  ;;  %v19_v13 = vld [vmem:[%s255_s0 + $0x28] sm:$0xff]  ;;  %v68_v15 = vmul.f32 %v14_v1, %v14_v1 }
   0x3   :  { %v33_v8 = vadd.f32 %v32_v5, %v31_v4  ;;  %v36_v9 = vsel %vm30_vm1, %v17_v7, 0.0  ;;  %v38_v12 = vsel %vm30_vm1, %v18_v10, 0.0  ;;  %v69_v16 = vmul.f32 %v15_v2, %v15_v2  ;;  %v20_v19 = vld [vmem:[%s255_s0 + $0x30] sm:$0xff]  ;;  %v21_v24 = vld [vmem:[%s255_s0 + $0x38] sm:$0xff]  ;;  %v22_v31 = vld [vmem:[%s255_s0 + $0x40] sm:$0xff] }
   0x4   :  { %v70_v17 = vmul.f32 %v16_v3, %v16_v3  ;;  %v40_v18 = vsel %vm30_vm1, %v19_v13, 0.0  ;;  %v71_v21 = vmul.f32 %v17_v7, %v17_v7  ;;  %v42_v22 = vsel %vm30_vm1, %v20_v19, 0.0  ;;  %v23_v37 = vld [vmem:[%s255_s0 + $0x48] sm:$0xff]  ;;  %v24_v43 = vld [vmem:[%s255_s0 + $0x50] sm:$0xff]  ;;  %v25_v49 = vld [vmem:[%s255_s0 + $0x58] sm:$0xff] }
   0x5   :  { %v35_v11 = vadd.f32 %v34_v6, %v33_v8  ;;  %v72_v23 = vmul.f32 %v18_v10, %v18_v10  ;;  %v84_v26 = vsel %vm30_vm1, %v68_v15, 0.0  ;;  %v85_v27 = vsel %vm30_vm1, %v69_v16, 0.0  ;;  %v26_v55 = vld [vmem:[%s255_s0 + $0x60] sm:$0xff]  ;;  %v27_v61 = vld [vmem:[%s255_s0 + $0x68] sm:$0xff]  ;;  %v28_v3 = vld [vmem:[%s255_s0 + $0x70] sm:$0xff] }
   0x6   :  { %v87_v28 = vsel %vm30_vm1, %v70_v17, 0.0  ;;  %v44_v29 = vsel %vm30_vm1, %v21_v24, 0.0  ;;  %v86_v30 = vadd.f32 %v85_v27, %v84_v26  ;;  %v73_v33 = vmul.f32 %v19_v13, %v19_v13 }
   0x7   :  { %v37_v14 = vadd.f32 %v36_v9, %v35_v11  ;;  %v89_v34 = vsel %vm30_vm1, %v71_v21, 0.0  ;;  %v46_v35 = vsel %vm30_vm1, %v22_v31, 0.0  ;;  %v74_v39 = vmul.f32 %v20_v19, %v20_v19  ;;  %v29_v9 = vld [vmem:[%s255_s0 + $0x78] sm:$0xff] }
   0x8   :  { %v88_v36 = vadd.f32 %v87_v28, %v86_v30  ;;  %v91_v40 = vsel %vm30_vm1, %v72_v23, 0.0  ;;  %v48_v41 = vsel %vm30_vm1, %v23_v37, 0.0  ;;  %v75_v45 = vmul.f32 %v21_v24, %v21_v24 }
   0x9   :  { %v39_v20 = vadd.f32 %v38_v12, %v37_v14  ;;  %v93_v46 = vsel %vm30_vm1, %v73_v33, 0.0  ;;  %v50_v47 = vsel %vm30_vm1, %v24_v43, 0.0  ;;  %v76_v51 = vmul.f32 %v22_v31, %v22_v31 }
   0xa   :  { %v90_v42 = vadd.f32 %v89_v34, %v88_v36  ;;  %v95_v52 = vsel %vm30_vm1, %v74_v39, 0.0  ;;  %v52_v53 = vsel %vm30_vm1, %v25_v49, 0.0  ;;  %v77_v57 = vmul.f32 %v23_v37, %v23_v37 }
   0xb   :  { %v41_v25 = vadd.f32 %v40_v18, %v39_v20  ;;  %v97_v58 = vsel %vm30_vm1, %v75_v45, 0.0  ;;  %v54_v59 = vsel %vm30_vm1, %v26_v55, 0.0  ;;  %v78_v63 = vmul.f32 %v24_v43, %v24_v43  ;;  %v123_v43 = vld [vmem:[%s254_s1] sm:$0x3] }
   0xc   :  { %v92_v48 = vadd.f32 %v91_v40, %v90_v42  ;;  %v99_v0 = vsel %vm30_vm1, %v76_v51, 0.0  ;;  %v56_v1 = vsel %vm30_vm1, %v27_v61, 0.0  ;;  %v79_v5 = vmul.f32 %v25_v49, %v25_v49 }
   0xd   :  { %v43_v32 = vadd.f32 %v42_v22, %v41_v25  ;;  %v101_v6 = vsel %vm30_vm1, %v77_v57, 0.0  ;;  %v58_v7 = vsel %vm30_vm1, %v28_v3, 0.0  ;;  %v80_v11 = vmul.f32 %v26_v55, %v26_v55 }
   0xe   :  { %v94_v54 = vadd.f32 %v93_v46, %v92_v48  ;;  %v103_v12 = vsel %vm30_vm1, %v78_v63, 0.0  ;;  %v60_v13 = vsel %vm30_vm1, %v29_v9, 0.0  ;;  %v81_v16 = vmul.f32 %v27_v61, %v27_v61 }
   0xf   :  { %v45_v38 = vadd.f32 %v44_v29, %v43_v32  ;;  %v105_v17 = vsel %vm30_vm1, %v79_v5, 0.0  ;;  %v82_v20 = vmul.f32 %v28_v3, %v28_v3  ;;  %v107_v21 = vsel %vm30_vm1, %v80_v11, 0.0 }
  0x10   :  { %v96_v60 = vadd.f32 %v95_v52, %v94_v54  ;;  %v83_v24 = vmul.f32 %v29_v9, %v29_v9  ;;  %v109_v25 = vsel %vm30_vm1, %v81_v16, 0.0 }
  0x11   :  { %v47_v44 = vadd.f32 %v46_v35, %v45_v38  ;;  %v111_v28 = vsel %vm30_vm1, %v82_v20, 0.0 }
  0x12   :  { %v98_v2 = vadd.f32 %v97_v58, %v96_v60  ;;  %v113_v30 = vsel %vm30_vm1, %v83_v24, 0.0 }
  0x13   :  { %v49_v50 = vadd.f32 %v48_v41, %v47_v44 }
  0x14   :  { %v100_v8 = vadd.f32 %v99_v0, %v98_v2 }
  0x15   :  { %v51_v56 = vadd.f32 %v50_v47, %v49_v50 }
  0x16   :  { %v102_v14 = vadd.f32 %v101_v6, %v100_v8 }
  0x17   :  { %v53_v62 = vadd.f32 %v52_v53, %v51_v56 }
  0x18   :  { %v104_v18 = vadd.f32 %v103_v12, %v102_v14 }
  0x19   :  { %v55_v4 = vadd.f32 %v54_v59, %v53_v62 }
  0x1a   :  { %v106_v22 = vadd.f32 %v105_v17, %v104_v18 }
  0x1b   :  { %v57_v10 = vadd.f32 %v56_v1, %v55_v4 }
  0x1c   :  { %v108_v26 = vadd.f32 %v107_v21, %v106_v22 }
  0x1d   :  { %v59_v15 = vadd.f32 %v58_v7, %v57_v10 }
  0x1e   :  { %v110_v29 = vadd.f32 %v109_v25, %v108_v26 }
  0x1f   :  { %v61_v19 = vadd.f32 %v60_v13, %v59_v15 }
  0x20   :  { %v112_v32 = vadd.f32 %v111_v28, %v110_v29 }
  0x21   :  { %v62_v23 = vrot.slane %v61_v19, 4 }
  0x22   :  { %v114_v33 = vadd.f32 %v113_v30, %v112_v32 }
  0x23   :  { %v63_v27 = vadd.f32 %v62_v23, %v61_v19 }
  0x24   :  { %v115_v35 = vrot.slane %v114_v33, 4 }
  0x25   :  { %v64_v31 = vrot.slane %v63_v27, 2 }
  0x26   :  { %v116_v36 = vadd.f32 %v115_v35, %v114_v33 }
  0x27   :  { %v65_v34 = vadd.f32 %v64_v31, %v63_v27 }
  0x28   :  { %v117_v38 = vrot.slane %v116_v36, 2 }
  0x29   :  { %v66_v37 = vrot.slane %v65_v34, 1 }
  0x2a   :  { %v118_v39 = vadd.f32 %v117_v38, %v116_v36 }
  0x2b   :  { %v67_v40 = vadd.f32 %v66_v37, %v65_v34 }
  0x2c   :  { %v119_v41 = vrot.slane %v118_v39, 1 }
  0x2e   :  { %v120_v42 = vadd.f32 %v119_v41, %v118_v39 }
  0x30   :  { %v122_v44 = vsel %vm121_vm2, %v67_v40, %v120_v42 }
  0x31   :  { %v124_v45 = vadd.f32 %v123_v43, %v122_v44 }
  0x33   :  { %126 = vst.msk [vmem:[%s254_s1] sm:$0x3] %vm12_vm0, %v124_v45 }
  0x3a   :  { %v130_v46 = vld [vmem:[%s254_s1] sm:$0x3] }
  0x3b   :  { %v132_v47 = vmul.f32 0.0078125, %v130_v46 }
  0x3d   :  { %v133_v48 = vmul.f32 %v132_v47, %v132_v47 }
  0x3f   :  { %v135_v49 = vrot.slane %v133_v48, 7 }
  0x41   :  { %v137_v50 = vsub.f32 %v132_v47, %v135_v49 }
  0x43   :  { %v138_v51 = vsel %vm121_vm2, %v132_v47, %v137_v50 }
  0x44   :  { %139 = vst.msk [vmem:[%s254_s1] sm:$0x3] %vm12_vm0, %v138_v51 }

// kernel: vae_forward.20
= control target key start
LH: loop header
LB: loop body
LE: loop exit
PB: predicated region body
PF: predicated region fallthrough
CT: control target
= control target key end

     0   :  { %8 = vsyncpa [#allocation3], 0  ;;  %s330_s12 = smov [#allocation2]   ;;  %s463_s0 = inlined_call_operand.vmem [shape: bf16[128,9], index: 0, kind: input, shape index: {}]   ;;  %s464_s1 = inlined_call_operand.vmem [shape: bf16[9,8], index: 1, kind: input, shape index: {}]   ;;  %s465_s2 = inlined_call_operand.hbm [shape: f32[1,8], index: 2, kind: input, shape index: {}]   ;;  %s466_s3 = inlined_call_operand.vmem [shape: f32[128,8], index: 3, kind: output, shape index: {}]  }
   0x1   :  { %s19_s13 = sshll.u32 %s330_s12, 4  ;;  %s306_s16 = scalar_lea.hbm %s465_s2, 16  ;;  %s20_s13 = int_to_ptr.vmem [resolvable:$true] %s19_s13 }
   0x2   :  { %p307_p0 = scmp.ne.s32.totalorder %s465_s2, %s306_s16  ;;  %p310_p1 = scmp.lt.u32.totalorder %s306_s16, %s465_s2 }
   0x4   :  { %p312_p2 = pnand %p310_p1, %p307_p0 }
   0x6   :  { %315 = shalt.err (!%p312_p2)
}
   0x7   :  { %s316_s21 = scalar_lea.vmem %s20_s13, 16  ;;  %s320_s22 = scalar_lea.vmem %s20_s13, 32 }
   0x8   :  { %p317_p3 = scmp.ne.s32.totalorder %s20_s13, %s316_s21  ;;  %p321_p4 = scmp.lt.s32.totalorder %s20_s13, %s20_s13 }
   0x9   :  { %p322_p5 = scmp.lt.s32.totalorder %s320_s22, %s316_s21 }
   0xb   :  { %p323_p6 = por %p322_p5, %p321_p4 }
   0xd   :  { %p324_p7 = pnand %p323_p6, %p317_p3 }
   0xf   :  { %327 = shalt.err (!%p324_p7)
}
  0x10   :  { %22 = dma.hbm_to_vmem [thread:$0]  %s465_s2, 16, %s20_s13, [#allocation3]  }
  0x11   :  { %328 = dma.done.wait [#allocation3], 16  }
  0x12   :  { %329 = vsyncadd [#allocation3], 4294967280  ;;  %vm122_vm0 = vcmask 1043456   ;;  %vm123_vm1 = vcmask 1044480   ;;  %v331_v0 = vmov 65535   ;;  %vm97_vm2 = vcmask 72704  }
  0x13   :  { %v124_v1 = vsel %vm122_vm0, 4294967295, %v331_v0  ;;  %v297_v3 = vld [vmem:[%s464_s1] sm:$0x1f]   ;;  %v300_v7 = vld [vmem:[%s463_s0 + $0x8] sm:$0xff]   ;;  %v302_v9 = vld [vmem:[%s463_s0 + $0x10] sm:$0xff]   ;;  %vm226_vm3 = vcmask 64512  }
  0x14   :  { %v125_v2 = vsel %vm123_vm1, %v124_v1, 0  ;;  %v298_v4 = vld [vmem:[%s463_s0] sm:$0xff]   ;;  %v301_v8 = vld [vmem:[%s463_s0 + $0x28] sm:$0xff]   ;;  %v303_v10 = vld [vmem:[%s463_s0 + $0x30] sm:$0xff]  }
  0x15   :  { %v127_v5 = vand.u32 %v297_v3, %v125_v2  ;;  %v299_v6 = vld [vmem:[%s463_s0 + $0x20] sm:$0xff]   ;;  %277 = vmatprep.mubr.msk.bf16.mxu0 %vm97_vm2, %v298_v4  ;;  %v304_v11 = vld [vmem:[%s463_s0 + $0x18] sm:$0xff]  }
  0x16   :  { %285 = vmatprep.mubr.msk.bf16.mxu1 %vm97_vm2, %v299_v6  ;;  %v305_v12 = vld [vmem:[%s463_s0 + $0x38] sm:$0xff]   ;;  %v248_v13 = vld [vmem:[#allocation2] ss:$0 sm:$0xff] }
  0x17   :  { %275 = vmatprep.subr.bf16.mxu0 %v127_v5  ;;  %293 = vmatprep.subr.bf16.mxu1 %v127_v5 }
  0x18   :  { %276 = vmatpush3.bf16.msra.mxu0 %v127_v5  ;;  %294 = vmatpush3.bf16.msra.mxu1 %v127_v5 }
  0x1b   :  { %278 = vmatmul.mubr.msk.bf16.vlgmr.msra.gmra.mrb[0].mxu0 %vm97_vm2, %v300_v7  ;;  %286 = vmatmul.mubr.msk.bf16.vlgmr.msra.gmra.mrb[0].mxu1 %vm97_vm2, %v301_v8 }
  0x1c   :  { %281 = vmatprep.mubr.msk.bf16.mxu0 %vm97_vm2, %v302_v9  ;;  %289 = vmatprep.mubr.msk.bf16.mxu1 %vm97_vm2, %v303_v10 }
  0x23   :  { %282 = vmatmul.mubr.msk.bf16.gmra.mrb[4].mxu0 %vm97_vm2, %v304_v11  ;;  %290 = vmatmul.mubr.msk.bf16.gmra.mrb[4].mxu1 %vm97_vm2, %v305_v12 }
  0xee   :  { %v279_v14 = vpop.f32.mrb[0].mxu0  ;;  %v287_v15 = vpop.f32.mrb[0].mxu1 }
  0xef   :  { %v172_v16 = vadd.f32 %v279_v14, %v248_v13  ;;  %v204_v17 = vadd.f32 %v287_v15, %v248_v13  ;;  %v163_v18 = vpop.f32.mrb[1].mxu0  ;;  %v195_v19 = vpop.f32.mrb[1].mxu1 }
  0xf0   :  { %v164_v20 = vadd.f32 %v248_v13, %v163_v18  ;;  %v196_v21 = vadd.f32 %v248_v13, %v195_v19  ;;  %v280_v22 = vpop.f32.mrb[2].mxu0  ;;  %v288_v23 = vpop.f32.mrb[2].mxu1 }
  0xf1   :  { %229 = vst.msk [vmem:[%s466_s3 + $0x10] sm:$0xff] %vm226_vm3, %v172_v16  ;;  %237 = vst.msk [vmem:[%s466_s3 + $0x50] sm:$0xff] %vm226_vm3, %v204_v17  ;;  %v175_v24 = vadd.f32 %v280_v22, %v248_v13  ;;  %v207_v25 = vadd.f32 %v288_v23, %v248_v13  ;;  %v166_v26 = vpop.f32.mrb[3].mxu0  ;;  %v198_v27 = vpop.f32.mrb[3].mxu1 }
  0xf2   :  { %227 = vst.msk [vmem:[%s466_s3] sm:$0xff] %vm226_vm3, %v164_v20  ;;  %235 = vst.msk [vmem:[%s466_s3 + $0x40] sm:$0xff] %vm226_vm3, %v196_v21  ;;  %v167_v28 = vadd.f32 %v248_v13, %v166_v26  ;;  %v199_v29 = vadd.f32 %v248_v13, %v198_v27 }
  0xf3   :  { %230 = vst.msk [vmem:[%s466_s3 + $0x18] sm:$0xff] %vm226_vm3, %v175_v24  ;;  %238 = vst.msk [vmem:[%s466_s3 + $0x58] sm:$0xff] %vm226_vm3, %v207_v25 }
  0xf4   :  { %228 = vst.msk [vmem:[%s466_s3 + $0x8] sm:$0xff] %vm226_vm3, %v167_v28  ;;  %236 = vst.msk [vmem:[%s466_s3 + $0x48] sm:$0xff] %vm226_vm3, %v199_v29 }
  0xf6   :  { %v283_v30 = vpop.f32.mrb[4].mxu0  ;;  %v291_v31 = vpop.f32.mrb[4].mxu1 }
  0xf7   :  { %v188_v32 = vadd.f32 %v283_v30, %v248_v13  ;;  %v220_v33 = vadd.f32 %v291_v31, %v248_v13  ;;  %v179_v34 = vpop.f32.mrb[5].mxu0  ;;  %v211_v35 = vpop.f32.mrb[5].mxu1 }
  0xf8   :  { %v180_v36 = vadd.f32 %v248_v13, %v179_v34  ;;  %v212_v37 = vadd.f32 %v248_v13, %v211_v35  ;;  %v284_v38 = vpop.f32.mrb[6].mxu0  ;;  %v292_v39 = vpop.f32.mrb[6].mxu1 }
  0xf9   :  { %233 = vst.msk [vmem:[%s466_s3 + $0x30] sm:$0xff] %vm226_vm3, %v188_v32  ;;  %241 = vst.msk [vmem:[%s466_s3 + $0x70] sm:$0xff] %vm226_vm3, %v220_v33  ;;  %v191_v40 = vadd.f32 %v284_v38, %v248_v13  ;;  %v223_v41 = vadd.f32 %v292_v39, %v248_v13  ;;  %v182_v42 = vpop.f32.mrb[7].mxu0  ;;  %v214_v43 = vpop.f32.mrb[7].mxu1 }
  0xfa   :  { %231 = vst.msk [vmem:[%s466_s3 + $0x20] sm:$0xff] %vm226_vm3, %v180_v36  ;;  %239 = vst.msk [vmem:[%s466_s3 + $0x60] sm:$0xff] %vm226_vm3, %v212_v37  ;;  %v183_v44 = vadd.f32 %v248_v13, %v182_v42  ;;  %v215_v45 = vadd.f32 %v248_v13, %v214_v43 }
  0xfb   :  { %234 = vst.msk [vmem:[%s466_s3 + $0x38] sm:$0xff] %vm226_vm3, %v191_v40  ;;  %242 = vst.msk [vmem:[%s466_s3 + $0x78] sm:$0xff] %vm226_vm3, %v223_v41 }
  0xfc   :  { %232 = vst.msk [vmem:[%s466_s3 + $0x28] sm:$0xff] %vm226_vm3, %v183_v44  ;;  %240 = vst.msk [vmem:[%s466_s3 + $0x68] sm:$0xff] %vm226_vm3, %v215_v45 }
  0xfd   :  { %247 = vsyncpa [#allocation3], 1 }

// kernel: vae_forward.22
= control target key start
LH: loop header
LB: loop body
LE: loop exit
PB: predicated region body
PF: predicated region fallthrough
CT: control target
= control target key end

     0   :  { %9 = vsyncpa [#allocation3], 0  ;;  %s551_s0 = inlined_call_operand.vmem [shape: f32[128,8], index: 0, kind: input, shape index: {}]   ;;  %s552_s1 = inlined_call_operand.vmem [shape: f32[2,8], index: 1, kind: input, shape index: {}]   ;;  %s553_s2 = inlined_call_operand.hbm [shape: f32[1,8], index: 2, kind: input, shape index: {}]   ;;  %s554_s3 = inlined_call_operand.hbm [shape: f32[1,8], index: 3, kind: input, shape index: {}]   ;;  %s555_s4 = inlined_call_operand.vmem [shape: f32[128,8], index: 4, kind: output, shape index: {}]  }
   0x1   :  { %10 = vsyncpa [#allocation5], 0  ;;  %s271_s15 = smov [#allocation2]   ;;  %s272_s17 = smov [#allocation4]  }
   0x2   :  { %s21_s16 = sshll.u32 %s271_s15, 4  ;;  %s31_s18 = sshll.u32 %s272_s17, 4  ;;  %s22_s16 = int_to_ptr.vmem [resolvable:$true] %s21_s16  ;;  %s32_s18 = int_to_ptr.vmem [resolvable:$true] %s31_s18 }
   0x3   :  { %s223_s21 = scalar_lea.hbm %s553_s2, 16 }
   0x4   :  { %p224_p0 = scmp.ne.s32.totalorder %s553_s2, %s223_s21  ;;  %p227_p1 = scmp.lt.u32.totalorder %s223_s21, %s553_s2 }
   0x6   :  { %p229_p2 = pnand %p227_p1, %p224_p0 }
   0x8   :  { %232 = shalt.err (!%p229_p2)
}
   0x9   :  { %s233_s26 = scalar_lea.vmem %s22_s16, 16  ;;  %s237_s27 = scalar_lea.vmem %s22_s16, 32 }
   0xa   :  { %p234_p3 = scmp.ne.s32.totalorder %s22_s16, %s233_s26  ;;  %p238_p4 = scmp.lt.s32.totalorder %s22_s16, %s22_s16 }
   0xb   :  { %p239_p5 = scmp.lt.s32.totalorder %s237_s27, %s233_s26 }
   0xd   :  { %p240_p6 = por %p239_p5, %p238_p4 }
   0xf   :  { %p241_p7 = pnand %p240_p6, %p234_p3 }
  0x11   :  { %244 = shalt.err (!%p241_p7)
}
  0x12   :  { %24 = dma.hbm_to_vmem [thread:$0]  %s553_s2, 16, %s22_s16, [#allocation3]  }
  0x13   :  { %s245_s6 = scalar_lea.hbm %s554_s3, 16 }
  0x14   :  { %p246_p8 = scmp.ne.s32.totalorder %s554_s3, %s245_s6  ;;  %p249_p9 = scmp.lt.u32.totalorder %s245_s6, %s554_s3 }
  0x16   :  { %p251_p10 = pnand %p249_p9, %p246_p8 }
  0x18   :  { %254 = shalt.err (!%p251_p10)
}
  0x19   :  { %s255_s11 = scalar_lea.vmem %s32_s18, 16  ;;  %s259_s12 = scalar_lea.vmem %s32_s18, 32 }
  0x1a   :  { %p256_p11 = scmp.ne.s32.totalorder %s32_s18, %s255_s11  ;;  %p260_p12 = scmp.lt.s32.totalorder %s32_s18, %s32_s18 }
  0x1b   :  { %p261_p13 = scmp.lt.s32.totalorder %s259_s12, %s255_s11 }
  0x1d   :  { %p262_p0 = por %p261_p13, %p260_p12 }
  0x1f   :  { %p263_p1 = pnand %p262_p0, %p256_p11 }
  0x21   :  { %266 = shalt.err (!%p263_p1)
}
  0x22   :  { %34 = dma.hbm_to_vmem [thread:$0]  %s554_s3, 16, %s32_s18, [#allocation5]  }
  0x23   :  { %267 = dma.done.wait [#allocation3], 16  }
  0x24   :  { %268 = vsyncadd [#allocation3], 4294967280 }
  0x25   :  { %269 = dma.done.wait [#allocation5], 16  }
  0x26   :  { %270 = vsyncadd [#allocation5], 4294967280  ;;  %v58_v0 = vlaneseq  ;;  %v57_v2 = vld [vmem:[%s552_s1] sm:$0x3]  ;;  %v42_v7 = vld [vmem:[%s551_s0 + $0x8] sm:$0xff]  ;;  %vm194_vm0 = vcmask 64512  }
  0x27   :  { %v78_v3 = vadd.f32 1e-05, %v57_v2  ;;  %v41_v5 = vld [vmem:[%s551_s0] sm:$0xff]  ;;  %v43_v8 = vld [vmem:[%s551_s0 + $0x10] sm:$0xff]  ;;  %v44_v9 = vld [vmem:[%s551_s0 + $0x18] sm:$0xff] }
  0x28   :  { %v59_v1 = vshrl.u32 %v58_v0, 7  ;;  %v45_v10 = vld [vmem:[%s551_s0 + $0x20] sm:$0xff]  ;;  %v46_v11 = vld [vmem:[%s551_s0 + $0x28] sm:$0xff]  ;;  %v47_v12 = vld [vmem:[%s551_s0 + $0x30] sm:$0xff] }
  0x29   :  { %221 = vrsqrt.f32 %v78_v3  ;;  %v48_v14 = vld [vmem:[%s551_s0 + $0x38] sm:$0xff]  ;;  %v354_v15 = vld [vmem:[%s551_s0 + $0x40] sm:$0xff]  ;;  %v359_v16 = vld [vmem:[%s551_s0 + $0x48] sm:$0xff] }
  0x2a   :  { %v60_v4 = vsub.s32 0, %v59_v1  ;;  %v82_v13 = vsub.s32 1, %v59_v1  ;;  %v365_v18 = vld [vmem:[%s551_s0 + $0x50] sm:$0xff]  ;;  %v370_v19 = vld [vmem:[%s551_s0 + $0x58] sm:$0xff]  ;;  %v375_v20 = vld [vmem:[%s551_s0 + $0x60] sm:$0xff] }
  0x2b   :  { %v384_v25 = vld [vmem:[%s551_s0 + $0x68] sm:$0xff]  ;;  %v389_v26 = vld [vmem:[%s551_s0 + $0x70] sm:$0xff]  ;;  %v394_v27 = vld [vmem:[%s551_s0 + $0x78] sm:$0xff] }
  0x2c   :  { %v328_v6 = vrot.slane %v57_v2, %v60_v4  ;;  %v409_v37 = vld [vmem:[#allocation2] ss:$0 sm:$0xff]  ;;  %v423_v46 = vld [vmem:[#allocation4] ss:$0 sm:$0xff] }
  0x2e   :  { %v62_v17 = vsub.f32 %v41_v5, %v328_v6  ;;  %v63_v21 = vsub.f32 %v42_v7, %v328_v6  ;;  %v64_v22 = vsub.f32 %v43_v8, %v328_v6  ;;  %v65_v23 = vsub.f32 %v44_v9, %v328_v6 }
  0x2f   :  { %v66_v24 = vsub.f32 %v45_v10, %v328_v6  ;;  %v67_v29 = vsub.f32 %v46_v11, %v328_v6  ;;  %v68_v30 = vsub.f32 %v47_v12, %v328_v6  ;;  %v69_v31 = vsub.f32 %v48_v14, %v328_v6 }
  0x30   :  { %v70_v32 = vsub.f32 %v354_v15, %v328_v6  ;;  %v71_v34 = vsub.f32 %v359_v16, %v328_v6  ;;  %v72_v35 = vsub.f32 %v365_v18, %v328_v6  ;;  %v73_v36 = vsub.f32 %v370_v19, %v328_v6 }
  0x31   :  { %v74_v38 = vsub.f32 %v375_v20, %v328_v6  ;;  %v75_v39 = vsub.f32 %v384_v25, %v328_v6  ;;  %v76_v40 = vsub.f32 %v389_v26, %v328_v6  ;;  %v77_v41 = vsub.f32 %v394_v27, %v328_v6 }
  0x33   :  { %v222_v28 = vpop.eup %221 }
  0x34   :  { %v401_v33 = vrot.slane %v222_v28, %v82_v13 }
  0x36   :  { %v84_v42 = vmul.f32 %v401_v33, %v62_v17  ;;  %v85_v43 = vmul.f32 %v401_v33, %v63_v21  ;;  %v86_v44 = vmul.f32 %v401_v33, %v64_v22  ;;  %v87_v45 = vmul.f32 %v401_v33, %v65_v23 }
  0x37   :  { %v88_v47 = vmul.f32 %v401_v33, %v66_v24  ;;  %v89_v48 = vmul.f32 %v401_v33, %v67_v29  ;;  %v90_v49 = vmul.f32 %v401_v33, %v68_v30  ;;  %v91_v50 = vmul.f32 %v401_v33, %v69_v31 }
  0x38   :  { %v107_v51 = vmul.f32 %v409_v37, %v84_v42  ;;  %v108_v52 = vmul.f32 %v409_v37, %v85_v43  ;;  %v109_v53 = vmul.f32 %v409_v37, %v86_v44  ;;  %v110_v54 = vmul.f32 %v409_v37, %v87_v45 }
  0x39   :  { %v111_v55 = vmul.f32 %v409_v37, %v88_v47  ;;  %v112_v56 = vmul.f32 %v409_v37, %v89_v48  ;;  %v113_v57 = vmul.f32 %v409_v37, %v90_v49  ;;  %v114_v58 = vmul.f32 %v409_v37, %v91_v50 }
  0x3a   :  { %v130_v59 = vadd.f32 %v423_v46, %v107_v51  ;;  %v131_v60 = vadd.f32 %v423_v46, %v108_v52  ;;  %v132_v61 = vadd.f32 %v423_v46, %v109_v53  ;;  %v133_v62 = vadd.f32 %v423_v46, %v110_v54 }
  0x3b   :  { %v134_v63 = vadd.f32 %v423_v46, %v111_v55  ;;  %v135_v0 = vadd.f32 %v423_v46, %v112_v56  ;;  %v136_v1 = vadd.f32 %v423_v46, %v113_v57  ;;  %v137_v2 = vadd.f32 %v423_v46, %v114_v58 }
  0x3c   :  { %vm146_vm1 = vcmp.ge.f32.partialorder %v130_v59, 0.0  ;;  %v162_v3 = vmul.f32 0.01, %v130_v59  ;;  %vm147_vm2 = vcmp.ge.f32.partialorder %v131_v60, 0.0  ;;  %v163_v4 = vmul.f32 0.01, %v131_v60 }
  0x3d   :  { %vm148_vm3 = vcmp.ge.f32.partialorder %v132_v61, 0.0  ;;  %v164_v5 = vmul.f32 0.01, %v132_v61  ;;  %vm149_vm4 = vcmp.ge.f32.partialorder %v133_v62, 0.0  ;;  %v165_v7 = vmul.f32 0.01, %v133_v62 }
  0x3e   :  { %v178_v8 = vsel %vm146_vm1, %v130_v59, %v162_v3  ;;  %v179_v9 = vsel %vm147_vm2, %v131_v60, %v163_v4  ;;  %vm150_vm5 = vcmp.ge.f32.partialorder %v134_v63, 0.0  ;;  %v166_v10 = vmul.f32 0.01, %v134_v63 }
  0x3f   :  { %195 = vst.msk [vmem:[%s555_s4] sm:$0xff] %vm194_vm0, %v178_v8  ;;  %196 = vst.msk [vmem:[%s555_s4 + $0x8] sm:$0xff] %vm194_vm0, %v179_v9  ;;  %v180_v11 = vsel %vm148_vm3, %v132_v61, %v164_v5  ;;  %v181_v12 = vsel %vm149_vm4, %v133_v62, %v165_v7  ;;  %vm151_vm6 = vcmp.ge.f32.partialorder %v135_v0, 0.0  ;;  %v167_v13 = vmul.f32 0.01, %v135_v0 }
  0x40   :  { %197 = vst.msk [vmem:[%s555_s4 + $0x10] sm:$0xff] %vm194_vm0, %v180_v11  ;;  %198 = vst.msk [vmem:[%s555_s4 + $0x18] sm:$0xff] %vm194_vm0, %v181_v12  ;;  %v182_v14 = vsel %vm150_vm5, %v134_v63, %v166_v10  ;;  %vm152_vm7 = vcmp.ge.f32.partialorder %v136_v1, 0.0  ;;  %v168_v16 = vmul.f32 0.01, %v136_v1  ;;  %vm153_vm8 = vcmp.ge.f32.partialorder %v137_v2, 0.0 }
  0x41   :  { %199 = vst.msk [vmem:[%s555_s4 + $0x20] sm:$0xff] %vm194_vm0, %v182_v14  ;;  %v183_v17 = vsel %vm151_vm6, %v135_v0, %v167_v13  ;;  %v169_v20 = vmul.f32 0.01, %v137_v2  ;;  %v92_v21 = vmul.f32 %v401_v33, %v70_v32  ;;  %v93_v22 = vmul.f32 %v401_v33, %v71_v34 }
  0x42   :  { %200 = vst.msk [vmem:[%s555_s4 + $0x28] sm:$0xff] %vm194_vm0, %v183_v17  ;;  %v184_v23 = vsel %vm152_vm7, %v136_v1, %v168_v16  ;;  %v94_v24 = vmul.f32 %v401_v33, %v72_v35  ;;  %v95_v15 = vmul.f32 %v401_v33, %v73_v36  ;;  %v96_v28 = vmul.f32 %v401_v33, %v74_v38 }
  0x43   :  { %201 = vst.msk [vmem:[%s555_s4 + $0x30] sm:$0xff] %vm194_vm0, %v184_v23  ;;  %v185_v29 = vsel %vm153_vm8, %v137_v2, %v169_v20  ;;  %v115_v30 = vmul.f32 %v409_v37, %v92_v21  ;;  %v116_v31 = vmul.f32 %v409_v37, %v93_v22  ;;  %v97_v18 = vmul.f32 %v401_v33, %v75_v39 }
  0x44   :  { %202 = vst.msk [vmem:[%s555_s4 + $0x38] sm:$0xff] %vm194_vm0, %v185_v29  ;;  %v117_v19 = vmul.f32 %v409_v37, %v94_v24  ;;  %v118_v32 = vmul.f32 %v409_v37, %v95_v15  ;;  %v119_v34 = vmul.f32 %v409_v37, %v96_v28  ;;  %v98_v35 = vmul.f32 %v401_v33, %v76_v40 }
  0x45   :  { %v138_v25 = vadd.f32 %v423_v46, %v115_v30  ;;  %v139_v36 = vadd.f32 %v423_v46, %v116_v31  ;;  %v120_v38 = vmul.f32 %v409_v37, %v97_v18  ;;  %v99_v39 = vmul.f32 %v401_v33, %v77_v41 }
  0x46   :  { %v140_v42 = vadd.f32 %v423_v46, %v117_v19  ;;  %v141_v43 = vadd.f32 %v423_v46, %v118_v32  ;;  %v142_v44 = vadd.f32 %v423_v46, %v119_v34  ;;  %v121_v26 = vmul.f32 %v409_v37, %v98_v35 }
  0x47   :  { %vm154_vm9 = vcmp.ge.f32.partialorder %v138_v25, 0.0  ;;  %v170_v40 = vmul.f32 0.01, %v138_v25  ;;  %vm155_vm10 = vcmp.ge.f32.partialorder %v139_v36, 0.0  ;;  %v171_v45 = vmul.f32 0.01, %v139_v36 }
  0x48   :  { %vm156_vm11 = vcmp.ge.f32.partialorder %v140_v42, 0.0  ;;  %v172_v47 = vmul.f32 0.01, %v140_v42  ;;  %vm157_vm12 = vcmp.ge.f32.partialorder %v141_v43, 0.0  ;;  %v173_v48 = vmul.f32 0.01, %v141_v43 }
  0x49   :  { %v186_v49 = vsel %vm154_vm9, %v138_v25, %v170_v40  ;;  %v187_v6 = vsel %vm155_vm10, %v139_v36, %v171_v45  ;;  %vm158_vm13 = vcmp.ge.f32.partialorder %v142_v44, 0.0  ;;  %v174_v27 = vmul.f32 0.01, %v142_v44 }
  0x4a   :  { %203 = vst.msk [vmem:[%s555_s4 + $0x40] sm:$0xff] %vm194_vm0, %v186_v49  ;;  %204 = vst.msk [vmem:[%s555_s4 + $0x48] sm:$0xff] %vm194_vm0, %v187_v6  ;;  %v188_v33 = vsel %vm156_vm11, %v140_v42, %v172_v47  ;;  %v189_v41 = vsel %vm157_vm12, %v141_v43, %v173_v48  ;;  %v143_v50 = vadd.f32 %v423_v46, %v120_v38 }
  0x4b   :  { %v144_v51 = vadd.f32 %v423_v46, %v121_v26  ;;  %205 = vst.msk [vmem:[%s555_s4 + $0x50] sm:$0xff] %vm194_vm0, %v188_v33  ;;  %206 = vst.msk [vmem:[%s555_s4 + $0x58] sm:$0xff] %vm194_vm0, %v189_v41  ;;  %v190_v52 = vsel %vm158_vm13, %v142_v44, %v174_v27  ;;  %v122_v53 = vmul.f32 %v409_v37, %v99_v39 }
  0x4c   :  { %207 = vst.msk [vmem:[%s555_s4 + $0x60] sm:$0xff] %vm194_vm0, %v190_v52  ;;  %vm159_vm14 = vcmp.ge.f32.partialorder %v143_v50, 0.0  ;;  %v175_v54 = vmul.f32 0.01, %v143_v50 }
  0x4d   :  { %vm160_vm15 = vcmp.ge.f32.partialorder %v144_v51, 0.0  ;;  %v176_v55 = vmul.f32 0.01, %v144_v51  ;;  %v145_v56 = vadd.f32 %v423_v46, %v122_v53 }
  0x4e   :  { %v191_v57 = vsel %vm159_vm14, %v143_v50, %v175_v54 }
  0x4f   :  { %v192_v58 = vsel %vm160_vm15, %v144_v51, %v176_v55  ;;  %208 = vst.msk [vmem:[%s555_s4 + $0x68] sm:$0xff] %vm194_vm0, %v191_v57  ;;  %vm161_vm1 = vcmp.ge.f32.partialorder %v145_v56, 0.0  ;;  %v177_v37 = vmul.f32 0.01, %v145_v56 }
  0x50   :  { %209 = vst.msk [vmem:[%s555_s4 + $0x70] sm:$0xff] %vm194_vm0, %v192_v58 }
  0x51   :  { %v193_v59 = vsel %vm161_vm1, %v145_v56, %v177_v37 }
  0x52   :  { %210 = vst.msk [vmem:[%s555_s4 + $0x78] sm:$0xff] %vm194_vm0, %v193_v59 }
  0x53   :  { %215 = vsyncpa [#allocation3], 1 }
  0x54   :  { %216 = vsyncpa [#allocation5], 1 }

// kernel: vae_forward.24
= control target key start
LH: loop header
LB: loop body
LE: loop exit
PB: predicated region body
PF: predicated region fallthrough
CT: control target
= control target key end

     0   :  { %vm12_vm0 = vcmask 123904   ;;  %vm18_vm1 = vcmask 130048   ;;  %v73_v0 = vmov 0.0   ;;  %vm49_vm2 = vcmask 1040384   ;;  %s122_s1 = inlined_call_operand.vmem [shape: f32[2,16], index: 1, kind: output, shape index: {}]   ;;  %s123_s0 = inlined_call_operand.vmem [shape: f32[32,16], index: 0, kind: input, shape index: {}]  }
   0x1   :  { %13 = vst.msk [vmem:[%s122_s1] sm:$0x3] %vm12_vm0, %v73_v0  ;;  %v14_v1 = vld [vmem:[%s123_s0] sm:$0xff]  ;;  %v15_v2 = vld [vmem:[%s123_s0 + $0x8] sm:$0xff]  ;;  %v16_v3 = vld [vmem:[%s123_s0 + $0x10] sm:$0xff] }
   0x2   :  { %v17_v4 = vld [vmem:[%s123_s0 + $0x18] sm:$0xff]  ;;  %v19_v5 = vsel %vm18_vm1, %v14_v1, 0.0  ;;  %v20_v6 = vsel %vm18_vm1, %v15_v2, 0.0  ;;  %v22_v7 = vsel %vm18_vm1, %v16_v3, 0.0  ;;  %v32_v8 = vmul.f32 %v14_v1, %v14_v1 }
   0x3   :  { %v21_v9 = vadd.f32 %v20_v6, %v19_v5  ;;  %v33_v10 = vmul.f32 %v15_v2, %v15_v2  ;;  %v34_v11 = vmul.f32 %v16_v3, %v16_v3  ;;  %v24_v12 = vsel %vm18_vm1, %v17_v4, 0.0 }
   0x4   :  { %v35_v13 = vmul.f32 %v17_v4, %v17_v4  ;;  %v36_v14 = vsel %vm18_vm1, %v32_v8, 0.0 }
   0x5   :  { %v23_v15 = vadd.f32 %v22_v7, %v21_v9  ;;  %v37_v16 = vsel %vm18_vm1, %v33_v10, 0.0  ;;  %v39_v17 = vsel %vm18_vm1, %v34_v11, 0.0 }
   0x6   :  { %v38_v18 = vadd.f32 %v37_v16, %v36_v14  ;;  %v41_v20 = vsel %vm18_vm1, %v35_v13, 0.0 }
   0x7   :  { %v25_v19 = vadd.f32 %v24_v12, %v23_v15 }
   0x8   :  { %v40_v21 = vadd.f32 %v39_v17, %v38_v18  ;;  %v51_v35 = vld [vmem:[%s122_s1] sm:$0x3] }
   0x9   :  { %v26_v22 = vrot.slane %v25_v19, 4 }
   0xa   :  { %v42_v23 = vadd.f32 %v41_v20, %v40_v21 }
   0xb   :  { %v27_v24 = vadd.f32 %v26_v22, %v25_v19 }
   0xc   :  { %v43_v25 = vrot.slane %v42_v23, 4 }
   0xd   :  { %v28_v26 = vrot.slane %v27_v24, 2 }
   0xe   :  { %v44_v27 = vadd.f32 %v43_v25, %v42_v23 }
   0xf   :  { %v29_v28 = vadd.f32 %v28_v26, %v27_v24 }
  0x10   :  { %v45_v29 = vrot.slane %v44_v27, 2 }
  0x11   :  { %v30_v30 = vrot.slane %v29_v28, 1 }
  0x12   :  { %v46_v31 = vadd.f32 %v45_v29, %v44_v27 }
  0x13   :  { %v31_v32 = vadd.f32 %v30_v30, %v29_v28 }
  0x14   :  { %v47_v33 = vrot.slane %v46_v31, 1 }
  0x16   :  { %v48_v34 = vadd.f32 %v47_v33, %v46_v31 }
  0x18   :  { %v50_v36 = vsel %vm49_vm2, %v31_v32, %v48_v34 }
  0x19   :  { %v52_v37 = vadd.f32 %v51_v35, %v50_v36 }
  0x1b   :  { %54 = vst.msk [vmem:[%s122_s1] sm:$0x3] %vm12_vm0, %v52_v37 }
  0x22   :  { %v58_v38 = vld [vmem:[%s122_s1] sm:$0x3] }
  0x23   :  { %v60_v39 = vmul.f32 0.03125, %v58_v38 }
  0x25   :  { %v61_v40 = vmul.f32 %v60_v39, %v60_v39 }
  0x27   :  { %v63_v41 = vrot.slane %v61_v40, 7 }
  0x29   :  { %v65_v42 = vsub.f32 %v60_v39, %v63_v41 }
  0x2b   :  { %v66_v43 = vsel %vm49_vm2, %v60_v39, %v65_v42 }
  0x2c   :  { %67 = vst.msk [vmem:[%s122_s1] sm:$0x3] %vm12_vm0, %v66_v43 }

// kernel: vae_forward.23
= control target key start
LH: loop header
LB: loop body
LE: loop exit
PB: predicated region body
PF: predicated region fallthrough
CT: control target
= control target key end

     0   :  { %vm72_vm0 = vcmask 588800   ;;  %vm79_vm1 = vcmask 1043456   ;;  %vm132_vm2 = vcmask 130048   ;;  %s236_s1 = inlined_call_operand.vmem [shape: bf16[72,16], index: 1, kind: input, shape index: {}]   ;;  %s237_s0 = inlined_call_operand.vmem [shape: bf16[32,72], index: 0, kind: input, shape index: {}]   ;;  %s238_s2 = inlined_call_operand.vmem [shape: f32[1,16], index: 2, kind: input, shape index: {}]   ;;  %s239_s3 = inlined_call_operand.vmem [shape: f32[32,16], index: 3, kind: output, shape index: {}]  }
   0x1   :  { %v173_v0 = vld [vmem:[%s236_s1] sm:$0xff]   ;;  %v174_v1 = vld [vmem:[%s236_s1 + $0x8] sm:$0xff]   ;;  %v175_v2 = vld [vmem:[%s236_s1 + $0x10] sm:$0xff]  }
   0x2   :  { %158 = vmatprep.subr.bf16.mxu0 %v173_v0  ;;  %v178_v3 = vld [vmem:[%s237_s0] sm:$0xff]   ;;  %v176_v4 = vld [vmem:[%s236_s1 + $0x18] sm:$0xff]   ;;  %v179_v7 = vld [vmem:[%s237_s0 + $0x8] sm:$0xff]  }
   0x3   :  { %159 = vmatpush3.bf16.msra.mxu0 %v173_v0  ;;  %168 = vmatprep.mubr.msk.bf16.mxu0 %vm72_vm0, %v178_v3  ;;  %v177_v5 = vld [vmem:[%s236_s1 + $0x20] ss:$0 sps:$4 sm:$0xff]  }
   0x4   :  { %160 = vmatprep.subr.bf16.mxu0 %v174_v1  ;;  %v81_v6 = vsel %vm79_vm1, %v177_v5, 0  ;;  %v141_v8 = vld [vmem:[%s238_s2] ss:$0 sm:$0xff] }
   0x7   :  { %161 = vmatpush3.bf16.msra.mxu0 %v174_v1 }
   0x8   :  { %162 = vmatprep.subr.bf16.mxu0 %v175_v2 }
   0xb   :  { %163 = vmatpush3.bf16.msra.mxu0 %v175_v2 }
   0xc   :  { %164 = vmatprep.subr.bf16.mxu0 %v176_v4 }
   0xf   :  { %165 = vmatpush3.bf16.msra.mxu0 %v176_v4 }
  0x10   :  { %172 = vmatprep.subr.msk.bf16.mxu0 %vm79_vm1, %v177_v5 }
  0x13   :  { %167 = vmatpush3.bf16.msra.mxu0 %v81_v6 }
  0x16   :  { %169 = vmatmul.mubr.msk.bf16.vlgmr.msra.gmra.mrb[0].mxu0 %vm72_vm0, %v179_v7 }
  0xe9   :  { %v170_v9 = vpop.f32.mrb[0].mxu0 }
  0xea   :  { %v126_v10 = vadd.f32 %v170_v9, %v141_v8  ;;  %v117_v11 = vpop.f32.mrb[1].mxu0 }
  0xeb   :  { %v118_v12 = vadd.f32 %v141_v8, %v117_v11  ;;  %v171_v13 = vpop.f32.mrb[2].mxu0 }
  0xec   :  { %135 = vst.msk [vmem:[%s239_s3 + $0x10] sm:$0xff] %vm132_vm2, %v126_v10  ;;  %v129_v14 = vadd.f32 %v171_v13, %v141_v8  ;;  %v120_v15 = vpop.f32.mrb[3].mxu0 }
  0xed   :  { %133 = vst.msk [vmem:[%s239_s3] sm:$0xff] %vm132_vm2, %v118_v12  ;;  %v121_v16 = vadd.f32 %v141_v8, %v120_v15 }
  0xee   :  { %136 = vst.msk [vmem:[%s239_s3 + $0x18] sm:$0xff] %vm132_vm2, %v129_v14 }
  0xef   :  { %134 = vst.msk [vmem:[%s239_s3 + $0x8] sm:$0xff] %vm132_vm2, %v121_v16 }

// kernel: vae_forward.25
= control target key start
LH: loop header
LB: loop body
LE: loop exit
PB: predicated region body
PF: predicated region fallthrough
CT: control target
= control target key end

     0   :  { %v22_v0 = vlaneseq  ;;  %vm74_vm0 = vcmask 130048   ;;  %s149_s1 = inlined_call_operand.vmem [shape: f32[2,16], index: 1, kind: input, shape index: {}]   ;;  %s150_s0 = inlined_call_operand.vmem [shape: f32[32,16], index: 0, kind: input, shape index: {}]   ;;  %s151_s2 = inlined_call_operand.vmem [shape: f32[1,16], index: 2, kind: input, shape index: {}]   ;;  %s152_s3 = inlined_call_operand.vmem [shape: f32[1,16], index: 3, kind: input, shape index: {}]   ;;  %s153_s4 = inlined_call_operand.vmem [shape: f32[32,16], index: 4, kind: output, shape index: {}]  }
   0x1   :  { %v21_v1 = vld [vmem:[%s149_s1] sm:$0x3]  ;;  %v18_v7 = vld [vmem:[%s150_s0 + $0x8] sm:$0xff]  ;;  %v19_v8 = vld [vmem:[%s150_s0 + $0x10] sm:$0xff] }
   0x2   :  { %v23_v2 = vshrl.u32 %v22_v0, 7  ;;  %v30_v3 = vadd.f32 1e-05, %v21_v1  ;;  %v17_v5 = vld [vmem:[%s150_s0] sm:$0xff]  ;;  %v20_v9 = vld [vmem:[%s150_s0 + $0x18] sm:$0xff] }
   0x3   :  { %v83_v17 = vld [vmem:[%s151_s2] ss:$0 sm:$0xff] }
   0x4   :  { %85 = vrsqrt.f32 %v30_v3  ;;  %v24_v4 = vsub.s32 0, %v23_v2  ;;  %v34_v10 = vsub.s32 1, %v23_v2  ;;  %v84_v22 = vld [vmem:[%s152_s3] ss:$0 sm:$0xff] }
   0x6   :  { %v25_v6 = vrot.slane %v21_v1, %v24_v4 }
   0x8   :  { %v26_v11 = vsub.f32 %v17_v5, %v25_v6  ;;  %v27_v12 = vsub.f32 %v18_v7, %v25_v6  ;;  %v28_v13 = vsub.f32 %v19_v8, %v25_v6  ;;  %v29_v14 = vsub.f32 %v20_v9, %v25_v6 }
   0xe   :  { %v86_v15 = vpop.eup %85 }
   0xf   :  { %v35_v16 = vrot.slane %v86_v15, %v34_v10 }
  0x11   :  { %v36_v18 = vmul.f32 %v35_v16, %v26_v11  ;;  %v37_v19 = vmul.f32 %v35_v16, %v27_v12  ;;  %v38_v20 = vmul.f32 %v35_v16, %v28_v13  ;;  %v39_v21 = vmul.f32 %v35_v16, %v29_v14 }
  0x13   :  { %v47_v23 = vmul.f32 %v83_v17, %v36_v18  ;;  %v48_v24 = vmul.f32 %v83_v17, %v37_v19  ;;  %v49_v25 = vmul.f32 %v83_v17, %v38_v20  ;;  %v50_v26 = vmul.f32 %v83_v17, %v39_v21 }
  0x15   :  { %v58_v27 = vadd.f32 %v84_v22, %v47_v23  ;;  %v59_v28 = vadd.f32 %v84_v22, %v48_v24  ;;  %v60_v29 = vadd.f32 %v84_v22, %v49_v25  ;;  %v61_v30 = vadd.f32 %v84_v22, %v50_v26 }
  0x17   :  { %vm62_vm1 = vcmp.ge.f32.partialorder %v58_v27, 0.0  ;;  %v66_v31 = vmul.f32 0.01, %v58_v27  ;;  %vm63_vm2 = vcmp.ge.f32.partialorder %v59_v28, 0.0  ;;  %v67_v32 = vmul.f32 0.01, %v59_v28 }
  0x18   :  { %vm64_vm3 = vcmp.ge.f32.partialorder %v60_v29, 0.0  ;;  %v68_v33 = vmul.f32 0.01, %v60_v29  ;;  %vm65_vm4 = vcmp.ge.f32.partialorder %v61_v30, 0.0  ;;  %v69_v34 = vmul.f32 0.01, %v61_v30 }
  0x19   :  { %v70_v35 = vsel %vm62_vm1, %v58_v27, %v66_v31  ;;  %v71_v36 = vsel %vm63_vm2, %v59_v28, %v67_v32 }
  0x1a   :  { %75 = vst.msk [vmem:[%s153_s4] sm:$0xff] %vm74_vm0, %v70_v35  ;;  %76 = vst.msk [vmem:[%s153_s4 + $0x8] sm:$0xff] %vm74_vm0, %v71_v36  ;;  %v72_v37 = vsel %vm64_vm3, %v60_v29, %v68_v33  ;;  %v73_v38 = vsel %vm65_vm4, %v61_v30, %v69_v34 }
  0x1b   :  { %77 = vst.msk [vmem:[%s153_s4 + $0x10] sm:$0xff] %vm74_vm0, %v72_v37  ;;  %78 = vst.msk [vmem:[%s153_s4 + $0x18] sm:$0xff] %vm74_vm0, %v73_v38 }

// kernel: vae_forward.28
= control target key start
LH: loop header
LB: loop body
LE: loop exit
PB: predicated region body
PF: predicated region fallthrough
CT: control target
= control target key end

     0   :  { %v19_v0 = vlaneseq  ;;  %vm50_vm1 = vcmask 261120   ;;  %s100_s1 = inlined_call_operand.vmem [shape: f32[2,32], index: 1, kind: input, shape index: {}]   ;;  %s101_s0 = inlined_call_operand.vmem [shape: f32[8,32], index: 0, kind: input, shape index: {}]   ;;  %s102_s2 = inlined_call_operand.vmem [shape: f32[1,32], index: 2, kind: input, shape index: {}]   ;;  %s103_s3 = inlined_call_operand.vmem [shape: f32[1,32], index: 3, kind: input, shape index: {}]   ;;  %s104_s4 = inlined_call_operand.vmem [shape: f32[8,32], index: 4, kind: output, shape index: {}]  }
   0x1   :  { %v18_v1 = vld [vmem:[%s100_s1] sm:$0x3] }
   0x2   :  { %v20_v2 = vshrl.u32 %v19_v0, 7  ;;  %v24_v3 = vadd.f32 1e-05, %v18_v1  ;;  %v17_v6 = vld [vmem:[%s101_s0] sm:$0xff] }
   0x3   :  { %v56_v11 = vld [vmem:[%s102_s2] ss:$0 sm:$0xff] }
   0x4   :  { %58 = vrsqrt.f32 %v24_v3  ;;  %v21_v4 = vsub.s32 0, %v20_v2  ;;  %v28_v7 = vsub.s32 1, %v20_v2  ;;  %v57_v13 = vld [vmem:[%s103_s3] ss:$0 sm:$0xff] }
   0x6   :  { %v22_v5 = vrot.slane %v18_v1, %v21_v4 }
   0x8   :  { %v23_v8 = vsub.f32 %v17_v6, %v22_v5 }
   0xe   :  { %v59_v9 = vpop.eup %58 }
   0xf   :  { %v29_v10 = vrot.slane %v59_v9, %v28_v7 }
  0x11   :  { %v30_v12 = vmul.f32 %v29_v10, %v23_v8 }
  0x13   :  { %v38_v14 = vmul.f32 %v56_v11, %v30_v12 }
  0x15   :  { %v46_v15 = vadd.f32 %v57_v13, %v38_v14 }
  0x17   :  { %vm47_vm0 = vcmp.ge.f32.partialorder %v46_v15, 0.0  ;;  %v48_v16 = vmul.f32 0.01, %v46_v15 }
  0x19   :  { %v49_v17 = vsel %vm47_vm0, %v46_v15, %v48_v16 }
  0x1a   :  { %51 = vst.msk [vmem:[%s104_s4] sm:$0xff] %vm50_vm1, %v49_v17 }

// kernel: vae_forward.27
= control target key start
LH: loop header
LB: loop body
LE: loop exit
PB: predicated region body
PF: predicated region fallthrough
CT: control target
= control target key end

     0   :  { %vm12_vm0 = vcmask 254976   ;;  %vm15_vm1 = vcmask 261120   ;;  %v55_v0 = vmov 0.0   ;;  %vm31_vm2 = vcmask 1040384   ;;  %s87_s1 = inlined_call_operand.vmem [shape: f32[2,32], index: 1, kind: output, shape index: {}]   ;;  %s88_s0 = inlined_call_operand.vmem [shape: f32[8,32], index: 0, kind: input, shape index: {}]  }
   0x1   :  { %13 = vst.msk [vmem:[%s87_s1] sm:$0x3] %vm12_vm0, %v55_v0  ;;  %v14_v1 = vld [vmem:[%s88_s0] sm:$0xff] }
   0x2   :  { %v16_v2 = vsel %vm15_vm1, %v14_v1, 0.0  ;;  %v23_v3 = vmul.f32 %v14_v1, %v14_v1 }
   0x3   :  { %v17_v4 = vrot.slane %v16_v2, 4 }
   0x4   :  { %v24_v5 = vsel %vm15_vm1, %v23_v3, 0.0 }
   0x5   :  { %v18_v6 = vadd.f32 %v17_v4, %v16_v2  ;;  %v25_v7 = vrot.slane %v24_v5, 4 }
   0x7   :  { %v19_v8 = vrot.slane %v18_v6, 2  ;;  %v26_v9 = vadd.f32 %v25_v7, %v24_v5 }
   0x8   :  { %v33_v17 = vld [vmem:[%s87_s1] sm:$0x3] }
   0x9   :  { %v20_v10 = vadd.f32 %v19_v8, %v18_v6  ;;  %v27_v11 = vrot.slane %v26_v9, 2 }
   0xb   :  { %v21_v12 = vrot.slane %v20_v10, 1  ;;  %v28_v13 = vadd.f32 %v27_v11, %v26_v9 }
   0xd   :  { %v22_v14 = vadd.f32 %v21_v12, %v20_v10  ;;  %v29_v15 = vrot.slane %v28_v13, 1 }
   0xf   :  { %v30_v16 = vadd.f32 %v29_v15, %v28_v13 }
  0x11   :  { %v32_v18 = vsel %vm31_vm2, %v22_v14, %v30_v16 }
  0x12   :  { %v34_v19 = vadd.f32 %v33_v17, %v32_v18 }
  0x14   :  { %36 = vst.msk [vmem:[%s87_s1] sm:$0x3] %vm12_vm0, %v34_v19 }
  0x1b   :  { %v40_v20 = vld [vmem:[%s87_s1] sm:$0x3] }
  0x1c   :  { %v42_v21 = vmul.f32 0.125, %v40_v20 }
  0x1e   :  { %v43_v22 = vmul.f32 %v42_v21, %v42_v21 }
  0x20   :  { %v45_v23 = vrot.slane %v43_v22, 7 }
  0x22   :  { %v47_v24 = vsub.f32 %v42_v21, %v45_v23 }
  0x24   :  { %v48_v25 = vsel %vm31_vm2, %v42_v21, %v47_v24 }
  0x25   :  { %49 = vst.msk [vmem:[%s87_s1] sm:$0x3] %vm12_vm0, %v48_v25 }

// kernel: vae_forward.26
= control target key start
LH: loop header
LB: loop body
LE: loop exit
PB: predicated region body
PF: predicated region fallthrough
CT: control target
= control target key end

     0   :  { %v176_v0 = vmov 0   ;;  %vm101_vm0 = vcmask 130048   ;;  %vm145_vm1 = vcmask 261120   ;;  %s233_s1 = inlined_call_operand.vmem [shape: bf16[144,32], index: 1, kind: input, shape index: {}]   ;;  %s234_s0 = inlined_call_operand.vmem [shape: bf16[8,144], index: 0, kind: input, shape index: {}]   ;;  %s235_s2 = inlined_call_operand.vmem [shape: f32[1,32], index: 2, kind: input, shape index: {}]   ;;  %s236_s3 = inlined_call_operand.vmem [shape: f32[8,32], index: 3, kind: output, shape index: {}]  }
   0x1   :  { %105 = vmatprep.subr.bf16.mxu0 %v176_v0  ;;  %v165_v1 = vld [vmem:[%s233_s1] sm:$0xff]   ;;  %v166_v2 = vld [vmem:[%s233_s1 + $0x8] sm:$0xff]   ;;  %v167_v3 = vld [vmem:[%s233_s1 + $0x10] sm:$0xff]  }
   0x2   :  { %106 = vmatpush1.bf16.msra.mxu0 %v165_v1  ;;  %v15_v4 = vld [vmem:[%s234_s0] sm:$0xff]  ;;  %v168_v5 = vld [vmem:[%s233_s1 + $0x18] sm:$0xff]   ;;  %v170_v8 = vld [vmem:[%s233_s1 + $0x28] sm:$0xff]  }
   0x3   :  { %107 = vmatprep.subr.bf16.mxu0 %v176_v0  ;;  %v153_v6 = vcombine.high %v15_v4, %v15_v4  ;;  %v169_v7 = vld [vmem:[%s233_s1 + $0x20] sm:$0xff]   ;;  %v171_v9 = vld [vmem:[%s233_s1 + $0x30] sm:$0xff]   ;;  %v172_v10 = vld [vmem:[%s233_s1 + $0x38] sm:$0xff]   ;;  %v152_v12 = vcombine.low %v15_v4, %v15_v4 }
   0x4   :  { %v173_v11 = vld [vmem:[%s233_s1 + $0x40] sm:$0xff]  }
   0x5   :  { %163 = vmatprep.mubr.msk.bf16.mxu0 %vm101_vm0, %v153_v6  ;;  %v151_v13 = vld [vmem:[%s235_s2] ss:$0 sm:$0xff] }
   0x6   :  { %108 = vmatpush1.bf16.msra.mxu0 %v166_v2 }
   0x7   :  { %109 = vmatprep.subr.bf16.mxu0 %v176_v0 }
   0xa   :  { %110 = vmatpush1.bf16.msra.mxu0 %v167_v3 }
   0xb   :  { %111 = vmatprep.subr.bf16.mxu0 %v176_v0 }
   0xe   :  { %112 = vmatpush1.bf16.msra.mxu0 %v168_v5 }
   0xf   :  { %113 = vmatprep.subr.bf16.mxu0 %v176_v0 }
  0x12   :  { %114 = vmatpush1.bf16.msra.mxu0 %v169_v7 }
  0x13   :  { %115 = vmatprep.subr.bf16.mxu0 %v176_v0 }
  0x16   :  { %116 = vmatpush1.bf16.msra.mxu0 %v170_v8 }
  0x17   :  { %117 = vmatprep.subr.bf16.mxu0 %v176_v0 }
  0x1a   :  { %118 = vmatpush1.bf16.msra.mxu0 %v171_v9 }
  0x1b   :  { %119 = vmatprep.subr.bf16.mxu0 %v176_v0 }
  0x1e   :  { %120 = vmatpush1.bf16.msra.mxu0 %v172_v10 }
  0x1f   :  { %121 = vmatprep.subr.bf16.mxu0 %v176_v0 }
  0x22   :  { %122 = vmatpush1.bf16.msra.mxu0 %v173_v11 }
  0x25   :  { %138 = vmatmul.mubr.bf16.vlgmr.msra.gmra.mrb[0].mxu0 %v152_v12 }
  0xf8   :  { %v139_v14 = vpop.f32.mrb[0].mxu0 }
  0xf9   :  { %v140_v15 = vadd.f32 %v151_v13, %v139_v14  ;;  %v141_v16 = vpop.f32.mrb[1].mxu0 }
  0xfa   :  { %v142_v17 = vpop.f32.mrb[2].mxu0 }
  0xfb   :  { %146 = vst.msk [vmem:[%s236_s3] sm:$0xff] %vm145_vm1, %v140_v15  ;;  %v143_v18 = vpop.f32.mrb[3].mxu0 }

// kernel: vae_forward.29
= control target key start
LH: loop header
LB: loop body
LE: loop exit
PB: predicated region body
PF: predicated region fallthrough
CT: control target
= control target key end

     0   :  { %16 = vsyncpa [#allocation3], 0  ;;  %v513_v1 = vmov 0.0   ;;  %vm514_vm0 = vmmov 0   ;;  %s668_s0 = inlined_call_operand.vmem [shape: bf16[2,128], index: 0, kind: input, shape index: {}]   ;;  %s669_s1 = inlined_call_operand.vmem [shape: bf16[128,8], index: 1, kind: input, shape index: {}]   ;;  %s670_s2 = inlined_call_operand.vmem [shape: f32[1,8], index: 2, kind: input, shape index: {}]   ;;  %s671_s3 = inlined_call_operand.vmem [shape: bf16[128,8], index: 3, kind: input, shape index: {}]   ;;  %s672_s4 = inlined_call_operand.vmem [shape: f32[1,8], index: 4, kind: input, shape index: {}]   ;;  %s673_s5 = inlined_call_operand.vmem [shape: f32[2,8], index: 5, kind: input, shape index: {}]   ;;  %s674_s6 = inlined_call_operand.vmem [shape: bf16[8,128], index: 6, kind: input, shape index: {}]   ;;  %s675_s7 = inlined_call_operand.vmem [shape: f32[1,128], index: 7, kind: input, shape index: {}]   ;;  %s676_s8 = inlined_call_operand.hbm [shape: f32[2,8], index: 8, kind: output, shape index: {0}]   ;;  %s677_s9 = inlined_call_operand.hbm [shape: f32[2,8], index: 9, kind: output, shape index: {1}]   ;;  %s678_s10 = inlined_call_operand.vmem [shape: f32[2,128], index: 10, kind: output, shape index: {2}]  }
   0x1   :  { %v447_v0 = vld [vmem:[%s671_s3] sm:$0xff]   ;;  %417 = vmatprep.subr.bf16.mxu1 %v513_v1  ;;  %397 = vmatprep.subr.bf16.mxu0 %v513_v1  ;;  %v448_v2 = vld [vmem:[%s671_s3 + $0x8] sm:$0xff]   ;;  %v449_v4 = vld [vmem:[%s671_s3 + $0x10] sm:$0xff]  }
   0x2   :  { %418 = vmatpush3.bf16.msra.mxu1 %v447_v0  ;;  %433 = vmatprep.mubr.msk.bf16.mxu1 %vm514_vm0, %v513_v1  ;;  %v451_v3 = vld [vmem:[%s669_s1] sm:$0xff]   ;;  %v453_v5 = vld [vmem:[%s669_s1 + $0x8] sm:$0xff]   ;;  %v450_v6 = vld [vmem:[%s671_s3 + $0x18] sm:$0xff]  }
   0x3   :  { %419 = vmatprep.subr.bf16.mxu1 %v513_v1  ;;  %413 = vmatprep.mubr.msk.bf16.mxu0 %vm514_vm0, %v513_v1  ;;  %v455_v7 = vld [vmem:[%s669_s1 + $0x10] sm:$0xff]   ;;  %v452_v8 = vld [vmem:[%s671_s3 + $0x20] sm:$0xff]   ;;  %v457_v9 = vld [vmem:[%s669_s1 + $0x18] sm:$0xff]  }
   0x4   :  { %398 = vmatpush3.bf16.msra.mxu0 %v451_v3 }
   0x5   :  { %399 = vmatprep.subr.bf16.mxu0 %v513_v1 }
   0x6   :  { %420 = vmatpush3.bf16.msra.mxu1 %v448_v2 }
   0x7   :  { %421 = vmatprep.subr.bf16.mxu1 %v513_v1 }
   0x8   :  { %400 = vmatpush3.bf16.msra.mxu0 %v453_v5 }
   0x9   :  { %401 = vmatprep.subr.bf16.mxu0 %v513_v1 }
   0xa   :  { %422 = vmatpush3.bf16.msra.mxu1 %v449_v4 }
   0xb   :  { %423 = vmatprep.subr.bf16.mxu1 %v513_v1 }
   0xc   :  { %402 = vmatpush3.bf16.msra.mxu0 %v455_v7 }
   0xd   :  { %403 = vmatprep.subr.bf16.mxu0 %v513_v1 }
   0xe   :  { %424 = vmatpush3.bf16.msra.mxu1 %v450_v6 }
   0xf   :  { %425 = vmatprep.subr.bf16.mxu1 %v513_v1 }
  0x10   :  { %17 = vsyncpa [#allocation5], 0  ;;  %v454_v10 = vld [vmem:[%s671_s3 + $0x28] sm:$0xff]   ;;  %404 = vmatpush3.bf16.msra.mxu0 %v457_v9  ;;  %v459_v11 = vld [vmem:[%s669_s1 + $0x20] sm:$0xff]   ;;  %vm277_vm1 = vcmask 1043456   ;;  %vm321_vm2 = vcmask 58368  }
  0x11   :  { %405 = vmatprep.subr.bf16.mxu0 %v513_v1  ;;  %v456_v12 = vld [vmem:[%s671_s3 + $0x30] sm:$0xff]   ;;  %v460_v13 = vld [vmem:[%s669_s1 + $0x28] sm:$0xff]   ;;  %v458_v14 = vld [vmem:[%s671_s3 + $0x38] sm:$0xff]   ;;  %vm273_vm3 = vcmask 64512   ;;  %s516_s11 = smov [#allocation4]  }
  0x12   :  { %426 = vmatpush3.bf16.msra.mxu1 %v452_v8  ;;  %v461_v15 = vld [vmem:[%s669_s1 + $0x30] sm:$0xff]   ;;  %v35_v16 = vld [vmem:[%s668_s0] sm:$0x1]  ;;  %v462_v17 = vld [vmem:[%s669_s1 + $0x38] sm:$0xff]   ;;  %s341_s12 = sshll.u32 %s516_s11, 4  ;;  %s342_s12 = int_to_ptr.vmem [resolvable:$true] %s341_s12 }
  0x13   :  { %427 = vmatprep.subr.bf16.mxu1 %v513_v1  ;;  %v265_v18 = vld [vmem:[%s674_s6] sm:$0xf] }
  0x14   :  { %406 = vmatpush3.bf16.msra.mxu0 %v459_v11  ;;  %v279_v19 = vsel %vm277_vm1, %v265_v18, 0  ;;  %v366_v20 = vld [vmem:[%s672_s4] ss:$0 sm:$0xff] }
  0x15   :  { %407 = vmatprep.subr.bf16.mxu0 %v513_v1  ;;  %v357_v25 = vld [vmem:[%s670_s2] ss:$0 sm:$0xff]  ;;  %s515_s2 = smov [#allocation2]  }
  0x16   :  { %428 = vmatpush3.bf16.msra.mxu1 %v454_v10  ;;  %v258_v34 = vld [vmem:[%s673_s5] sm:$0x3]  ;;  %s331_s30 = sshll.u32 %s515_s2, 4  ;;  %s332_s30 = int_to_ptr.vmem [resolvable:$true] %s331_s30 }
  0x17   :  { %429 = vmatprep.subr.bf16.mxu1 %v513_v1  ;;  %s465_s13 = scalar_lea.vmem %s332_s30, 32  ;;  %p470_p1 = scmp.lt.s32.totalorder %s332_s30, %s332_s30 }
  0x18   :  { %408 = vmatpush3.bf16.msra.mxu0 %v460_v13  ;;  %p466_p0 = scmp.ne.s32.totalorder %s332_s30, %s465_s13  ;;  %p471_p2 = scmp.lt.s32.totalorder %s465_s13, %s465_s13 }
  0x19   :  { %409 = vmatprep.subr.bf16.mxu0 %v513_v1 }
  0x1a   :  { %430 = vmatpush3.bf16.msra.mxu1 %v456_v12  ;;  %p472_p3 = por %p471_p2, %p470_p1 }
  0x1b   :  { %431 = vmatprep.subr.bf16.mxu1 %v513_v1 }
  0x1c   :  { %410 = vmatpush3.bf16.msra.mxu0 %v461_v15  ;;  %p473_p4 = pnand %p472_p3, %p466_p0 }
  0x1d   :  { %411 = vmatprep.subr.bf16.mxu0 %v513_v1 }
  0x1e   :  { %432 = vmatpush3.bf16.msra.mxu1 %v458_v14 }
  0x20   :  { %412 = vmatpush3.bf16.msra.mxu0 %v462_v17 }
  0x21   :  { %434 = vmatmul.mubr.bf16.vlgmr.msra.gmra.mrb[0].mxu1 %v35_v16  ;;  %437 = vmatprep.subr.bf16.mxu0 %v513_v1 }
  0x23   :  { %414 = vmatmul.mubr.bf16.vlgmr.msra.gmra.mrb[0].mxu0 %v35_v16 }
  0x24   :  { %439 = vmatprep.mubr.msk.bf16.mxu0 %vm514_vm0, %v513_v1  ;;  %438 = vmatpush3.bf16.msra.mxu0 %v279_v19 }
  0xf4   :  { %v252_v21 = vpop.f32.mrb[0].mxu1 }
  0xf5   :  { %v253_v22 = vadd.f32 %v366_v20, %v252_v21  ;;  %v435_v23 = vpop.f32.mrb[1].mxu1 }
  0xf6   :  { %v255_v24 = vpop.f32.mrb[2].mxu1  ;;  %v141_v28 = vpop.f32.mrb[0].mxu0 }
  0xf7   :  { %v259_v26 = vmul.f32 0.5, %v253_v22  ;;  %v436_v27 = vpop.f32.mrb[3].mxu1  ;;  %323 = vst.msk [vmem:[#allocation4] sm:$0x3] %vm321_vm2, %v253_v22  ;;  %v142_v30 = vadd.f32 %v357_v25, %v141_v28  ;;  %v415_v31 = vpop.f32.mrb[1].mxu0 }
  0xf8   :  { %v144_v32 = vpop.f32.mrb[2].mxu0 }
  0xf9   :  { %v260_v29 = vmul.f32 1.442695, %v259_v26  ;;  %v416_v33 = vpop.f32.mrb[3].mxu0  ;;  %322 = vst.msk [vmem:[#allocation2] sm:$0x3] %vm321_vm2, %v142_v30 }
  0xfb   :  { %463 = vpow2.f32 %v260_v29 }
 0x105   :  { %v464_v35 = vpop.eup %463 }
 0x106   :  { %v262_v36 = vmul.f32 %v464_v35, %v258_v34 }
 0x108   :  { %v263_v37 = vadd.f32 %v262_v36, %v142_v30 }
 0x10a   :  { %v264_v38 = vpack.c.bf16 %v263_v37, %v263_v37 }
 0x10c   :  { %440 = vmatmul.mubr.msk.bf16.vlgmr.msra.gmra.mrb[4].mxu0 %vm273_vm3, %v264_v38 }
 0x10d   :  { %476 = shalt.err (!%p473_p4)
}
 0x10e   :  { %s477_s15 = scalar_lea.hbm %s676_s8, 32 }
 0x10f   :  { %p478_p5 = scmp.ne.s32.totalorder %s676_s8, %s477_s15  ;;  %p481_p6 = scmp.lt.u32.totalorder %s477_s15, %s676_s8 }
 0x111   :  { %p483_p7 = pnand %p481_p6, %p478_p5 }
 0x113   :  { %486 = shalt.err (!%p483_p7)
}
 0x114   :  { %334 = dma.vmem_to_hbm [thread:$0]  %s332_s30, 32, %s676_s8, [#allocation3]  }
 0x115   :  { %s487_s22 = scalar_lea.vmem %s342_s12, 32  ;;  %p492_p9 = scmp.lt.s32.totalorder %s342_s12, %s342_s12 }
 0x116   :  { %p488_p8 = scmp.ne.s32.totalorder %s342_s12, %s487_s22  ;;  %p493_p10 = scmp.lt.s32.totalorder %s487_s22, %s487_s22 }
 0x118   :  { %p494_p11 = por %p493_p10, %p492_p9 }
 0x11a   :  { %p495_p12 = pnand %p494_p11, %p488_p8 }
 0x11c   :  { %498 = shalt.err (!%p495_p12)
}
 0x11d   :  { %s499_s25 = scalar_lea.hbm %s677_s9, 32 }
 0x11e   :  { %p500_p13 = scmp.ne.s32.totalorder %s677_s9, %s499_s25  ;;  %p503_p0 = scmp.lt.u32.totalorder %s499_s25, %s677_s9 }
 0x120   :  { %p505_p1 = pnand %p503_p0, %p500_p13 }
 0x122   :  { %508 = shalt.err (!%p505_p1)
}
 0x123   :  { %344 = dma.vmem_to_hbm [thread:$0]  %s342_s12, 32, %s677_s9, [#allocation5]   ;;  %v375_v39 = vld [vmem:[%s675_s7] ss:$0 sm:$0xff] }
 0x1df   :  { %v315_v40 = vpop.f32.mrb[4].mxu0 }
 0x1e0   :  { %v316_v41 = vadd.f32 %v375_v39, %v315_v40  ;;  %v441_v42 = vpop.f32.mrb[5].mxu0 }
 0x1e1   :  { %v318_v43 = vpop.f32.mrb[6].mxu0 }
 0x1e2   :  { %324 = vst [vmem:[%s678_s10] sm:$0x3] %v316_v41  ;;  %v442_v44 = vpop.f32.mrb[7].mxu0 }
 0x1e3   :  { %509 = dma.done.wait [#allocation3], 32  }
 0x1e4   :  { %510 = vsyncadd [#allocation3], 4294967264 }
 0x1e5   :  { %511 = dma.done.wait [#allocation5], 32  }
 0x1e6   :  { %512 = vsyncadd [#allocation5], 4294967264 }
 0x1e7   :  { %355 = vsyncpa [#allocation3], 1 }
 0x1e8   :  { %356 = vsyncpa [#allocation5], 1 }

// kernel: vae_forward.30
= control target key start
LH: loop header
LB: loop body
LE: loop exit
PB: predicated region body
PF: predicated region fallthrough
CT: control target
= control target key end

     0   :  { %v719_v0 = vmov 0.0   ;;  %vm720_vm0 = vmmov 0   ;;  %vm83_vm1 = vcmask 261120   ;;  %vm127_vm2 = vcmask 130048   ;;  %s886_s4 = inlined_call_operand.vmem [shape: bf16[9,32,16], index: 4, kind: input, shape index: {}]   ;;  %s887_s0 = inlined_call_operand.vmem [shape: bf16[8,32], index: 0, kind: input, shape index: {}]   ;;  %s888_s1 = inlined_call_operand.vmem [shape: bf16[8,32], index: 1, kind: input, shape index: {}]   ;;  %s889_s2 = inlined_call_operand.vmem [shape: bf16[8,32], index: 2, kind: input, shape index: {}]   ;;  %s890_s3 = inlined_call_operand.vmem [shape: bf16[8,32], index: 3, kind: input, shape index: {}]   ;;  %s891_s5 = inlined_call_operand.vmem [shape: f32[1,16], index: 5, kind: input, shape index: {}]   ;;  %s892_s6 = inlined_call_operand.vmem [shape: f32[4,8,16], index: 6, kind: output, shape index: {}]  }
   0x1   :  { %627 = vmatprep.subr.bf16.mxu0 %v719_v0  ;;  %v701_v1 = vld [vmem:[%s886_s4 + $0x40] sm:$0xff]   ;;  %635 = vmatprep.subr.bf16.mxu1 %v719_v0  ;;  %v702_v2 = vld [vmem:[%s886_s4 + $0x30] sm:$0xff]   ;;  %v703_v3 = vld [vmem:[%s886_s4 + $0x48] sm:$0xff]  }
   0x2   :  { %631 = vmatprep.mubr.msk.bf16.mxu0 %vm720_vm0, %v719_v0  ;;  %639 = vmatprep.mubr.msk.bf16.mxu1 %vm720_vm0, %v719_v0  ;;  %v704_v4 = vld [vmem:[%s886_s4 + $0x38] sm:$0xff]   ;;  %v61_v5 = vld [vmem:[%s887_s0] sm:$0xf]  ;;  %v705_v6 = vld [vmem:[%s886_s4 + $0x50] sm:$0xff]  }
   0x3   :  { %628 = vmatpush3.bf16.msra.mxu0 %v701_v1  ;;  %636 = vmatpush3.bf16.msra.mxu1 %v702_v2  ;;  %v62_v7 = vld [vmem:[%s888_s1] sm:$0xf]  ;;  %v706_v8 = vld [vmem:[%s886_s4 + $0x10] sm:$0xff]   ;;  %v707_v9 = vld [vmem:[%s886_s4 + $0x58] sm:$0xff]  }
   0x4   :  { %629 = vmatprep.subr.bf16.mxu0 %v719_v0  ;;  %637 = vmatprep.subr.bf16.mxu1 %v719_v0  ;;  %v708_v10 = vld [vmem:[%s886_s4 + $0x18] sm:$0xff]   ;;  %v709_v11 = vld [vmem:[%s886_s4 + $0x70] sm:$0xff]   ;;  %v63_v12 = vld [vmem:[%s889_s2] sm:$0xf] }
   0x5   :  { %v710_v13 = vld [vmem:[%s886_s4 + $0x60] sm:$0xff]   ;;  %v711_v14 = vld [vmem:[%s886_s4 + $0x78] sm:$0xff]   ;;  %v712_v15 = vld [vmem:[%s886_s4 + $0x68] sm:$0xff]  }
   0x6   :  { %v713_v16 = vld [vmem:[%s886_s4 + $0x80] sm:$0xff]   ;;  %v715_v18 = vld [vmem:[%s886_s4 + $0x88] sm:$0xff]  }
   0x7   :  { %630 = vmatpush3.bf16.msra.mxu0 %v703_v3  ;;  %638 = vmatpush3.bf16.msra.mxu1 %v704_v4  ;;  %v714_v17 = vld [vmem:[%s886_s4 + $0x20] sm:$0xff]   ;;  %v716_v19 = vld [vmem:[%s886_s4 + $0x28] sm:$0xff]  }
   0x8   :  { %643 = vmatprep.subr.bf16.mxu0 %v719_v0  ;;  %651 = vmatprep.subr.bf16.mxu1 %v719_v0  ;;  %v717_v20 = vld [vmem:[%s886_s4] sm:$0xff]   ;;  %v718_v21 = vld [vmem:[%s886_s4 + $0x8] sm:$0xff]  }
   0x9   :  { %v64_v22 = vld [vmem:[%s890_s3] sm:$0xf] }
   0xa   :  { %632 = vmatmul.mubr.msk.bf16.vlgmr.msra.gmra.mrb[0].mxu0 %vm83_vm1, %v61_v5  ;;  %640 = vmatmul.mubr.msk.bf16.vlgmr.msra.gmra.mrb[0].mxu1 %vm83_vm1, %v62_v7  ;;  %v569_v23 = vld [vmem:[%s891_s5] ss:$0 sm:$0xff] }
   0xb   :  { %644 = vmatpush3.bf16.msra.mxu0 %v705_v6  ;;  %652 = vmatpush3.bf16.msra.mxu1 %v706_v8 }
   0xc   :  { %645 = vmatprep.subr.bf16.mxu0 %v719_v0  ;;  %653 = vmatprep.subr.bf16.mxu1 %v719_v0 }
   0xd   :  { %647 = vmatprep.mubr.msk.bf16.mxu0 %vm720_vm0, %v719_v0  ;;  %655 = vmatprep.mubr.msk.bf16.mxu1 %vm720_vm0, %v719_v0 }
   0xf   :  { %646 = vmatpush3.bf16.msra.mxu0 %v707_v9  ;;  %654 = vmatpush3.bf16.msra.mxu1 %v708_v10 }
  0x10   :  { %659 = vmatprep.subr.bf16.mxu0 %v719_v0  ;;  %667 = vmatprep.subr.bf16.mxu1 %v719_v0 }
  0x12   :  { %648 = vmatmul.mubr.msk.bf16.vlgmr.msra.gmra.mrb[4].mxu0 %vm83_vm1, %v61_v5  ;;  %656 = vmatmul.mubr.msk.bf16.vlgmr.msra.gmra.mrb[4].mxu1 %vm83_vm1, %v63_v12 }
  0x13   :  { %660 = vmatpush3.bf16.msra.mxu0 %v709_v11  ;;  %668 = vmatpush3.bf16.msra.mxu1 %v710_v13 }
  0x14   :  { %661 = vmatprep.subr.bf16.mxu0 %v719_v0  ;;  %669 = vmatprep.subr.bf16.mxu1 %v719_v0 }
  0x15   :  { %663 = vmatprep.mubr.msk.bf16.mxu0 %vm720_vm0, %v719_v0  ;;  %671 = vmatprep.mubr.msk.bf16.mxu1 %vm720_vm0, %v719_v0 }
  0x17   :  { %662 = vmatpush3.bf16.msra.mxu0 %v711_v14  ;;  %670 = vmatpush3.bf16.msra.mxu1 %v712_v15 }
  0x18   :  { %675 = vmatprep.subr.bf16.mxu0 %v719_v0  ;;  %683 = vmatprep.subr.bf16.mxu1 %v719_v0 }
  0x1a   :  { %664 = vmatmul.mubr.msk.bf16.vlgmr.msra.gmra.mrb[8].mxu0 %vm83_vm1, %v61_v5  ;;  %672 = vmatmul.mubr.msk.bf16.vlgmr.msra.gmra.mrb[8].mxu1 %vm83_vm1, %v62_v7 }
  0x1b   :  { %676 = vmatpush3.bf16.msra.mxu0 %v713_v16  ;;  %684 = vmatpush3.bf16.msra.mxu1 %v714_v17 }
  0x1c   :  { %677 = vmatprep.subr.bf16.mxu0 %v719_v0  ;;  %685 = vmatprep.subr.bf16.mxu1 %v719_v0 }
  0x1d   :  { %679 = vmatprep.mubr.msk.bf16.mxu0 %vm720_vm0, %v719_v0  ;;  %687 = vmatprep.mubr.msk.bf16.mxu1 %vm720_vm0, %v719_v0 }
  0x1f   :  { %678 = vmatpush3.bf16.msra.mxu0 %v715_v18  ;;  %686 = vmatpush3.bf16.msra.mxu1 %v716_v19 }
  0x20   :  { %691 = vmatprep.subr.bf16.mxu0 %v719_v0 }
  0x22   :  { %680 = vmatmul.mubr.msk.bf16.vlgmr.msra.gmra.mrb[12].mxu0 %vm83_vm1, %v61_v5  ;;  %688 = vmatmul.mubr.msk.bf16.vlgmr.msra.gmra.mrb[12].mxu1 %vm83_vm1, %v63_v12 }
  0x23   :  { %692 = vmatpush3.bf16.msra.mxu0 %v717_v20  ;;  %695 = vmatprep.mubr.msk.bf16.mxu0 %vm720_vm0, %v719_v0 }
  0x24   :  { %693 = vmatprep.subr.bf16.mxu0 %v719_v0 }
  0x27   :  { %694 = vmatpush3.bf16.msra.mxu0 %v718_v21 }
  0x2a   :  { %696 = vmatmul.mubr.msk.bf16.vlgmr.msra.gmra.mrb[16].mxu0 %vm83_vm1, %v64_v22 }
  0xdd   :  { %v121_v24 = vpop.f32.mrb[0].mxu0  ;;  %v178_v27 = vpop.f32.mrb[0].mxu1 }
  0xde   :  { %v122_v25 = vadd.f32 %v569_v23, %v121_v24  ;;  %v633_v26 = vpop.f32.mrb[1].mxu0  ;;  %v641_v29 = vpop.f32.mrb[1].mxu1 }
  0xdf   :  { %v124_v28 = vpop.f32.mrb[2].mxu0  ;;  %v181_v31 = vpop.f32.mrb[2].mxu1 }
  0xe0   :  { %128 = vst.msk [vmem:[%s892_s6] sm:$0xff] %vm127_vm2, %v122_v25  ;;  %v634_v30 = vpop.f32.mrb[3].mxu0  ;;  %v642_v32 = vpop.f32.mrb[3].mxu1 }
  0xe5   :  { %v230_v33 = vpop.f32.mrb[4].mxu0  ;;  %v288_v36 = vpop.f32.mrb[4].mxu1 }
  0xe6   :  { %v231_v34 = vadd.f32 %v230_v33, %v178_v27  ;;  %v649_v35 = vpop.f32.mrb[5].mxu0  ;;  %v657_v38 = vpop.f32.mrb[5].mxu1 }
  0xe7   :  { %v233_v37 = vpop.f32.mrb[6].mxu0  ;;  %v291_v41 = vpop.f32.mrb[6].mxu1 }
  0xe8   :  { %v236_v39 = vadd.f32 %v569_v23, %v231_v34  ;;  %v650_v40 = vpop.f32.mrb[7].mxu0  ;;  %v658_v42 = vpop.f32.mrb[7].mxu1 }
  0xea   :  { %579 = vst.msk [vmem:[%s892_s6 + $0x8] sm:$0xff] %vm127_vm2, %v236_v39 }
  0xed   :  { %v340_v43 = vpop.f32.mrb[8].mxu0  ;;  %v395_v46 = vpop.f32.mrb[8].mxu1 }
  0xee   :  { %v341_v44 = vadd.f32 %v340_v43, %v288_v36  ;;  %v665_v45 = vpop.f32.mrb[9].mxu0  ;;  %v673_v48 = vpop.f32.mrb[9].mxu1 }
  0xef   :  { %v343_v47 = vpop.f32.mrb[10].mxu0  ;;  %v398_v51 = vpop.f32.mrb[10].mxu1 }
  0xf0   :  { %v346_v49 = vadd.f32 %v569_v23, %v341_v44  ;;  %v666_v50 = vpop.f32.mrb[11].mxu0  ;;  %v674_v52 = vpop.f32.mrb[11].mxu1 }
  0xf2   :  { %586 = vst.msk [vmem:[%s892_s6 + $0x10] sm:$0xff] %vm127_vm2, %v346_v49 }
  0xf5   :  { %v447_v53 = vpop.f32.mrb[12].mxu0  ;;  %v499_v56 = vpop.f32.mrb[12].mxu1 }
  0xf6   :  { %v448_v54 = vadd.f32 %v447_v53, %v395_v46  ;;  %v681_v55 = vpop.f32.mrb[13].mxu0  ;;  %v689_v58 = vpop.f32.mrb[13].mxu1 }
  0xf7   :  { %v450_v57 = vpop.f32.mrb[14].mxu0  ;;  %v502_v61 = vpop.f32.mrb[14].mxu1 }
  0xf8   :  { %v505_v59 = vadd.f32 %v499_v56, %v448_v54  ;;  %v682_v60 = vpop.f32.mrb[15].mxu0  ;;  %v690_v62 = vpop.f32.mrb[15].mxu1 }
  0xfd   :  { %v555_v63 = vpop.f32.mrb[16].mxu0 }
  0xfe   :  { %v561_v0 = vadd.f32 %v555_v63, %v505_v59  ;;  %v697_v1 = vpop.f32.mrb[17].mxu0 }
  0xff   :  { %v558_v2 = vpop.f32.mrb[18].mxu0 }
 0x100   :  { %v562_v3 = vadd.f32 %v569_v23, %v561_v0  ;;  %v698_v4 = vpop.f32.mrb[19].mxu0 }
 0x102   :  { %599 = vst.msk [vmem:[%s892_s6 + $0x18] sm:$0xff] %vm127_vm2, %v562_v3 }

// kernel: vae_forward.35
= control target key start
LH: loop header
LB: loop body
LE: loop exit
PB: predicated region body
PF: predicated region fallthrough
CT: control target
= control target key end

     0   :  { %v34_v0 = vlaneseq  ;;  %vm170_vm0 = vcmask 64512   ;;  %s458_s1 = inlined_call_operand.vmem [shape: f32[2,8], index: 1, kind: input, shape index: {}]   ;;  %s459_s0 = inlined_call_operand.vmem [shape: f32[128,8], index: 0, kind: input, shape index: {}]   ;;  %s460_s2 = inlined_call_operand.vmem [shape: f32[1,8], index: 2, kind: input, shape index: {}]   ;;  %s461_s3 = inlined_call_operand.vmem [shape: f32[1,8], index: 3, kind: input, shape index: {}]   ;;  %s462_s4 = inlined_call_operand.vmem [shape: f32[128,8], index: 4, kind: output, shape index: {}]  }
   0x1   :  { %v33_v1 = vld [vmem:[%s458_s1] sm:$0x3]  ;;  %v18_v7 = vld [vmem:[%s459_s0 + $0x8] sm:$0xff]  ;;  %v19_v8 = vld [vmem:[%s459_s0 + $0x10] sm:$0xff] }
   0x2   :  { %v35_v2 = vshrl.u32 %v34_v0, 7  ;;  %v54_v3 = vadd.f32 1e-05, %v33_v1  ;;  %v17_v5 = vld [vmem:[%s459_s0] sm:$0xff]  ;;  %v20_v9 = vld [vmem:[%s459_s0 + $0x18] sm:$0xff]  ;;  %v22_v11 = vld [vmem:[%s459_s0 + $0x28] sm:$0xff] }
   0x3   :  { %v21_v10 = vld [vmem:[%s459_s0 + $0x20] sm:$0xff]  ;;  %v23_v12 = vld [vmem:[%s459_s0 + $0x30] sm:$0xff]  ;;  %v24_v14 = vld [vmem:[%s459_s0 + $0x38] sm:$0xff] }
   0x4   :  { %v36_v4 = vsub.s32 0, %v35_v2  ;;  %193 = vrsqrt.f32 %v54_v3  ;;  %v58_v13 = vsub.s32 1, %v35_v2  ;;  %v252_v15 = vld [vmem:[%s459_s0 + $0x40] sm:$0xff]  ;;  %v257_v16 = vld [vmem:[%s459_s0 + $0x48] sm:$0xff]  ;;  %v263_v18 = vld [vmem:[%s459_s0 + $0x50] sm:$0xff] }
   0x5   :  { %v268_v19 = vld [vmem:[%s459_s0 + $0x58] sm:$0xff]  ;;  %v273_v20 = vld [vmem:[%s459_s0 + $0x60] sm:$0xff]  ;;  %v282_v25 = vld [vmem:[%s459_s0 + $0x68] sm:$0xff] }
   0x6   :  { %v226_v6 = vrot.slane %v33_v1, %v36_v4  ;;  %v287_v26 = vld [vmem:[%s459_s0 + $0x70] sm:$0xff]  ;;  %v292_v27 = vld [vmem:[%s459_s0 + $0x78] sm:$0xff]  ;;  %v310_v37 = vld [vmem:[%s460_s2] ss:$0 sm:$0xff] }
   0x7   :  { %v327_v46 = vld [vmem:[%s461_s3] ss:$0 sm:$0xff] }
   0x8   :  { %v38_v17 = vsub.f32 %v17_v5, %v226_v6  ;;  %v39_v21 = vsub.f32 %v18_v7, %v226_v6  ;;  %v40_v22 = vsub.f32 %v19_v8, %v226_v6  ;;  %v41_v23 = vsub.f32 %v20_v9, %v226_v6 }
   0x9   :  { %v42_v24 = vsub.f32 %v21_v10, %v226_v6  ;;  %v43_v29 = vsub.f32 %v22_v11, %v226_v6  ;;  %v44_v30 = vsub.f32 %v23_v12, %v226_v6  ;;  %v45_v31 = vsub.f32 %v24_v14, %v226_v6 }
   0xa   :  { %v46_v32 = vsub.f32 %v252_v15, %v226_v6  ;;  %v47_v34 = vsub.f32 %v257_v16, %v226_v6  ;;  %v48_v35 = vsub.f32 %v263_v18, %v226_v6  ;;  %v49_v36 = vsub.f32 %v268_v19, %v226_v6 }
   0xb   :  { %v50_v38 = vsub.f32 %v273_v20, %v226_v6  ;;  %v51_v39 = vsub.f32 %v282_v25, %v226_v6  ;;  %v52_v40 = vsub.f32 %v287_v26, %v226_v6  ;;  %v53_v41 = vsub.f32 %v292_v27, %v226_v6 }
   0xe   :  { %v194_v28 = vpop.eup %193 }
   0xf   :  { %v299_v33 = vrot.slane %v194_v28, %v58_v13 }
  0x11   :  { %v60_v42 = vmul.f32 %v299_v33, %v38_v17  ;;  %v61_v43 = vmul.f32 %v299_v33, %v39_v21  ;;  %v62_v44 = vmul.f32 %v299_v33, %v40_v22  ;;  %v63_v45 = vmul.f32 %v299_v33, %v41_v23 }
  0x12   :  { %v64_v47 = vmul.f32 %v299_v33, %v42_v24  ;;  %v65_v48 = vmul.f32 %v299_v33, %v43_v29  ;;  %v66_v49 = vmul.f32 %v299_v33, %v44_v30  ;;  %v67_v50 = vmul.f32 %v299_v33, %v45_v31 }
  0x13   :  { %v83_v51 = vmul.f32 %v310_v37, %v60_v42  ;;  %v84_v52 = vmul.f32 %v310_v37, %v61_v43  ;;  %v85_v53 = vmul.f32 %v310_v37, %v62_v44  ;;  %v86_v54 = vmul.f32 %v310_v37, %v63_v45 }
  0x14   :  { %v87_v55 = vmul.f32 %v310_v37, %v64_v47  ;;  %v88_v56 = vmul.f32 %v310_v37, %v65_v48  ;;  %v89_v57 = vmul.f32 %v310_v37, %v66_v49  ;;  %v90_v58 = vmul.f32 %v310_v37, %v67_v50 }
  0x15   :  { %v106_v59 = vadd.f32 %v327_v46, %v83_v51  ;;  %v107_v60 = vadd.f32 %v327_v46, %v84_v52  ;;  %v108_v61 = vadd.f32 %v327_v46, %v85_v53  ;;  %v109_v62 = vadd.f32 %v327_v46, %v86_v54 }
  0x16   :  { %v110_v63 = vadd.f32 %v327_v46, %v87_v55  ;;  %v111_v0 = vadd.f32 %v327_v46, %v88_v56  ;;  %v112_v1 = vadd.f32 %v327_v46, %v89_v57  ;;  %v113_v2 = vadd.f32 %v327_v46, %v90_v58 }
  0x17   :  { %vm122_vm1 = vcmp.ge.f32.partialorder %v106_v59, 0.0  ;;  %v138_v3 = vmul.f32 0.01, %v106_v59  ;;  %vm123_vm2 = vcmp.ge.f32.partialorder %v107_v60, 0.0  ;;  %v139_v4 = vmul.f32 0.01, %v107_v60 }
  0x18   :  { %vm124_vm3 = vcmp.ge.f32.partialorder %v108_v61, 0.0  ;;  %v140_v5 = vmul.f32 0.01, %v108_v61  ;;  %vm125_vm4 = vcmp.ge.f32.partialorder %v109_v62, 0.0  ;;  %v141_v7 = vmul.f32 0.01, %v109_v62 }
  0x19   :  { %v154_v8 = vsel %vm122_vm1, %v106_v59, %v138_v3  ;;  %v155_v9 = vsel %vm123_vm2, %v107_v60, %v139_v4  ;;  %vm126_vm5 = vcmp.ge.f32.partialorder %v110_v63, 0.0  ;;  %v142_v10 = vmul.f32 0.01, %v110_v63 }
  0x1a   :  { %171 = vst.msk [vmem:[%s462_s4] sm:$0xff] %vm170_vm0, %v154_v8  ;;  %172 = vst.msk [vmem:[%s462_s4 + $0x8] sm:$0xff] %vm170_vm0, %v155_v9  ;;  %v156_v11 = vsel %vm124_vm3, %v108_v61, %v140_v5  ;;  %v157_v12 = vsel %vm125_vm4, %v109_v62, %v141_v7  ;;  %vm127_vm6 = vcmp.ge.f32.partialorder %v111_v0, 0.0  ;;  %v143_v13 = vmul.f32 0.01, %v111_v0 }
  0x1b   :  { %173 = vst.msk [vmem:[%s462_s4 + $0x10] sm:$0xff] %vm170_vm0, %v156_v11  ;;  %174 = vst.msk [vmem:[%s462_s4 + $0x18] sm:$0xff] %vm170_vm0, %v157_v12  ;;  %v158_v14 = vsel %vm126_vm5, %v110_v63, %v142_v10  ;;  %vm128_vm7 = vcmp.ge.f32.partialorder %v112_v1, 0.0  ;;  %v144_v16 = vmul.f32 0.01, %v112_v1  ;;  %vm129_vm8 = vcmp.ge.f32.partialorder %v113_v2, 0.0 }
  0x1c   :  { %175 = vst.msk [vmem:[%s462_s4 + $0x20] sm:$0xff] %vm170_vm0, %v158_v14  ;;  %v159_v17 = vsel %vm127_vm6, %v111_v0, %v143_v13  ;;  %v145_v21 = vmul.f32 0.01, %v113_v2  ;;  %v68_v22 = vmul.f32 %v299_v33, %v46_v32  ;;  %v69_v23 = vmul.f32 %v299_v33, %v47_v34 }
  0x1d   :  { %176 = vst.msk [vmem:[%s462_s4 + $0x28] sm:$0xff] %vm170_vm0, %v159_v17  ;;  %v160_v24 = vsel %vm128_vm7, %v112_v1, %v144_v16  ;;  %v70_v28 = vmul.f32 %v299_v33, %v48_v35  ;;  %v71_v15 = vmul.f32 %v299_v33, %v49_v36  ;;  %v72_v29 = vmul.f32 %v299_v33, %v50_v38 }
  0x1e   :  { %177 = vst.msk [vmem:[%s462_s4 + $0x30] sm:$0xff] %vm170_vm0, %v160_v24  ;;  %v161_v30 = vsel %vm129_vm8, %v113_v2, %v145_v21  ;;  %v91_v18 = vmul.f32 %v310_v37, %v68_v22  ;;  %v92_v31 = vmul.f32 %v310_v37, %v69_v23  ;;  %v73_v19 = vmul.f32 %v299_v33, %v51_v39 }
  0x1f   :  { %178 = vst.msk [vmem:[%s462_s4 + $0x38] sm:$0xff] %vm170_vm0, %v161_v30  ;;  %v93_v20 = vmul.f32 %v310_v37, %v70_v28  ;;  %v94_v32 = vmul.f32 %v310_v37, %v71_v15  ;;  %v95_v34 = vmul.f32 %v310_v37, %v72_v29  ;;  %v74_v35 = vmul.f32 %v299_v33, %v52_v40 }
  0x20   :  { %v114_v25 = vadd.f32 %v327_v46, %v91_v18  ;;  %v115_v36 = vadd.f32 %v327_v46, %v92_v31  ;;  %v96_v38 = vmul.f32 %v310_v37, %v73_v19  ;;  %v75_v39 = vmul.f32 %v299_v33, %v53_v41 }
  0x21   :  { %v116_v42 = vadd.f32 %v327_v46, %v93_v20  ;;  %v117_v43 = vadd.f32 %v327_v46, %v94_v32  ;;  %v118_v44 = vadd.f32 %v327_v46, %v95_v34  ;;  %v97_v26 = vmul.f32 %v310_v37, %v74_v35 }
  0x22   :  { %vm130_vm9 = vcmp.ge.f32.partialorder %v114_v25, 0.0  ;;  %v146_v40 = vmul.f32 0.01, %v114_v25  ;;  %vm131_vm10 = vcmp.ge.f32.partialorder %v115_v36, 0.0  ;;  %v147_v45 = vmul.f32 0.01, %v115_v36 }
  0x23   :  { %vm132_vm11 = vcmp.ge.f32.partialorder %v116_v42, 0.0  ;;  %v148_v47 = vmul.f32 0.01, %v116_v42  ;;  %vm133_vm12 = vcmp.ge.f32.partialorder %v117_v43, 0.0  ;;  %v149_v48 = vmul.f32 0.01, %v117_v43 }
  0x24   :  { %v162_v49 = vsel %vm130_vm9, %v114_v25, %v146_v40  ;;  %v163_v6 = vsel %vm131_vm10, %v115_v36, %v147_v45  ;;  %vm134_vm13 = vcmp.ge.f32.partialorder %v118_v44, 0.0  ;;  %v150_v27 = vmul.f32 0.01, %v118_v44 }
  0x25   :  { %179 = vst.msk [vmem:[%s462_s4 + $0x40] sm:$0xff] %vm170_vm0, %v162_v49  ;;  %180 = vst.msk [vmem:[%s462_s4 + $0x48] sm:$0xff] %vm170_vm0, %v163_v6  ;;  %v164_v33 = vsel %vm132_vm11, %v116_v42, %v148_v47  ;;  %v165_v41 = vsel %vm133_vm12, %v117_v43, %v149_v48  ;;  %v119_v50 = vadd.f32 %v327_v46, %v96_v38 }
  0x26   :  { %v120_v51 = vadd.f32 %v327_v46, %v97_v26  ;;  %181 = vst.msk [vmem:[%s462_s4 + $0x50] sm:$0xff] %vm170_vm0, %v164_v33  ;;  %182 = vst.msk [vmem:[%s462_s4 + $0x58] sm:$0xff] %vm170_vm0, %v165_v41  ;;  %v166_v52 = vsel %vm134_vm13, %v118_v44, %v150_v27  ;;  %v98_v53 = vmul.f32 %v310_v37, %v75_v39 }
  0x27   :  { %183 = vst.msk [vmem:[%s462_s4 + $0x60] sm:$0xff] %vm170_vm0, %v166_v52  ;;  %vm135_vm14 = vcmp.ge.f32.partialorder %v119_v50, 0.0  ;;  %v151_v54 = vmul.f32 0.01, %v119_v50 }
  0x28   :  { %vm136_vm15 = vcmp.ge.f32.partialorder %v120_v51, 0.0  ;;  %v152_v55 = vmul.f32 0.01, %v120_v51  ;;  %v121_v56 = vadd.f32 %v327_v46, %v98_v53 }
  0x29   :  { %v167_v57 = vsel %vm135_vm14, %v119_v50, %v151_v54 }
  0x2a   :  { %v168_v58 = vsel %vm136_vm15, %v120_v51, %v152_v55  ;;  %184 = vst.msk [vmem:[%s462_s4 + $0x68] sm:$0xff] %vm170_vm0, %v167_v57  ;;  %vm137_vm1 = vcmp.ge.f32.partialorder %v121_v56, 0.0  ;;  %v153_v37 = vmul.f32 0.01, %v121_v56 }
  0x2b   :  { %185 = vst.msk [vmem:[%s462_s4 + $0x70] sm:$0xff] %vm170_vm0, %v168_v58 }
  0x2c   :  { %v169_v59 = vsel %vm137_vm1, %v121_v56, %v153_v37 }
  0x2d   :  { %186 = vst.msk [vmem:[%s462_s4 + $0x78] sm:$0xff] %vm170_vm0, %v169_v59 }

// kernel: vae_forward.33
= control target key start
LH: loop header
LB: loop body
LE: loop exit
PB: predicated region body
PF: predicated region fallthrough
CT: control target
= control target key end

     0   :  { %vm81_vm0 = vcmask 130048   ;;  %vm137_vm1 = vcmask 64512   ;;  %s1006_s4 = inlined_call_operand.vmem [shape: bf16[9,16,8], index: 4, kind: input, shape index: {}]   ;;  %s1007_s0 = inlined_call_operand.vmem [shape: bf16[32,16], index: 0, kind: input, shape index: {}]   ;;  %s1008_s1 = inlined_call_operand.vmem [shape: bf16[32,16], index: 1, kind: input, shape index: {}]   ;;  %s1009_s2 = inlined_call_operand.vmem [shape: bf16[32,16], index: 2, kind: input, shape index: {}]   ;;  %s1010_s3 = inlined_call_operand.vmem [shape: bf16[32,16], index: 3, kind: input, shape index: {}]   ;;  %s1011_s5 = inlined_call_operand.vmem [shape: f32[1,8], index: 5, kind: input, shape index: {}]   ;;  %s1012_s6 = inlined_call_operand.vmem [shape: f32[4,32,8], index: 6, kind: output, shape index: {}]  }
   0x1   :  { %v818_v0 = vld [vmem:[%s1006_s4 + $0x20] sm:$0xff]   ;;  %v819_v1 = vld [vmem:[%s1006_s4 + $0x28] sm:$0xff]   ;;  %v822_v4 = vld [vmem:[%s1006_s4 + $0x30] sm:$0xff]  }
   0x2   :  { %744 = vmatprep.subr.bf16.mxu0 %v818_v0  ;;  %v820_v2 = vld [vmem:[%s1007_s0] sm:$0xff]   ;;  %756 = vmatprep.subr.bf16.mxu1 %v819_v1  ;;  %v821_v3 = vld [vmem:[%s1007_s0 + $0x8] sm:$0xff]   ;;  %v823_v5 = vld [vmem:[%s1006_s4 + $0x18] sm:$0xff]  }
   0x3   :  { %745 = vmatpush3.bf16.msra.mxu0 %v818_v0  ;;  %757 = vmatpush3.bf16.msra.mxu1 %v819_v1  ;;  %v824_v6 = vld [vmem:[%s1008_s1] sm:$0xff]   ;;  %v827_v8 = vld [vmem:[%s1006_s4 + $0x8] sm:$0xff]   ;;  %v830_v11 = vld [vmem:[%s1006_s4 + $0x10] sm:$0xff]  }
   0x4   :  { %746 = vmatprep.mubr.msk.bf16.mxu0 %vm81_vm0, %v820_v2  ;;  %758 = vmatprep.mubr.msk.bf16.mxu1 %vm81_vm0, %v820_v2  ;;  %v826_v7 = vld [vmem:[%s1006_s4 + $0x40] sm:$0xff]   ;;  %v825_v9 = vld [vmem:[%s1008_s1 + $0x8] sm:$0xff]   ;;  %v831_v12 = vld [vmem:[%s1006_s4 + $0x38] sm:$0xff]  }
   0x5   :  { %774 = vmatprep.subr.bf16.mxu1 %v822_v4  ;;  %750 = vmatprep.subr.bf16.mxu0 %v823_v5  ;;  %v828_v10 = vld [vmem:[%s1009_s2] sm:$0xff]   ;;  %v829_v13 = vld [vmem:[%s1009_s2 + $0x8] sm:$0xff]  }
   0x6   :  { %747 = vmatmul.mubr.msk.bf16.vlgmr.msra.gmra.mrb[0].mxu0 %vm81_vm0, %v821_v3  ;;  %759 = vmatmul.mubr.msk.bf16.vlgmr.msra.gmra.mrb[0].mxu1 %vm81_vm0, %v821_v3  ;;  %v832_v14 = vld [vmem:[%s1006_s4] sm:$0xff]   ;;  %v834_v16 = vld [vmem:[%s1010_s3 + $0x8] sm:$0xff]  }
   0x7   :  { %775 = vmatpush3.bf16.msra.mxu1 %v822_v4  ;;  %751 = vmatpush3.bf16.msra.mxu0 %v823_v5  ;;  %v833_v15 = vld [vmem:[%s1010_s3] sm:$0xff]  }
   0x8   :  { %752 = vmatprep.mubr.msk.bf16.mxu0 %vm81_vm0, %v824_v6  ;;  %776 = vmatprep.mubr.msk.bf16.mxu1 %vm81_vm0, %v824_v6  ;;  %v669_v18 = vld [vmem:[%s1011_s5] ss:$0 sm:$0xff] }
   0x9   :  { %780 = vmatprep.subr.bf16.mxu1 %v826_v7  ;;  %762 = vmatprep.subr.bf16.mxu0 %v827_v8 }
   0xe   :  { %753 = vmatmul.mubr.msk.bf16.vlgmr.msra.gmra.mrb[4].mxu0 %vm81_vm0, %v825_v9  ;;  %777 = vmatmul.mubr.msk.bf16.vlgmr.msra.gmra.mrb[4].mxu1 %vm81_vm0, %v825_v9 }
   0xf   :  { %763 = vmatpush3.bf16.msra.mxu0 %v827_v8  ;;  %781 = vmatpush3.bf16.msra.mxu1 %v826_v7 }
  0x10   :  { %764 = vmatprep.mubr.msk.bf16.mxu0 %vm81_vm0, %v828_v10  ;;  %782 = vmatprep.mubr.msk.bf16.mxu1 %vm81_vm0, %v820_v2 }
  0x11   :  { %786 = vmatprep.subr.bf16.mxu1 %v830_v11  ;;  %768 = vmatprep.subr.bf16.mxu0 %v831_v12 }
  0x16   :  { %765 = vmatmul.mubr.msk.bf16.vlgmr.msra.gmra.mrb[8].mxu0 %vm81_vm0, %v829_v13 }
  0x17   :  { %769 = vmatpush3.bf16.msra.mxu0 %v831_v12  ;;  %770 = vmatprep.mubr.msk.bf16.mxu0 %vm81_vm0, %v820_v2 }
  0x1a   :  { %783 = vmatmul.mubr.msk.bf16.vlgmr.msra.gmra.mrb[4].mxu1 %vm81_vm0, %v821_v3 }
  0x1b   :  { %787 = vmatpush3.bf16.msra.mxu1 %v830_v11  ;;  %788 = vmatprep.mubr.msk.bf16.mxu1 %vm81_vm0, %v828_v10 }
  0x1c   :  { %792 = vmatprep.subr.bf16.mxu1 %v832_v14 }
  0x22   :  { %771 = vmatmul.mubr.msk.bf16.vlgmr.msra.gmra.mrb[8].mxu0 %vm81_vm0, %v821_v3 }
  0x26   :  { %789 = vmatmul.mubr.msk.bf16.vlgmr.msra.gmra.mrb[4].mxu1 %vm81_vm0, %v829_v13 }
  0x27   :  { %793 = vmatpush3.bf16.msra.mxu1 %v832_v14  ;;  %794 = vmatprep.mubr.msk.bf16.mxu1 %vm81_vm0, %v833_v15 }
  0x32   :  { %795 = vmatmul.mubr.msk.bf16.vlgmr.msra.gmra.mrb[4].mxu1 %vm81_vm0, %v834_v16 }
  0xd9   :  { %v748_v17 = vpop.f32.mrb[0].mxu0  ;;  %v760_v19 = vpop.f32.mrb[0].mxu1 }
  0xda   :  { %v131_v20 = vadd.f32 %v748_v17, %v669_v18  ;;  %v122_v21 = vpop.f32.mrb[1].mxu0  ;;  %v253_v22 = vpop.f32.mrb[1].mxu1 }
  0xdb   :  { %v123_v23 = vadd.f32 %v669_v18, %v122_v21  ;;  %v749_v24 = vpop.f32.mrb[2].mxu0  ;;  %v761_v25 = vpop.f32.mrb[2].mxu1 }
  0xdc   :  { %140 = vst.msk [vmem:[%s1012_s6 + $0x10] sm:$0xff] %vm137_vm1, %v131_v20  ;;  %v134_v26 = vadd.f32 %v749_v24, %v669_v18  ;;  %v125_v27 = vpop.f32.mrb[3].mxu0  ;;  %v256_v28 = vpop.f32.mrb[3].mxu1 }
  0xdd   :  { %138 = vst.msk [vmem:[%s1012_s6] sm:$0xff] %vm137_vm1, %v123_v23  ;;  %v126_v29 = vadd.f32 %v669_v18, %v125_v27 }
  0xde   :  { %141 = vst.msk [vmem:[%s1012_s6 + $0x18] sm:$0xff] %vm137_vm1, %v134_v26 }
  0xdf   :  { %139 = vst.msk [vmem:[%s1012_s6 + $0x8] sm:$0xff] %vm137_vm1, %v126_v29 }
  0xe1   :  { %v754_v30 = vpop.f32.mrb[4].mxu0 }
  0xe2   :  { %v262_v31 = vadd.f32 %v760_v19, %v754_v30  ;;  %v198_v32 = vpop.f32.mrb[5].mxu0 }
  0xe3   :  { %v254_v33 = vadd.f32 %v253_v22, %v198_v32  ;;  %v755_v34 = vpop.f32.mrb[6].mxu0 }
  0xe4   :  { %v270_v35 = vadd.f32 %v669_v18, %v262_v31  ;;  %v265_v36 = vadd.f32 %v761_v25, %v755_v34  ;;  %v201_v37 = vpop.f32.mrb[7].mxu0 }
  0xe5   :  { %v268_v38 = vadd.f32 %v669_v18, %v254_v33  ;;  %v257_v39 = vadd.f32 %v256_v28, %v201_v37 }
  0xe6   :  { %685 = vst.msk [vmem:[%s1012_s6 + $0x30] sm:$0xff] %vm137_vm1, %v270_v35  ;;  %v271_v40 = vadd.f32 %v669_v18, %v265_v36 }
  0xe7   :  { %683 = vst.msk [vmem:[%s1012_s6 + $0x20] sm:$0xff] %vm137_vm1, %v268_v38  ;;  %v269_v41 = vadd.f32 %v669_v18, %v257_v39 }
  0xe8   :  { %686 = vst.msk [vmem:[%s1012_s6 + $0x38] sm:$0xff] %vm137_vm1, %v271_v40 }
  0xe9   :  { %684 = vst.msk [vmem:[%s1012_s6 + $0x28] sm:$0xff] %vm137_vm1, %v269_v41 }
  0xf5   :  { %v772_v42 = vpop.f32.mrb[8].mxu0 }
  0xf6   :  { %v405_v43 = vadd.f32 %v772_v42, %v669_v18  ;;  %v388_v44 = vpop.f32.mrb[9].mxu0 }
  0xf7   :  { %v403_v45 = vadd.f32 %v669_v18, %v388_v44  ;;  %v773_v46 = vpop.f32.mrb[10].mxu0 }
  0xf8   :  { %697 = vst.msk [vmem:[%s1012_s6 + $0x50] sm:$0xff] %vm137_vm1, %v405_v43  ;;  %v406_v47 = vadd.f32 %v773_v46, %v669_v18  ;;  %v391_v48 = vpop.f32.mrb[11].mxu0 }
  0xf9   :  { %695 = vst.msk [vmem:[%s1012_s6 + $0x40] sm:$0xff] %vm137_vm1, %v403_v45  ;;  %v404_v49 = vadd.f32 %v669_v18, %v391_v48 }
  0xfa   :  { %698 = vst.msk [vmem:[%s1012_s6 + $0x58] sm:$0xff] %vm137_vm1, %v406_v47 }
  0xfb   :  { %696 = vst.msk [vmem:[%s1012_s6 + $0x48] sm:$0xff] %vm137_vm1, %v404_v49 }
 0x105   :  { %v796_v50 = vpop.f32.mrb[4].mxu1 }
 0x106   :  { %v658_v51 = vadd.f32 %v796_v50, %v669_v18  ;;  %v637_v52 = vpop.f32.mrb[5].mxu1 }
 0x107   :  { %v656_v53 = vadd.f32 %v669_v18, %v637_v52  ;;  %v797_v54 = vpop.f32.mrb[6].mxu1 }
 0x108   :  { %715 = vst.msk [vmem:[%s1012_s6 + $0x70] sm:$0xff] %vm137_vm1, %v658_v51  ;;  %v659_v55 = vadd.f32 %v797_v54, %v669_v18  ;;  %v640_v56 = vpop.f32.mrb[7].mxu1 }
 0x109   :  { %713 = vst.msk [vmem:[%s1012_s6 + $0x60] sm:$0xff] %vm137_vm1, %v656_v53  ;;  %v657_v57 = vadd.f32 %v669_v18, %v640_v56 }
 0x10a   :  { %716 = vst.msk [vmem:[%s1012_s6 + $0x78] sm:$0xff] %vm137_vm1, %v659_v55 }
 0x10b   :  { %714 = vst.msk [vmem:[%s1012_s6 + $0x68] sm:$0xff] %vm137_vm1, %v657_v57 }

// kernel: vae_forward.37
= control target key start
LH: loop header
LB: loop body
LE: loop exit
PB: predicated region body
PF: predicated region fallthrough
CT: control target
= control target key end

     0   :  { %vm12_vm0 = vcmask 58368   ;;  %vm78_vm1 = vcmask 64512   ;;  %v433_v0 = vmov 0.0   ;;  %vm409_vm2 = vcmask 1040384   ;;  %s1314_s0 = inlined_call_operand.vmem [shape: f32[512,8], index: 0, kind: input, shape index: {}]   ;;  %s1315_s1 = inlined_call_operand.vmem [shape: f32[2,8], index: 1, kind: output, shape index: {}]  }
   0x1   :  { %13 = vst.msk [vmem:[%s1315_s1] sm:$0x3] %vm12_vm0, %v433_v0  ;;  %v451_v1 = vld [vmem:[%s1314_s0] sm:$0xff]  ;;  %v456_v2 = vld [vmem:[%s1314_s0 + $0x8] sm:$0xff]  ;;  %v461_v3 = vld [vmem:[%s1314_s0 + $0x10] sm:$0xff] }
   0x2   :  { %v79_v4 = vsel %vm78_vm1, %v451_v1, 0.0  ;;  %v80_v5 = vsel %vm78_vm1, %v456_v2, 0.0  ;;  %v82_v6 = vsel %vm78_vm1, %v461_v3, 0.0  ;;  %v472_v7 = vld [vmem:[%s1314_s0 + $0x18] sm:$0xff]  ;;  %v479_v10 = vld [vmem:[%s1314_s0 + $0x20] sm:$0xff]  ;;  %v486_v13 = vld [vmem:[%s1314_s0 + $0x28] sm:$0xff] }
   0x3   :  { %v81_v8 = vadd.f32 %v80_v5, %v79_v4  ;;  %v84_v9 = vsel %vm78_vm1, %v472_v7, 0.0  ;;  %v86_v12 = vsel %vm78_vm1, %v479_v10, 0.0  ;;  %v88_v15 = vsel %vm78_vm1, %v486_v13, 0.0  ;;  %v493_v16 = vld [vmem:[%s1314_s0 + $0x30] sm:$0xff]  ;;  %v498_v18 = vld [vmem:[%s1314_s0 + $0x38] sm:$0xff]  ;;  %v503_v19 = vld [vmem:[%s1314_s0 + $0x40] sm:$0xff] }
   0x4   :  { %v90_v20 = vsel %vm78_vm1, %v493_v16, 0.0  ;;  %v510_v21 = vld [vmem:[%s1314_s0 + $0x48] sm:$0xff]  ;;  %v515_v22 = vld [vmem:[%s1314_s0 + $0x50] sm:$0xff]  ;;  %v520_v23 = vld [vmem:[%s1314_s0 + $0x58] sm:$0xff]  ;;  %v92_v25 = vsel %vm78_vm1, %v498_v18, 0.0  ;;  %v94_v26 = vsel %vm78_vm1, %v503_v19, 0.0 }
   0x5   :  { %v83_v11 = vadd.f32 %v82_v6, %v81_v8  ;;  %v529_v27 = vld [vmem:[%s1314_s0 + $0x108] sm:$0xff]  ;;  %v534_v28 = vld [vmem:[%s1314_s0 + $0x110] sm:$0xff]  ;;  %v539_v29 = vld [vmem:[%s1314_s0 + $0x118] sm:$0xff]  ;;  %v96_v30 = vsel %vm78_vm1, %v510_v21, 0.0  ;;  %v98_v31 = vsel %vm78_vm1, %v515_v22, 0.0  ;;  %v547_v32 = vsel %vm78_vm1, %v520_v23, 0.0 }
   0x6   :  { %v552_v33 = vld [vmem:[%s1314_s0 + $0x120] sm:$0xff]  ;;  %v557_v34 = vld [vmem:[%s1314_s0 + $0x128] sm:$0xff]  ;;  %v562_v35 = vld [vmem:[%s1314_s0 + $0x130] sm:$0xff]  ;;  %v566_v37 = vsel %vm78_vm1, %v529_v27, 0.0  ;;  %v570_v38 = vsel %vm78_vm1, %v534_v28, 0.0  ;;  %v574_v39 = vsel %vm78_vm1, %v539_v29, 0.0 }
   0x7   :  { %v85_v14 = vadd.f32 %v84_v9, %v83_v11  ;;  %1334 = vst [vmem:[#allocation2_spill] sm:$0xff] %v566_v37  ;;  %1335 = vst [vmem:[#allocation3_spill] sm:$0xff] %v570_v38  ;;  %v579_v40 = vld [vmem:[%s1314_s0 + $0x138] sm:$0xff]  ;;  %v584_v41 = vld [vmem:[%s1314_s0 + $0x140] sm:$0xff]  ;;  %v593_v43 = vsel %vm78_vm1, %v552_v33, 0.0  ;;  %v597_v44 = vsel %vm78_vm1, %v557_v34, 0.0  ;;  %v214_v37 = vmul.f32 %v461_v3, %v461_v3 }
   0x8   :  { %1336 = vst [vmem:[#allocation4_spill] sm:$0xff] %v574_v39  ;;  %v589_v42 = vld [vmem:[%s1314_s0 + $0x148] sm:$0xff]  ;;  %1337 = vst [vmem:[#allocation5_spill] sm:$0xff] %v593_v43  ;;  %v601_v45 = vsel %vm78_vm1, %v562_v35, 0.0  ;;  %v606_v46 = vld [vmem:[%s1314_s0 + $0x150] sm:$0xff]  ;;  %v620_v50 = vsel %vm78_vm1, %v579_v40, 0.0 }
   0x9   :  { %v87_v17 = vadd.f32 %v86_v12, %v85_v14  ;;  %1338 = vst [vmem:[#allocation6_spill] sm:$0xff] %v597_v44  ;;  %1339 = vst [vmem:[#allocation7_spill] sm:$0xff] %v601_v45  ;;  %v611_v47 = vld [vmem:[%s1314_s0 + $0x158] sm:$0xff]  ;;  %v616_v48 = vld [vmem:[%s1314_s0 + $0x160] sm:$0xff]  ;;  %v624_v51 = vsel %vm78_vm1, %v584_v41, 0.0  ;;  %v628_v52 = vsel %vm78_vm1, %v589_v42, 0.0 }
   0xa   :  { %1340 = vst [vmem:[#allocation8_spill] sm:$0xff] %v620_v50  ;;  %1341 = vst [vmem:[#allocation9_spill] sm:$0xff] %v624_v51  ;;  %v633_v53 = vld [vmem:[%s1314_s0 + $0x168] sm:$0xff]  ;;  %v638_v54 = vld [vmem:[%s1314_s0 + $0x170] sm:$0xff]  ;;  %v647_v56 = vsel %vm78_vm1, %v606_v46, 0.0  ;;  %v651_v57 = vsel %vm78_vm1, %v611_v47, 0.0 }
   0xb   :  { %v89_v24 = vadd.f32 %v88_v15, %v87_v17  ;;  %1342 = vst [vmem:[#allocation10_spill] sm:$0xff] %v628_v52  ;;  %v643_v55 = vld [vmem:[%s1314_s0 + $0x178] sm:$0xff]  ;;  %1343 = vst [vmem:[#allocation11_spill] sm:$0xff] %v647_v56  ;;  %v655_v58 = vsel %vm78_vm1, %v616_v48, 0.0  ;;  %v660_v59 = vld [vmem:[%s1314_s0 + $0x180] sm:$0xff]  ;;  %v674_v63 = vsel %vm78_vm1, %v633_v53, 0.0 }
   0xc   :  { %1344 = vst [vmem:[#allocation12_spill] sm:$0xff] %v651_v57  ;;  %1345 = vst [vmem:[#allocation13_spill] sm:$0xff] %v655_v58  ;;  %v665_v60 = vld [vmem:[%s1314_s0 + $0x188] sm:$0xff]  ;;  %v670_v61 = vld [vmem:[%s1314_s0 + $0x190] sm:$0xff]  ;;  %v678_v0 = vsel %vm78_vm1, %v638_v54, 0.0  ;;  %v682_v4 = vsel %vm78_vm1, %v643_v55, 0.0 }
   0xd   :  { %v91_v36 = vadd.f32 %v90_v20, %v89_v24  ;;  %1346 = vst [vmem:[#allocation14_spill] sm:$0xff] %v674_v63  ;;  %1347 = vst [vmem:[#allocation15_spill] sm:$0xff] %v678_v0  ;;  %v687_v5 = vld [vmem:[%s1314_s0 + $0x198] sm:$0xff]  ;;  %v692_v6 = vld [vmem:[%s1314_s0 + $0x1a0] sm:$0xff]  ;;  %v701_v9 = vsel %vm78_vm1, %v660_v59, 0.0  ;;  %v705_v11 = vsel %vm78_vm1, %v665_v60, 0.0 }
   0xe   :  { %1348 = vst [vmem:[#allocation16_spill] sm:$0xff] %v682_v4  ;;  %v697_v8 = vld [vmem:[%s1314_s0 + $0x1a8] sm:$0xff]  ;;  %1349 = vst [vmem:[#allocation17_spill] sm:$0xff] %v701_v9  ;;  %v709_v12 = vsel %vm78_vm1, %v670_v61, 0.0  ;;  %v714_v14 = vld [vmem:[%s1314_s0 + $0x60] sm:$0xff] }
   0xf   :  { %v93_v49 = vadd.f32 %v92_v25, %v91_v36  ;;  %1350 = vst [vmem:[#allocation18_spill] sm:$0xff] %v705_v11  ;;  %1351 = vst [vmem:[#allocation19_spill] sm:$0xff] %v709_v12  ;;  %v719_v15 = vld [vmem:[%s1314_s0 + $0x1b0] sm:$0xff]  ;;  %v724_v17 = vld [vmem:[%s1314_s0 + $0x1b8] sm:$0xff]  ;;  %v733_v25 = vsel %vm78_vm1, %v687_v5, 0.0  ;;  %v741_v36 = vsel %vm78_vm1, %v697_v8, 0.0 }
  0x10   :  { %v729_v20 = vld [vmem:[%s1314_s0 + $0x1c0] sm:$0xff]  ;;  %1352 = vst [vmem:[#allocation20_spill] sm:$0xff] %v733_v25  ;;  %1354 = vst [vmem:[#allocation22_spill] sm:$0xff] %v741_v36  ;;  %v764_v36 = vsel %vm78_vm1, %v724_v17, 0.0  ;;  %v778_v11 = vld [vmem:[%s1314_s0 + $0x1e8] sm:$0xff] }
  0x11   :  { %v95_v62 = vadd.f32 %v94_v26, %v93_v49  ;;  %v737_v26 = vsel %vm78_vm1, %v692_v6, 0.0  ;;  %v746_v49 = vld [vmem:[%s1314_s0 + $0x1c8] sm:$0xff]  ;;  %1356 = vst [vmem:[#allocation24_spill] sm:$0xff] %v764_v36  ;;  %v768_v25 = vsel %vm78_vm1, %v729_v20, 0.0  ;;  %v773_v12 = vld [vmem:[%s1314_s0 + $0x1e0] sm:$0xff]  ;;  %v800_v0 = vld [vmem:[%s1314_s0 + $0x1f8] sm:$0xff] }
  0x12   :  { %1353 = vst [vmem:[#allocation21_spill] sm:$0xff] %v737_v26  ;;  %v760_v26 = vsel %vm78_vm1, %v719_v15, 0.0  ;;  %1357 = vst [vmem:[#allocation25_spill] sm:$0xff] %v768_v25  ;;  %v787_v9 = vsel %vm78_vm1, %v746_v49, 0.0  ;;  %v822_v58 = vsel %vm78_vm1, %v800_v0, 0.0  ;;  %v851_v56 = vld [vmem:[%s1314_s0 + $0x90] sm:$0xff] }
  0x13   :  { %v97_v24 = vadd.f32 %v96_v30, %v95_v62  ;;  %v751_v30 = vld [vmem:[%s1314_s0 + $0x1d0] sm:$0xff]  ;;  %v756_v62 = vld [vmem:[%s1314_s0 + $0x1d8] sm:$0xff]  ;;  %1355 = vst [vmem:[#allocation23_spill] sm:$0xff] %v760_v26  ;;  %1359 = vst [vmem:[#allocation27_spill] sm:$0xff] %v787_v9  ;;  %v810_v9 = vsel %vm78_vm1, %v778_v11, 0.0 }
  0x14   :  { %v783_v26 = vld [vmem:[%s1314_s0 + $0x1f0] sm:$0xff]  ;;  %v791_v25 = vsel %vm78_vm1, %v751_v30, 0.0  ;;  %v795_v4 = vsel %vm78_vm1, %v756_v62, 0.0  ;;  %1362 = vst [vmem:[#allocation30_spill] sm:$0xff] %v800_v0  ;;  %1364 = vst [vmem:[#allocation32_spill] sm:$0xff] %v810_v9  ;;  %v856_v52 = vld [vmem:[%s1314_s0 + $0x98] sm:$0xff] }
  0x15   :  { %1358 = vst [vmem:[#allocation26_spill] sm:$0xff] %v783_v26  ;;  %v99_v36 = vadd.f32 %v98_v31, %v97_v24  ;;  %1360 = vst [vmem:[#allocation28_spill] sm:$0xff] %v791_v25  ;;  %v102_v31 = vsel %vm78_vm1, %v714_v14, 0.0  ;;  %v806_v24 = vsel %vm78_vm1, %v773_v12, 0.0  ;;  %v814_v25 = vsel %vm78_vm1, %v783_v26, 0.0  ;;  %v28_v9 = vld [vmem:[%s1314_s0 + $0x70] sm:$0xff] }
  0x16   :  { %1361 = vst [vmem:[#allocation29_spill] sm:$0xff] %v795_v4  ;;  %1363 = vst [vmem:[#allocation31_spill] sm:$0xff] %v806_v24  ;;  %v27_v4 = vld [vmem:[%s1314_s0 + $0x68] sm:$0xff]  ;;  %v861_v51 = vld [vmem:[%s1314_s0 + $0xa0] sm:$0xff]  ;;  %v116_v39 = vsel %vm78_vm1, %v856_v52, 0.0 }
  0x17   :  { %1365 = vst [vmem:[#allocation33_spill] sm:$0xff] %v814_v25  ;;  %v101_v63 = vadd.f32 %v547_v32, %v99_v36  ;;  %1366 = vst [vmem:[#allocation34_spill] sm:$0xff] %v822_v58  ;;  %v104_v24 = vsel %vm78_vm1, %v27_v4, 0.0  ;;  %v831_v25 = vld [vmem:[%s1314_s0 + $0x78] sm:$0xff]  ;;  %v836_v32 = vld [vmem:[%s1314_s0 + $0x80] sm:$0xff]  ;;  %v106_v58 = vsel %vm78_vm1, %v28_v9, 0.0 }
  0x18   :  { %1367 = vst [vmem:[#allocation35_spill] sm:$0xff] %v831_v25  ;;  %1368 = vst [vmem:[#allocation36_spill] sm:$0xff] %v836_v32  ;;  %v841_v36 = vld [vmem:[%s1314_s0 + $0x88] sm:$0xff]  ;;  %v877_v43 = vld [vmem:[%s1314_s0 + $0xb0] sm:$0xff]  ;;  %v118_v38 = vsel %vm78_vm1, %v861_v51, 0.0 }
  0x19   :  { %v103_v57 = vadd.f32 %v102_v31, %v101_v63  ;;  %1369 = vst [vmem:[#allocation37_spill] sm:$0xff] %v841_v36  ;;  %v212_v63 = vmul.f32 %v451_v1, %v451_v1  ;;  %v213_v31 = vmul.f32 %v456_v2, %v456_v2  ;;  %1370 = vst [vmem:[#allocation38_spill] sm:$0xff] %v851_v56  ;;  %v108_v1 = vsel %vm78_vm1, %v831_v25, 0.0  ;;  %v872_v44 = vld [vmem:[%s1314_s0 + $0xa8] sm:$0xff]  ;;  %v918_v0 = vld [vmem:[%s1314_s0 + $0xd8] sm:$0xff] }
  0x1a   :  { %1371 = vst [vmem:[#allocation39_spill] sm:$0xff] %v856_v52  ;;  %1372 = vst [vmem:[#allocation40_spill] sm:$0xff] %v861_v51  ;;  %v110_v2 = vsel %vm78_vm1, %v836_v32, 0.0  ;;  %v112_v45 = vsel %vm78_vm1, %v841_v36, 0.0  ;;  %v895_v36 = vld [vmem:[%s1314_s0 + $0xc0] sm:$0xff]  ;;  %v900_v32 = vld [vmem:[%s1314_s0 + $0xc8] sm:$0xff]  ;;  %v215_v25 = vmul.f32 %v472_v7, %v472_v7 }
  0x1b   :  { %v105_v50 = vadd.f32 %v104_v24, %v103_v57  ;;  %1373 = vst [vmem:[#allocation41_spill] sm:$0xff] %v872_v44  ;;  %1374 = vst [vmem:[#allocation42_spill] sm:$0xff] %v877_v43  ;;  %v882_v57 = vld [vmem:[%s1314_s0 + $0xb8] sm:$0xff]  ;;  %v114_v24 = vsel %vm78_vm1, %v851_v56, 0.0  ;;  %v905_v52 = vld [vmem:[%s1314_s0 + $0xd0] sm:$0xff]  ;;  %v120_v51 = vsel %vm78_vm1, %v872_v44, 0.0 }
  0x1c   :  { %1375 = vst [vmem:[#allocation43_spill] sm:$0xff] %v882_v57  ;;  %1376 = vst [vmem:[#allocation44_spill] sm:$0xff] %v895_v36  ;;  %v911_v3 = vsel %vm78_vm1, %v877_v43, 0.0  ;;  %v923_v26 = vld [vmem:[%s1314_s0 + $0xe0] sm:$0xff]  ;;  %v935_v7 = vsel %vm78_vm1, %v900_v32, 0.0  ;;  %v939_v43 = vsel %vm78_vm1, %v905_v52, 0.0 }
  0x1d   :  { %1377 = vst [vmem:[#allocation45_spill] sm:$0xff] %v900_v32  ;;  %1378 = vst [vmem:[#allocation46_spill] sm:$0xff] %v905_v52  ;;  %v107_v56 = vadd.f32 %v106_v58, %v105_v50  ;;  %v927_v50 = vsel %vm78_vm1, %v882_v57, 0.0  ;;  %v931_v58 = vsel %vm78_vm1, %v895_v36, 0.0  ;;  %v944_v44 = vld [vmem:[%s1314_s0 + $0xe8] sm:$0xff]  ;;  %v949_v57 = vld [vmem:[%s1314_s0 + $0xf0] sm:$0xff]  ;;  %v216_v52 = vmul.f32 %v479_v10, %v479_v10 }
  0x1e   :  { %1379 = vst [vmem:[#allocation47_spill] sm:$0xff] %v918_v0  ;;  %1380 = vst [vmem:[#allocation48_spill] sm:$0xff] %v923_v26  ;;  %v957_v32 = vsel %vm78_vm1, %v923_v26, 0.0  ;;  %v219_v26 = vmul.f32 %v498_v18, %v498_v18  ;;  %v220_v10 = vmul.f32 %v503_v19, %v503_v19  ;;  %v245_v18 = vmul.f32 %v529_v27, %v529_v27 }
  0x1f   :  { %1381 = vst [vmem:[#allocation49_spill] sm:$0xff] %v931_v58  ;;  %1382 = vst [vmem:[#allocation50_spill] sm:$0xff] %v935_v7  ;;  %v109_v36 = vadd.f32 %v108_v1, %v107_v56  ;;  %v953_v58 = vsel %vm78_vm1, %v918_v0, 0.0  ;;  %v967_v7 = vsel %vm78_vm1, %v949_v57, 0.0  ;;  %v217_v56 = vmul.f32 %v486_v13, %v486_v13 }
  0x20   :  { %1383 = vst [vmem:[#allocation51_spill] sm:$0xff] %v939_v43  ;;  %1384 = vst [vmem:[#allocation52_spill] sm:$0xff] %v944_v44  ;;  %v963_v43 = vsel %vm78_vm1, %v944_v44, 0.0  ;;  %v218_v1 = vmul.f32 %v493_v16, %v493_v16  ;;  %v221_v44 = vmul.f32 %v510_v21, %v510_v21  ;;  %v224_v13 = vmul.f32 %v714_v14, %v714_v14 }
  0x21   :  { %1385 = vst [vmem:[#allocation53_spill] sm:$0xff] %v949_v57  ;;  %1386 = vst [vmem:[#allocation54_spill] sm:$0xff] %v967_v7  ;;  %v111_v0 = vadd.f32 %v110_v2, %v109_v36  ;;  %v222_v57 = vmul.f32 %v515_v22, %v515_v22  ;;  %v223_v7 = vmul.f32 %v520_v23, %v520_v23 }
  0x22   :  { %v985_v16 = vmul.f32 %v27_v4, %v27_v4  ;;  %v987_v2 = vmul.f32 %v28_v9, %v28_v9  ;;  %v246_v19 = vmul.f32 %v534_v28, %v534_v28  ;;  %v247_v21 = vmul.f32 %v539_v29, %v539_v29 }
  0x23   :  { %v113_v36 = vadd.f32 %v112_v45, %v111_v0  ;;  %v248_v22 = vmul.f32 %v552_v33, %v552_v33  ;;  %v249_v23 = vmul.f32 %v557_v34, %v557_v34  ;;  %v250_v45 = vmul.f32 %v562_v35, %v562_v35 }
  0x24   :  { %v251_v4 = vmul.f32 %v579_v40, %v579_v40  ;;  %v252_v27 = vmul.f32 %v584_v41, %v584_v41  ;;  %v253_v28 = vmul.f32 %v589_v42, %v589_v42  ;;  %v254_v29 = vmul.f32 %v606_v46, %v606_v46 }
  0x25   :  { %v115_v0 = vadd.f32 %v114_v24, %v113_v36  ;;  %v255_v33 = vmul.f32 %v611_v47, %v611_v47  ;;  %v276_v34 = vsel %vm78_vm1, %v212_v63, 0.0  ;;  %v277_v35 = vsel %vm78_vm1, %v213_v31, 0.0 }
  0x26   :  { %v256_v40 = vmul.f32 %v616_v48, %v616_v48  ;;  %v278_v14 = vadd.f32 %v277_v35, %v276_v34  ;;  %v279_v41 = vsel %vm78_vm1, %v214_v37, 0.0  ;;  %v257_v42 = vmul.f32 %v633_v53, %v633_v53  ;;  %v1388_v34 = vld [vmem:[#allocation30_spill] sm:$0xff] }
  0x27   :  { %v117_v9 = vadd.f32 %v116_v39, %v115_v0  ;;  %v258_v46 = vmul.f32 %v638_v54, %v638_v54  ;;  %v259_v47 = vmul.f32 %v643_v55, %v643_v55  ;;  %v281_v63 = vsel %vm78_vm1, %v215_v25, 0.0  ;;  %v1387_v0 = vld [vmem:[#allocation26_spill] sm:$0xff] }
  0x28   :  { %v260_v39 = vmul.f32 %v660_v59, %v660_v59  ;;  %v261_v48 = vmul.f32 %v665_v60, %v665_v60  ;;  %v280_v31 = vadd.f32 %v279_v41, %v278_v14  ;;  %v262_v37 = vmul.f32 %v670_v61, %v670_v61  ;;  %v1389_v41 = vld [vmem:[#allocation49_spill] sm:$0xff] }
  0x29   :  { %v119_v24 = vadd.f32 %v118_v38, %v117_v9  ;;  %v263_v53 = vmul.f32 %v687_v5, %v687_v5  ;;  %v264_v54 = vmul.f32 %v692_v6, %v692_v6  ;;  %v283_v55 = vsel %vm78_vm1, %v216_v52, 0.0 }
  0x2a   :  { %v265_v38 = vmul.f32 %v697_v8, %v697_v8  ;;  %v266_v59 = vmul.f32 %v719_v15, %v719_v15  ;;  %v282_v60 = vadd.f32 %v281_v63, %v280_v31  ;;  %v267_v36 = vmul.f32 %v724_v17, %v724_v17 }
  0x2b   :  { %v121_v25 = vadd.f32 %v120_v51, %v119_v24  ;;  %v268_v61 = vmul.f32 %v729_v20, %v729_v20  ;;  %v269_v5 = vmul.f32 %v746_v49, %v746_v49  ;;  %v285_v6 = vsel %vm78_vm1, %v217_v56, 0.0 }
  0x2c   :  { %v270_v52 = vmul.f32 %v751_v30, %v751_v30  ;;  %v271_v8 = vmul.f32 %v756_v62, %v756_v62  ;;  %v284_v15 = vadd.f32 %v283_v55, %v282_v60  ;;  %v272_v17 = vmul.f32 %v773_v12, %v773_v12 }
  0x2d   :  { %v123_v51 = vadd.f32 %v911_v3, %v121_v25  ;;  %v273_v20 = vmul.f32 %v778_v11, %v778_v11  ;;  %v274_v49 = vmul.f32 %v1387_v0, %v1387_v0  ;;  %v287_v56 = vsel %vm78_vm1, %v218_v1, 0.0  ;;  %v1391_v25 = vld [vmem:[#allocation51_spill] sm:$0xff] }
  0x2e   :  { %v275_v30 = vmul.f32 %v1388_v34, %v1388_v34  ;;  %v286_v35 = vadd.f32 %v285_v6, %v284_v15  ;;  %v289_v62 = vsel %vm78_vm1, %v219_v26, 0.0  ;;  %v291_v9 = vsel %vm78_vm1, %v220_v10, 0.0  ;;  %v1393_v34 = vld [vmem:[#allocation54_spill] sm:$0xff] }
  0x2f   :  { %v125_v3 = vadd.f32 %v927_v50, %v123_v51  ;;  %v293_v12 = vsel %vm78_vm1, %v221_v44, 0.0  ;;  %v295_v14 = vsel %vm78_vm1, %v222_v57, 0.0  ;;  %v297_v11 = vsel %vm78_vm1, %v223_v7, 0.0  ;;  %v1390_v7 = vld [vmem:[#allocation50_spill] sm:$0xff] }
  0x30   :  { %v288_v24 = vadd.f32 %v287_v56, %v286_v35  ;;  %v299_v1 = vsel %vm78_vm1, %v224_v13, 0.0  ;;  %v1068_v50 = vsel %vm78_vm1, %v245_v18, 0.0  ;;  %v1071_v31 = vsel %vm78_vm1, %v246_v19, 0.0  ;;  %v1392_v56 = vld [vmem:[#allocation35_spill] sm:$0xff] }
  0x31   :  { %v127_v63 = vadd.f32 %v1389_v41, %v125_v3  ;;  %v1074_v26 = vsel %vm78_vm1, %v247_v21, 0.0  ;;  %v1077_v44 = vsel %vm78_vm1, %v248_v22, 0.0  ;;  %v1080_v57 = vsel %vm78_vm1, %v249_v23, 0.0 }
  0x32   :  { %v290_v55 = vadd.f32 %v289_v62, %v288_v24  ;;  %v1084_v13 = vsel %vm78_vm1, %v250_v45, 0.0  ;;  %v1087_v18 = vsel %vm78_vm1, %v251_v4, 0.0  ;;  %v1090_v19 = vsel %vm78_vm1, %v252_v27, 0.0  ;;  %v1394_v62 = vld [vmem:[#allocation36_spill] sm:$0xff] }
  0x33   :  { %v129_v10 = vadd.f32 %v1390_v7, %v127_v63  ;;  %v1093_v21 = vsel %vm78_vm1, %v253_v28, 0.0  ;;  %v1096_v22 = vsel %vm78_vm1, %v254_v29, 0.0  ;;  %v1099_v23 = vsel %vm78_vm1, %v255_v33, 0.0 }
  0x34   :  { %v292_v6 = vadd.f32 %v291_v9, %v290_v55  ;;  %v1103_v45 = vsel %vm78_vm1, %v256_v40, 0.0  ;;  %v1106_v4 = vsel %vm78_vm1, %v257_v42, 0.0  ;;  %v1109_v27 = vsel %vm78_vm1, %v258_v46, 0.0 }
  0x35   :  { %v131_v60 = vadd.f32 %v1391_v25, %v129_v10  ;;  %v1112_v28 = vsel %vm78_vm1, %v259_v47, 0.0  ;;  %v1115_v29 = vsel %vm78_vm1, %v260_v39, 0.0  ;;  %v1118_v33 = vsel %vm78_vm1, %v261_v48, 0.0  ;;  %v1396_v10 = vld [vmem:[#allocation38_spill] sm:$0xff] }
  0x36   :  { %v294_v15 = vadd.f32 %v293_v12, %v292_v6  ;;  %v1122_v40 = vsel %vm78_vm1, %v262_v37, 0.0  ;;  %v1125_v42 = vsel %vm78_vm1, %v263_v53, 0.0  ;;  %v1128_v46 = vsel %vm78_vm1, %v264_v54, 0.0  ;;  %v1397_v25 = vld [vmem:[#allocation2_spill] sm:$0xff] }
  0x37   :  { %v133_v51 = vadd.f32 %v953_v58, %v131_v60  ;;  %v1131_v47 = vsel %vm78_vm1, %v265_v38, 0.0  ;;  %v1134_v39 = vsel %vm78_vm1, %v266_v59, 0.0  ;;  %v1137_v48 = vsel %vm78_vm1, %v267_v36, 0.0 }
  0x38   :  { %v296_v0 = vadd.f32 %v295_v14, %v294_v15  ;;  %v1141_v37 = vsel %vm78_vm1, %v268_v61, 0.0  ;;  %v1144_v53 = vsel %vm78_vm1, %v269_v5, 0.0  ;;  %v1147_v54 = vsel %vm78_vm1, %v270_v52, 0.0 }
  0x39   :  { %v135_v58 = vadd.f32 %v957_v32, %v133_v51  ;;  %v1150_v38 = vsel %vm78_vm1, %v271_v8, 0.0  ;;  %v1153_v59 = vsel %vm78_vm1, %v272_v17, 0.0  ;;  %v1156_v36 = vsel %vm78_vm1, %v273_v20, 0.0  ;;  %v1161_v32 = vld [vmem:[%s1314_s0 + $0xf8] sm:$0xff]  ;;  %v1398_v51 = vld [vmem:[#allocation39_spill] sm:$0xff] }
  0x3a   :  { %v298_v5 = vadd.f32 %v297_v11, %v296_v0  ;;  %v1165_v52 = vsel %vm78_vm1, %v274_v49, 0.0  ;;  %v1168_v8 = vsel %vm78_vm1, %v275_v30, 0.0  ;;  %v140_v17 = vsel %vm78_vm1, %v1161_v32, 0.0 }
  0x3b   :  { %v137_v61 = vadd.f32 %v963_v43, %v135_v58  ;;  %v227_v20 = vmul.f32 %v1392_v56, %v1392_v56  ;;  %v301_v3 = vsel %vm78_vm1, %v985_v16, 0.0  ;;  %v1179_v43 = vld [vmem:[%s1314_s0 + $0x100] sm:$0xff]  ;;  %v228_v9 = vmul.f32 %v1394_v62, %v1394_v62  ;;  %v1395_v16 = vld [vmem:[#allocation37_spill] sm:$0xff]  ;;  %v1399_v58 = vld [vmem:[#allocation3_spill] sm:$0xff] }
  0x3c   :  { %v300_v35 = vadd.f32 %v299_v1, %v298_v5  ;;  %v142_v30 = vsel %vm78_vm1, %v1179_v43, 0.0  ;;  %v303_v12 = vsel %vm78_vm1, %v987_v2, 0.0  ;;  %v229_v41 = vmul.f32 %v1395_v16, %v1395_v16  ;;  %v1400_v5 = vld [vmem:[#allocation40_spill] sm:$0xff]  ;;  %v1403_v62 = vld [vmem:[#allocation5_spill] sm:$0xff] }
  0x3d   :  { %v139_v49 = vadd.f32 %v1393_v34, %v137_v61  ;;  %v305_v63 = vsel %vm78_vm1, %v227_v20, 0.0  ;;  %v230_v1 = vmul.f32 %v1396_v10, %v1396_v10  ;;  %v307_v55 = vsel %vm78_vm1, %v228_v9, 0.0  ;;  %v1401_v20 = vld [vmem:[#allocation4_spill] sm:$0xff] }
  0x3e   :  { %v302_v11 = vadd.f32 %v301_v3, %v300_v35  ;;  %v231_v2 = vmul.f32 %v1398_v51, %v1398_v51  ;;  %v309_v15 = vsel %vm78_vm1, %v229_v41, 0.0  ;;  %v1405_v41 = vld [vmem:[#allocation6_spill] sm:$0xff] }
  0x3f   :  { %v141_v14 = vadd.f32 %v140_v17, %v139_v49  ;;  %v232_v17 = vmul.f32 %v1400_v5, %v1400_v5  ;;  %v311_v56 = vsel %vm78_vm1, %v230_v1, 0.0  ;;  %v1402_v49 = vld [vmem:[#allocation41_spill] sm:$0xff] }
  0x40   :  { %v304_v7 = vadd.f32 %v303_v12, %v302_v11  ;;  %v233_v35 = vmul.f32 %v1402_v49, %v1402_v49 }
  0x41   :  { %v143_v24 = vadd.f32 %v142_v30, %v141_v14  ;;  %v313_v30 = vsel %vm78_vm1, %v231_v2, 0.0  ;;  %v1404_v14 = vld [vmem:[#allocation42_spill] sm:$0xff]  ;;  %v315_v16 = vsel %vm78_vm1, %v232_v17, 0.0 }
  0x42   :  { %v306_v6 = vadd.f32 %v305_v63, %v304_v7  ;;  %v234_v11 = vmul.f32 %v1404_v14, %v1404_v14  ;;  %v1406_v7 = vld [vmem:[#allocation43_spill] sm:$0xff]  ;;  %v317_v1 = vsel %vm78_vm1, %v233_v35, 0.0 }
  0x43   :  { %v145_v60 = vadd.f32 %v1397_v25, %v143_v24  ;;  %v235_v10 = vmul.f32 %v1406_v7, %v1406_v7 }
  0x44   :  { %v308_v61 = vadd.f32 %v307_v55, %v306_v6  ;;  %v1407_v55 = vld [vmem:[#allocation7_spill] sm:$0xff]  ;;  %v1408_v6 = vld [vmem:[#allocation44_spill] sm:$0xff]  ;;  %v319_v2 = vsel %vm78_vm1, %v234_v11, 0.0 }
  0x45   :  { %v147_v0 = vadd.f32 %v1399_v58, %v145_v60  ;;  %v236_v51 = vmul.f32 %v1408_v6, %v1408_v6  ;;  %v321_v17 = vsel %vm78_vm1, %v235_v10, 0.0 }
  0x46   :  { %v310_v34 = vadd.f32 %v309_v15, %v308_v61  ;;  %v1409_v15 = vld [vmem:[#allocation8_spill] sm:$0xff]  ;;  %v1410_v61 = vld [vmem:[#allocation45_spill] sm:$0xff] }
  0x47   :  { %v149_v3 = vadd.f32 %v1401_v20, %v147_v0  ;;  %v237_v5 = vmul.f32 %v1410_v61, %v1410_v61  ;;  %v323_v35 = vsel %vm78_vm1, %v236_v51, 0.0 }
  0x48   :  { %v312_v12 = vadd.f32 %v311_v56, %v310_v34  ;;  %v1411_v56 = vld [vmem:[#allocation9_spill] sm:$0xff]  ;;  %v1412_v34 = vld [vmem:[#allocation46_spill] sm:$0xff] }
  0x49   :  { %v151_v9 = vadd.f32 %v1403_v62, %v149_v3  ;;  %v238_v49 = vmul.f32 %v1412_v34, %v1412_v34  ;;  %v325_v11 = vsel %vm78_vm1, %v237_v5, 0.0 }
  0x4a   :  { %v314_v24 = vadd.f32 %v313_v30, %v312_v12  ;;  %v1413_v30 = vld [vmem:[#allocation10_spill] sm:$0xff]  ;;  %v1414_v12 = vld [vmem:[#allocation47_spill] sm:$0xff] }
  0x4b   :  { %v153_v63 = vadd.f32 %v1405_v41, %v151_v9  ;;  %v239_v14 = vmul.f32 %v1414_v12, %v1414_v12  ;;  %v327_v10 = vsel %vm78_vm1, %v238_v49, 0.0  ;;  %v1422_v49 = vld [vmem:[#allocation15_spill] sm:$0xff]  ;;  %v1423_v12 = vld [vmem:[#allocation16_spill] sm:$0xff] }
  0x4c   :  { %v316_v60 = vadd.f32 %v315_v16, %v314_v24  ;;  %v1415_v16 = vld [vmem:[#allocation11_spill] sm:$0xff]  ;;  %v1416_v24 = vld [vmem:[#allocation48_spill] sm:$0xff] }
  0x4d   :  { %v155_v25 = vadd.f32 %v1407_v55, %v153_v63  ;;  %v240_v7 = vmul.f32 %v1416_v24, %v1416_v24  ;;  %v329_v51 = vsel %vm78_vm1, %v239_v14, 0.0 }
  0x4e   :  { %v318_v0 = vadd.f32 %v317_v1, %v316_v60  ;;  %v1417_v1 = vld [vmem:[#allocation12_spill] sm:$0xff] }
  0x4f   :  { %v157_v58 = vadd.f32 %v1409_v15, %v155_v25  ;;  %v1418_v60 = vld [vmem:[#allocation52_spill] sm:$0xff]  ;;  %v331_v5 = vsel %vm78_vm1, %v240_v7, 0.0  ;;  %v1425_v7 = vld [vmem:[#allocation18_spill] sm:$0xff] }
  0x50   :  { %v320_v3 = vadd.f32 %v319_v2, %v318_v0  ;;  %v241_v6 = vmul.f32 %v1418_v60, %v1418_v60  ;;  %v1419_v2 = vld [vmem:[#allocation13_spill] sm:$0xff] }
  0x51   :  { %v159_v20 = vadd.f32 %v1411_v56, %v157_v58  ;;  %v1420_v0 = vld [vmem:[#allocation53_spill] sm:$0xff] }
  0x52   :  { %v322_v9 = vadd.f32 %v321_v17, %v320_v3  ;;  %v242_v61 = vmul.f32 %v1420_v0, %v1420_v0  ;;  %v1421_v17 = vld [vmem:[#allocation14_spill] sm:$0xff]  ;;  %v243_v3 = vmul.f32 %v1161_v32, %v1161_v32  ;;  %v333_v34 = vsel %vm78_vm1, %v241_v6, 0.0  ;;  %v1427_v6 = vld [vmem:[#allocation20_spill] sm:$0xff] }
  0x53   :  { %v161_v62 = vadd.f32 %v1413_v30, %v159_v20  ;;  %v1429_v0 = vld [vmem:[#allocation22_spill] sm:$0xff] }
  0x54   :  { %v324_v63 = vadd.f32 %v323_v35, %v322_v9  ;;  %v335_v9 = vsel %vm78_vm1, %v242_v61, 0.0 }
  0x55   :  { %v163_v41 = vadd.f32 %v1415_v16, %v161_v62  ;;  %v244_v62 = vmul.f32 %v1179_v43, %v1179_v43  ;;  %v337_v16 = vsel %vm78_vm1, %v243_v3, 0.0  ;;  %v1431_v3 = vld [vmem:[#allocation24_spill] sm:$0xff] }
  0x56   :  { %v326_v25 = vadd.f32 %v325_v11, %v324_v63 }
  0x57   :  { %v165_v55 = vadd.f32 %v1417_v1, %v163_v41  ;;  %v1424_v41 = vld [vmem:[#allocation17_spill] sm:$0xff]  ;;  %v339_v32 = vsel %vm78_vm1, %v244_v62, 0.0  ;;  %v1433_v62 = vld [vmem:[#allocation27_spill] sm:$0xff] }
  0x58   :  { %v328_v58 = vadd.f32 %v327_v10, %v326_v25 }
  0x59   :  { %v167_v15 = vadd.f32 %v1419_v2, %v165_v55  ;;  %v1426_v55 = vld [vmem:[#allocation19_spill] sm:$0xff]  ;;  %v1428_v2 = vld [vmem:[#allocation21_spill] sm:$0xff] }
  0x5a   :  { %v330_v20 = vadd.f32 %v329_v51, %v328_v58 }
  0x5b   :  { %v169_v56 = vadd.f32 %v1421_v17, %v167_v15  ;;  %v1430_v17 = vld [vmem:[#allocation23_spill] sm:$0xff] }
  0x5c   :  { %v332_v30 = vadd.f32 %v331_v5, %v330_v20 }
  0x5d   :  { %v171_v35 = vadd.f32 %v1422_v49, %v169_v56 }
  0x5e   :  { %v334_v11 = vadd.f32 %v333_v34, %v332_v30 }
  0x5f   :  { %v173_v14 = vadd.f32 %v1423_v12, %v171_v35  ;;  %v1432_v35 = vld [vmem:[#allocation25_spill] sm:$0xff]  ;;  %v1434_v12 = vld [vmem:[#allocation28_spill] sm:$0xff] }
  0x60   :  { %v336_v24 = vadd.f32 %v335_v9, %v334_v11  ;;  %v1435_v11 = vld [vmem:[#allocation29_spill] sm:$0xff] }
  0x61   :  { %v175_v63 = vadd.f32 %v1424_v41, %v173_v14  ;;  %v1436_v41 = vld [vmem:[#allocation31_spill] sm:$0xff] }
  0x62   :  { %v338_v1 = vadd.f32 %v337_v16, %v336_v24  ;;  %v1437_v24 = vld [vmem:[#allocation32_spill] sm:$0xff] }
  0x63   :  { %v177_v10 = vadd.f32 %v1425_v7, %v175_v63  ;;  %v1438_v7 = vld [vmem:[#allocation33_spill] sm:$0xff] }
  0x64   :  { %v340_v60 = vadd.f32 %v339_v32, %v338_v1  ;;  %v1439_v1 = vld [vmem:[#allocation34_spill] sm:$0xff] }
  0x65   :  { %v179_v25 = vadd.f32 %v1426_v55, %v177_v10 }
  0x66   :  { %v342_v51 = vadd.f32 %v1068_v50, %v340_v60 }
  0x67   :  { %v181_v43 = vadd.f32 %v1427_v6, %v179_v25 }
  0x68   :  { %v344_v58 = vadd.f32 %v1071_v31, %v342_v51 }
  0x69   :  { %v183_v15 = vadd.f32 %v1428_v2, %v181_v43 }
  0x6a   :  { %v346_v5 = vadd.f32 %v1074_v26, %v344_v58 }
  0x6b   :  { %v185_v61 = vadd.f32 %v1429_v0, %v183_v15 }
  0x6c   :  { %v348_v20 = vadd.f32 %v1077_v44, %v346_v5 }
  0x6d   :  { %v187_v56 = vadd.f32 %v1430_v17, %v185_v61 }
  0x6e   :  { %v350_v49 = vadd.f32 %v1080_v57, %v348_v20 }
  0x6f   :  { %v189_v34 = vadd.f32 %v1431_v3, %v187_v56 }
  0x70   :  { %v352_v50 = vadd.f32 %v1084_v13, %v350_v49 }
  0x71   :  { %v191_v30 = vadd.f32 %v1432_v35, %v189_v34 }
  0x72   :  { %v354_v31 = vadd.f32 %v1087_v18, %v352_v50 }
  0x73   :  { %v193_v9 = vadd.f32 %v1433_v62, %v191_v30 }
  0x74   :  { %v356_v26 = vadd.f32 %v1090_v19, %v354_v31 }
  0x75   :  { %v195_v14 = vadd.f32 %v1434_v12, %v193_v9 }
  0x76   :  { %v358_v44 = vadd.f32 %v1093_v21, %v356_v26 }
  0x77   :  { %v197_v16 = vadd.f32 %v1435_v11, %v195_v14 }
  0x78   :  { %v360_v57 = vadd.f32 %v1096_v22, %v358_v44 }
  0x79   :  { %v199_v63 = vadd.f32 %v1436_v41, %v197_v16 }
  0x7a   :  { %v362_v13 = vadd.f32 %v1099_v23, %v360_v57 }
  0x7b   :  { %v201_v32 = vadd.f32 %v1437_v24, %v199_v63 }
  0x7c   :  { %v364_v18 = vadd.f32 %v1103_v45, %v362_v13 }
  0x7d   :  { %v203_v10 = vadd.f32 %v1438_v7, %v201_v32 }
  0x7e   :  { %v366_v19 = vadd.f32 %v1106_v4, %v364_v18 }
  0x7f   :  { %v205_v55 = vadd.f32 %v1439_v1, %v203_v10 }
  0x80   :  { %v368_v25 = vadd.f32 %v1109_v27, %v366_v19 }
  0x81   :  { %v206_v2 = vrot.slane %v205_v55, 4 }
  0x82   :  { %v370_v21 = vadd.f32 %v1112_v28, %v368_v25 }
  0x84   :  { %v372_v60 = vadd.f32 %v1115_v29, %v370_v21 }
  0x86   :  { %v374_v22 = vadd.f32 %v1118_v33, %v372_v60 }
  0x88   :  { %v376_v6 = vadd.f32 %v1122_v40, %v374_v22  ;;  %v207_v40 = vadd.f32 %v206_v2, %v205_v55 }
  0x8a   :  { %v378_v23 = vadd.f32 %v1125_v42, %v376_v6  ;;  %v208_v15 = vrot.slane %v207_v40, 2 }
  0x8c   :  { %v380_v43 = vadd.f32 %v1128_v46, %v378_v23 }
  0x8e   :  { %v382_v45 = vadd.f32 %v1131_v47, %v380_v43 }
  0x90   :  { %v384_v51 = vadd.f32 %v1134_v39, %v382_v45 }
  0x92   :  { %v386_v4 = vadd.f32 %v1137_v48, %v384_v51  ;;  %v209_v48 = vadd.f32 %v208_v15, %v207_v40 }
  0x94   :  { %v388_v27 = vadd.f32 %v1141_v37, %v386_v4  ;;  %v210_v0 = vrot.slane %v209_v48, 1 }
  0x96   :  { %v390_v28 = vadd.f32 %v1144_v53, %v388_v27  ;;  %v211_v5 = vadd.f32 %v210_v0, %v209_v48 }
  0x98   :  { %v392_v29 = vadd.f32 %v1147_v54, %v390_v28 }
  0x9a   :  { %v394_v33 = vadd.f32 %v1150_v38, %v392_v29 }
  0x9c   :  { %v396_v42 = vadd.f32 %v1153_v59, %v394_v33  ;;  %v411_v59 = vld [vmem:[%s1315_s1] sm:$0x3] }
  0x9e   :  { %v398_v46 = vadd.f32 %v1156_v36, %v396_v42 }
  0xa0   :  { %v400_v47 = vadd.f32 %v1165_v52, %v398_v46 }
  0xa2   :  { %v402_v39 = vadd.f32 %v1168_v8, %v400_v47 }
  0xa4   :  { %v403_v58 = vrot.slane %v402_v39, 4 }
  0xa6   :  { %v404_v37 = vadd.f32 %v403_v58, %v402_v39 }
  0xa8   :  { %v405_v53 = vrot.slane %v404_v37, 2 }
  0xaa   :  { %v406_v61 = vadd.f32 %v405_v53, %v404_v37 }
  0xac   :  { %v407_v54 = vrot.slane %v406_v61, 1 }
  0xae   :  { %v408_v38 = vadd.f32 %v407_v54, %v406_v61 }
  0xb0   :  { %v410_v36 = vsel %vm409_vm2, %v211_v5, %v408_v38 }
  0xb1   :  { %v412_v17 = vadd.f32 %v411_v59, %v410_v36 }
  0xb3   :  { %414 = vst.msk [vmem:[%s1315_s1] sm:$0x3] %vm12_vm0, %v412_v17 }
  0xba   :  { %v418_v52 = vld [vmem:[%s1315_s1] sm:$0x3] }
  0xbb   :  { %v420_v8 = vmul.f32 0.001953125, %v418_v52 }
  0xbd   :  { %v421_v56 = vmul.f32 %v420_v8, %v420_v8 }
  0xbf   :  { %v423_v20 = vrot.slane %v421_v56, 7 }
  0xc1   :  { %v425_v3 = vsub.f32 %v420_v8, %v423_v20 }
  0xc3   :  { %v426_v34 = vsel %vm409_vm2, %v420_v8, %v425_v3 }
  0xc4   :  { %427 = vst.msk [vmem:[%s1315_s1] sm:$0x3] %vm12_vm0, %v426_v34 }

// kernel: vae_forward.38
= control target key start
LH: loop header
LB: loop body
LE: loop exit
PB: predicated region body
PF: predicated region fallthrough
CT: control target
= control target key end

     0   :  { %v82_v0 = vlaneseq  ;;  %vm554_vm0 = vcmask 64512   ;;  %s1563_s0 = inlined_call_operand.vmem [shape: f32[512,8], index: 0, kind: input, shape index: {}]   ;;  %s1564_s1 = inlined_call_operand.vmem [shape: f32[2,8], index: 1, kind: input, shape index: {}]   ;;  %s1565_s2 = inlined_call_operand.vmem [shape: f32[1,8], index: 2, kind: input, shape index: {}]   ;;  %s1566_s3 = inlined_call_operand.vmem [shape: f32[1,8], index: 3, kind: input, shape index: {}]   ;;  %s1567_s4 = inlined_call_operand.vmem [shape: f32[512,8], index: 4, kind: output, shape index: {}]  }
   0x1   :  { %v81_v1 = vld [vmem:[%s1564_s1] sm:$0x3]  ;;  %v665_v5 = vld [vmem:[%s1563_s0 + $0x8] sm:$0xff]  ;;  %v670_v6 = vld [vmem:[%s1563_s0 + $0x10] sm:$0xff] }
   0x2   :  { %v655_v2 = vshrl.u32 %v82_v0, 7  ;;  %v150_v3 = vadd.f32 1e-05, %v81_v1  ;;  %v660_v4 = vld [vmem:[%s1563_s0] sm:$0xff]  ;;  %v675_v7 = vld [vmem:[%s1563_s0 + $0x18] sm:$0xff]  ;;  %v686_v10 = vld [vmem:[%s1563_s0 + $0x28] sm:$0xff] }
   0x3   :  { %v681_v9 = vld [vmem:[%s1563_s0 + $0x20] sm:$0xff]  ;;  %v691_v11 = vld [vmem:[%s1563_s0 + $0x30] sm:$0xff]  ;;  %v696_v12 = vld [vmem:[%s1563_s0 + $0x38] sm:$0xff] }
   0x4   :  { %v84_v8 = vsub.s32 0, %v655_v2  ;;  %625 = vrsqrt.f32 %v150_v3  ;;  %v701_v13 = vld [vmem:[%s1563_s0 + $0x40] sm:$0xff]  ;;  %v706_v14 = vld [vmem:[%s1563_s0 + $0x48] sm:$0xff]  ;;  %v711_v15 = vld [vmem:[%s1563_s0 + $0x50] sm:$0xff]  ;;  %v154_v20 = vsub.s32 1, %v655_v2 }
   0x5   :  { %v718_v17 = vld [vmem:[%s1563_s0 + $0x58] sm:$0xff]  ;;  %v723_v18 = vld [vmem:[%s1563_s0 + $0x60] sm:$0xff]  ;;  %v728_v19 = vld [vmem:[%s1563_s0 + $0x68] sm:$0xff] }
   0x6   :  { %v713_v16 = vrot.slane %v81_v1, %v84_v8  ;;  %v734_v21 = vld [vmem:[%s1563_s0 + $0x70] sm:$0xff]  ;;  %v739_v22 = vld [vmem:[%s1563_s0 + $0x78] sm:$0xff]  ;;  %v744_v23 = vld [vmem:[%s1563_s0 + $0x80] sm:$0xff] }
   0x7   :  { %v757_v28 = vld [vmem:[%s1563_s0 + $0x88] sm:$0xff]  ;;  %v762_v29 = vld [vmem:[%s1563_s0 + $0x90] sm:$0xff]  ;;  %v767_v30 = vld [vmem:[%s1563_s0 + $0x98] sm:$0xff] }
   0x8   :  { %v86_v24 = vsub.f32 %v660_v4, %v713_v16  ;;  %v87_v25 = vsub.f32 %v665_v5, %v713_v16  ;;  %v88_v26 = vsub.f32 %v670_v6, %v713_v16  ;;  %v89_v27 = vsub.f32 %v675_v7, %v713_v16  ;;  %v780_v35 = vld [vmem:[%s1563_s0 + $0xa0] sm:$0xff]  ;;  %v785_v36 = vld [vmem:[%s1563_s0 + $0xa8] sm:$0xff]  ;;  %v790_v37 = vld [vmem:[%s1563_s0 + $0xb0] sm:$0xff] }
   0x9   :  { %v90_v31 = vsub.f32 %v681_v9, %v713_v16  ;;  %v91_v32 = vsub.f32 %v686_v10, %v713_v16  ;;  %v92_v33 = vsub.f32 %v691_v11, %v713_v16  ;;  %v93_v34 = vsub.f32 %v696_v12, %v713_v16  ;;  %v803_v42 = vld [vmem:[%s1563_s0 + $0xb8] sm:$0xff]  ;;  %v808_v43 = vld [vmem:[%s1563_s0 + $0xc0] sm:$0xff]  ;;  %v813_v44 = vld [vmem:[%s1563_s0 + $0xc8] sm:$0xff] }
   0xa   :  { %v94_v38 = vsub.f32 %v701_v13, %v713_v16  ;;  %v95_v39 = vsub.f32 %v706_v14, %v713_v16  ;;  %v96_v40 = vsub.f32 %v711_v15, %v713_v16  ;;  %v97_v41 = vsub.f32 %v718_v17, %v713_v16  ;;  %v826_v49 = vld [vmem:[%s1563_s0 + $0xd0] sm:$0xff]  ;;  %v831_v50 = vld [vmem:[%s1563_s0 + $0xd8] sm:$0xff]  ;;  %v836_v51 = vld [vmem:[%s1563_s0 + $0xe0] sm:$0xff] }
   0xb   :  { %v98_v45 = vsub.f32 %v723_v18, %v713_v16  ;;  %v99_v46 = vsub.f32 %v728_v19, %v713_v16  ;;  %v100_v47 = vsub.f32 %v734_v21, %v713_v16  ;;  %v101_v48 = vsub.f32 %v739_v22, %v713_v16  ;;  %v849_v56 = vld [vmem:[%s1563_s0 + $0xe8] sm:$0xff]  ;;  %v854_v57 = vld [vmem:[%s1563_s0 + $0xf0] sm:$0xff]  ;;  %v859_v58 = vld [vmem:[%s1563_s0 + $0xf8] sm:$0xff] }
   0xc   :  { %v102_v52 = vsub.f32 %v744_v23, %v713_v16  ;;  %v103_v53 = vsub.f32 %v757_v28, %v713_v16  ;;  %v104_v54 = vsub.f32 %v762_v29, %v713_v16  ;;  %v105_v55 = vsub.f32 %v767_v30, %v713_v16  ;;  %v872_v63 = vld [vmem:[%s1563_s0 + $0x100] sm:$0xff]  ;;  %v877_v0 = vld [vmem:[%s1563_s0 + $0x108] sm:$0xff]  ;;  %v882_v1 = vld [vmem:[%s1563_s0 + $0x110] sm:$0xff] }
   0xd   :  { %v106_v59 = vsub.f32 %v780_v35, %v713_v16  ;;  %v107_v60 = vsub.f32 %v785_v36, %v713_v16  ;;  %v903_v11 = vld [vmem:[%s1565_s2] ss:$0 sm:$0xff] }
   0xe   :  { %v626_v2 = vpop.eup %625  ;;  %v920_v12 = vld [vmem:[%s1566_s3] ss:$0 sm:$0xff] }
   0xf   :  { %v892_v7 = vrot.slane %v626_v2, %v154_v20 }
  0x11   :  { %v156_v8 = vmul.f32 %v892_v7, %v86_v24  ;;  %v157_v10 = vmul.f32 %v892_v7, %v87_v25  ;;  %v158_v6 = vmul.f32 %v892_v7, %v88_v26  ;;  %v159_v5 = vmul.f32 %v892_v7, %v89_v27 }
  0x12   :  { %v160_v20 = vmul.f32 %v892_v7, %v90_v31  ;;  %v161_v2 = vmul.f32 %v892_v7, %v91_v32  ;;  %v162_v4 = vmul.f32 %v892_v7, %v92_v33  ;;  %v163_v9 = vmul.f32 %v892_v7, %v93_v34 }
  0x13   :  { %v227_v24 = vmul.f32 %v903_v11, %v156_v8  ;;  %v228_v25 = vmul.f32 %v903_v11, %v157_v10  ;;  %v229_v26 = vmul.f32 %v903_v11, %v158_v6  ;;  %v230_v27 = vmul.f32 %v903_v11, %v159_v5 }
  0x14   :  { %v231_v3 = vmul.f32 %v903_v11, %v160_v20  ;;  %v232_v62 = vmul.f32 %v903_v11, %v161_v2  ;;  %v233_v31 = vmul.f32 %v903_v11, %v162_v4  ;;  %v234_v32 = vmul.f32 %v903_v11, %v163_v9 }
  0x15   :  { %v298_v33 = vadd.f32 %v920_v12, %v227_v24  ;;  %v299_v34 = vadd.f32 %v920_v12, %v228_v25  ;;  %v300_v8 = vadd.f32 %v920_v12, %v229_v26  ;;  %v301_v10 = vadd.f32 %v920_v12, %v230_v27 }
  0x16   :  { %v302_v6 = vadd.f32 %v920_v12, %v231_v3  ;;  %v303_v5 = vadd.f32 %v920_v12, %v232_v62  ;;  %v304_v20 = vadd.f32 %v920_v12, %v233_v31  ;;  %v305_v2 = vadd.f32 %v920_v12, %v234_v32 }
  0x17   :  { %vm362_vm1 = vcmp.ge.f32.partialorder %v298_v33, 0.0  ;;  %v426_v4 = vmul.f32 0.01, %v298_v33  ;;  %vm363_vm2 = vcmp.ge.f32.partialorder %v299_v34, 0.0  ;;  %v427_v9 = vmul.f32 0.01, %v299_v34 }
  0x18   :  { %vm364_vm3 = vcmp.ge.f32.partialorder %v300_v8, 0.0  ;;  %v428_v24 = vmul.f32 0.01, %v300_v8  ;;  %vm365_vm4 = vcmp.ge.f32.partialorder %v301_v10, 0.0  ;;  %v429_v25 = vmul.f32 0.01, %v301_v10 }
  0x19   :  { %v490_v61 = vsel %vm362_vm1, %v298_v33, %v426_v4  ;;  %v491_v26 = vsel %vm363_vm2, %v299_v34, %v427_v9  ;;  %vm366_vm5 = vcmp.ge.f32.partialorder %v302_v6, 0.0  ;;  %v430_v27 = vmul.f32 0.01, %v302_v6 }
  0x1a   :  { %555 = vst.msk [vmem:[%s1567_s4] sm:$0xff] %vm554_vm0, %v490_v61  ;;  %556 = vst.msk [vmem:[%s1567_s4 + $0x8] sm:$0xff] %vm554_vm0, %v491_v26  ;;  %v492_v62 = vsel %vm364_vm3, %v300_v8, %v428_v24  ;;  %v493_v3 = vsel %vm365_vm4, %v301_v10, %v429_v25  ;;  %vm367_vm6 = vcmp.ge.f32.partialorder %v303_v5, 0.0  ;;  %v431_v31 = vmul.f32 0.01, %v303_v5 }
  0x1b   :  { %557 = vst.msk [vmem:[%s1567_s4 + $0x10] sm:$0xff] %vm554_vm0, %v492_v62  ;;  %558 = vst.msk [vmem:[%s1567_s4 + $0x18] sm:$0xff] %vm554_vm0, %v493_v3  ;;  %v494_v61 = vsel %vm366_vm5, %v302_v6, %v430_v27  ;;  %vm368_vm7 = vcmp.ge.f32.partialorder %v304_v20, 0.0  ;;  %v432_v32 = vmul.f32 0.01, %v304_v20  ;;  %vm369_vm8 = vcmp.ge.f32.partialorder %v305_v2, 0.0 }
  0x1c   :  { %559 = vst.msk [vmem:[%s1567_s4 + $0x20] sm:$0xff] %vm554_vm0, %v494_v61  ;;  %v495_v33 = vsel %vm367_vm6, %v303_v5, %v431_v31  ;;  %v433_v34 = vmul.f32 0.01, %v305_v2  ;;  %v164_v8 = vmul.f32 %v892_v7, %v94_v38  ;;  %v165_v10 = vmul.f32 %v892_v7, %v95_v39 }
  0x1d   :  { %560 = vst.msk [vmem:[%s1567_s4 + $0x28] sm:$0xff] %vm554_vm0, %v495_v33  ;;  %v496_v6 = vsel %vm368_vm7, %v304_v20, %v432_v32  ;;  %v166_v5 = vmul.f32 %v892_v7, %v96_v40  ;;  %v167_v13 = vmul.f32 %v892_v7, %v97_v41  ;;  %v168_v14 = vmul.f32 %v892_v7, %v98_v45 }
  0x1e   :  { %561 = vst.msk [vmem:[%s1567_s4 + $0x30] sm:$0xff] %vm554_vm0, %v496_v6  ;;  %v497_v38 = vsel %vm369_vm8, %v305_v2, %v433_v34  ;;  %v235_v15 = vmul.f32 %v903_v11, %v164_v8  ;;  %v236_v39 = vmul.f32 %v903_v11, %v165_v10  ;;  %v169_v17 = vmul.f32 %v892_v7, %v99_v46 }
  0x1f   :  { %562 = vst.msk [vmem:[%s1567_s4 + $0x38] sm:$0xff] %vm554_vm0, %v497_v38  ;;  %v237_v18 = vmul.f32 %v903_v11, %v166_v5  ;;  %v238_v40 = vmul.f32 %v903_v11, %v167_v13  ;;  %v239_v41 = vmul.f32 %v903_v11, %v168_v14  ;;  %v170_v45 = vmul.f32 %v892_v7, %v100_v47 }
  0x20   :  { %v306_v19 = vadd.f32 %v920_v12, %v235_v15  ;;  %v307_v46 = vadd.f32 %v920_v12, %v236_v39  ;;  %v240_v20 = vmul.f32 %v903_v11, %v169_v17  ;;  %v171_v2 = vmul.f32 %v892_v7, %v101_v48 }
  0x21   :  { %v308_v4 = vadd.f32 %v920_v12, %v237_v18  ;;  %v309_v9 = vadd.f32 %v920_v12, %v238_v40  ;;  %v310_v24 = vadd.f32 %v920_v12, %v239_v41  ;;  %v241_v21 = vmul.f32 %v903_v11, %v170_v45 }
  0x22   :  { %vm370_vm9 = vcmp.ge.f32.partialorder %v306_v19, 0.0  ;;  %v434_v47 = vmul.f32 0.01, %v306_v19  ;;  %vm371_vm10 = vcmp.ge.f32.partialorder %v307_v46, 0.0  ;;  %v435_v25 = vmul.f32 0.01, %v307_v46 }
  0x23   :  { %vm372_vm11 = vcmp.ge.f32.partialorder %v308_v4, 0.0  ;;  %v436_v26 = vmul.f32 0.01, %v308_v4  ;;  %vm373_vm12 = vcmp.ge.f32.partialorder %v309_v9, 0.0  ;;  %v437_v27 = vmul.f32 0.01, %v309_v9 }
  0x24   :  { %v498_v62 = vsel %vm370_vm9, %v306_v19, %v434_v47  ;;  %v499_v22 = vsel %vm371_vm10, %v307_v46, %v435_v25  ;;  %vm374_vm13 = vcmp.ge.f32.partialorder %v310_v24, 0.0  ;;  %v438_v48 = vmul.f32 0.01, %v310_v24 }
  0x25   :  { %563 = vst.msk [vmem:[%s1567_s4 + $0x40] sm:$0xff] %vm554_vm0, %v498_v62  ;;  %564 = vst.msk [vmem:[%s1567_s4 + $0x48] sm:$0xff] %vm554_vm0, %v499_v22  ;;  %v500_v3 = vsel %vm372_vm11, %v308_v4, %v436_v26  ;;  %v501_v31 = vsel %vm373_vm12, %v309_v9, %v437_v27  ;;  %v311_v61 = vadd.f32 %v920_v12, %v240_v20 }
  0x26   :  { %v312_v32 = vadd.f32 %v920_v12, %v241_v21  ;;  %565 = vst.msk [vmem:[%s1567_s4 + $0x50] sm:$0xff] %vm554_vm0, %v500_v3  ;;  %566 = vst.msk [vmem:[%s1567_s4 + $0x58] sm:$0xff] %vm554_vm0, %v501_v31  ;;  %v502_v33 = vsel %vm374_vm13, %v310_v24, %v438_v48  ;;  %v242_v34 = vmul.f32 %v903_v11, %v171_v2 }
  0x27   :  { %v172_v8 = vmul.f32 %v892_v7, %v102_v52  ;;  %v173_v10 = vmul.f32 %v892_v7, %v103_v53  ;;  %567 = vst.msk [vmem:[%s1567_s4 + $0x60] sm:$0xff] %vm554_vm0, %v502_v33  ;;  %vm375_vm14 = vcmp.ge.f32.partialorder %v311_v61, 0.0  ;;  %v439_v6 = vmul.f32 0.01, %v311_v61 }
  0x28   :  { %vm376_vm15 = vcmp.ge.f32.partialorder %v312_v32, 0.0  ;;  %v440_v5 = vmul.f32 0.01, %v312_v32  ;;  %v313_v13 = vadd.f32 %v920_v12, %v242_v34  ;;  %v174_v28 = vmul.f32 %v892_v7, %v104_v54 }
  0x29   :  { %v243_v23 = vmul.f32 %v903_v11, %v172_v8  ;;  %v244_v52 = vmul.f32 %v903_v11, %v173_v10  ;;  %v503_v53 = vsel %vm375_vm14, %v311_v61, %v439_v6  ;;  %v175_v38 = vmul.f32 %v892_v7, %v105_v55 }
  0x2a   :  { %v504_v14 = vsel %vm376_vm15, %v312_v32, %v440_v5  ;;  %v176_v15 = vmul.f32 %v892_v7, %v106_v59  ;;  %568 = vst.msk [vmem:[%s1567_s4 + $0x68] sm:$0xff] %vm554_vm0, %v503_v53  ;;  %vm377_vm1 = vcmp.ge.f32.partialorder %v313_v13, 0.0  ;;  %v441_v29 = vmul.f32 0.01, %v313_v13 }
  0x2b   :  { %569 = vst.msk [vmem:[%s1567_s4 + $0x70] sm:$0xff] %vm554_vm0, %v504_v14  ;;  %v314_v30 = vadd.f32 %v920_v12, %v243_v23  ;;  %v315_v54 = vadd.f32 %v920_v12, %v244_v52  ;;  %v245_v35 = vmul.f32 %v903_v11, %v174_v28  ;;  %v246_v55 = vmul.f32 %v903_v11, %v175_v38 }
  0x2c   :  { %v247_v59 = vmul.f32 %v903_v11, %v176_v15  ;;  %v177_v39 = vmul.f32 %v892_v7, %v107_v60  ;;  %v505_v17 = vsel %vm377_vm1, %v313_v13, %v441_v29  ;;  %v1568_v60 = vsub.f32 %v790_v37, %v713_v16 }
  0x2d   :  { %vm378_vm2 = vcmp.ge.f32.partialorder %v314_v30, 0.0  ;;  %v442_v18 = vmul.f32 0.01, %v314_v30  ;;  %vm379_vm3 = vcmp.ge.f32.partialorder %v315_v54, 0.0  ;;  %570 = vst.msk [vmem:[%s1567_s4 + $0x78] sm:$0xff] %vm554_vm0, %v505_v17  ;;  %v316_v41 = vadd.f32 %v920_v12, %v245_v35 }
  0x2e   :  { %v443_v40 = vmul.f32 0.01, %v315_v54  ;;  %v317_v45 = vadd.f32 %v920_v12, %v246_v55  ;;  %v318_v19 = vadd.f32 %v920_v12, %v247_v59  ;;  %v248_v36 = vmul.f32 %v903_v11, %v177_v39 }
  0x2f   :  { %v506_v46 = vsel %vm378_vm2, %v314_v30, %v442_v18  ;;  %v178_v20 = vmul.f32 %v892_v7, %v1568_v60  ;;  %v1569_v2 = vsub.f32 %v803_v42, %v713_v16  ;;  %vm380_vm4 = vcmp.ge.f32.partialorder %v316_v41, 0.0 }
  0x30   :  { %571 = vst.msk [vmem:[%s1567_s4 + $0x80] sm:$0xff] %vm554_vm0, %v506_v46  ;;  %v507_v9 = vsel %vm379_vm3, %v315_v54, %v443_v40  ;;  %v444_v24 = vmul.f32 0.01, %v316_v41  ;;  %vm381_vm5 = vcmp.ge.f32.partialorder %v317_v45, 0.0  ;;  %v445_v37 = vmul.f32 0.01, %v317_v45 }
  0x31   :  { %v179_v4 = vmul.f32 %v892_v7, %v1569_v2  ;;  %572 = vst.msk [vmem:[%s1567_s4 + $0x88] sm:$0xff] %vm554_vm0, %v507_v9  ;;  %vm382_vm6 = vcmp.ge.f32.partialorder %v318_v19, 0.0  ;;  %v446_v21 = vmul.f32 0.01, %v318_v19  ;;  %v319_v42 = vadd.f32 %v920_v12, %v248_v36 }
  0x32   :  { %v508_v47 = vsel %vm380_vm4, %v316_v41, %v444_v24  ;;  %v249_v25 = vmul.f32 %v903_v11, %v178_v20  ;;  %v1570_v27 = vsub.f32 %v808_v43, %v713_v16  ;;  %v509_v22 = vsel %vm381_vm5, %v317_v45, %v445_v37  ;;  %v52_v37 = vld [vmem:[%s1563_s0 + $0x118] sm:$0xff] }
  0x33   :  { %v250_v26 = vmul.f32 %v903_v11, %v179_v4  ;;  %573 = vst.msk [vmem:[%s1567_s4 + $0x90] sm:$0xff] %vm554_vm0, %v508_v47  ;;  %v510_v48 = vsel %vm382_vm6, %v318_v19, %v446_v21  ;;  %vm383_vm7 = vcmp.ge.f32.partialorder %v319_v42, 0.0  ;;  %v447_v3 = vmul.f32 0.01, %v319_v42  ;;  %574 = vst.msk [vmem:[%s1567_s4 + $0x98] sm:$0xff] %vm554_vm0, %v509_v22  ;;  %v53_v22 = vld [vmem:[%s1563_s0 + $0x120] sm:$0xff] }
  0x34   :  { %v180_v62 = vmul.f32 %v892_v7, %v1570_v27  ;;  %575 = vst.msk [vmem:[%s1567_s4 + $0xa0] sm:$0xff] %vm554_vm0, %v510_v48  ;;  %v320_v43 = vadd.f32 %v920_v12, %v249_v25  ;;  %v1571_v32 = vsub.f32 %v813_v44, %v713_v16  ;;  %v1572_v8 = vsub.f32 %v826_v49, %v713_v16  ;;  %v54_v48 = vld [vmem:[%s1563_s0 + $0x128] sm:$0xff] }
  0x35   :  { %v321_v31 = vadd.f32 %v920_v12, %v250_v26  ;;  %v511_v34 = vsel %vm383_vm7, %v319_v42, %v447_v3  ;;  %v1573_v6 = vsub.f32 %v831_v50, %v713_v16  ;;  %v1574_v13 = vsub.f32 %v836_v51, %v713_v16 }
  0x36   :  { %v251_v61 = vmul.f32 %v903_v11, %v180_v62  ;;  %v181_v33 = vmul.f32 %v892_v7, %v1571_v32  ;;  %v182_v10 = vmul.f32 %v892_v7, %v1572_v8  ;;  %576 = vst.msk [vmem:[%s1567_s4 + $0xa8] sm:$0xff] %vm554_vm0, %v511_v34  ;;  %vm384_vm8 = vcmp.ge.f32.partialorder %v320_v43, 0.0 }
  0x37   :  { %v183_v5 = vmul.f32 %v892_v7, %v1573_v6  ;;  %v184_v23 = vmul.f32 %v892_v7, %v1574_v13  ;;  %v448_v44 = vmul.f32 0.01, %v320_v43  ;;  %vm385_vm9 = vcmp.ge.f32.partialorder %v321_v31, 0.0  ;;  %v55_v6 = vld [vmem:[%s1563_s0 + $0x130] sm:$0xff] }
  0x38   :  { %v449_v49 = vmul.f32 0.01, %v321_v31  ;;  %v322_v52 = vadd.f32 %v920_v12, %v251_v61  ;;  %v252_v50 = vmul.f32 %v903_v11, %v181_v33  ;;  %v253_v28 = vmul.f32 %v903_v11, %v182_v10 }
  0x39   :  { %v254_v53 = vmul.f32 %v903_v11, %v183_v5  ;;  %v512_v51 = vsel %vm384_vm8, %v320_v43, %v448_v44  ;;  %v255_v38 = vmul.f32 %v903_v11, %v184_v23  ;;  %v1575_v15 = vsub.f32 %v849_v56, %v713_v16 }
  0x3a   :  { %v513_v14 = vsel %vm385_vm9, %v321_v31, %v449_v49  ;;  %577 = vst.msk [vmem:[%s1567_s4 + $0xb0] sm:$0xff] %vm554_vm0, %v512_v51  ;;  %vm386_vm10 = vcmp.ge.f32.partialorder %v322_v52, 0.0  ;;  %v450_v30 = vmul.f32 0.01, %v322_v52  ;;  %v323_v54 = vadd.f32 %v920_v12, %v252_v50 }
  0x3b   :  { %v185_v29 = vmul.f32 %v892_v7, %v1575_v15  ;;  %578 = vst.msk [vmem:[%s1567_s4 + $0xb8] sm:$0xff] %vm554_vm0, %v513_v14  ;;  %v324_v35 = vadd.f32 %v920_v12, %v253_v28  ;;  %v325_v56 = vadd.f32 %v920_v12, %v254_v53  ;;  %v326_v55 = vadd.f32 %v920_v12, %v255_v38  ;;  %v56_v14 = vld [vmem:[%s1563_s0 + $0x138] sm:$0xff]  ;;  %v57_v38 = vld [vmem:[%s1563_s0 + $0x140] sm:$0xff] }
  0x3c   :  { %v1576_v39 = vsub.f32 %v854_v57, %v713_v16  ;;  %v514_v18 = vsel %vm386_vm10, %v322_v52, %v450_v30  ;;  %vm387_vm11 = vcmp.ge.f32.partialorder %v323_v54, 0.0  ;;  %v451_v40 = vmul.f32 0.01, %v323_v54 }
  0x3d   :  { %v256_v59 = vmul.f32 %v903_v11, %v185_v29  ;;  %vm388_vm12 = vcmp.ge.f32.partialorder %v324_v35, 0.0  ;;  %579 = vst.msk [vmem:[%s1567_s4 + $0xc0] sm:$0xff] %vm554_vm0, %v514_v18  ;;  %v452_v41 = vmul.f32 0.01, %v324_v35  ;;  %vm389_vm13 = vcmp.ge.f32.partialorder %v325_v56, 0.0 }
  0x3e   :  { %v186_v17 = vmul.f32 %v892_v7, %v1576_v39  ;;  %v453_v45 = vmul.f32 0.01, %v325_v56  ;;  %vm390_vm14 = vcmp.ge.f32.partialorder %v326_v55, 0.0  ;;  %v515_v19 = vsel %vm387_vm11, %v323_v54, %v451_v40 }
  0x3f   :  { %v454_v46 = vmul.f32 0.01, %v326_v55  ;;  %v327_v36 = vadd.f32 %v920_v12, %v256_v59  ;;  %580 = vst.msk [vmem:[%s1567_s4 + $0xc8] sm:$0xff] %vm554_vm0, %v515_v19  ;;  %v516_v60 = vsel %vm388_vm12, %v324_v35, %v452_v41  ;;  %v1577_v2 = vsub.f32 %v859_v58, %v713_v16 }
  0x40   :  { %v257_v57 = vmul.f32 %v903_v11, %v186_v17  ;;  %v517_v20 = vsel %vm389_vm13, %v325_v56, %v453_v45  ;;  %v1578_v9 = vsub.f32 %v872_v63, %v713_v16  ;;  %581 = vst.msk [vmem:[%s1567_s4 + $0xd0] sm:$0xff] %vm554_vm0, %v516_v60  ;;  %v1579_v25 = vsub.f32 %v877_v0, %v713_v16  ;;  %v59_v60 = vld [vmem:[%s1563_s0 + $0x150] sm:$0xff] }
  0x41   :  { %v187_v4 = vmul.f32 %v892_v7, %v1577_v2  ;;  %582 = vst.msk [vmem:[%s1567_s4 + $0xd8] sm:$0xff] %vm554_vm0, %v517_v20  ;;  %v518_v58 = vsel %vm390_vm14, %v326_v55, %v454_v46  ;;  %vm391_vm15 = vcmp.ge.f32.partialorder %v327_v36, 0.0  ;;  %v455_v21 = vmul.f32 0.01, %v327_v36  ;;  %v58_v55 = vld [vmem:[%s1563_s0 + $0x148] sm:$0xff]  ;;  %v60_v20 = vld [vmem:[%s1563_s0 + $0x158] sm:$0xff] }
  0x42   :  { %v188_v24 = vmul.f32 %v892_v7, %v1578_v9  ;;  %v328_v63 = vadd.f32 %v920_v12, %v257_v57  ;;  %583 = vst.msk [vmem:[%s1567_s4 + $0xe0] sm:$0xff] %vm554_vm0, %v518_v58  ;;  %v189_v26 = vmul.f32 %v892_v7, %v1579_v25  ;;  %v1580_v27 = vsub.f32 %v882_v1, %v713_v16  ;;  %v61_v25 = vld [vmem:[%s1563_s0 + $0x160] sm:$0xff] }
  0x43   :  { %v258_v42 = vmul.f32 %v903_v11, %v187_v4  ;;  %v519_v3 = vsel %vm391_vm15, %v327_v36, %v455_v21  ;;  %v121_v0 = vsub.f32 %v52_v37, %v713_v16  ;;  %v122_v8 = vsub.f32 %v53_v22, %v713_v16 }
  0x44   :  { %v259_v47 = vmul.f32 %v903_v11, %v188_v24  ;;  %v190_v62 = vmul.f32 %v892_v7, %v1580_v27  ;;  %vm392_vm1 = vcmp.ge.f32.partialorder %v328_v63, 0.0  ;;  %v456_v43 = vmul.f32 0.01, %v328_v63  ;;  %584 = vst.msk [vmem:[%s1567_s4 + $0xe8] sm:$0xff] %vm554_vm0, %v519_v3 }
  0x45   :  { %v329_v1 = vadd.f32 %v920_v12, %v258_v42  ;;  %v260_v61 = vmul.f32 %v903_v11, %v189_v26  ;;  %v191_v34 = vmul.f32 %v892_v7, %v121_v0  ;;  %v123_v10 = vsub.f32 %v54_v48, %v713_v16  ;;  %v62_v0 = vld [vmem:[%s1563_s0 + $0x168] sm:$0xff] }
  0x46   :  { %v330_v31 = vadd.f32 %v920_v12, %v259_v47  ;;  %v261_v32 = vmul.f32 %v903_v11, %v190_v62  ;;  %v520_v33 = vsel %vm392_vm1, %v328_v63, %v456_v43  ;;  %v192_v52 = vmul.f32 %v892_v7, %v122_v8  ;;  %v63_v8 = vld [vmem:[%s1563_s0 + $0x170] sm:$0xff] }
  0x47   :  { %585 = vst.msk [vmem:[%s1567_s4 + $0xf0] sm:$0xff] %vm554_vm0, %v520_v33  ;;  %vm393_vm2 = vcmp.ge.f32.partialorder %v329_v1, 0.0  ;;  %v457_v5 = vmul.f32 0.01, %v329_v1  ;;  %v331_v23 = vadd.f32 %v920_v12, %v260_v61  ;;  %v262_v49 = vmul.f32 %v903_v11, %v191_v34 }
  0x48   :  { %vm394_vm3 = vcmp.ge.f32.partialorder %v330_v31, 0.0  ;;  %v458_v13 = vmul.f32 0.01, %v330_v31  ;;  %v332_v44 = vadd.f32 %v920_v12, %v261_v32  ;;  %v193_v53 = vmul.f32 %v892_v7, %v123_v10 }
  0x49   :  { %v521_v50 = vsel %vm393_vm2, %v329_v1, %v457_v5  ;;  %v124_v51 = vsub.f32 %v55_v6, %v713_v16  ;;  %vm395_vm4 = vcmp.ge.f32.partialorder %v331_v23, 0.0  ;;  %v459_v15 = vmul.f32 0.01, %v331_v23 }
  0x4a   :  { %v522_v28 = vsel %vm394_vm3, %v330_v31, %v458_v13  ;;  %586 = vst.msk [vmem:[%s1567_s4 + $0xf8] sm:$0xff] %vm554_vm0, %v521_v50  ;;  %vm396_vm5 = vcmp.ge.f32.partialorder %v332_v44, 0.0  ;;  %v460_v29 = vmul.f32 0.01, %v332_v44  ;;  %v333_v30 = vadd.f32 %v920_v12, %v262_v49 }
  0x4b   :  { %587 = vst.msk [vmem:[%s1567_s4 + $0x100] sm:$0xff] %vm554_vm0, %v522_v28  ;;  %v263_v54 = vmul.f32 %v903_v11, %v192_v52  ;;  %v264_v35 = vmul.f32 %v903_v11, %v193_v53  ;;  %v194_v56 = vmul.f32 %v892_v7, %v124_v51  ;;  %v523_v59 = vsel %vm395_vm4, %v331_v23, %v459_v15  ;;  %v64_v23 = vld [vmem:[%s1563_s0 + $0x178] sm:$0xff] }
  0x4c   :  { %v524_v39 = vsel %vm396_vm5, %v332_v44, %v460_v29  ;;  %v125_v17 = vsub.f32 %v56_v14, %v713_v16  ;;  %v126_v18 = vsub.f32 %v57_v38, %v713_v16  ;;  %588 = vst.msk [vmem:[%s1567_s4 + $0x108] sm:$0xff] %vm554_vm0, %v523_v59  ;;  %vm397_vm6 = vcmp.ge.f32.partialorder %v333_v30, 0.0  ;;  %v65_v14 = vld [vmem:[%s1563_s0 + $0x180] sm:$0xff] }
  0x4d   :  { %589 = vst.msk [vmem:[%s1567_s4 + $0x110] sm:$0xff] %vm554_vm0, %v524_v39  ;;  %v461_v40 = vmul.f32 0.01, %v333_v30  ;;  %v334_v41 = vadd.f32 %v920_v12, %v263_v54  ;;  %v335_v45 = vadd.f32 %v920_v12, %v264_v35  ;;  %v265_v19 = vmul.f32 %v903_v11, %v194_v56  ;;  %v66_v56 = vld [vmem:[%s1563_s0 + $0x188] sm:$0xff] }
  0x4e   :  { %v195_v46 = vmul.f32 %v892_v7, %v125_v17  ;;  %v196_v36 = vmul.f32 %v892_v7, %v126_v18  ;;  %v127_v57 = vsub.f32 %v58_v55, %v713_v16  ;;  %v128_v42 = vsub.f32 %v59_v60, %v713_v16  ;;  %v67_v18 = vld [vmem:[%s1563_s0 + $0x190] sm:$0xff]  ;;  %v68_v60 = vld [vmem:[%s1563_s0 + $0x198] sm:$0xff] }
  0x4f   :  { %v525_v2 = vsel %vm397_vm6, %v333_v30, %v461_v40  ;;  %vm398_vm7 = vcmp.ge.f32.partialorder %v334_v41, 0.0  ;;  %v462_v4 = vmul.f32 0.01, %v334_v41  ;;  %vm399_vm8 = vcmp.ge.f32.partialorder %v335_v45, 0.0 }
  0x50   :  { %590 = vst.msk [vmem:[%s1567_s4 + $0x118] sm:$0xff] %vm554_vm0, %v525_v2  ;;  %v463_v9 = vmul.f32 0.01, %v335_v45  ;;  %v336_v24 = vadd.f32 %v920_v12, %v265_v19  ;;  %v266_v37 = vmul.f32 %v903_v11, %v195_v46  ;;  %v267_v58 = vmul.f32 %v903_v11, %v196_v36 }
  0x51   :  { %v526_v21 = vsel %vm398_vm7, %v334_v41, %v462_v4  ;;  %v197_v63 = vmul.f32 %v892_v7, %v127_v57  ;;  %v129_v47 = vsub.f32 %v60_v20, %v713_v16  ;;  %v198_v3 = vmul.f32 %v892_v7, %v128_v42  ;;  %v69_v20 = vld [vmem:[%s1563_s0 + $0x1a0] sm:$0xff] }
  0x52   :  { %591 = vst.msk [vmem:[%s1567_s4 + $0x120] sm:$0xff] %vm554_vm0, %v526_v21  ;;  %v527_v26 = vsel %vm399_vm8, %v335_v45, %v463_v9  ;;  %vm400_vm9 = vcmp.ge.f32.partialorder %v336_v24, 0.0  ;;  %v464_v27 = vmul.f32 0.01, %v336_v24  ;;  %v337_v62 = vadd.f32 %v920_v12, %v266_v37 }
  0x53   :  { %592 = vst.msk [vmem:[%s1567_s4 + $0x128] sm:$0xff] %vm554_vm0, %v527_v26  ;;  %v338_v22 = vadd.f32 %v920_v12, %v267_v58  ;;  %v268_v48 = vmul.f32 %v903_v11, %v197_v63  ;;  %v199_v43 = vmul.f32 %v892_v7, %v129_v47  ;;  %v130_v61 = vsub.f32 %v61_v25, %v713_v16  ;;  %v70_v26 = vld [vmem:[%s1563_s0 + $0x1a8] sm:$0xff] }
  0x54   :  { %v528_v1 = vsel %vm400_vm9, %v336_v24, %v464_v27  ;;  %vm401_vm10 = vcmp.ge.f32.partialorder %v337_v62, 0.0  ;;  %v465_v31 = vmul.f32 0.01, %v337_v62  ;;  %v269_v34 = vmul.f32 %v903_v11, %v198_v3 }
  0x55   :  { %593 = vst.msk [vmem:[%s1567_s4 + $0x130] sm:$0xff] %vm554_vm0, %v528_v1  ;;  %vm402_vm11 = vcmp.ge.f32.partialorder %v338_v22, 0.0  ;;  %v466_v32 = vmul.f32 0.01, %v338_v22  ;;  %v339_v33 = vadd.f32 %v920_v12, %v268_v48  ;;  %v270_v6 = vmul.f32 %v903_v11, %v199_v43 }
  0x56   :  { %v529_v10 = vsel %vm401_vm10, %v337_v62, %v465_v31  ;;  %v200_v5 = vmul.f32 %v892_v7, %v130_v61  ;;  %v131_v13 = vsub.f32 %v62_v0, %v713_v16  ;;  %v340_v52 = vadd.f32 %v920_v12, %v269_v34  ;;  %v71_v0 = vld [vmem:[%s1563_s0 + $0x1b0] sm:$0xff] }
  0x57   :  { %594 = vst.msk [vmem:[%s1567_s4 + $0x138] sm:$0xff] %vm554_vm0, %v529_v10  ;;  %v530_v44 = vsel %vm402_vm11, %v338_v22, %v466_v32  ;;  %vm403_vm12 = vcmp.ge.f32.partialorder %v339_v33, 0.0  ;;  %v467_v49 = vmul.f32 0.01, %v339_v33  ;;  %v341_v50 = vadd.f32 %v920_v12, %v270_v6 }
  0x58   :  { %595 = vst.msk [vmem:[%s1567_s4 + $0x140] sm:$0xff] %vm554_vm0, %v530_v44  ;;  %v271_v28 = vmul.f32 %v903_v11, %v200_v5  ;;  %v201_v53 = vmul.f32 %v892_v7, %v131_v13  ;;  %v132_v51 = vsub.f32 %v63_v8, %v713_v16  ;;  %vm404_vm13 = vcmp.ge.f32.partialorder %v340_v52, 0.0  ;;  %v73_v44 = vld [vmem:[%s1563_s0 + $0x1c0] sm:$0xff] }
  0x59   :  { %v531_v38 = vsel %vm403_vm12, %v339_v33, %v467_v49  ;;  %v468_v15 = vmul.f32 0.01, %v340_v52  ;;  %v133_v29 = vsub.f32 %v64_v23, %v713_v16  ;;  %vm405_vm14 = vcmp.ge.f32.partialorder %v341_v50, 0.0  ;;  %v72_v23 = vld [vmem:[%s1563_s0 + $0x1b8] sm:$0xff] }
  0x5a   :  { %596 = vst.msk [vmem:[%s1567_s4 + $0x148] sm:$0xff] %vm554_vm0, %v531_v38  ;;  %v469_v30 = vmul.f32 0.01, %v341_v50  ;;  %v342_v54 = vadd.f32 %v920_v12, %v271_v28  ;;  %v272_v35 = vmul.f32 %v903_v11, %v201_v53  ;;  %v202_v59 = vmul.f32 %v892_v7, %v132_v51 }
  0x5b   :  { %v532_v55 = vsel %vm404_vm13, %v340_v52, %v468_v15  ;;  %v203_v39 = vmul.f32 %v892_v7, %v133_v29  ;;  %v134_v17 = vsub.f32 %v65_v14, %v713_v16  ;;  %v135_v57 = vsub.f32 %v66_v56, %v713_v16 }
  0x5c   :  { %597 = vst.msk [vmem:[%s1567_s4 + $0x150] sm:$0xff] %vm554_vm0, %v532_v55  ;;  %v533_v40 = vsel %vm405_vm14, %v341_v50, %v469_v30  ;;  %vm406_vm15 = vcmp.ge.f32.partialorder %v342_v54, 0.0  ;;  %v470_v41 = vmul.f32 0.01, %v342_v54  ;;  %v343_v45 = vadd.f32 %v920_v12, %v272_v35  ;;  %v74_v30 = vld [vmem:[%s1563_s0 + $0x1c8] sm:$0xff] }
  0x5d   :  { %598 = vst.msk [vmem:[%s1567_s4 + $0x158] sm:$0xff] %vm554_vm0, %v533_v40  ;;  %v273_v19 = vmul.f32 %v903_v11, %v202_v59  ;;  %v274_v46 = vmul.f32 %v903_v11, %v203_v39  ;;  %v204_v36 = vmul.f32 %v892_v7, %v134_v17  ;;  %v136_v9 = vsub.f32 %v67_v18, %v713_v16 }
  0x5e   :  { %v534_v2 = vsel %vm406_vm15, %v342_v54, %v470_v41  ;;  %vm407_vm1 = vcmp.ge.f32.partialorder %v343_v45, 0.0  ;;  %v471_v4 = vmul.f32 0.01, %v343_v45  ;;  %v205_v21 = vmul.f32 %v892_v7, %v135_v57  ;;  %v75_v54 = vld [vmem:[%s1563_s0 + $0x1d0] sm:$0xff] }
  0x5f   :  { %599 = vst.msk [vmem:[%s1567_s4 + $0x160] sm:$0xff] %vm554_vm0, %v534_v2  ;;  %v344_v24 = vadd.f32 %v920_v12, %v273_v19  ;;  %v345_v37 = vadd.f32 %v920_v12, %v274_v46  ;;  %v275_v58 = vmul.f32 %v903_v11, %v204_v36  ;;  %v206_v42 = vmul.f32 %v892_v7, %v136_v9  ;;  %v76_v19 = vld [vmem:[%s1563_s0 + $0x1d8] sm:$0xff]  ;;  %v77_v9 = vld [vmem:[%s1563_s0 + $0x1e0] sm:$0xff] }
  0x60   :  { %v535_v63 = vsel %vm407_vm1, %v343_v45, %v471_v4  ;;  %v137_v47 = vsub.f32 %v68_v60, %v713_v16  ;;  %v138_v25 = vsub.f32 %v69_v20, %v713_v16  ;;  %v276_v48 = vmul.f32 %v903_v11, %v205_v21 }
  0x61   :  { %600 = vst.msk [vmem:[%s1567_s4 + $0x168] sm:$0xff] %vm554_vm0, %v535_v63  ;;  %vm408_vm2 = vcmp.ge.f32.partialorder %v344_v24, 0.0  ;;  %v472_v27 = vmul.f32 0.01, %v344_v24  ;;  %vm409_vm3 = vcmp.ge.f32.partialorder %v345_v37, 0.0  ;;  %v346_v22 = vadd.f32 %v920_v12, %v275_v58 }
  0x62   :  { %v473_v62 = vmul.f32 0.01, %v345_v37  ;;  %v277_v3 = vmul.f32 %v903_v11, %v206_v42  ;;  %v207_v43 = vmul.f32 %v892_v7, %v137_v47  ;;  %v208_v61 = vmul.f32 %v892_v7, %v138_v25 }
  0x63   :  { %v536_v1 = vsel %vm408_vm2, %v344_v24, %v472_v27  ;;  %v139_v32 = vsub.f32 %v70_v26, %v713_v16  ;;  %vm410_vm4 = vcmp.ge.f32.partialorder %v346_v22, 0.0  ;;  %v474_v33 = vmul.f32 0.01, %v346_v22  ;;  %v78_v24 = vld [vmem:[%s1563_s0 + $0x1e8] sm:$0xff] }
  0x64   :  { %v537_v31 = vsel %vm409_vm3, %v345_v37, %v473_v62  ;;  %601 = vst.msk [vmem:[%s1567_s4 + $0x170] sm:$0xff] %vm554_vm0, %v536_v1  ;;  %v347_v34 = vadd.f32 %v920_v12, %v276_v48  ;;  %v348_v8 = vadd.f32 %v920_v12, %v277_v3  ;;  %v278_v10 = vmul.f32 %v903_v11, %v207_v43  ;;  %v79_v48 = vld [vmem:[%s1563_s0 + $0x1f0] sm:$0xff] }
  0x65   :  { %602 = vst.msk [vmem:[%s1567_s4 + $0x178] sm:$0xff] %vm554_vm0, %v537_v31  ;;  %v279_v6 = vmul.f32 %v903_v11, %v208_v61  ;;  %v209_v5 = vmul.f32 %v892_v7, %v139_v32  ;;  %v140_v13 = vsub.f32 %v71_v0, %v713_v16  ;;  %v538_v49 = vsel %vm410_vm4, %v346_v22, %v474_v33 }
  0x66   :  { %vm411_vm5 = vcmp.ge.f32.partialorder %v347_v34, 0.0  ;;  %v475_v52 = vmul.f32 0.01, %v347_v34  ;;  %vm412_vm6 = vcmp.ge.f32.partialorder %v348_v8, 0.0  ;;  %603 = vst.msk [vmem:[%s1567_s4 + $0x180] sm:$0xff] %vm554_vm0, %v538_v49  ;;  %v349_v28 = vadd.f32 %v920_v12, %v278_v10  ;;  %v80_v10 = vld [vmem:[%s1563_s0 + $0x1f8] sm:$0xff] }
  0x67   :  { %v476_v50 = vmul.f32 0.01, %v348_v8  ;;  %v350_v53 = vadd.f32 %v920_v12, %v279_v6  ;;  %v280_v51 = vmul.f32 %v903_v11, %v209_v5  ;;  %v210_v38 = vmul.f32 %v892_v7, %v140_v13 }
  0x68   :  { %v539_v14 = vsel %vm411_vm5, %v347_v34, %v475_v52  ;;  %v141_v15 = vsub.f32 %v72_v23, %v713_v16  ;;  %v142_v29 = vsub.f32 %v73_v44, %v713_v16  ;;  %vm413_vm7 = vcmp.ge.f32.partialorder %v349_v28, 0.0 }
  0x69   :  { %604 = vst.msk [vmem:[%s1567_s4 + $0x188] sm:$0xff] %vm554_vm0, %v539_v14  ;;  %v540_v35 = vsel %vm412_vm6, %v348_v8, %v476_v50  ;;  %v477_v56 = vmul.f32 0.01, %v349_v28  ;;  %vm414_vm8 = vcmp.ge.f32.partialorder %v350_v53, 0.0  ;;  %v478_v55 = vmul.f32 0.01, %v350_v53 }
  0x6a   :  { %605 = vst.msk [vmem:[%s1567_s4 + $0x190] sm:$0xff] %vm554_vm0, %v540_v35  ;;  %v351_v59 = vadd.f32 %v920_v12, %v280_v51  ;;  %v281_v39 = vmul.f32 %v903_v11, %v210_v38  ;;  %v211_v17 = vmul.f32 %v892_v7, %v141_v15  ;;  %v212_v40 = vmul.f32 %v892_v7, %v142_v29 }
  0x6b   :  { %v541_v18 = vsel %vm413_vm7, %v349_v28, %v477_v56  ;;  %v143_v41 = vsub.f32 %v74_v30, %v713_v16  ;;  %v144_v45 = vsub.f32 %v75_v54, %v713_v16  ;;  %v542_v46 = vsel %vm414_vm8, %v350_v53, %v478_v55 }
  0x6c   :  { %606 = vst.msk [vmem:[%s1567_s4 + $0x198] sm:$0xff] %vm554_vm0, %v541_v18  ;;  %vm415_vm9 = vcmp.ge.f32.partialorder %v351_v59, 0.0  ;;  %v479_v36 = vmul.f32 0.01, %v351_v59  ;;  %v352_v57 = vadd.f32 %v920_v12, %v281_v39  ;;  %607 = vst.msk [vmem:[%s1567_s4 + $0x1a0] sm:$0xff] %vm554_vm0, %v542_v46  ;;  %v282_v60 = vmul.f32 %v903_v11, %v211_v17 }
  0x6d   :  { %v283_v20 = vmul.f32 %v903_v11, %v212_v40  ;;  %v213_v2 = vmul.f32 %v892_v7, %v143_v41  ;;  %v214_v4 = vmul.f32 %v892_v7, %v144_v45  ;;  %v145_v21 = vsub.f32 %v76_v19, %v713_v16 }
  0x6e   :  { %v543_v37 = vsel %vm415_vm9, %v351_v59, %v479_v36  ;;  %vm416_vm10 = vcmp.ge.f32.partialorder %v352_v57, 0.0  ;;  %v480_v58 = vmul.f32 0.01, %v352_v57  ;;  %v353_v63 = vadd.f32 %v920_v12, %v282_v60 }
  0x6f   :  { %608 = vst.msk [vmem:[%s1567_s4 + $0x1a8] sm:$0xff] %vm554_vm0, %v543_v37  ;;  %v354_v42 = vadd.f32 %v920_v12, %v283_v20  ;;  %v284_v47 = vmul.f32 %v903_v11, %v213_v2  ;;  %v285_v25 = vmul.f32 %v903_v11, %v214_v4  ;;  %v215_v27 = vmul.f32 %v892_v7, %v145_v21 }
  0x70   :  { %v544_v26 = vsel %vm416_vm10, %v352_v57, %v480_v58  ;;  %v146_v62 = vsub.f32 %v77_v9, %v713_v16  ;;  %v147_v22 = vsub.f32 %v78_v24, %v713_v16  ;;  %vm417_vm11 = vcmp.ge.f32.partialorder %v353_v63, 0.0 }
  0x71   :  { %609 = vst.msk [vmem:[%s1567_s4 + $0x1b0] sm:$0xff] %vm554_vm0, %v544_v26  ;;  %v481_v3 = vmul.f32 0.01, %v353_v63  ;;  %vm418_vm12 = vcmp.ge.f32.partialorder %v354_v42, 0.0  ;;  %v482_v43 = vmul.f32 0.01, %v354_v42  ;;  %v355_v0 = vadd.f32 %v920_v12, %v284_v47 }
  0x72   :  { %v356_v1 = vadd.f32 %v920_v12, %v285_v25  ;;  %v286_v31 = vmul.f32 %v903_v11, %v215_v27  ;;  %v216_v61 = vmul.f32 %v892_v7, %v146_v62  ;;  %v217_v34 = vmul.f32 %v892_v7, %v147_v22 }
  0x73   :  { %v545_v32 = vsel %vm417_vm11, %v353_v63, %v481_v3  ;;  %v546_v33 = vsel %vm418_vm12, %v354_v42, %v482_v43  ;;  %v148_v8 = vsub.f32 %v79_v48, %v713_v16  ;;  %vm419_vm13 = vcmp.ge.f32.partialorder %v355_v0, 0.0 }
  0x74   :  { %610 = vst.msk [vmem:[%s1567_s4 + $0x1b8] sm:$0xff] %vm554_vm0, %v545_v32  ;;  %611 = vst.msk [vmem:[%s1567_s4 + $0x1c0] sm:$0xff] %vm554_vm0, %v546_v33  ;;  %v483_v6 = vmul.f32 0.01, %v355_v0  ;;  %vm420_vm14 = vcmp.ge.f32.partialorder %v356_v1, 0.0  ;;  %v357_v13 = vadd.f32 %v920_v12, %v286_v31  ;;  %v287_v23 = vmul.f32 %v903_v11, %v216_v61 }
  0x75   :  { %v484_v5 = vmul.f32 0.01, %v356_v1  ;;  %v288_v44 = vmul.f32 %v903_v11, %v217_v34  ;;  %v218_v49 = vmul.f32 %v892_v7, %v148_v8  ;;  %v149_v28 = vsub.f32 %v80_v10, %v713_v16 }
  0x76   :  { %v547_v52 = vsel %vm419_vm13, %v355_v0, %v483_v6  ;;  %vm421_vm15 = vcmp.ge.f32.partialorder %v357_v13, 0.0  ;;  %v485_v53 = vmul.f32 0.01, %v357_v13  ;;  %v358_v51 = vadd.f32 %v920_v12, %v287_v23 }
  0x77   :  { %v548_v50 = vsel %vm420_vm14, %v356_v1, %v484_v5  ;;  %612 = vst.msk [vmem:[%s1567_s4 + $0x1c8] sm:$0xff] %vm554_vm0, %v547_v52  ;;  %v359_v14 = vadd.f32 %v920_v12, %v288_v44  ;;  %v289_v38 = vmul.f32 %v903_v11, %v218_v49  ;;  %v219_v16 = vmul.f32 %v892_v7, %v149_v28 }
  0x78   :  { %613 = vst.msk [vmem:[%s1567_s4 + $0x1d0] sm:$0xff] %vm554_vm0, %v548_v50  ;;  %v549_v15 = vsel %vm421_vm15, %v357_v13, %v485_v53  ;;  %vm422_vm1 = vcmp.ge.f32.partialorder %v358_v51, 0.0  ;;  %v486_v29 = vmul.f32 0.01, %v358_v51 }
  0x79   :  { %vm423_vm2 = vcmp.ge.f32.partialorder %v359_v14, 0.0  ;;  %614 = vst.msk [vmem:[%s1567_s4 + $0x1d8] sm:$0xff] %vm554_vm0, %v549_v15  ;;  %v487_v30 = vmul.f32 0.01, %v359_v14  ;;  %v360_v54 = vadd.f32 %v920_v12, %v289_v38  ;;  %v290_v35 = vmul.f32 %v903_v11, %v219_v16 }
  0x7a   :  { %v550_v56 = vsel %vm422_vm1, %v358_v51, %v486_v29 }
  0x7b   :  { %615 = vst.msk [vmem:[%s1567_s4 + $0x1e0] sm:$0xff] %vm554_vm0, %v550_v56  ;;  %v551_v7 = vsel %vm423_vm2, %v359_v14, %v487_v30  ;;  %vm424_vm3 = vcmp.ge.f32.partialorder %v360_v54, 0.0  ;;  %v488_v55 = vmul.f32 0.01, %v360_v54  ;;  %v361_v59 = vadd.f32 %v920_v12, %v290_v35 }
  0x7c   :  { %616 = vst.msk [vmem:[%s1567_s4 + $0x1e8] sm:$0xff] %vm554_vm0, %v551_v7 }
  0x7d   :  { %v552_v39 = vsel %vm424_vm3, %v360_v54, %v488_v55  ;;  %vm425_vm4 = vcmp.ge.f32.partialorder %v361_v59, 0.0  ;;  %v489_v17 = vmul.f32 0.01, %v361_v59 }
  0x7e   :  { %617 = vst.msk [vmem:[%s1567_s4 + $0x1f0] sm:$0xff] %vm554_vm0, %v552_v39 }
  0x7f   :  { %v553_v11 = vsel %vm425_vm4, %v361_v59, %v489_v17 }
  0x80   :  { %618 = vst.msk [vmem:[%s1567_s4 + $0x1f8] sm:$0xff] %vm554_vm0, %v553_v11 }

// kernel: vae_forward.36
= control target key start
LH: loop header
LB: loop body
LE: loop exit
PB: predicated region body
PF: predicated region fallthrough
CT: control target
= control target key end

     0   :  { %vm169_vm0 = vcmask 1043456   ;;  %vm144_vm1 = vcmask 64512   ;;  %s2555_s4 = inlined_call_operand.vmem [shape: bf16[9,8,8], index: 4, kind: input, shape index: {}]   ;;  %s2556_s0 = inlined_call_operand.vmem [shape: bf16[128,8], index: 0, kind: input, shape index: {}]   ;;  %s2557_s1 = inlined_call_operand.vmem [shape: bf16[128,8], index: 1, kind: input, shape index: {}]   ;;  %s2558_s2 = inlined_call_operand.vmem [shape: bf16[128,8], index: 2, kind: input, shape index: {}]   ;;  %s2559_s3 = inlined_call_operand.vmem [shape: bf16[128,8], index: 3, kind: input, shape index: {}]   ;;  %s2560_s5 = inlined_call_operand.vmem [shape: f32[1,8], index: 5, kind: input, shape index: {}]   ;;  %s2561_s6 = inlined_call_operand.vmem [shape: f32[4,128,8], index: 6, kind: output, shape index: {}]  }
   0x1   :  { %v28_v0 = vld [vmem:[%s2555_s4 + $0x10] sm:$0xf]  ;;  %v29_v1 = vld [vmem:[%s2555_s4 + $0x14] sm:$0xf]  ;;  %v1981_v4 = vld [vmem:[%s2556_s0] sm:$0xff]  }
   0x2   :  { %1891 = vmatprep.subr.msk.bf16.mxu0 %vm169_vm0, %v28_v0  ;;  %1894 = vmatprep.subr.msk.bf16.mxu1 %vm169_vm0, %v29_v1  ;;  %v171_v2 = vsel %vm169_vm0, %v28_v0, 0  ;;  %v451_v3 = vsel %vm169_vm0, %v29_v1, 0  ;;  %v1986_v5 = vld [vmem:[%s2556_s0 + $0x20] sm:$0xff]   ;;  %v1995_v6 = vld [vmem:[%s2556_s0 + $0x8] sm:$0xff]   ;;  %v30_v10 = vld [vmem:[%s2555_s4 + $0x18] sm:$0xf] }
   0x3   :  { %1648 = vmatpush3.bf16.msra.mxu0 %v171_v2  ;;  %1810 = vmatpush3.bf16.msra.mxu1 %v451_v3  ;;  %v27_v7 = vld [vmem:[%s2555_s4 + $0xc] sm:$0xf]  ;;  %v881_v11 = vsel %vm169_vm0, %v30_v10, 0  ;;  %v2019_v12 = vld [vmem:[%s2556_s0 + $0x10] sm:$0xff]   ;;  %v2034_v14 = vld [vmem:[%s2556_s0 + $0x18] sm:$0xff]  }
   0x4   :  { %1649 = vmatprep.mubr.msk.bf16.mxu0 %vm144_vm1, %v1981_v4  ;;  %1693 = vmatprep.mubr.msk.bf16.mxu1 %vm144_vm1, %v1986_v5  ;;  %v2004_v8 = vld [vmem:[%s2556_s0 + $0x28] sm:$0xff]   ;;  %v351_v9 = vsel %vm169_vm0, %v27_v7, 0  ;;  %v2024_v13 = vld [vmem:[%s2556_s0 + $0x30] sm:$0xff]   ;;  %v2039_v15 = vld [vmem:[%s2556_s0 + $0x38] sm:$0xff]  }
   0x5   :  { %1892 = vmatprep.subr.msk.bf16.mxu0 %vm169_vm0, %v27_v7  ;;  %1897 = vmatprep.subr.msk.bf16.mxu1 %vm169_vm0, %v30_v10  ;;  %v1909_v16 = vld [vmem:[%s2557_s1] sm:$0xff]   ;;  %v1910_v18 = vld [vmem:[%s2557_s1 + $0x8] sm:$0xff]   ;;  %v1911_v19 = vld [vmem:[%s2557_s1 + $0x10] sm:$0xff]  }
   0x6   :  { %1650 = vmatmul.mubr.msk.bf16.vlgmr.msra.gmra.mrb[0].mxu0 %vm144_vm1, %v1995_v6  ;;  %1694 = vmatmul.mubr.msk.bf16.vlgmr.msra.gmra.mrb[0].mxu1 %vm144_vm1, %v2004_v8  ;;  %v32_v17 = vld [vmem:[%s2555_s4 + $0x20] sm:$0xf]  ;;  %v26_v21 = vld [vmem:[%s2555_s4 + $0x8] sm:$0xf]  ;;  %v1912_v22 = vld [vmem:[%s2557_s1 + $0x18] sm:$0xff]  }
   0x7   :  { %1666 = vmatpush3.bf16.msra.mxu0 %v351_v9  ;;  %1738 = vmatpush3.bf16.msra.mxu1 %v881_v11  ;;  %v981_v20 = vsel %vm169_vm0, %v32_v17, 0  ;;  %v1913_v23 = vld [vmem:[%s2557_s1 + $0x20] sm:$0xff]   ;;  %v1914_v24 = vld [vmem:[%s2557_s1 + $0x28] sm:$0xff]   ;;  %v1915_v25 = vld [vmem:[%s2557_s1 + $0x30] sm:$0xff]   ;;  %v1081_v28 = vsel %vm169_vm0, %v26_v21, 0 }
   0x8   :  { %1653 = vmatprep.mubr.msk.bf16.mxu0 %vm144_vm1, %v2019_v12  ;;  %1893 = vmatprep.subr.msk.bf16.mxu0 %vm169_vm0, %v29_v1  ;;  %v25_v26 = vld [vmem:[%s2555_s4 + $0x4] sm:$0xf]  ;;  %v1916_v27 = vld [vmem:[%s2557_s1 + $0x38] sm:$0xff]   ;;  %v24_v29 = vld [vmem:[%s2555_s4] sm:$0xf] }
   0x9   :  { %1697 = vmatprep.mubr.msk.bf16.mxu1 %vm144_vm1, %v2024_v13  ;;  %1898 = vmatprep.subr.msk.bf16.mxu1 %vm169_vm0, %v32_v17  ;;  %v648_v30 = vsel %vm169_vm0, %v25_v26, 0  ;;  %v31_v31 = vld [vmem:[%s2555_s4 + $0x1c] sm:$0xf]  ;;  %v1917_v32 = vld [vmem:[%s2558_s2] sm:$0xff]   ;;  %v1918_v33 = vld [vmem:[%s2558_s2 + $0x8] sm:$0xff]   ;;  %v1261_v36 = vsel %vm169_vm0, %v24_v29, 0 }
   0xa   :  { %v748_v34 = vsel %vm169_vm0, %v31_v31, 0  ;;  %v1919_v35 = vld [vmem:[%s2558_s2 + $0x10] sm:$0xff]   ;;  %v1920_v37 = vld [vmem:[%s2558_s2 + $0x18] sm:$0xff]   ;;  %v1921_v38 = vld [vmem:[%s2558_s2 + $0x20] sm:$0xff]  }
   0xb   :  { %v1922_v39 = vld [vmem:[%s2558_s2 + $0x28] sm:$0xff]   ;;  %v1923_v40 = vld [vmem:[%s2558_s2 + $0x30] sm:$0xff]   ;;  %v1924_v41 = vld [vmem:[%s2558_s2 + $0x38] sm:$0xff]  }
   0xc   :  { %v1925_v42 = vld [vmem:[%s2559_s3] sm:$0xff]   ;;  %v1926_v43 = vld [vmem:[%s2559_s3 + $0x8] sm:$0xff]   ;;  %v1927_v44 = vld [vmem:[%s2559_s3 + $0x10] sm:$0xff]  }
   0xd   :  { %v1928_v45 = vld [vmem:[%s2559_s3 + $0x18] sm:$0xff]   ;;  %v1929_v46 = vld [vmem:[%s2559_s3 + $0x20] sm:$0xff]   ;;  %v1930_v47 = vld [vmem:[%s2559_s3 + $0x28] sm:$0xff]  }
   0xe   :  { %1654 = vmatmul.mubr.msk.bf16.gmra.mrb[4].mxu0 %vm144_vm1, %v2034_v14  ;;  %1698 = vmatmul.mubr.msk.bf16.gmra.mrb[4].mxu1 %vm144_vm1, %v2039_v15  ;;  %v1931_v48 = vld [vmem:[%s2559_s3 + $0x30] sm:$0xff]   ;;  %v1932_v49 = vld [vmem:[%s2559_s3 + $0x38] sm:$0xff]   ;;  %v2233_v50 = vld [vmem:[%s2560_s5] ss:$0 sm:$0xff] }
   0xf   :  { %1657 = vmatprep.mubr.msk.bf16.mxu0 %vm144_vm1, %v1986_v5  ;;  %1739 = vmatprep.mubr.msk.bf16.mxu1 %vm144_vm1, %v1909_v16 }
  0x16   :  { %1658 = vmatmul.mubr.msk.bf16.gmra.mrb[8].mxu0 %vm144_vm1, %v2004_v8  ;;  %1740 = vmatmul.mubr.msk.bf16.vlgmr.msra.gmra.mrb[8].mxu1 %vm144_vm1, %v1910_v18 }
  0x17   :  { %1661 = vmatprep.mubr.msk.bf16.mxu0 %vm144_vm1, %v2024_v13  ;;  %1756 = vmatpush3.bf16.msra.mxu1 %v981_v20 }
  0x18   :  { %1743 = vmatprep.mubr.msk.bf16.mxu1 %vm144_vm1, %v1911_v19  ;;  %1899 = vmatprep.subr.msk.bf16.mxu1 %vm169_vm0, %v26_v21 }
  0x1e   :  { %1662 = vmatmul.mubr.msk.bf16.gmra.mrb[12].mxu0 %vm144_vm1, %v2039_v15  ;;  %1744 = vmatmul.mubr.msk.bf16.gmra.mrb[12].mxu1 %vm144_vm1, %v1912_v22 }
  0x1f   :  { %1667 = vmatprep.mubr.msk.bf16.mxu0 %vm144_vm1, %v1909_v16  ;;  %1747 = vmatprep.mubr.msk.bf16.mxu1 %vm144_vm1, %v1913_v23 }
  0x26   :  { %1668 = vmatmul.mubr.msk.bf16.vlgmr.msra.gmra.mrb[16].mxu0 %vm144_vm1, %v1910_v18  ;;  %1748 = vmatmul.mubr.msk.bf16.gmra.mrb[16].mxu1 %vm144_vm1, %v1914_v24 }
  0x27   :  { %1684 = vmatpush3.bf16.msra.mxu0 %v451_v3  ;;  %1671 = vmatprep.mubr.msk.bf16.mxu0 %vm144_vm1, %v1911_v19 }
  0x28   :  { %1751 = vmatprep.mubr.msk.bf16.mxu1 %vm144_vm1, %v1915_v25  ;;  %1895 = vmatprep.subr.msk.bf16.mxu0 %vm169_vm0, %v25_v26 }
  0x2e   :  { %1672 = vmatmul.mubr.msk.bf16.gmra.mrb[20].mxu0 %vm144_vm1, %v1912_v22  ;;  %1752 = vmatmul.mubr.msk.bf16.gmra.mrb[20].mxu1 %vm144_vm1, %v1916_v27 }
  0x2f   :  { %1675 = vmatprep.mubr.msk.bf16.mxu0 %vm144_vm1, %v1913_v23  ;;  %1757 = vmatprep.mubr.msk.bf16.mxu1 %vm144_vm1, %v1981_v4 }
  0x36   :  { %1676 = vmatmul.mubr.msk.bf16.gmra.mrb[24].mxu0 %vm144_vm1, %v1914_v24  ;;  %1758 = vmatmul.mubr.msk.bf16.vlgmr.msra.gmra.mrb[8].mxu1 %vm144_vm1, %v1995_v6 }
  0x37   :  { %1679 = vmatprep.mubr.msk.bf16.mxu0 %vm144_vm1, %v1915_v25  ;;  %1774 = vmatpush3.bf16.msra.mxu1 %v1081_v28 }
  0x38   :  { %1761 = vmatprep.mubr.msk.bf16.mxu1 %vm144_vm1, %v2019_v12  ;;  %1900 = vmatprep.subr.msk.bf16.mxu1 %vm169_vm0, %v24_v29 }
  0x3e   :  { %1680 = vmatmul.mubr.msk.bf16.gmra.mrb[28].mxu0 %vm144_vm1, %v1916_v27  ;;  %1762 = vmatmul.mubr.msk.bf16.gmra.mrb[12].mxu1 %vm144_vm1, %v2034_v14 }
  0x3f   :  { %1685 = vmatprep.mubr.msk.bf16.mxu0 %vm144_vm1, %v1981_v4  ;;  %1765 = vmatprep.mubr.msk.bf16.mxu1 %vm144_vm1, %v1986_v5 }
  0x46   :  { %1686 = vmatmul.mubr.msk.bf16.vlgmr.msra.gmra.mrb[16].mxu0 %vm144_vm1, %v1995_v6  ;;  %1766 = vmatmul.mubr.msk.bf16.gmra.mrb[16].mxu1 %vm144_vm1, %v2004_v8 }
  0x47   :  { %1702 = vmatpush3.bf16.msra.mxu0 %v648_v30  ;;  %1689 = vmatprep.mubr.msk.bf16.mxu0 %vm144_vm1, %v2019_v12 }
  0x48   :  { %1769 = vmatprep.mubr.msk.bf16.mxu1 %vm144_vm1, %v2024_v13  ;;  %1896 = vmatprep.subr.msk.bf16.mxu0 %vm169_vm0, %v31_v31 }
  0x4e   :  { %1690 = vmatmul.mubr.msk.bf16.gmra.mrb[20].mxu0 %vm144_vm1, %v2034_v14  ;;  %1770 = vmatmul.mubr.msk.bf16.gmra.mrb[20].mxu1 %vm144_vm1, %v2039_v15 }
  0x4f   :  { %1703 = vmatprep.mubr.msk.bf16.mxu0 %vm144_vm1, %v1917_v32  ;;  %1775 = vmatprep.mubr.msk.bf16.mxu1 %vm144_vm1, %v1917_v32 }
  0x56   :  { %1704 = vmatmul.mubr.msk.bf16.vlgmr.msra.gmra.mrb[32].mxu0 %vm144_vm1, %v1918_v33  ;;  %1776 = vmatmul.mubr.msk.bf16.vlgmr.msra.gmra.mrb[8].mxu1 %vm144_vm1, %v1918_v33 }
  0x57   :  { %1720 = vmatpush3.bf16.msra.mxu0 %v748_v34  ;;  %1792 = vmatpush3.bf16.msra.mxu1 %v1261_v36 }
  0x58   :  { %1707 = vmatprep.mubr.msk.bf16.mxu0 %vm144_vm1, %v1919_v35  ;;  %1779 = vmatprep.mubr.msk.bf16.mxu1 %vm144_vm1, %v1919_v35 }
  0x5e   :  { %1708 = vmatmul.mubr.msk.bf16.gmra.mrb[36].mxu0 %vm144_vm1, %v1920_v37  ;;  %1780 = vmatmul.mubr.msk.bf16.gmra.mrb[12].mxu1 %vm144_vm1, %v1920_v37 }
  0x5f   :  { %1711 = vmatprep.mubr.msk.bf16.mxu0 %vm144_vm1, %v1921_v38  ;;  %1783 = vmatprep.mubr.msk.bf16.mxu1 %vm144_vm1, %v1921_v38 }
  0x66   :  { %1712 = vmatmul.mubr.msk.bf16.gmra.mrb[40].mxu0 %vm144_vm1, %v1922_v39  ;;  %1784 = vmatmul.mubr.msk.bf16.gmra.mrb[16].mxu1 %vm144_vm1, %v1922_v39 }
  0x67   :  { %1715 = vmatprep.mubr.msk.bf16.mxu0 %vm144_vm1, %v1923_v40  ;;  %1787 = vmatprep.mubr.msk.bf16.mxu1 %vm144_vm1, %v1923_v40 }
  0x6e   :  { %1716 = vmatmul.mubr.msk.bf16.gmra.mrb[44].mxu0 %vm144_vm1, %v1924_v41  ;;  %1788 = vmatmul.mubr.msk.bf16.gmra.mrb[20].mxu1 %vm144_vm1, %v1924_v41 }
  0x6f   :  { %1721 = vmatprep.mubr.msk.bf16.mxu0 %vm144_vm1, %v1981_v4  ;;  %1793 = vmatprep.mubr.msk.bf16.mxu1 %vm144_vm1, %v1925_v42 }
  0x76   :  { %1722 = vmatmul.mubr.msk.bf16.vlgmr.msra.gmra.mrb[32].mxu0 %vm144_vm1, %v1995_v6  ;;  %1794 = vmatmul.mubr.msk.bf16.vlgmr.msra.gmra.mrb[8].mxu1 %vm144_vm1, %v1926_v43 }
  0x77   :  { %1725 = vmatprep.mubr.msk.bf16.mxu0 %vm144_vm1, %v2019_v12  ;;  %1797 = vmatprep.mubr.msk.bf16.mxu1 %vm144_vm1, %v1927_v44 }
  0x7e   :  { %1726 = vmatmul.mubr.msk.bf16.gmra.mrb[36].mxu0 %vm144_vm1, %v2034_v14  ;;  %1798 = vmatmul.mubr.msk.bf16.gmra.mrb[12].mxu1 %vm144_vm1, %v1928_v45 }
  0x7f   :  { %1729 = vmatprep.mubr.msk.bf16.mxu0 %vm144_vm1, %v1986_v5  ;;  %1801 = vmatprep.mubr.msk.bf16.mxu1 %vm144_vm1, %v1929_v46 }
  0x86   :  { %1730 = vmatmul.mubr.msk.bf16.gmra.mrb[40].mxu0 %vm144_vm1, %v2004_v8  ;;  %1802 = vmatmul.mubr.msk.bf16.gmra.mrb[16].mxu1 %vm144_vm1, %v1930_v47 }
  0x87   :  { %1733 = vmatprep.mubr.msk.bf16.mxu0 %vm144_vm1, %v2024_v13  ;;  %1805 = vmatprep.mubr.msk.bf16.mxu1 %vm144_vm1, %v1931_v48 }
  0x8e   :  { %1734 = vmatmul.mubr.msk.bf16.gmra.mrb[44].mxu0 %vm144_vm1, %v2039_v15  ;;  %1806 = vmatmul.mubr.msk.bf16.gmra.mrb[20].mxu1 %vm144_vm1, %v1932_v49 }
  0xd9   :  { %v1651_v51 = vpop.f32.mrb[0].mxu0  ;;  %v1695_v53 = vpop.f32.mrb[0].mxu1 }
  0xda   :  { %v216_v52 = vadd.f32 %v1651_v51, %v2233_v50  ;;  %v207_v54 = vpop.f32.mrb[1].mxu0  ;;  %v519_v56 = vpop.f32.mrb[1].mxu1 }
  0xdb   :  { %v208_v55 = vadd.f32 %v2233_v50, %v207_v54  ;;  %v1652_v57 = vpop.f32.mrb[2].mxu0  ;;  %v1696_v59 = vpop.f32.mrb[2].mxu1 }
  0xdc   :  { %272 = vst.msk [vmem:[%s2561_s6 + $0x10] sm:$0xff] %vm144_vm1, %v216_v52  ;;  %v219_v58 = vadd.f32 %v1652_v57, %v2233_v50  ;;  %v210_v60 = vpop.f32.mrb[3].mxu0  ;;  %v522_v62 = vpop.f32.mrb[3].mxu1 }
  0xdd   :  { %270 = vst.msk [vmem:[%s2561_s6] sm:$0xff] %vm144_vm1, %v208_v55  ;;  %v211_v61 = vadd.f32 %v2233_v50, %v210_v60 }
  0xde   :  { %273 = vst.msk [vmem:[%s2561_s6 + $0x18] sm:$0xff] %vm144_vm1, %v219_v58 }
  0xdf   :  { %271 = vst.msk [vmem:[%s2561_s6 + $0x8] sm:$0xff] %vm144_vm1, %v211_v61 }
  0xe1   :  { %v1655_v63 = vpop.f32.mrb[4].mxu0  ;;  %v1699_v1 = vpop.f32.mrb[4].mxu1 }
  0xe2   :  { %v232_v0 = vadd.f32 %v1655_v63, %v2233_v50  ;;  %v223_v2 = vpop.f32.mrb[5].mxu0  ;;  %v535_v4 = vpop.f32.mrb[5].mxu1 }
  0xe3   :  { %v224_v3 = vadd.f32 %v2233_v50, %v223_v2  ;;  %v1656_v5 = vpop.f32.mrb[6].mxu0  ;;  %v1700_v7 = vpop.f32.mrb[6].mxu1 }
  0xe4   :  { %276 = vst.msk [vmem:[%s2561_s6 + $0x30] sm:$0xff] %vm144_vm1, %v232_v0  ;;  %v235_v6 = vadd.f32 %v1656_v5, %v2233_v50  ;;  %v226_v8 = vpop.f32.mrb[7].mxu0  ;;  %v538_v10 = vpop.f32.mrb[7].mxu1 }
  0xe5   :  { %274 = vst.msk [vmem:[%s2561_s6 + $0x20] sm:$0xff] %vm144_vm1, %v224_v3  ;;  %v227_v9 = vadd.f32 %v2233_v50, %v226_v8 }
  0xe6   :  { %277 = vst.msk [vmem:[%s2561_s6 + $0x38] sm:$0xff] %vm144_vm1, %v235_v6 }
  0xe7   :  { %275 = vst.msk [vmem:[%s2561_s6 + $0x28] sm:$0xff] %vm144_vm1, %v227_v9 }
  0xe9   :  { %v1659_v11 = vpop.f32.mrb[8].mxu0 }
  0xea   :  { %v248_v12 = vadd.f32 %v1659_v11, %v2233_v50  ;;  %v239_v13 = vpop.f32.mrb[9].mxu0 }
  0xeb   :  { %v240_v14 = vadd.f32 %v2233_v50, %v239_v13  ;;  %v1660_v15 = vpop.f32.mrb[10].mxu0 }
  0xec   :  { %280 = vst.msk [vmem:[%s2561_s6 + $0x50] sm:$0xff] %vm144_vm1, %v248_v12  ;;  %v251_v16 = vadd.f32 %v1660_v15, %v2233_v50  ;;  %v242_v17 = vpop.f32.mrb[11].mxu0 }
  0xed   :  { %278 = vst.msk [vmem:[%s2561_s6 + $0x40] sm:$0xff] %vm144_vm1, %v240_v14  ;;  %v243_v18 = vadd.f32 %v2233_v50, %v242_v17 }
  0xee   :  { %281 = vst.msk [vmem:[%s2561_s6 + $0x58] sm:$0xff] %vm144_vm1, %v251_v16 }
  0xef   :  { %279 = vst.msk [vmem:[%s2561_s6 + $0x48] sm:$0xff] %vm144_vm1, %v243_v18 }
  0xf1   :  { %v1663_v19 = vpop.f32.mrb[12].mxu0 }
  0xf2   :  { %v264_v20 = vadd.f32 %v1663_v19, %v2233_v50  ;;  %v255_v21 = vpop.f32.mrb[13].mxu0 }
  0xf3   :  { %v256_v22 = vadd.f32 %v2233_v50, %v255_v21  ;;  %v1664_v23 = vpop.f32.mrb[14].mxu0 }
  0xf4   :  { %284 = vst.msk [vmem:[%s2561_s6 + $0x70] sm:$0xff] %vm144_vm1, %v264_v20  ;;  %v267_v24 = vadd.f32 %v1664_v23, %v2233_v50  ;;  %v258_v25 = vpop.f32.mrb[15].mxu0 }
  0xf5   :  { %282 = vst.msk [vmem:[%s2561_s6 + $0x60] sm:$0xff] %vm144_vm1, %v256_v22  ;;  %v259_v26 = vadd.f32 %v2233_v50, %v258_v25 }
  0xf6   :  { %285 = vst.msk [vmem:[%s2561_s6 + $0x78] sm:$0xff] %vm144_vm1, %v267_v24 }
  0xf7   :  { %283 = vst.msk [vmem:[%s2561_s6 + $0x68] sm:$0xff] %vm144_vm1, %v259_v26 }
 0x109   :  { %v1677_v27 = vpop.f32.mrb[24].mxu0 }
 0x10a   :  { %v528_v28 = vadd.f32 %v1695_v53, %v1677_v27  ;;  %v419_v29 = vpop.f32.mrb[25].mxu0 }
 0x10b   :  { %v520_v30 = vadd.f32 %v519_v56, %v419_v29  ;;  %v1678_v31 = vpop.f32.mrb[26].mxu0 }
 0x10c   :  { %v560_v32 = vadd.f32 %v2233_v50, %v528_v28  ;;  %v531_v33 = vadd.f32 %v1696_v59, %v1678_v31  ;;  %v422_v34 = vpop.f32.mrb[27].mxu0 }
 0x10d   :  { %v558_v35 = vadd.f32 %v2233_v50, %v520_v30  ;;  %v523_v36 = vadd.f32 %v522_v62, %v422_v34 }
 0x10e   :  { %1464 = vst.msk [vmem:[%s2561_s6 + $0xd0] sm:$0xff] %vm144_vm1, %v560_v32  ;;  %v561_v37 = vadd.f32 %v2233_v50, %v531_v33 }
 0x10f   :  { %1462 = vst.msk [vmem:[%s2561_s6 + $0xc0] sm:$0xff] %vm144_vm1, %v558_v35  ;;  %v559_v38 = vadd.f32 %v2233_v50, %v523_v36 }
 0x110   :  { %1465 = vst.msk [vmem:[%s2561_s6 + $0xd8] sm:$0xff] %vm144_vm1, %v561_v37 }
 0x111   :  { %1463 = vst.msk [vmem:[%s2561_s6 + $0xc8] sm:$0xff] %vm144_vm1, %v559_v38  ;;  %v1681_v39 = vpop.f32.mrb[28].mxu0 }
 0x112   :  { %v544_v40 = vadd.f32 %v1699_v1, %v1681_v39  ;;  %v435_v41 = vpop.f32.mrb[29].mxu0 }
 0x113   :  { %v536_v42 = vadd.f32 %v535_v4, %v435_v41  ;;  %v1682_v43 = vpop.f32.mrb[30].mxu0 }
 0x114   :  { %v564_v44 = vadd.f32 %v2233_v50, %v544_v40  ;;  %v547_v45 = vadd.f32 %v1700_v7, %v1682_v43  ;;  %v438_v46 = vpop.f32.mrb[31].mxu0 }
 0x115   :  { %v562_v47 = vadd.f32 %v2233_v50, %v536_v42  ;;  %v539_v48 = vadd.f32 %v538_v10, %v438_v46 }
 0x116   :  { %1468 = vst.msk [vmem:[%s2561_s6 + $0xf0] sm:$0xff] %vm144_vm1, %v564_v44  ;;  %v565_v49 = vadd.f32 %v2233_v50, %v547_v45 }
 0x117   :  { %1466 = vst.msk [vmem:[%s2561_s6 + $0xe0] sm:$0xff] %vm144_vm1, %v562_v47  ;;  %v563_v51 = vadd.f32 %v2233_v50, %v539_v48 }
 0x118   :  { %1469 = vst.msk [vmem:[%s2561_s6 + $0xf8] sm:$0xff] %vm144_vm1, %v565_v49 }
 0x119   :  { %1467 = vst.msk [vmem:[%s2561_s6 + $0xe8] sm:$0xff] %vm144_vm1, %v563_v51  ;;  %v1687_v52 = vpop.f32.mrb[16].mxu0 }
 0x11a   :  { %v552_v53 = vadd.f32 %v1687_v52, %v2233_v50  ;;  %v487_v54 = vpop.f32.mrb[17].mxu0 }
 0x11b   :  { %v550_v55 = vadd.f32 %v2233_v50, %v487_v54  ;;  %v1688_v56 = vpop.f32.mrb[18].mxu0 }
 0x11c   :  { %1456 = vst.msk [vmem:[%s2561_s6 + $0x90] sm:$0xff] %vm144_vm1, %v552_v53  ;;  %v553_v57 = vadd.f32 %v1688_v56, %v2233_v50  ;;  %v490_v58 = vpop.f32.mrb[19].mxu0 }
 0x11d   :  { %1454 = vst.msk [vmem:[%s2561_s6 + $0x80] sm:$0xff] %vm144_vm1, %v550_v55  ;;  %v551_v59 = vadd.f32 %v2233_v50, %v490_v58 }
 0x11e   :  { %1457 = vst.msk [vmem:[%s2561_s6 + $0x98] sm:$0xff] %vm144_vm1, %v553_v57 }
 0x11f   :  { %1455 = vst.msk [vmem:[%s2561_s6 + $0x88] sm:$0xff] %vm144_vm1, %v551_v59 }
 0x121   :  { %v1691_v60 = vpop.f32.mrb[20].mxu0 }
 0x122   :  { %v556_v61 = vadd.f32 %v1691_v60, %v2233_v50  ;;  %v503_v62 = vpop.f32.mrb[21].mxu0 }
 0x123   :  { %v554_v63 = vadd.f32 %v2233_v50, %v503_v62  ;;  %v1692_v0 = vpop.f32.mrb[22].mxu0 }
 0x124   :  { %1460 = vst.msk [vmem:[%s2561_s6 + $0xb0] sm:$0xff] %vm144_vm1, %v556_v61  ;;  %v557_v1 = vadd.f32 %v1692_v0, %v2233_v50  ;;  %v506_v2 = vpop.f32.mrb[23].mxu0 }
 0x125   :  { %1458 = vst.msk [vmem:[%s2561_s6 + $0xa0] sm:$0xff] %vm144_vm1, %v554_v63  ;;  %v555_v3 = vadd.f32 %v2233_v50, %v506_v2 }
 0x126   :  { %1461 = vst.msk [vmem:[%s2561_s6 + $0xb8] sm:$0xff] %vm144_vm1, %v557_v1 }
 0x127   :  { %1459 = vst.msk [vmem:[%s2561_s6 + $0xa8] sm:$0xff] %vm144_vm1, %v555_v3 }
 0x149   :  { %v1723_v4 = vpop.f32.mrb[32].mxu0  ;;  %v1795_v6 = vpop.f32.mrb[8].mxu1 }
 0x14a   :  { %v849_v5 = vadd.f32 %v1723_v4, %v2233_v50  ;;  %v784_v7 = vpop.f32.mrb[33].mxu0  ;;  %v1378_v8 = vadd.f32 %v1795_v6, %v2233_v50  ;;  %v1297_v10 = vpop.f32.mrb[9].mxu1 }
 0x14b   :  { %v847_v9 = vadd.f32 %v2233_v50, %v784_v7  ;;  %v1724_v11 = vpop.f32.mrb[34].mxu0  ;;  %v1376_v12 = vadd.f32 %v2233_v50, %v1297_v10  ;;  %v1796_v14 = vpop.f32.mrb[10].mxu1 }
 0x14c   :  { %1496 = vst.msk [vmem:[%s2561_s6 + $0x110] sm:$0xff] %vm144_vm1, %v849_v5  ;;  %v850_v13 = vadd.f32 %v1724_v11, %v2233_v50  ;;  %v787_v15 = vpop.f32.mrb[35].mxu0  ;;  %1552 = vst.msk [vmem:[%s2561_s6 + $0x190] sm:$0xff] %vm144_vm1, %v1378_v8  ;;  %v1379_v16 = vadd.f32 %v1796_v14, %v2233_v50  ;;  %v1300_v18 = vpop.f32.mrb[11].mxu1 }
 0x14d   :  { %1494 = vst.msk [vmem:[%s2561_s6 + $0x100] sm:$0xff] %vm144_vm1, %v847_v9  ;;  %v848_v17 = vadd.f32 %v2233_v50, %v787_v15  ;;  %1550 = vst.msk [vmem:[%s2561_s6 + $0x180] sm:$0xff] %vm144_vm1, %v1376_v12  ;;  %v1377_v19 = vadd.f32 %v2233_v50, %v1300_v18 }
 0x14e   :  { %1497 = vst.msk [vmem:[%s2561_s6 + $0x118] sm:$0xff] %vm144_vm1, %v850_v13  ;;  %1553 = vst.msk [vmem:[%s2561_s6 + $0x198] sm:$0xff] %vm144_vm1, %v1379_v16 }
 0x14f   :  { %1495 = vst.msk [vmem:[%s2561_s6 + $0x108] sm:$0xff] %vm144_vm1, %v848_v17  ;;  %1551 = vst.msk [vmem:[%s2561_s6 + $0x188] sm:$0xff] %vm144_vm1, %v1377_v19 }
 0x151   :  { %v1727_v20 = vpop.f32.mrb[36].mxu0  ;;  %v1799_v22 = vpop.f32.mrb[12].mxu1 }
 0x152   :  { %v853_v21 = vadd.f32 %v1727_v20, %v2233_v50  ;;  %v800_v23 = vpop.f32.mrb[37].mxu0  ;;  %v1382_v24 = vadd.f32 %v1799_v22, %v2233_v50  ;;  %v1313_v26 = vpop.f32.mrb[13].mxu1 }
 0x153   :  { %v851_v25 = vadd.f32 %v2233_v50, %v800_v23  ;;  %v1728_v27 = vpop.f32.mrb[38].mxu0  ;;  %v1380_v28 = vadd.f32 %v2233_v50, %v1313_v26  ;;  %v1800_v30 = vpop.f32.mrb[14].mxu1 }
 0x154   :  { %1500 = vst.msk [vmem:[%s2561_s6 + $0x130] sm:$0xff] %vm144_vm1, %v853_v21  ;;  %v854_v29 = vadd.f32 %v1728_v27, %v2233_v50  ;;  %v803_v31 = vpop.f32.mrb[39].mxu0  ;;  %1556 = vst.msk [vmem:[%s2561_s6 + $0x1b0] sm:$0xff] %vm144_vm1, %v1382_v24  ;;  %v1383_v32 = vadd.f32 %v1800_v30, %v2233_v50  ;;  %v1316_v34 = vpop.f32.mrb[15].mxu1 }
 0x155   :  { %1498 = vst.msk [vmem:[%s2561_s6 + $0x120] sm:$0xff] %vm144_vm1, %v851_v25  ;;  %v852_v33 = vadd.f32 %v2233_v50, %v803_v31  ;;  %1554 = vst.msk [vmem:[%s2561_s6 + $0x1a0] sm:$0xff] %vm144_vm1, %v1380_v28  ;;  %v1381_v35 = vadd.f32 %v2233_v50, %v1316_v34 }
 0x156   :  { %1501 = vst.msk [vmem:[%s2561_s6 + $0x138] sm:$0xff] %vm144_vm1, %v854_v29  ;;  %1557 = vst.msk [vmem:[%s2561_s6 + $0x1b8] sm:$0xff] %vm144_vm1, %v1383_v32 }
 0x157   :  { %1499 = vst.msk [vmem:[%s2561_s6 + $0x128] sm:$0xff] %vm144_vm1, %v852_v33  ;;  %1555 = vst.msk [vmem:[%s2561_s6 + $0x1a8] sm:$0xff] %vm144_vm1, %v1381_v35 }
 0x159   :  { %v1731_v36 = vpop.f32.mrb[40].mxu0  ;;  %v1803_v38 = vpop.f32.mrb[16].mxu1 }
 0x15a   :  { %v857_v37 = vadd.f32 %v1731_v36, %v2233_v50  ;;  %v816_v39 = vpop.f32.mrb[41].mxu0  ;;  %v1386_v40 = vadd.f32 %v1803_v38, %v2233_v50  ;;  %v1329_v42 = vpop.f32.mrb[17].mxu1 }
 0x15b   :  { %v855_v41 = vadd.f32 %v2233_v50, %v816_v39  ;;  %v1732_v43 = vpop.f32.mrb[42].mxu0  ;;  %v1384_v44 = vadd.f32 %v2233_v50, %v1329_v42  ;;  %v1804_v46 = vpop.f32.mrb[18].mxu1 }
 0x15c   :  { %1504 = vst.msk [vmem:[%s2561_s6 + $0x150] sm:$0xff] %vm144_vm1, %v857_v37  ;;  %v858_v45 = vadd.f32 %v1732_v43, %v2233_v50  ;;  %v819_v47 = vpop.f32.mrb[43].mxu0  ;;  %1560 = vst.msk [vmem:[%s2561_s6 + $0x1d0] sm:$0xff] %vm144_vm1, %v1386_v40  ;;  %v1387_v48 = vadd.f32 %v1804_v46, %v2233_v50  ;;  %v1332_v51 = vpop.f32.mrb[19].mxu1 }
 0x15d   :  { %1502 = vst.msk [vmem:[%s2561_s6 + $0x140] sm:$0xff] %vm144_vm1, %v855_v41  ;;  %v856_v49 = vadd.f32 %v2233_v50, %v819_v47  ;;  %1558 = vst.msk [vmem:[%s2561_s6 + $0x1c0] sm:$0xff] %vm144_vm1, %v1384_v44  ;;  %v1385_v52 = vadd.f32 %v2233_v50, %v1332_v51 }
 0x15e   :  { %1505 = vst.msk [vmem:[%s2561_s6 + $0x158] sm:$0xff] %vm144_vm1, %v858_v45  ;;  %1561 = vst.msk [vmem:[%s2561_s6 + $0x1d8] sm:$0xff] %vm144_vm1, %v1387_v48 }
 0x15f   :  { %1503 = vst.msk [vmem:[%s2561_s6 + $0x148] sm:$0xff] %vm144_vm1, %v856_v49  ;;  %1559 = vst.msk [vmem:[%s2561_s6 + $0x1c8] sm:$0xff] %vm144_vm1, %v1385_v52 }
 0x161   :  { %v1735_v53 = vpop.f32.mrb[44].mxu0  ;;  %v1807_v55 = vpop.f32.mrb[20].mxu1 }
 0x162   :  { %v861_v54 = vadd.f32 %v1735_v53, %v2233_v50  ;;  %v832_v56 = vpop.f32.mrb[45].mxu0  ;;  %v1390_v57 = vadd.f32 %v1807_v55, %v2233_v50  ;;  %v1345_v59 = vpop.f32.mrb[21].mxu1 }
 0x163   :  { %v859_v58 = vadd.f32 %v2233_v50, %v832_v56  ;;  %v1736_v60 = vpop.f32.mrb[46].mxu0  ;;  %v1388_v61 = vadd.f32 %v2233_v50, %v1345_v59  ;;  %v1808_v63 = vpop.f32.mrb[22].mxu1 }
 0x164   :  { %1508 = vst.msk [vmem:[%s2561_s6 + $0x170] sm:$0xff] %vm144_vm1, %v861_v54  ;;  %v862_v62 = vadd.f32 %v1736_v60, %v2233_v50  ;;  %v835_v0 = vpop.f32.mrb[47].mxu0  ;;  %1564 = vst.msk [vmem:[%s2561_s6 + $0x1f0] sm:$0xff] %vm144_vm1, %v1390_v57  ;;  %v1391_v1 = vadd.f32 %v1808_v63, %v2233_v50  ;;  %v1348_v3 = vpop.f32.mrb[23].mxu1 }
 0x165   :  { %1506 = vst.msk [vmem:[%s2561_s6 + $0x160] sm:$0xff] %vm144_vm1, %v859_v58  ;;  %v860_v2 = vadd.f32 %v2233_v50, %v835_v0  ;;  %1562 = vst.msk [vmem:[%s2561_s6 + $0x1e0] sm:$0xff] %vm144_vm1, %v1388_v61  ;;  %v1389_v4 = vadd.f32 %v2233_v50, %v1348_v3 }
 0x166   :  { %1509 = vst.msk [vmem:[%s2561_s6 + $0x178] sm:$0xff] %vm144_vm1, %v862_v62  ;;  %1565 = vst.msk [vmem:[%s2561_s6 + $0x1f8] sm:$0xff] %vm144_vm1, %v1391_v1 }
 0x167   :  { %1507 = vst.msk [vmem:[%s2561_s6 + $0x168] sm:$0xff] %vm144_vm1, %v860_v2  ;;  %1563 = vst.msk [vmem:[%s2561_s6 + $0x1e8] sm:$0xff] %vm144_vm1, %v1389_v4 }

// kernel: vae_forward.39
= control target key start
LH: loop header
LB: loop body
LE: loop exit
PB: predicated region body
PF: predicated region fallthrough
CT: control target
= control target key end

     0   :  { %vm282_vm0 = vcmask 588800   ;;  %vm379_vm1 = vcmask 1043456   ;;  %s1586_s1 = inlined_call_operand.vmem [shape: bf16[72,128], index: 1, kind: input, shape index: {}]   ;;  %s1587_s0 = inlined_call_operand.vmem [shape: bf16[512,72], index: 0, kind: input, shape index: {}]   ;;  %s1588_s2 = inlined_call_operand.vmem [shape: f32[1,128], index: 2, kind: input, shape index: {}]   ;;  %s1589_s3 = inlined_call_operand.vmem [shape: f32[512,128], index: 3, kind: output, shape index: {}]  }
   0x1   :  { %v997_v0 = vld [vmem:[%s1586_s1] sm:$0xff]   ;;  %v998_v1 = vld [vmem:[%s1586_s1 + $0x8] sm:$0xff]   ;;  %v999_v2 = vld [vmem:[%s1586_s1 + $0x10] sm:$0xff]  }
   0x2   :  { %911 = vmatprep.subr.bf16.mxu0 %v997_v0  ;;  %985 = vmatprep.subr.bf16.mxu1 %v997_v0  ;;  %v1002_v3 = vld [vmem:[%s1587_s0] sm:$0xff]   ;;  %v1000_v5 = vld [vmem:[%s1586_s1 + $0x18] sm:$0xff]   ;;  %v1004_v8 = vld [vmem:[%s1587_s0 + $0x8] sm:$0xff]  }
   0x3   :  { %912 = vmatpush3.bf16.msra.mxu0 %v997_v0  ;;  %990 = vmatpush3.bf16.msra.mxu1 %v997_v0  ;;  %v1003_v4 = vld [vmem:[%s1587_s0 + $0x80] sm:$0xff]   ;;  %v1005_v9 = vld [vmem:[%s1587_s0 + $0x88] sm:$0xff]   ;;  %v1006_v10 = vld [vmem:[%s1587_s0 + $0x10] sm:$0xff]  }
   0x4   :  { %913 = vmatprep.subr.bf16.mxu0 %v998_v1  ;;  %986 = vmatprep.subr.bf16.mxu1 %v998_v1  ;;  %v1001_v6 = vld [vmem:[%s1586_s1 + $0x20] ss:$0 sps:$4 sm:$0xff]   ;;  %v1007_v11 = vld [vmem:[%s1587_s0 + $0x90] sm:$0xff]   ;;  %v1008_v12 = vld [vmem:[%s1587_s0 + $0x18] sm:$0xff]  }
   0x5   :  { %921 = vmatprep.mubr.msk.bf16.mxu0 %vm282_vm0, %v1002_v3  ;;  %953 = vmatprep.mubr.msk.bf16.mxu1 %vm282_vm0, %v1003_v4  ;;  %v381_v7 = vsel %vm379_vm1, %v1001_v6, 0  ;;  %v1009_v13 = vld [vmem:[%s1587_s0 + $0x98] sm:$0xff]   ;;  %v1010_v14 = vld [vmem:[%s1587_s0 + $0x20] sm:$0xff]   ;;  %v1012_v16 = vld [vmem:[%s1587_s0 + $0x28] sm:$0xff]  }
   0x6   :  { %v1011_v15 = vld [vmem:[%s1587_s0 + $0xa0] sm:$0xff]   ;;  %v1013_v17 = vld [vmem:[%s1587_s0 + $0xa8] sm:$0xff]   ;;  %v1014_v18 = vld [vmem:[%s1587_s0 + $0x30] sm:$0xff]  }
   0x7   :  { %914 = vmatpush3.bf16.msra.mxu0 %v998_v1  ;;  %991 = vmatpush3.bf16.msra.mxu1 %v998_v1  ;;  %v1015_v19 = vld [vmem:[%s1587_s0 + $0xb0] sm:$0xff]   ;;  %v1016_v20 = vld [vmem:[%s1587_s0 + $0x38] sm:$0xff]   ;;  %v1018_v22 = vld [vmem:[%s1587_s0 + $0x40] sm:$0xff]  }
   0x8   :  { %915 = vmatprep.subr.bf16.mxu0 %v999_v2  ;;  %987 = vmatprep.subr.bf16.mxu1 %v999_v2  ;;  %v1017_v21 = vld [vmem:[%s1587_s0 + $0xb8] sm:$0xff]   ;;  %v1019_v23 = vld [vmem:[%s1587_s0 + $0xc0] sm:$0xff]   ;;  %v1020_v24 = vld [vmem:[%s1587_s0 + $0x48] sm:$0xff]  }
   0x9   :  { %v1021_v25 = vld [vmem:[%s1587_s0 + $0xc8] sm:$0xff]   ;;  %v1022_v26 = vld [vmem:[%s1587_s0 + $0x50] sm:$0xff]   ;;  %v1024_v28 = vld [vmem:[%s1587_s0 + $0x58] sm:$0xff]  }
   0xa   :  { %v1023_v27 = vld [vmem:[%s1587_s0 + $0xd0] sm:$0xff]   ;;  %v1025_v29 = vld [vmem:[%s1587_s0 + $0xd8] sm:$0xff]   ;;  %v1026_v30 = vld [vmem:[%s1587_s0 + $0x60] sm:$0xff]  }
   0xb   :  { %916 = vmatpush3.bf16.msra.mxu0 %v999_v2  ;;  %992 = vmatpush3.bf16.msra.mxu1 %v999_v2  ;;  %v1027_v31 = vld [vmem:[%s1587_s0 + $0xe0] sm:$0xff]   ;;  %v1028_v32 = vld [vmem:[%s1587_s0 + $0x68] sm:$0xff]   ;;  %v1030_v34 = vld [vmem:[%s1587_s0 + $0x70] sm:$0xff]  }
   0xc   :  { %917 = vmatprep.subr.bf16.mxu0 %v1000_v5  ;;  %988 = vmatprep.subr.bf16.mxu1 %v1000_v5  ;;  %v1029_v33 = vld [vmem:[%s1587_s0 + $0xe8] sm:$0xff]   ;;  %v1031_v35 = vld [vmem:[%s1587_s0 + $0xf0] sm:$0xff]   ;;  %v1032_v36 = vld [vmem:[%s1587_s0 + $0x78] sm:$0xff]  }
   0xd   :  { %v1033_v37 = vld [vmem:[%s1587_s0 + $0xf8] sm:$0xff]   ;;  %v1328_v38 = vld [vmem:[%s1588_s2] ss:$0 sm:$0xff] }
   0xf   :  { %918 = vmatpush3.bf16.msra.mxu0 %v1000_v5  ;;  %993 = vmatpush3.bf16.msra.mxu1 %v1000_v5 }
  0x10   :  { %995 = vmatprep.subr.msk.bf16.mxu0 %vm379_vm1, %v1001_v6  ;;  %996 = vmatprep.subr.msk.bf16.mxu1 %vm379_vm1, %v1001_v6 }
  0x13   :  { %920 = vmatpush3.bf16.msra.mxu0 %v381_v7  ;;  %994 = vmatpush3.bf16.msra.mxu1 %v381_v7 }
  0x16   :  { %922 = vmatmul.mubr.msk.bf16.vlgmr.msra.gmra.mrb[0].mxu0 %vm282_vm0, %v1004_v8  ;;  %954 = vmatmul.mubr.msk.bf16.vlgmr.msra.gmra.mrb[0].mxu1 %vm282_vm0, %v1005_v9 }
  0x17   :  { %925 = vmatprep.mubr.msk.bf16.mxu0 %vm282_vm0, %v1006_v10  ;;  %957 = vmatprep.mubr.msk.bf16.mxu1 %vm282_vm0, %v1007_v11 }
  0x1e   :  { %926 = vmatmul.mubr.msk.bf16.gmra.mrb[4].mxu0 %vm282_vm0, %v1008_v12  ;;  %958 = vmatmul.mubr.msk.bf16.gmra.mrb[4].mxu1 %vm282_vm0, %v1009_v13 }
  0x1f   :  { %929 = vmatprep.mubr.msk.bf16.mxu0 %vm282_vm0, %v1010_v14  ;;  %961 = vmatprep.mubr.msk.bf16.mxu1 %vm282_vm0, %v1011_v15 }
  0x26   :  { %930 = vmatmul.mubr.msk.bf16.gmra.mrb[8].mxu0 %vm282_vm0, %v1012_v16  ;;  %962 = vmatmul.mubr.msk.bf16.gmra.mrb[8].mxu1 %vm282_vm0, %v1013_v17 }
  0x27   :  { %933 = vmatprep.mubr.msk.bf16.mxu0 %vm282_vm0, %v1014_v18  ;;  %965 = vmatprep.mubr.msk.bf16.mxu1 %vm282_vm0, %v1015_v19 }
  0x2e   :  { %934 = vmatmul.mubr.msk.bf16.gmra.mrb[12].mxu0 %vm282_vm0, %v1016_v20  ;;  %966 = vmatmul.mubr.msk.bf16.gmra.mrb[12].mxu1 %vm282_vm0, %v1017_v21 }
  0x2f   :  { %937 = vmatprep.mubr.msk.bf16.mxu0 %vm282_vm0, %v1018_v22  ;;  %969 = vmatprep.mubr.msk.bf16.mxu1 %vm282_vm0, %v1019_v23 }
  0x36   :  { %938 = vmatmul.mubr.msk.bf16.gmra.mrb[16].mxu0 %vm282_vm0, %v1020_v24  ;;  %970 = vmatmul.mubr.msk.bf16.gmra.mrb[16].mxu1 %vm282_vm0, %v1021_v25 }
  0x37   :  { %941 = vmatprep.mubr.msk.bf16.mxu0 %vm282_vm0, %v1022_v26  ;;  %973 = vmatprep.mubr.msk.bf16.mxu1 %vm282_vm0, %v1023_v27 }
  0x3e   :  { %942 = vmatmul.mubr.msk.bf16.gmra.mrb[20].mxu0 %vm282_vm0, %v1024_v28  ;;  %974 = vmatmul.mubr.msk.bf16.gmra.mrb[20].mxu1 %vm282_vm0, %v1025_v29 }
  0x3f   :  { %945 = vmatprep.mubr.msk.bf16.mxu0 %vm282_vm0, %v1026_v30  ;;  %977 = vmatprep.mubr.msk.bf16.mxu1 %vm282_vm0, %v1027_v31 }
  0x46   :  { %946 = vmatmul.mubr.msk.bf16.gmra.mrb[24].mxu0 %vm282_vm0, %v1028_v32  ;;  %978 = vmatmul.mubr.msk.bf16.gmra.mrb[24].mxu1 %vm282_vm0, %v1029_v33 }
  0x47   :  { %949 = vmatprep.mubr.msk.bf16.mxu0 %vm282_vm0, %v1030_v34  ;;  %981 = vmatprep.mubr.msk.bf16.mxu1 %vm282_vm0, %v1031_v35 }
  0x4e   :  { %950 = vmatmul.mubr.msk.bf16.gmra.mrb[28].mxu0 %vm282_vm0, %v1032_v36  ;;  %982 = vmatmul.mubr.msk.bf16.gmra.mrb[28].mxu1 %vm282_vm0, %v1033_v37 }
  0xe9   :  { %v923_v39 = vpop.f32.mrb[0].mxu0  ;;  %v955_v40 = vpop.f32.mrb[0].mxu1 }
  0xea   :  { %v426_v41 = vadd.f32 %v923_v39, %v1328_v38  ;;  %v554_v42 = vadd.f32 %v955_v40, %v1328_v38  ;;  %v417_v43 = vpop.f32.mrb[1].mxu0  ;;  %v545_v44 = vpop.f32.mrb[1].mxu1 }
  0xeb   :  { %v418_v45 = vadd.f32 %v1328_v38, %v417_v43  ;;  %v546_v46 = vadd.f32 %v1328_v38, %v545_v44  ;;  %v924_v47 = vpop.f32.mrb[2].mxu0  ;;  %v956_v48 = vpop.f32.mrb[2].mxu1 }
  0xec   :  { %1034 = vtanh.f32 %v426_v41  ;;  %v429_v49 = vadd.f32 %v924_v47, %v1328_v38  ;;  %v420_v50 = vpop.f32.mrb[3].mxu0  ;;  %v548_v51 = vpop.f32.mrb[3].mxu1  ;;  %v557_v52 = vadd.f32 %v956_v48, %v1328_v38 }
  0xed   :  { %1036 = vtanh.f32 %v554_v42  ;;  %v421_v53 = vadd.f32 %v1328_v38, %v420_v50  ;;  %v549_v54 = vadd.f32 %v1328_v38, %v548_v51 }
  0xee   :  { %1038 = vtanh.f32 %v418_v45 }
  0xef   :  { %1040 = vtanh.f32 %v546_v46 }
  0xf0   :  { %1042 = vtanh.f32 %v429_v49 }
  0xf1   :  { %1044 = vtanh.f32 %v557_v52  ;;  %v927_v55 = vpop.f32.mrb[4].mxu0  ;;  %v959_v56 = vpop.f32.mrb[4].mxu1 }
  0xf2   :  { %1046 = vtanh.f32 %v421_v53  ;;  %v442_v57 = vadd.f32 %v927_v55, %v1328_v38  ;;  %v570_v58 = vadd.f32 %v959_v56, %v1328_v38  ;;  %v433_v59 = vpop.f32.mrb[5].mxu0  ;;  %v561_v60 = vpop.f32.mrb[5].mxu1 }
  0xf3   :  { %1048 = vtanh.f32 %v549_v54  ;;  %v434_v61 = vadd.f32 %v1328_v38, %v433_v59  ;;  %v562_v62 = vadd.f32 %v1328_v38, %v561_v60  ;;  %v928_v63 = vpop.f32.mrb[6].mxu0  ;;  %v960_v0 = vpop.f32.mrb[6].mxu1 }
  0xf4   :  { %1050 = vtanh.f32 %v442_v57  ;;  %v445_v1 = vadd.f32 %v928_v63, %v1328_v38  ;;  %v436_v2 = vpop.f32.mrb[7].mxu0  ;;  %v564_v3 = vpop.f32.mrb[7].mxu1  ;;  %v573_v4 = vadd.f32 %v960_v0, %v1328_v38 }
  0xf5   :  { %1052 = vtanh.f32 %v570_v58  ;;  %v437_v6 = vadd.f32 %v1328_v38, %v436_v2  ;;  %v565_v8 = vadd.f32 %v1328_v38, %v564_v3 }
  0xf6   :  { %v1035_v5 = vpop.eup %1034  ;;  %1054 = vtanh.f32 %v434_v61 }
  0xf7   :  { %v1037_v7 = vpop.eup %1036  ;;  %738 = vst [vmem:[%s1589_s3 + $0x10] sm:$0xff] %v1035_v5  ;;  %1056 = vtanh.f32 %v562_v62 }
  0xf8   :  { %v1039_v9 = vpop.eup %1038  ;;  %770 = vst [vmem:[%s1589_s3 + $0x110] sm:$0xff] %v1037_v7  ;;  %1058 = vtanh.f32 %v445_v1 }
  0xf9   :  { %v1041_v10 = vpop.eup %1040  ;;  %736 = vst [vmem:[%s1589_s3] sm:$0xff] %v1039_v9  ;;  %1060 = vtanh.f32 %v573_v4  ;;  %v931_v11 = vpop.f32.mrb[8].mxu0 }
  0xfa   :  { %v963_v12 = vpop.f32.mrb[8].mxu1  ;;  %v1043_v13 = vpop.eup %1042  ;;  %768 = vst [vmem:[%s1589_s3 + $0x100] sm:$0xff] %v1041_v10  ;;  %1062 = vtanh.f32 %v437_v6  ;;  %v458_v14 = vadd.f32 %v931_v11, %v1328_v38 }
  0xfb   :  { %v586_v15 = vadd.f32 %v963_v12, %v1328_v38  ;;  %v449_v16 = vpop.f32.mrb[9].mxu0  ;;  %v577_v17 = vpop.f32.mrb[9].mxu1  ;;  %739 = vst [vmem:[%s1589_s3 + $0x18] sm:$0xff] %v1043_v13  ;;  %1064 = vtanh.f32 %v565_v8 }
  0xfc   :  { %v1045_v18 = vpop.eup %1044  ;;  %v450_v19 = vadd.f32 %v1328_v38, %v449_v16  ;;  %v578_v20 = vadd.f32 %v1328_v38, %v577_v17  ;;  %v932_v21 = vpop.f32.mrb[10].mxu0  ;;  %1066 = vtanh.f32 %v458_v14 }
  0xfd   :  { %v964_v22 = vpop.f32.mrb[10].mxu1  ;;  %v1047_v23 = vpop.eup %1046  ;;  %771 = vst [vmem:[%s1589_s3 + $0x118] sm:$0xff] %v1045_v18  ;;  %v461_v24 = vadd.f32 %v932_v21, %v1328_v38  ;;  %1068 = vtanh.f32 %v586_v15 }
  0xfe   :  { %v452_v25 = vpop.f32.mrb[11].mxu0  ;;  %v580_v26 = vpop.f32.mrb[11].mxu1  ;;  %737 = vst [vmem:[%s1589_s3 + $0x8] sm:$0xff] %v1047_v23  ;;  %v589_v28 = vadd.f32 %v964_v22, %v1328_v38  ;;  %1070 = vtanh.f32 %v450_v19 }
  0xff   :  { %v1049_v27 = vpop.eup %1048  ;;  %v453_v30 = vadd.f32 %v1328_v38, %v452_v25  ;;  %1072 = vtanh.f32 %v578_v20  ;;  %v581_v32 = vadd.f32 %v1328_v38, %v580_v26 }
 0x100   :  { %v1051_v29 = vpop.eup %1050  ;;  %769 = vst [vmem:[%s1589_s3 + $0x108] sm:$0xff] %v1049_v27  ;;  %1074 = vtanh.f32 %v461_v24 }
 0x101   :  { %v1053_v31 = vpop.eup %1052  ;;  %742 = vst [vmem:[%s1589_s3 + $0x30] sm:$0xff] %v1051_v29  ;;  %1076 = vtanh.f32 %v589_v28  ;;  %v935_v35 = vpop.f32.mrb[12].mxu0 }
 0x102   :  { %v1055_v33 = vpop.eup %1054  ;;  %774 = vst [vmem:[%s1589_s3 + $0x130] sm:$0xff] %v1053_v31  ;;  %v967_v36 = vpop.f32.mrb[12].mxu1  ;;  %1078 = vtanh.f32 %v453_v30  ;;  %v474_v39 = vadd.f32 %v935_v35, %v1328_v38 }
 0x103   :  { %v1057_v34 = vpop.eup %1056  ;;  %740 = vst [vmem:[%s1589_s3 + $0x20] sm:$0xff] %v1055_v33  ;;  %v602_v40 = vadd.f32 %v967_v36, %v1328_v38  ;;  %v465_v41 = vpop.f32.mrb[13].mxu0  ;;  %1080 = vtanh.f32 %v581_v32 }
 0x104   :  { %v1059_v37 = vpop.eup %1058  ;;  %772 = vst [vmem:[%s1589_s3 + $0x120] sm:$0xff] %v1057_v34  ;;  %v593_v42 = vpop.f32.mrb[13].mxu1  ;;  %v466_v44 = vadd.f32 %v1328_v38, %v465_v41  ;;  %1082 = vtanh.f32 %v474_v39 }
 0x105   :  { %v1061_v43 = vpop.eup %1060  ;;  %743 = vst [vmem:[%s1589_s3 + $0x38] sm:$0xff] %v1059_v37  ;;  %v594_v45 = vadd.f32 %v1328_v38, %v593_v42  ;;  %v936_v46 = vpop.f32.mrb[14].mxu0  ;;  %1084 = vtanh.f32 %v602_v40 }
 0x106   :  { %v968_v47 = vpop.f32.mrb[14].mxu1  ;;  %v1063_v48 = vpop.eup %1062  ;;  %775 = vst [vmem:[%s1589_s3 + $0x138] sm:$0xff] %v1061_v43  ;;  %v477_v49 = vadd.f32 %v936_v46, %v1328_v38  ;;  %1086 = vtanh.f32 %v466_v44 }
 0x107   :  { %v468_v50 = vpop.f32.mrb[15].mxu0  ;;  %v596_v51 = vpop.f32.mrb[15].mxu1  ;;  %741 = vst [vmem:[%s1589_s3 + $0x28] sm:$0xff] %v1063_v48  ;;  %v605_v53 = vadd.f32 %v968_v47, %v1328_v38  ;;  %1088 = vtanh.f32 %v594_v45 }
 0x108   :  { %v1065_v52 = vpop.eup %1064  ;;  %v469_v55 = vadd.f32 %v1328_v38, %v468_v50  ;;  %v597_v57 = vadd.f32 %v1328_v38, %v596_v51  ;;  %1090 = vtanh.f32 %v477_v49 }
 0x109   :  { %v1067_v54 = vpop.eup %1066  ;;  %773 = vst [vmem:[%s1589_s3 + $0x128] sm:$0xff] %v1065_v52  ;;  %1092 = vtanh.f32 %v605_v53  ;;  %v939_v60 = vpop.f32.mrb[16].mxu0 }
 0x10a   :  { %v1069_v56 = vpop.eup %1068  ;;  %746 = vst [vmem:[%s1589_s3 + $0x50] sm:$0xff] %v1067_v54  ;;  %v971_v61 = vpop.f32.mrb[16].mxu1  ;;  %1094 = vtanh.f32 %v469_v55  ;;  %v490_v63 = vadd.f32 %v939_v60, %v1328_v38 }
 0x10b   :  { %v1071_v58 = vpop.eup %1070  ;;  %778 = vst [vmem:[%s1589_s3 + $0x150] sm:$0xff] %v1069_v56  ;;  %v618_v0 = vadd.f32 %v971_v61, %v1328_v38  ;;  %v481_v1 = vpop.f32.mrb[17].mxu0  ;;  %1096 = vtanh.f32 %v597_v57 }
 0x10c   :  { %v1073_v59 = vpop.eup %1072  ;;  %744 = vst [vmem:[%s1589_s3 + $0x40] sm:$0xff] %v1071_v58  ;;  %v609_v2 = vpop.f32.mrb[17].mxu1  ;;  %v482_v4 = vadd.f32 %v1328_v38, %v481_v1  ;;  %1098 = vtanh.f32 %v490_v63 }
 0x10d   :  { %v1075_v62 = vpop.eup %1074  ;;  %776 = vst [vmem:[%s1589_s3 + $0x140] sm:$0xff] %v1073_v59  ;;  %v610_v5 = vadd.f32 %v1328_v38, %v609_v2  ;;  %v940_v6 = vpop.f32.mrb[18].mxu0  ;;  %1100 = vtanh.f32 %v618_v0 }
 0x10e   :  { %v1077_v3 = vpop.eup %1076  ;;  %747 = vst [vmem:[%s1589_s3 + $0x58] sm:$0xff] %v1075_v62  ;;  %v972_v7 = vpop.f32.mrb[18].mxu1  ;;  %v493_v9 = vadd.f32 %v940_v6, %v1328_v38  ;;  %1102 = vtanh.f32 %v482_v4 }
 0x10f   :  { %v1079_v8 = vpop.eup %1078  ;;  %779 = vst [vmem:[%s1589_s3 + $0x158] sm:$0xff] %v1077_v3  ;;  %v484_v10 = vpop.f32.mrb[19].mxu0  ;;  %v621_v13 = vadd.f32 %v972_v7, %v1328_v38  ;;  %1104 = vtanh.f32 %v610_v5 }
 0x110   :  { %v612_v11 = vpop.f32.mrb[19].mxu1  ;;  %v1081_v12 = vpop.eup %1080  ;;  %745 = vst [vmem:[%s1589_s3 + $0x48] sm:$0xff] %v1079_v8  ;;  %v485_v15 = vadd.f32 %v1328_v38, %v484_v10  ;;  %1106 = vtanh.f32 %v493_v9 }
 0x111   :  { %v1083_v14 = vpop.eup %1082  ;;  %777 = vst [vmem:[%s1589_s3 + $0x148] sm:$0xff] %v1081_v12  ;;  %v613_v17 = vadd.f32 %v1328_v38, %v612_v11  ;;  %1108 = vtanh.f32 %v621_v13  ;;  %v943_v20 = vpop.f32.mrb[20].mxu0 }
 0x112   :  { %v1085_v16 = vpop.eup %1084  ;;  %750 = vst [vmem:[%s1589_s3 + $0x70] sm:$0xff] %v1083_v14  ;;  %v975_v21 = vpop.f32.mrb[20].mxu1  ;;  %1110 = vtanh.f32 %v485_v15  ;;  %v506_v23 = vadd.f32 %v943_v20, %v1328_v38 }
 0x113   :  { %v1087_v18 = vpop.eup %1086  ;;  %782 = vst [vmem:[%s1589_s3 + $0x170] sm:$0xff] %v1085_v16  ;;  %v634_v24 = vadd.f32 %v975_v21, %v1328_v38  ;;  %v497_v25 = vpop.f32.mrb[21].mxu0  ;;  %1112 = vtanh.f32 %v613_v17 }
 0x114   :  { %v1089_v19 = vpop.eup %1088  ;;  %748 = vst [vmem:[%s1589_s3 + $0x60] sm:$0xff] %v1087_v18  ;;  %v625_v26 = vpop.f32.mrb[21].mxu1  ;;  %v498_v28 = vadd.f32 %v1328_v38, %v497_v25  ;;  %1114 = vtanh.f32 %v506_v23 }
 0x115   :  { %v1091_v22 = vpop.eup %1090  ;;  %780 = vst [vmem:[%s1589_s3 + $0x160] sm:$0xff] %v1089_v19  ;;  %v626_v29 = vadd.f32 %v1328_v38, %v625_v26  ;;  %v944_v30 = vpop.f32.mrb[22].mxu0  ;;  %1116 = vtanh.f32 %v634_v24 }
 0x116   :  { %v1093_v27 = vpop.eup %1092  ;;  %751 = vst [vmem:[%s1589_s3 + $0x78] sm:$0xff] %v1091_v22  ;;  %v976_v31 = vpop.f32.mrb[22].mxu1  ;;  %v509_v33 = vadd.f32 %v944_v30, %v1328_v38  ;;  %1118 = vtanh.f32 %v498_v28 }
 0x117   :  { %v1095_v32 = vpop.eup %1094  ;;  %783 = vst [vmem:[%s1589_s3 + $0x178] sm:$0xff] %v1093_v27  ;;  %v500_v34 = vpop.f32.mrb[23].mxu0  ;;  %v637_v37 = vadd.f32 %v976_v31, %v1328_v38  ;;  %1120 = vtanh.f32 %v626_v29 }
 0x118   :  { %v628_v35 = vpop.f32.mrb[23].mxu1  ;;  %v1097_v36 = vpop.eup %1096  ;;  %749 = vst [vmem:[%s1589_s3 + $0x68] sm:$0xff] %v1095_v32  ;;  %v501_v40 = vadd.f32 %v1328_v38, %v500_v34  ;;  %1122 = vtanh.f32 %v509_v33 }
 0x119   :  { %v1099_v39 = vpop.eup %1098  ;;  %781 = vst [vmem:[%s1589_s3 + $0x168] sm:$0xff] %v1097_v36  ;;  %v629_v42 = vadd.f32 %v1328_v38, %v628_v35  ;;  %1124 = vtanh.f32 %v637_v37  ;;  %v947_v45 = vpop.f32.mrb[24].mxu0 }
 0x11a   :  { %v1101_v41 = vpop.eup %1100  ;;  %754 = vst [vmem:[%s1589_s3 + $0x90] sm:$0xff] %v1099_v39  ;;  %v979_v46 = vpop.f32.mrb[24].mxu1  ;;  %1126 = vtanh.f32 %v501_v40  ;;  %v522_v48 = vadd.f32 %v947_v45, %v1328_v38 }
 0x11b   :  { %v1103_v43 = vpop.eup %1102  ;;  %786 = vst [vmem:[%s1589_s3 + $0x190] sm:$0xff] %v1101_v41  ;;  %v650_v49 = vadd.f32 %v979_v46, %v1328_v38  ;;  %v513_v50 = vpop.f32.mrb[25].mxu0  ;;  %1128 = vtanh.f32 %v629_v42 }
 0x11c   :  { %v1105_v44 = vpop.eup %1104  ;;  %752 = vst [vmem:[%s1589_s3 + $0x80] sm:$0xff] %v1103_v43  ;;  %v641_v51 = vpop.f32.mrb[25].mxu1  ;;  %v514_v53 = vadd.f32 %v1328_v38, %v513_v50  ;;  %1130 = vtanh.f32 %v522_v48 }
 0x11d   :  { %v1107_v47 = vpop.eup %1106  ;;  %784 = vst [vmem:[%s1589_s3 + $0x180] sm:$0xff] %v1105_v44  ;;  %v642_v54 = vadd.f32 %v1328_v38, %v641_v51  ;;  %v948_v55 = vpop.f32.mrb[26].mxu0  ;;  %1132 = vtanh.f32 %v650_v49 }
 0x11e   :  { %v1109_v52 = vpop.eup %1108  ;;  %755 = vst [vmem:[%s1589_s3 + $0x98] sm:$0xff] %v1107_v47  ;;  %v980_v56 = vpop.f32.mrb[26].mxu1  ;;  %v525_v58 = vadd.f32 %v948_v55, %v1328_v38  ;;  %1134 = vtanh.f32 %v514_v53 }
 0x11f   :  { %v1111_v57 = vpop.eup %1110  ;;  %787 = vst [vmem:[%s1589_s3 + $0x198] sm:$0xff] %v1109_v52  ;;  %v516_v59 = vpop.f32.mrb[27].mxu0  ;;  %v653_v62 = vadd.f32 %v980_v56, %v1328_v38  ;;  %1136 = vtanh.f32 %v642_v54 }
 0x120   :  { %v644_v60 = vpop.f32.mrb[27].mxu1  ;;  %v1113_v61 = vpop.eup %1112  ;;  %753 = vst [vmem:[%s1589_s3 + $0x88] sm:$0xff] %v1111_v57  ;;  %v517_v0 = vadd.f32 %v1328_v38, %v516_v59  ;;  %1138 = vtanh.f32 %v525_v58 }
 0x121   :  { %v1115_v63 = vpop.eup %1114  ;;  %785 = vst [vmem:[%s1589_s3 + $0x188] sm:$0xff] %v1113_v61  ;;  %v645_v2 = vadd.f32 %v1328_v38, %v644_v60  ;;  %1140 = vtanh.f32 %v653_v62  ;;  %v951_v5 = vpop.f32.mrb[28].mxu0 }
 0x122   :  { %v1117_v1 = vpop.eup %1116  ;;  %758 = vst [vmem:[%s1589_s3 + $0xb0] sm:$0xff] %v1115_v63  ;;  %v983_v6 = vpop.f32.mrb[28].mxu1  ;;  %1142 = vtanh.f32 %v517_v0  ;;  %v538_v8 = vadd.f32 %v951_v5, %v1328_v38 }
 0x123   :  { %v1119_v3 = vpop.eup %1118  ;;  %790 = vst [vmem:[%s1589_s3 + $0x1b0] sm:$0xff] %v1117_v1  ;;  %v666_v9 = vadd.f32 %v983_v6, %v1328_v38  ;;  %v529_v10 = vpop.f32.mrb[29].mxu0  ;;  %1144 = vtanh.f32 %v645_v2 }
 0x124   :  { %v1121_v4 = vpop.eup %1120  ;;  %756 = vst [vmem:[%s1589_s3 + $0xa0] sm:$0xff] %v1119_v3  ;;  %v657_v11 = vpop.f32.mrb[29].mxu1  ;;  %v530_v13 = vadd.f32 %v1328_v38, %v529_v10  ;;  %1146 = vtanh.f32 %v538_v8 }
 0x125   :  { %v1123_v7 = vpop.eup %1122  ;;  %788 = vst [vmem:[%s1589_s3 + $0x1a0] sm:$0xff] %v1121_v4  ;;  %v658_v14 = vadd.f32 %v1328_v38, %v657_v11  ;;  %v952_v15 = vpop.f32.mrb[30].mxu0  ;;  %1148 = vtanh.f32 %v666_v9 }
 0x126   :  { %v1125_v12 = vpop.eup %1124  ;;  %759 = vst [vmem:[%s1589_s3 + $0xb8] sm:$0xff] %v1123_v7  ;;  %v984_v16 = vpop.f32.mrb[30].mxu1  ;;  %v541_v18 = vadd.f32 %v952_v15, %v1328_v38  ;;  %1150 = vtanh.f32 %v530_v13 }
 0x127   :  { %v1127_v17 = vpop.eup %1126  ;;  %791 = vst [vmem:[%s1589_s3 + $0x1b8] sm:$0xff] %v1125_v12  ;;  %v532_v19 = vpop.f32.mrb[31].mxu0  ;;  %v669_v22 = vadd.f32 %v984_v16, %v1328_v38  ;;  %1152 = vtanh.f32 %v658_v14 }
 0x128   :  { %v660_v20 = vpop.f32.mrb[31].mxu1  ;;  %v1129_v21 = vpop.eup %1128  ;;  %757 = vst [vmem:[%s1589_s3 + $0xa8] sm:$0xff] %v1127_v17  ;;  %v533_v24 = vadd.f32 %v1328_v38, %v532_v19  ;;  %1154 = vtanh.f32 %v541_v18 }
 0x129   :  { %v1131_v23 = vpop.eup %1130  ;;  %789 = vst [vmem:[%s1589_s3 + $0x1a8] sm:$0xff] %v1129_v21  ;;  %v661_v26 = vadd.f32 %v1328_v38, %v660_v20  ;;  %1156 = vtanh.f32 %v669_v22 }
 0x12a   :  { %v1133_v25 = vpop.eup %1132  ;;  %762 = vst [vmem:[%s1589_s3 + $0xd0] sm:$0xff] %v1131_v23  ;;  %1158 = vtanh.f32 %v533_v24 }
 0x12b   :  { %v1135_v27 = vpop.eup %1134  ;;  %794 = vst [vmem:[%s1589_s3 + $0x1d0] sm:$0xff] %v1133_v25  ;;  %1160 = vtanh.f32 %v661_v26 }
 0x12c   :  { %v1137_v28 = vpop.eup %1136  ;;  %760 = vst [vmem:[%s1589_s3 + $0xc0] sm:$0xff] %v1135_v27 }
 0x12d   :  { %v1139_v29 = vpop.eup %1138  ;;  %792 = vst [vmem:[%s1589_s3 + $0x1c0] sm:$0xff] %v1137_v28 }
 0x12e   :  { %v1141_v30 = vpop.eup %1140  ;;  %763 = vst [vmem:[%s1589_s3 + $0xd8] sm:$0xff] %v1139_v29 }
 0x12f   :  { %v1143_v38 = vpop.eup %1142  ;;  %795 = vst [vmem:[%s1589_s3 + $0x1d8] sm:$0xff] %v1141_v30 }
 0x130   :  { %v1145_v31 = vpop.eup %1144  ;;  %761 = vst [vmem:[%s1589_s3 + $0xc8] sm:$0xff] %v1143_v38 }
 0x131   :  { %v1147_v32 = vpop.eup %1146  ;;  %793 = vst [vmem:[%s1589_s3 + $0x1c8] sm:$0xff] %v1145_v31 }
 0x132   :  { %v1149_v33 = vpop.eup %1148  ;;  %766 = vst [vmem:[%s1589_s3 + $0xf0] sm:$0xff] %v1147_v32 }
 0x133   :  { %v1151_v34 = vpop.eup %1150  ;;  %798 = vst [vmem:[%s1589_s3 + $0x1f0] sm:$0xff] %v1149_v33 }
 0x134   :  { %v1153_v35 = vpop.eup %1152  ;;  %764 = vst [vmem:[%s1589_s3 + $0xe0] sm:$0xff] %v1151_v34 }
 0x135   :  { %v1155_v36 = vpop.eup %1154  ;;  %796 = vst [vmem:[%s1589_s3 + $0x1e0] sm:$0xff] %v1153_v35 }
 0x136   :  { %v1157_v37 = vpop.eup %1156  ;;  %767 = vst [vmem:[%s1589_s3 + $0xf8] sm:$0xff] %v1155_v36 }
 0x137   :  { %v1159_v39 = vpop.eup %1158  ;;  %799 = vst [vmem:[%s1589_s3 + $0x1f8] sm:$0xff] %v1157_v37 }
 0x138   :  { %v1161_v40 = vpop.eup %1160  ;;  %765 = vst [vmem:[%s1589_s3 + $0xe8] sm:$0xff] %v1159_v39 }
 0x139   :  { %797 = vst [vmem:[%s1589_s3 + $0x1e8] sm:$0xff] %v1161_v40 }

</bundles_post_ra>
